<compile_context>
chip_gen: v7x
topology: tpu7x:2x2x1
jax: 0.10.0
libtpu: 0.0.40
codegen_flags: <defaults>
</compile_context>

<pallas_src>
import functools
import math

import jax
import jax.numpy as jnp
from jax import lax
from jax.experimental import pallas as pl
from jax.experimental.pallas import tpu as pltpu


# --------------------------------------------------------------------------
# small helpers (usable both inside the kernels and in the pure-JAX reference)
# --------------------------------------------------------------------------
def _layernorm(x, g, b, eps=1e-5):
    m = jnp.mean(x, axis=-1, keepdims=True)
    v = jnp.mean((x - m) ** 2, axis=-1, keepdims=True)
    return (x - m) * lax.rsqrt(v + eps) * g + b


# --------------------------------------------------------------------------
# Kernel 1: the whole TransformerDecoder stack.
# grid = (S // s_tile, num_layers); the output block (s_tile, B, D) stays
# resident in VMEM across the (inner, "arbitrary") layer axis and carries the
# activations from layer to layer; the S axis is "parallel" (megacore on v7x).
# --------------------------------------------------------------------------
def decoder_layers_kernel(nhead, ffn_chunk,
                          h0_ref, sa_w_ref, sa_b_ref, sa_ow_ref, sa_ob_ref,
                          ca_c_ref,
                          ln1g_ref, ln1b_ref, ln2g_ref, ln2b_ref,
                          ln3g_ref, ln3b_ref,
                          w1_ref, b1_ref, w2_ref, b2_ref,
                          out_ref):
    layer = pl.program_id(1)

    @pl.when(layer == 0)
    def _():
        out_ref[...] = h0_ref[...]

    tS, B, D = out_ref.shape
    NL = tS * B
    dh = D // nhead
    scale = 1.0 / math.sqrt(dh)
    bf16 = jnp.bfloat16
    f32 = jnp.float32

    h = out_ref[...].reshape(NL, D)                       # f32 residual stream
    h_bf = h.astype(bf16)

    # ---- self attention (attends over axis 1 == the original batch axis) ----
    qkv = jnp.dot(h_bf, sa_w_ref[0],
                  preferred_element_type=f32) + sa_b_ref[0]        # (NL, 3D)
    qkv3 = qkv.reshape(tS, B, 3 * D)

    head_outs = []
    for hd in range(nhead):                 # value-level head slices; no VMEM
        lo = hd * dh                        # scratch, no masked partial stores
        qh = qkv3[:, :, lo:lo + dh].astype(bf16)                   # (tS, B, dh)
        kh = qkv3[:, :, D + lo:D + lo + dh].astype(bf16)
        vh = qkv3[:, :, 2 * D + lo:2 * D + lo + dh].astype(bf16)
        s = lax.dot_general(qh, kh, (((2,), (2,)), ((0,), (0,))),
                            preferred_element_type=f32) * scale    # (tS, B, B)
        s = s - jnp.max(s, axis=-1, keepdims=True)
        p = jnp.exp(s)
        p = p * pl.reciprocal(jnp.sum(p, axis=-1, keepdims=True), approx=True)
        head_outs.append(
            lax.dot_general(p.astype(bf16), vh,
                            (((2,), (1,)), ((0,), (0,))),
                            preferred_element_type=f32))           # (tS, B, dh)

    o = head_outs[0] if nhead == 1 else jnp.concatenate(head_outs, axis=-1)
    sa = jnp.dot(o.reshape(NL, D).astype(bf16), sa_ow_ref[0],
                 preferred_element_type=f32) + sa_ob_ref[0]  # single out-proj
    h = _layernorm(h + sa, ln1g_ref[0], ln1b_ref[0])

    # ---- cross attention with zero memory: per-layer constant row ----
    h = _layernorm(h + ca_c_ref[0], ln2g_ref[0], ln2b_ref[0])

    # ---- feed-forward (ReLU), hidden dim chunked so the (NL, 4D) f32
    #      intermediate is never fully live at large NL / D ----
    h_bf = h.astype(bf16)
    H4 = w1_ref.shape[-1]                                  # 4 * D
    acc = None
    for lo in range(0, H4, ffn_chunk):
        hi = lo + ffn_chunk
        f = jnp.dot(h_bf, w1_ref[0, :, lo:hi],
                    preferred_element_type=f32) + b1_ref[0, :, lo:hi]
        f = jnp.maximum(f, 0.0).astype(bf16)
        part = jnp.dot(f, w2_ref[0, lo:hi, :], preferred_element_type=f32)
        acc = part if acc is None else acc + part
    h = _layernorm(h + acc + b2_ref[0], ln3g_ref[0], ln3b_ref[0])

    out_ref[...] = h.reshape(tS, B, D)


# --------------------------------------------------------------------------
# Kernel 2: final LayerNorm + vocab projection (fc).
# grid = (rows, vocab) with the vocab axis inner and "arbitrary"; the LayerNorm
# (+ bf16 cast) is computed once per row tile into a VMEM scratch and reused
# for every vocab tile of that row block.
# --------------------------------------------------------------------------
def norm_fc_kernel(x_ref, g_ref, b_ref, w_ref, fb_ref, o_ref, xn_ref):
    @pl.when(pl.program_id(1) == 0)
    def _():
        xn_ref[...] = _layernorm(x_ref[...], g_ref[...],
                                 b_ref[...]).astype(jnp.bfloat16)
    o_ref[...] = (jnp.dot(xn_ref[...], w_ref[...],
                          preferred_element_type=jnp.float32) + fb_ref[...])


# --------------------------------------------------------------------------
# parameter init (deterministic, shapes follow the PyTorch module)
# --------------------------------------------------------------------------
def init_params(key, vocab, d_model, nhead, num_layers, max_len):
    ks = jax.random.split(key, 20)

    def n(k, shape, s=0.05, dtype=jnp.float32):
        return (jax.random.normal(k, shape, jnp.float32) * s).astype(dtype)

    D = d_model
    bf = jnp.bfloat16
    return {
        "tok_emb": n(ks[0], (vocab, D), 0.1),
        "pos_emb": n(ks[1], (max_len, D), 0.1),
        # self-attention (in_proj packed as q|k|v along the output axis)
        "sa_w": n(ks[2], (num_layers, D, 3 * D), 0.05, bf),
        "sa_b": n(ks[3], (num_layers, 1, 3 * D)),
        "sa_ow": n(ks[4], (num_layers, D, D), 0.05, bf),
        "sa_ob": n(ks[5], (num_layers, 1, D)),
        # cross-attention: only value-bias / out-proj matter (memory == 0);
        # kept in f32, folded into a constant in the wrapper.
        "ca_vb": n(ks[6], (num_layers, 1, D)),
        "ca_ow": n(ks[7], (num_layers, D, D)),
        "ca_ob": n(ks[8], (num_layers, 1, D)),
        # layer norms
        "ln1_g": 1.0 + n(ks[9], (num_layers, 1, D), 0.1),
        "ln1_b": n(ks[10], (num_layers, 1, D), 0.1),
        "ln2_g": 1.0 + n(ks[11], (num_layers, 1, D), 0.1),
        "ln2_b": n(ks[12], (num_layers, 1, D), 0.1),
        "ln3_g": 1.0 + n(ks[13], (num_layers, 1, D), 0.1),
        "ln3_b": n(ks[14], (num_layers, 1, D), 0.1),
        # feed-forward
        "ff_w1": n(ks[15], (num_layers, D, 4 * D), 0.05, bf),
        "ff_b1": n(ks[16], (num_layers, 1, 4 * D)),
        "ff_w2": n(ks[17], (num_layers, 4 * D, D), 0.05, bf),
        "ff_b2": n(ks[18], (num_layers, 1, D)),
        # final norm + fc
        "norm_g": jnp.ones((1, D), jnp.float32),
        "norm_b": jnp.zeros((1, D), jnp.float32),
        "fc_w": n(ks[19], (D, vocab), 0.05, bf),
        "fc_b": jnp.zeros((1, vocab), jnp.float32),
    }


# --------------------------------------------------------------------------
# forward pass using the Pallas kernels
# --------------------------------------------------------------------------
def gpt_forward(params, tokens, *, nhead, s_tile=None):
    B, S = tokens.shape
    D = params["tok_emb"].shape[1]
    V = params["fc_w"].shape[1]
    num_layers = params["sa_w"].shape[0]
    assert D % nhead == 0, "d_model must be divisible by nhead"
    # Performance note: B multiple of 8 and D, V multiples of 128 give
    # lane/sublane-dense tiles; other values still work (full-dim blocks).

    # 48 MiB: below v7x's 64 MiB physical VMEM per TensorCore, plenty for
    # these blocks, and still above the 32 MiB default on v5e/v6e.
    VMEM_LIMIT = 48 * 1024 * 1024

    # embedding * sqrt(d_model) + positional embedding, gathered directly in
    # (S, B, D) order (dropout = identity; embedding gather is XLA glue).
    h0 = (params["tok_emb"][tokens.T] * math.sqrt(D)
          + params["pos_emb"][:S][:, None, :]).astype(jnp.float32)   # (S, B, D)

    # cross-attention with zero memory collapses to a per-layer constant row.
    ca_c = (jnp.einsum("lkd,lde->lke", params["ca_vb"], params["ca_ow"])
            + params["ca_ob"]).astype(jnp.float32)            # (num_layers,1,D)

    # ---- s_tile: fill the MXU M dim (target s_tile*B ~= 256 rows) while
    # keeping >= 2 S tiles so the parallel axis can shard across v7x's 2 TCs.
    if s_tile is None:
        divs = [t for t in range(1, S + 1) if S % t == 0]
        cands = [t for t in divs if (S // t) >= 2] or divs
        want = max(1, -(-256 // B))
        fits = [t for t in cands if t <= want]
        s_tile = max(fits) if fits else min(cands)
    assert S % s_tile == 0

    ffn_chunk = min(4 * D, 512)           # lane-aligned chunks of the FFN hidden

    def L3(shape):
        return pl.BlockSpec((1,) + shape, lambda s, l: (l, 0, 0))

    act_spec = pl.BlockSpec((s_tile, B, D), lambda s, l: (s, 0, 0))
    in_specs = [
        act_spec,
        L3((D, 3 * D)), L3((1, 3 * D)), L3((D, D)), L3((1, D)),
        L3((1, D)),                                   # ca_c
        L3((1, D)), L3((1, D)), L3((1, D)), L3((1, D)), L3((1, D)), L3((1, D)),
        L3((D, 4 * D)), L3((1, 4 * D)), L3((4 * D, D)), L3((1, D)),
    ]

    h_out = pl.pallas_call(
        functools.partial(decoder_layers_kernel, nhead, ffn_chunk),
        out_shape=jax.ShapeDtypeStruct((S, B, D), jnp.float32),
        grid=(S // s_tile, num_layers),
        in_specs=in_specs,
        out_specs=act_spec,
        compiler_params=pltpu.CompilerParams(
            dimension_semantics=("parallel", "arbitrary"),
            vmem_limit_bytes=VMEM_LIMIT),
    )(h0,
      params["sa_w"], params["sa_b"], params["sa_ow"], params["sa_ob"],
      ca_c,
      params["ln1_g"], params["ln1_b"], params["ln2_g"], params["ln2_b"],
      params["ln3_g"], params["ln3_b"],
      params["ff_w1"], params["ff_b1"], params["ff_w2"], params["ff_b2"])

    # TODO(synk): this (S,B,D)->(B,S,D) permutation stays as one XLA transpose;
    # doing it in kernel 1's epilogue needs a sublane-granularity relayout
    # whose lowering support is not guaranteed.
    h_flat = jnp.transpose(h_out, (1, 0, 2)).reshape(B * S, D)

    M = B * S
    TM = next((t for t in (512, 256, 128, 64, 32, 16, 8) if M % t == 0), M)
    TN = next((t for t in (1024, 512, 256, 128) if V % t == 0), V)

    logits = pl.pallas_call(
        norm_fc_kernel,
        out_shape=jax.ShapeDtypeStruct((M, V), jnp.float32),
        grid=(M // TM, V // TN),
        in_specs=[
            pl.BlockSpec((TM, D), lambda i, j: (i, 0)),
            pl.BlockSpec((1, D), lambda i, j: (0, 0)),
            pl.BlockSpec((1, D), lambda i, j: (0, 0)),
            pl.BlockSpec((D, TN), lambda i, j: (0, j)),
            pl.BlockSpec((1, TN), lambda i, j: (0, j)),
        ],
        out_specs=pl.BlockSpec((TM, TN), lambda i, j: (i, j)),
        scratch_shapes=[pltpu.VMEM((TM, D), jnp.bfloat16)],
        compiler_params=pltpu.CompilerParams(
            dimension_semantics=("parallel", "arbitrary"),
            vmem_limit_bytes=VMEM_LIMIT),
    )(h_flat, params["norm_g"], params["norm_b"], params["fc_w"], params["fc_b"])

    return logits.reshape(B, S, V)


# --------------------------------------------------------------------------
# pure-JAX reference (same math, f32 throughout) for validation
# --------------------------------------------------------------------------
def ref_forward(params, tokens, *, nhead):
    f32 = jnp.float32
    B, S = tokens.shape
    D = params["tok_emb"].shape[1]
    num_layers = params["sa_w"].shape[0]
    dh = D // nhead

    h = params["tok_emb"][tokens] * math.sqrt(D) + params["pos_emb"][:S][None, :, :]
    h = jnp.transpose(h, (1, 0, 2))          # (N, L, D) = (S, B, D)
    N, L, _ = h.shape

    for l in range(num_layers):
        qkv = h @ params["sa_w"][l].astype(f32) + params["sa_b"][l]
        q = qkv[..., :D] / math.sqrt(dh)
        k = qkv[..., D:2 * D]
        v = qkv[..., 2 * D:]
        qh = q.reshape(N, L, nhead, dh)
        kh = k.reshape(N, L, nhead, dh)
        vh = v.reshape(N, L, nhead, dh)
        s = jnp.einsum("nlhd,nmhd->nhlm", qh, kh)
        a = jax.nn.softmax(s, axis=-1)
        o = jnp.einsum("nhlm,nmhd->nlhd", a, vh).reshape(N, L, D)
        sa = o @ params["sa_ow"][l].astype(f32) + params["sa_ob"][l]
        h = _layernorm(h + sa, params["ln1_g"][l], params["ln1_b"][l])

        c = params["ca_vb"][l] @ params["ca_ow"][l] + params["ca_ob"][l]
        h = _layernorm(h + c, params["ln2_g"][l], params["ln2_b"][l])

        f = jax.nn.relu(h @ params["ff_w1"][l].astype(f32) + params["ff_b1"][l])
        f = f @ params["ff_w2"][l].astype(f32) + params["ff_b2"][l]
        h = _layernorm(h + f, params["ln3_g"][l], params["ln3_b"][l])

    h = jnp.transpose(h, (1, 0, 2))          # (B, S, D)
    h = _layernorm(h, params["norm_g"], params["norm_b"])
    return h @ params["fc_w"].astype(f32) + params["fc_b"]


# --------------------------------------------------------------------------
if __name__ == "__main__":
    vocab_size = 256      # multiple of 128 -> lane-dense vocab tiles
    d_model = 128         # multiple of 128 -> lane-dense activations
    nhead = 4
    num_layers = 2
    max_len = 128
    B, S = 8, 32          # B=8 keeps the attention axis sublane-aligned;
                          # default s_tile -> 16 => NL=128 rows, 2 S-tiles.

    key = jax.random.PRNGKey(0)
    params = init_params(key, vocab_size, d_model, nhead, num_layers, max_len)
    tokens = jax.random.randint(jax.random.fold_in(key, 123), (B, S), 0,
                                vocab_size, dtype=jnp.int32)

    logits = gpt_forward(params, tokens, nhead=nhead)
    logits = jax.block_until_ready(logits)
    assert logits.shape == (B, S, vocab_size)

    # bf16 MXU inputs (f32 accumulation) vs. the pure-f32 reference: allow a
    # slightly relaxed tolerance for the reduced-mantissa matmul operands.
    ref = ref_forward(params, tokens, nhead=nhead)
    err = float(jnp.max(jnp.abs(logits - ref)))
    if not err < 5e-2:
        raise AssertionError(f"kernel/reference mismatch: max abs err = {err}")

    print("KERNEL_OK")
</pallas_src>

<mosaic_0001>
module attributes {stable_mosaic.version = 11 : i64} {
  func.func @decoder_layers_kernel(%arg0: i32, %arg1: i32, %arg2: memref<16x8x128xf32, #tpu.memory_space<vmem>>, %arg3: memref<1x128x384xbf16, #tpu.memory_space<vmem>>, %arg4: memref<1x1x384xf32, #tpu.memory_space<vmem>>, %arg5: memref<1x128x128xbf16, #tpu.memory_space<vmem>>, %arg6: memref<1x1x128xf32, #tpu.memory_space<vmem>>, %arg7: memref<1x1x128xf32, #tpu.memory_space<vmem>>, %arg8: memref<1x1x128xf32, #tpu.memory_space<vmem>>, %arg9: memref<1x1x128xf32, #tpu.memory_space<vmem>>, %arg10: memref<1x1x128xf32, #tpu.memory_space<vmem>>, %arg11: memref<1x1x128xf32, #tpu.memory_space<vmem>>, %arg12: memref<1x1x128xf32, #tpu.memory_space<vmem>>, %arg13: memref<1x1x128xf32, #tpu.memory_space<vmem>>, %arg14: memref<1x128x512xbf16, #tpu.memory_space<vmem>>, %arg15: memref<1x1x512xf32, #tpu.memory_space<vmem>>, %arg16: memref<1x512x128xbf16, #tpu.memory_space<vmem>>, %arg17: memref<1x1x128xf32, #tpu.memory_space<vmem>>, %arg18: memref<16x8x128xf32, #tpu.memory_space<vmem>>) attributes {dimension_semantics = [#tpu.dimension_semantics<parallel>, #tpu.dimension_semantics<arbitrary>], iteration_bounds = array<i64: 2, 2>, scalar_prefetch = 0 : i64, scratch_operands = 0 : i64, tpu.core_type = #tpu.core_type<tc>, window_params = [{transform_indices = @transform_0, window_bounds = array<i64: 16, 8, 128>}, {transform_indices = @transform_1, window_bounds = array<i64: 1, 128, 384>}, {transform_indices = @transform_2, window_bounds = array<i64: 1, 1, 384>}, {transform_indices = @transform_3, window_bounds = array<i64: 1, 128, 128>}, {transform_indices = @transform_4, window_bounds = array<i64: 1, 1, 128>}, {transform_indices = @transform_5, window_bounds = array<i64: 1, 1, 128>}, {transform_indices = @transform_6, window_bounds = array<i64: 1, 1, 128>}, {transform_indices = @transform_7, window_bounds = array<i64: 1, 1, 128>}, {transform_indices = @transform_8, window_bounds = array<i64: 1, 1, 128>}, {transform_indices = @transform_9, window_bounds = array<i64: 1, 1, 128>}, {transform_indices = @transform_10, window_bounds = array<i64: 1, 1, 128>}, {transform_indices = @transform_11, window_bounds = array<i64: 1, 1, 128>}, {transform_indices = @transform_12, window_bounds = array<i64: 1, 128, 512>}, {transform_indices = @transform_13, window_bounds = array<i64: 1, 1, 512>}, {transform_indices = @transform_14, window_bounds = array<i64: 1, 512, 128>}, {transform_indices = @transform_15, window_bounds = array<i64: 1, 1, 128>}, {transform_indices = @transform_16, window_bounds = array<i64: 16, 8, 128>}]} {
    %c0_i32 = arith.constant 0 : i32
    %0 = arith.cmpi eq, %arg1, %c0_i32 : i32
    %1 = arith.extui %0 : i1 to i32
    %c0_i32_0 = arith.constant 0 : i32
    %2 = arith.cmpi ne, %1, %c0_i32_0 : i32
    scf.if %2 {
      %c0_90 = arith.constant 0 : index
      %c0_91 = arith.constant 0 : index
      %c0_92 = arith.constant 0 : index
      %212 = vector.load %arg2[%c0_90, %c0_91, %c0_92] : memref<16x8x128xf32, #tpu.memory_space<vmem>>, vector<16x8x128xf32>
      %c0_93 = arith.constant 0 : index
      %c0_94 = arith.constant 0 : index
      %c0_95 = arith.constant 0 : index
      %213 = vector.load %arg18[%c0_93, %c0_94, %c0_95] : memref<16x8x128xf32, #tpu.memory_space<vmem>>, vector<16x8x128xf32>
      tpu.vector_store %arg18[%c0_93, %c0_94, %c0_95], %212 {strides = array<i32>} : memref<16x8x128xf32, #tpu.memory_space<vmem>>, vector<16x8x128xf32>,
    } else {
    }
    %c0 = arith.constant 0 : index
    %c0_1 = arith.constant 0 : index
    %c0_2 = arith.constant 0 : index
    %3 = vector.load %arg18[%c0, %c0_1, %c0_2] : memref<16x8x128xf32, #tpu.memory_space<vmem>>, vector<16x8x128xf32>
    %4 = vector.shape_cast %3 : vector<16x8x128xf32> to vector<128x128xf32>
    %5 = arith.truncf %4 : vector<128x128xf32> to vector<128x128xbf16>
    %c0_3 = arith.constant 0 : index
    %c0_4 = arith.constant 0 : index
    %c0_5 = arith.constant 0 : index
    %6 = vector.load %arg3[%c0_3, %c0_4, %c0_5] : memref<1x128x384xbf16, #tpu.memory_space<vmem>>, vector<1x128x384xbf16>
    %7 = vector.shape_cast %6 : vector<1x128x384xbf16> to vector<128x384xbf16>
    %cst = arith.constant dense<0.000000e+00> : vector<128x384xf32>
    %8 = tpu.matmul %5, %7, %cst {dimension_numbers = #tpu.dot_dimension_numbers<[1], [0], [0], [1], [0, 0, 1, 1], [], []>} : vector<128x128xbf16>, vector<128x384xbf16>, vector<128x384xf32> -> vector<128x384xf32>
    %c0_6 = arith.constant 0 : index
    %c0_7 = arith.constant 0 : index
    %c0_8 = arith.constant 0 : index
    %9 = vector.load %arg4[%c0_6, %c0_7, %c0_8] : memref<1x1x384xf32, #tpu.memory_space<vmem>>, vector<1x1x384xf32>
    %10 = vector.shape_cast %9 : vector<1x1x384xf32> to vector<1x384xf32>
    %11 = vector.broadcast %10 : vector<1x384xf32> to vector<128x384xf32>
    %12 = arith.addf %8, %11 : vector<128x384xf32>
    %13 = vector.shape_cast %12 : vector<128x384xf32> to vector<16x8x384xf32>
    %14 = vector.extract_strided_slice %13 {offsets = [0, 0, 0], sizes = [16, 8, 32], strides = [1, 1, 1]} : vector<16x8x384xf32> to vector<16x8x32xf32>
    %15 = arith.truncf %14 : vector<16x8x32xf32> to vector<16x8x32xbf16>
    %16 = vector.extract_strided_slice %13 {offsets = [0, 0, 128], sizes = [16, 8, 32], strides = [1, 1, 1]} : vector<16x8x384xf32> to vector<16x8x32xf32>
    %17 = arith.truncf %16 : vector<16x8x32xf32> to vector<16x8x32xbf16>
    %18 = vector.extract_strided_slice %13 {offsets = [0, 0, 256], sizes = [16, 8, 32], strides = [1, 1, 1]} : vector<16x8x384xf32> to vector<16x8x32xf32>
    %19 = arith.truncf %18 : vector<16x8x32xf32> to vector<16x8x32xbf16>
    %cst_9 = arith.constant dense<0.000000e+00> : vector<16x8x8xf32>
    %20 = tpu.matmul %15, %17, %cst_9 {dimension_numbers = #tpu.dot_dimension_numbers<[2], [2], [1], [1], [0, 0, 0, 1, 1, 1], [0], [0]>} : vector<16x8x32xbf16>, vector<16x8x32xbf16>, vector<16x8x8xf32> -> vector<16x8x8xf32>
    %cst_10 = arith.constant 0.176776692 : f32
    %21 = vector.broadcast %cst_10 : f32 to vector<16x8x8xf32>
    %22 = arith.mulf %20, %21 : vector<16x8x8xf32>
    %cst_11 = arith.constant dense<0xFF800000> : vector<16x8xf32>
    %23 = vector.multi_reduction <maximumf>, %22, %cst_11 [2] : vector<16x8x8xf32> to vector<16x8xf32>
    %24 = vector.shape_cast %23 : vector<16x8xf32> to vector<16x8x1xf32>
    %25 = vector.broadcast %24 : vector<16x8x1xf32> to vector<16x8x8xf32>
    %26 = arith.subf %22, %25 : vector<16x8x8xf32>
    %27 = math.exp %26 : vector<16x8x8xf32>
    %cst_12 = arith.constant dense<0.000000e+00> : vector<16x8xf32>
    %28 = vector.multi_reduction <add>, %27, %cst_12 [2] : vector<16x8x8xf32> to vector<16x8xf32>
    %29 = vector.shape_cast %28 : vector<16x8xf32> to vector<16x8x1xf32>
    %30 = tpu.reciprocal %29 {approx = true} : vector<16x8x1xf32> -> vector<16x8x1xf32>
    %31 = vector.broadcast %30 : vector<16x8x1xf32> to vector<16x8x8xf32>
    %32 = arith.mulf %27, %31 : vector<16x8x8xf32>
    %33 = arith.truncf %32 : vector<16x8x8xf32> to vector<16x8x8xbf16>
    %cst_13 = arith.constant dense<0.000000e+00> : vector<16x8x32xf32>
    %34 = tpu.matmul %33, %19, %cst_13 {dimension_numbers = #tpu.dot_dimension_numbers<[2], [1], [1], [2], [0, 0, 0, 1, 1, 2], [0], [0]>} : vector<16x8x8xbf16>, vector<16x8x32xbf16>, vector<16x8x32xf32> -> vector<16x8x32xf32>
    %35 = vector.extract_strided_slice %13 {offsets = [0, 0, 32], sizes = [16, 8, 32], strides = [1, 1, 1]} : vector<16x8x384xf32> to vector<16x8x32xf32>
    %36 = arith.truncf %35 : vector<16x8x32xf32> to vector<16x8x32xbf16>
    %37 = vector.extract_strided_slice %13 {offsets = [0, 0, 160], sizes = [16, 8, 32], strides = [1, 1, 1]} : vector<16x8x384xf32> to vector<16x8x32xf32>
    %38 = arith.truncf %37 : vector<16x8x32xf32> to vector<16x8x32xbf16>
    %39 = vector.extract_strided_slice %13 {offsets = [0, 0, 288], sizes = [16, 8, 32], strides = [1, 1, 1]} : vector<16x8x384xf32> to vector<16x8x32xf32>
    %40 = arith.truncf %39 : vector<16x8x32xf32> to vector<16x8x32xbf16>
    %cst_14 = arith.constant dense<0.000000e+00> : vector<16x8x8xf32>
    %41 = tpu.matmul %36, %38, %cst_14 {dimension_numbers = #tpu.dot_dimension_numbers<[2], [2], [1], [1], [0, 0, 0, 1, 1, 1], [0], [0]>} : vector<16x8x32xbf16>, vector<16x8x32xbf16>, vector<16x8x8xf32> -> vector<16x8x8xf32>
    %cst_15 = arith.constant 0.176776692 : f32
    %42 = vector.broadcast %cst_15 : f32 to vector<16x8x8xf32>
    %43 = arith.mulf %41, %42 : vector<16x8x8xf32>
    %cst_16 = arith.constant dense<0xFF800000> : vector<16x8xf32>
    %44 = vector.multi_reduction <maximumf>, %43, %cst_16 [2] : vector<16x8x8xf32> to vector<16x8xf32>
    %45 = vector.shape_cast %44 : vector<16x8xf32> to vector<16x8x1xf32>
    %46 = vector.broadcast %45 : vector<16x8x1xf32> to vector<16x8x8xf32>
    %47 = arith.subf %43, %46 : vector<16x8x8xf32>
    %48 = math.exp %47 : vector<16x8x8xf32>
    %cst_17 = arith.constant dense<0.000000e+00> : vector<16x8xf32>
    %49 = vector.multi_reduction <add>, %48, %cst_17 [2] : vector<16x8x8xf32> to vector<16x8xf32>
    %50 = vector.shape_cast %49 : vector<16x8xf32> to vector<16x8x1xf32>
    %51 = tpu.reciprocal %50 {approx = true} : vector<16x8x1xf32> -> vector<16x8x1xf32>
    %52 = vector.broadcast %51 : vector<16x8x1xf32> to vector<16x8x8xf32>
    %53 = arith.mulf %48, %52 : vector<16x8x8xf32>
    %54 = arith.truncf %53 : vector<16x8x8xf32> to vector<16x8x8xbf16>
    %cst_18 = arith.constant dense<0.000000e+00> : vector<16x8x32xf32>
    %55 = tpu.matmul %54, %40, %cst_18 {dimension_numbers = #tpu.dot_dimension_numbers<[2], [1], [1], [2], [0, 0, 0, 1, 1, 2], [0], [0]>} : vector<16x8x8xbf16>, vector<16x8x32xbf16>, vector<16x8x32xf32> -> vector<16x8x32xf32>
    %56 = vector.extract_strided_slice %13 {offsets = [0, 0, 64], sizes = [16, 8, 32], strides = [1, 1, 1]} : vector<16x8x384xf32> to vector<16x8x32xf32>
    %57 = arith.truncf %56 : vector<16x8x32xf32> to vector<16x8x32xbf16>
    %58 = vector.extract_strided_slice %13 {offsets = [0, 0, 192], sizes = [16, 8, 32], strides = [1, 1, 1]} : vector<16x8x384xf32> to vector<16x8x32xf32>
    %59 = arith.truncf %58 : vector<16x8x32xf32> to vector<16x8x32xbf16>
    %60 = vector.extract_strided_slice %13 {offsets = [0, 0, 320], sizes = [16, 8, 32], strides = [1, 1, 1]} : vector<16x8x384xf32> to vector<16x8x32xf32>
    %61 = arith.truncf %60 : vector<16x8x32xf32> to vector<16x8x32xbf16>
    %cst_19 = arith.constant dense<0.000000e+00> : vector<16x8x8xf32>
    %62 = tpu.matmul %57, %59, %cst_19 {dimension_numbers = #tpu.dot_dimension_numbers<[2], [2], [1], [1], [0, 0, 0, 1, 1, 1], [0], [0]>} : vector<16x8x32xbf16>, vector<16x8x32xbf16>, vector<16x8x8xf32> -> vector<16x8x8xf32>
    %cst_20 = arith.constant 0.176776692 : f32
    %63 = vector.broadcast %cst_20 : f32 to vector<16x8x8xf32>
    %64 = arith.mulf %62, %63 : vector<16x8x8xf32>
    %cst_21 = arith.constant dense<0xFF800000> : vector<16x8xf32>
    %65 = vector.multi_reduction <maximumf>, %64, %cst_21 [2] : vector<16x8x8xf32> to vector<16x8xf32>
    %66 = vector.shape_cast %65 : vector<16x8xf32> to vector<16x8x1xf32>
    %67 = vector.broadcast %66 : vector<16x8x1xf32> to vector<16x8x8xf32>
    %68 = arith.subf %64, %67 : vector<16x8x8xf32>
    %69 = math.exp %68 : vector<16x8x8xf32>
    %cst_22 = arith.constant dense<0.000000e+00> : vector<16x8xf32>
    %70 = vector.multi_reduction <add>, %69, %cst_22 [2] : vector<16x8x8xf32> to vector<16x8xf32>
    %71 = vector.shape_cast %70 : vector<16x8xf32> to vector<16x8x1xf32>
    %72 = tpu.reciprocal %71 {approx = true} : vector<16x8x1xf32> -> vector<16x8x1xf32>
    %73 = vector.broadcast %72 : vector<16x8x1xf32> to vector<16x8x8xf32>
    %74 = arith.mulf %69, %73 : vector<16x8x8xf32>
    %75 = arith.truncf %74 : vector<16x8x8xf32> to vector<16x8x8xbf16>
    %cst_23 = arith.constant dense<0.000000e+00> : vector<16x8x32xf32>
    %76 = tpu.matmul %75, %61, %cst_23 {dimension_numbers = #tpu.dot_dimension_numbers<[2], [1], [1], [2], [0, 0, 0, 1, 1, 2], [0], [0]>} : vector<16x8x8xbf16>, vector<16x8x32xbf16>, vector<16x8x32xf32> -> vector<16x8x32xf32>
    %77 = vector.extract_strided_slice %13 {offsets = [0, 0, 96], sizes = [16, 8, 32], strides = [1, 1, 1]} : vector<16x8x384xf32> to vector<16x8x32xf32>
    %78 = arith.truncf %77 : vector<16x8x32xf32> to vector<16x8x32xbf16>
    %79 = vector.extract_strided_slice %13 {offsets = [0, 0, 224], sizes = [16, 8, 32], strides = [1, 1, 1]} : vector<16x8x384xf32> to vector<16x8x32xf32>
    %80 = arith.truncf %79 : vector<16x8x32xf32> to vector<16x8x32xbf16>
    %81 = vector.extract_strided_slice %13 {offsets = [0, 0, 352], sizes = [16, 8, 32], strides = [1, 1, 1]} : vector<16x8x384xf32> to vector<16x8x32xf32>
    %82 = arith.truncf %81 : vector<16x8x32xf32> to vector<16x8x32xbf16>
    %cst_24 = arith.constant dense<0.000000e+00> : vector<16x8x8xf32>
    %83 = tpu.matmul %78, %80, %cst_24 {dimension_numbers = #tpu.dot_dimension_numbers<[2], [2], [1], [1], [0, 0, 0, 1, 1, 1], [0], [0]>} : vector<16x8x32xbf16>, vector<16x8x32xbf16>, vector<16x8x8xf32> -> vector<16x8x8xf32>
    %cst_25 = arith.constant 0.176776692 : f32
    %84 = vector.broadcast %cst_25 : f32 to vector<16x8x8xf32>
    %85 = arith.mulf %83, %84 : vector<16x8x8xf32>
    %cst_26 = arith.constant dense<0xFF800000> : vector<16x8xf32>
    %86 = vector.multi_reduction <maximumf>, %85, %cst_26 [2] : vector<16x8x8xf32> to vector<16x8xf32>
    %87 = vector.shape_cast %86 : vector<16x8xf32> to vector<16x8x1xf32>
    %88 = vector.broadcast %87 : vector<16x8x1xf32> to vector<16x8x8xf32>
    %89 = arith.subf %85, %88 : vector<16x8x8xf32>
    %90 = math.exp %89 : vector<16x8x8xf32>
    %cst_27 = arith.constant dense<0.000000e+00> : vector<16x8xf32>
    %91 = vector.multi_reduction <add>, %90, %cst_27 [2] : vector<16x8x8xf32> to vector<16x8xf32>
    %92 = vector.shape_cast %91 : vector<16x8xf32> to vector<16x8x1xf32>
    %93 = tpu.reciprocal %92 {approx = true} : vector<16x8x1xf32> -> vector<16x8x1xf32>
    %94 = vector.broadcast %93 : vector<16x8x1xf32> to vector<16x8x8xf32>
    %95 = arith.mulf %90, %94 : vector<16x8x8xf32>
    %96 = arith.truncf %95 : vector<16x8x8xf32> to vector<16x8x8xbf16>
    %cst_28 = arith.constant dense<0.000000e+00> : vector<16x8x32xf32>
    %97 = tpu.matmul %96, %82, %cst_28 {dimension_numbers = #tpu.dot_dimension_numbers<[2], [1], [1], [2], [0, 0, 0, 1, 1, 2], [0], [0]>} : vector<16x8x8xbf16>, vector<16x8x32xbf16>, vector<16x8x32xf32> -> vector<16x8x32xf32>
    %98 = tpu.concatenate %34, %55, %76, %97 in 2 : vector<16x8x32xf32>, vector<16x8x32xf32>, vector<16x8x32xf32>, vector<16x8x32xf32> -> vector<16x8x128xf32>
    %99 = vector.shape_cast %98 : vector<16x8x128xf32> to vector<128x128xf32>
    %100 = arith.truncf %99 : vector<128x128xf32> to vector<128x128xbf16>
    %c0_29 = arith.constant 0 : index
    %c0_30 = arith.constant 0 : index
    %c0_31 = arith.constant 0 : index
    %101 = vector.load %arg5[%c0_29, %c0_30, %c0_31] : memref<1x128x128xbf16, #tpu.memory_space<vmem>>, vector<1x128x128xbf16>
    %102 = vector.shape_cast %101 : vector<1x128x128xbf16> to vector<128x128xbf16>
    %cst_32 = arith.constant dense<0.000000e+00> : vector<128x128xf32>
    %103 = tpu.matmul %100, %102, %cst_32 {dimension_numbers = #tpu.dot_dimension_numbers<[1], [0], [0], [1], [0, 0, 1, 1], [], []>} : vector<128x128xbf16>, vector<128x128xbf16>, vector<128x128xf32> -> vector<128x128xf32>
    %c0_33 = arith.constant 0 : index
    %c0_34 = arith.constant 0 : index
    %c0_35 = arith.constant 0 : index
    %104 = vector.load %arg6[%c0_33, %c0_34, %c0_35] : memref<1x1x128xf32, #tpu.memory_space<vmem>>, vector<1x1x128xf32>
    %105 = vector.shape_cast %104 : vector<1x1x128xf32> to vector<1x128xf32>
    %106 = vector.broadcast %105 : vector<1x128xf32> to vector<128x128xf32>
    %107 = arith.addf %103, %106 : vector<128x128xf32>
    %108 = arith.addf %4, %107 : vector<128x128xf32>
    %c0_36 = arith.constant 0 : index
    %c0_37 = arith.constant 0 : index
    %c0_38 = arith.constant 0 : index
    %109 = vector.load %arg8[%c0_36, %c0_37, %c0_38] : memref<1x1x128xf32, #tpu.memory_space<vmem>>, vector<1x1x128xf32>
    %110 = vector.shape_cast %109 : vector<1x1x128xf32> to vector<1x128xf32>
    %c0_39 = arith.constant 0 : index
    %c0_40 = arith.constant 0 : index
    %c0_41 = arith.constant 0 : index
    %111 = vector.load %arg9[%c0_39, %c0_40, %c0_41] : memref<1x1x128xf32, #tpu.memory_space<vmem>>, vector<1x1x128xf32>
    %112 = vector.shape_cast %111 : vector<1x1x128xf32> to vector<1x128xf32>
    %cst_42 = arith.constant dense<0.000000e+00> : vector<128xf32>
    %113 = vector.multi_reduction <add>, %108, %cst_42 [1] : vector<128x128xf32> to vector<128xf32>
    %114 = vector.shape_cast %113 : vector<128xf32> to vector<128x1xf32>
    %cst_43 = arith.constant 1.280000e+02 : f32
    %115 = vector.broadcast %cst_43 : f32 to vector<128x1xf32>
    %116 = arith.divf %114, %115 : vector<128x1xf32>
    %117 = vector.broadcast %116 : vector<128x1xf32> to vector<128x128xf32>
    %118 = arith.subf %108, %117 : vector<128x128xf32>
    %119 = arith.mulf %118, %118 : vector<128x128xf32>
    %cst_44 = arith.constant dense<0.000000e+00> : vector<128xf32>
    %120 = vector.multi_reduction <add>, %119, %cst_44 [1] : vector<128x128xf32> to vector<128xf32>
    %121 = vector.shape_cast %120 : vector<128xf32> to vector<128x1xf32>
    %cst_45 = arith.constant 1.280000e+02 : f32
    %122 = vector.broadcast %cst_45 : f32 to vector<128x1xf32>
    %123 = arith.divf %121, %122 : vector<128x1xf32>
    %124 = vector.broadcast %116 : vector<128x1xf32> to vector<128x128xf32>
    %125 = arith.subf %108, %124 : vector<128x128xf32>
    %cst_46 = arith.constant 9.99999974E-6 : f32
    %126 = vector.broadcast %cst_46 : f32 to vector<128x1xf32>
    %127 = arith.addf %123, %126 : vector<128x1xf32>
    %128 = math.rsqrt %127 : vector<128x1xf32>
    %129 = vector.broadcast %128 : vector<128x1xf32> to vector<128x128xf32>
    %130 = arith.mulf %125, %129 : vector<128x128xf32>
    %131 = vector.broadcast %110 : vector<1x128xf32> to vector<128x128xf32>
    %132 = arith.mulf %130, %131 : vector<128x128xf32>
    %133 = vector.broadcast %112 : vector<1x128xf32> to vector<128x128xf32>
    %134 = arith.addf %132, %133 : vector<128x128xf32>
    %c0_47 = arith.constant 0 : index
    %c0_48 = arith.constant 0 : index
    %c0_49 = arith.constant 0 : index
    %135 = vector.load %arg7[%c0_47, %c0_48, %c0_49] : memref<1x1x128xf32, #tpu.memory_space<vmem>>, vector<1x1x128xf32>
    %136 = vector.shape_cast %135 : vector<1x1x128xf32> to vector<1x128xf32>
    %137 = vector.broadcast %136 : vector<1x128xf32> to vector<128x128xf32>
    %138 = arith.addf %134, %137 : vector<128x128xf32>
    %c0_50 = arith.constant 0 : index
    %c0_51 = arith.constant 0 : index
    %c0_52 = arith.constant 0 : index
    %139 = vector.load %arg10[%c0_50, %c0_51, %c0_52] : memref<1x1x128xf32, #tpu.memory_space<vmem>>, vector<1x1x128xf32>
    %140 = vector.shape_cast %139 : vector<1x1x128xf32> to vector<1x128xf32>
    %c0_53 = arith.constant 0 : index
    %c0_54 = arith.constant 0 : index
    %c0_55 = arith.constant 0 : index
    %141 = vector.load %arg11[%c0_53, %c0_54, %c0_55] : memref<1x1x128xf32, #tpu.memory_space<vmem>>, vector<1x1x128xf32>
    %142 = vector.shape_cast %141 : vector<1x1x128xf32> to vector<1x128xf32>
    %cst_56 = arith.constant dense<0.000000e+00> : vector<128xf32>
    %143 = vector.multi_reduction <add>, %138, %cst_56 [1] : vector<128x128xf32> to vector<128xf32>
    %144 = vector.shape_cast %143 : vector<128xf32> to vector<128x1xf32>
    %cst_57 = arith.constant 1.280000e+02 : f32
    %145 = vector.broadcast %cst_57 : f32 to vector<128x1xf32>
    %146 = arith.divf %144, %145 : vector<128x1xf32>
    %147 = vector.broadcast %146 : vector<128x1xf32> to vector<128x128xf32>
    %148 = arith.subf %138, %147 : vector<128x128xf32>
    %149 = arith.mulf %148, %148 : vector<128x128xf32>
    %cst_58 = arith.constant dense<0.000000e+00> : vector<128xf32>
    %150 = vector.multi_reduction <add>, %149, %cst_58 [1] : vector<128x128xf32> to vector<128xf32>
    %151 = vector.shape_cast %150 : vector<128xf32> to vector<128x1xf32>
    %cst_59 = arith.constant 1.280000e+02 : f32
    %152 = vector.broadcast %cst_59 : f32 to vector<128x1xf32>
    %153 = arith.divf %151, %152 : vector<128x1xf32>
    %154 = vector.broadcast %146 : vector<128x1xf32> to vector<128x128xf32>
    %155 = arith.subf %138, %154 : vector<128x128xf32>
    %cst_60 = arith.constant 9.99999974E-6 : f32
    %156 = vector.broadcast %cst_60 : f32 to vector<128x1xf32>
    %157 = arith.addf %153, %156 : vector<128x1xf32>
    %158 = math.rsqrt %157 : vector<128x1xf32>
    %159 = vector.broadcast %158 : vector<128x1xf32> to vector<128x128xf32>
    %160 = arith.mulf %155, %159 : vector<128x128xf32>
    %161 = vector.broadcast %140 : vector<1x128xf32> to vector<128x128xf32>
    %162 = arith.mulf %160, %161 : vector<128x128xf32>
    %163 = vector.broadcast %142 : vector<1x128xf32> to vector<128x128xf32>
    %164 = arith.addf %162, %163 : vector<128x128xf32>
    %165 = arith.truncf %164 : vector<128x128xf32> to vector<128x128xbf16>
    %c0_61 = arith.constant 0 : index
    %c0_62 = arith.constant 0 : index
    %c0_63 = arith.constant 0 : index
    %166 = vector.load %arg14[%c0_61, %c0_62, %c0_63] : memref<1x128x512xbf16, #tpu.memory_space<vmem>>, vector<1x128x512xbf16>
    %167 = vector.shape_cast %166 : vector<1x128x512xbf16> to vector<128x512xbf16>
    %cst_64 = arith.constant dense<0.000000e+00> : vector<128x512xf32>
    %168 = tpu.matmul %165, %167, %cst_64 {dimension_numbers = #tpu.dot_dimension_numbers<[1], [0], [0], [1], [0, 0, 1, 1], [], []>} : vector<128x128xbf16>, vector<128x512xbf16>, vector<128x512xf32> -> vector<128x512xf32>
    %c0_65 = arith.constant 0 : index
    %c0_66 = arith.constant 0 : index
    %c0_67 = arith.constant 0 : index
    %169 = vector.load %arg15[%c0_65, %c0_66, %c0_67] : memref<1x1x512xf32, #tpu.memory_space<vmem>>, vector<1x1x512xf32>
    %170 = vector.shape_cast %169 : vector<1x1x512xf32> to vector<1x512xf32>
    %171 = vector.broadcast %170 : vector<1x512xf32> to vector<128x512xf32>
    %172 = arith.addf %168, %171 : vector<128x512xf32>
    %cst_68 = arith.constant 0.000000e+00 : f32
    %173 = vector.broadcast %cst_68 : f32 to vector<128x512xf32>
    %174 = arith.maximumf %172, %173 : vector<128x512xf32>
    %175 = arith.truncf %174 : vector<128x512xf32> to vector<128x512xbf16>
    %c0_69 = arith.constant 0 : index
    %c0_70 = arith.constant 0 : index
    %c0_71 = arith.constant 0 : index
    %176 = vector.load %arg16[%c0_69, %c0_70, %c0_71] : memref<1x512x128xbf16, #tpu.memory_space<vmem>>, vector<1x512x128xbf16>
    %177 = vector.shape_cast %176 : vector<1x512x128xbf16> to vector<512x128xbf16>
    %cst_72 = arith.constant dense<0.000000e+00> : vector<128x128xf32>
    %178 = tpu.matmul %175, %177, %cst_72 {dimension_numbers = #tpu.dot_dimension_numbers<[1], [0], [0], [1], [0, 0, 1, 1], [], []>} : vector<128x512xbf16>, vector<512x128xbf16>, vector<128x128xf32> -> vector<128x128xf32>
    %179 = arith.addf %164, %178 : vector<128x128xf32>
    %c0_73 = arith.constant 0 : index
    %c0_74 = arith.constant 0 : index
    %c0_75 = arith.constant 0 : index
    %180 = vector.load %arg17[%c0_73, %c0_74, %c0_75] : memref<1x1x128xf32, #tpu.memory_space<vmem>>, vector<1x1x128xf32>
    %181 = vector.shape_cast %180 : vector<1x1x128xf32> to vector<1x128xf32>
    %182 = vector.broadcast %181 : vector<1x128xf32> to vector<128x128xf32>
    %183 = arith.addf %179, %182 : vector<128x128xf32>
    %c0_76 = arith.constant 0 : index
    %c0_77 = arith.constant 0 : index
    %c0_78 = arith.constant 0 : index
    %184 = vector.load %arg12[%c0_76, %c0_77, %c0_78] : memref<1x1x128xf32, #tpu.memory_space<vmem>>, vector<1x1x128xf32>
    %185 = vector.shape_cast %184 : vector<1x1x128xf32> to vector<1x128xf32>
    %c0_79 = arith.constant 0 : index
    %c0_80 = arith.constant 0 : index
    %c0_81 = arith.constant 0 : index
    %186 = vector.load %arg13[%c0_79, %c0_80, %c0_81] : memref<1x1x128xf32, #tpu.memory_space<vmem>>, vector<1x1x128xf32>
    %187 = vector.shape_cast %186 : vector<1x1x128xf32> to vector<1x128xf32>
    %cst_82 = arith.constant dense<0.000000e+00> : vector<128xf32>
    %188 = vector.multi_reduction <add>, %183, %cst_82 [1] : vector<128x128xf32> to vector<128xf32>
    %189 = vector.shape_cast %188 : vector<128xf32> to vector<128x1xf32>
    %cst_83 = arith.constant 1.280000e+02 : f32
    %190 = vector.broadcast %cst_83 : f32 to vector<128x1xf32>
    %191 = arith.divf %189, %190 : vector<128x1xf32>
    %192 = vector.broadcast %191 : vector<128x1xf32> to vector<128x128xf32>
    %193 = arith.subf %183, %192 : vector<128x128xf32>
    %194 = arith.mulf %193, %193 : vector<128x128xf32>
    %cst_84 = arith.constant dense<0.000000e+00> : vector<128xf32>
    %195 = vector.multi_reduction <add>, %194, %cst_84 [1] : vector<128x128xf32> to vector<128xf32>
    %196 = vector.shape_cast %195 : vector<128xf32> to vector<128x1xf32>
    %cst_85 = arith.constant 1.280000e+02 : f32
    %197 = vector.broadcast %cst_85 : f32 to vector<128x1xf32>
    %198 = arith.divf %196, %197 : vector<128x1xf32>
    %199 = vector.broadcast %191 : vector<128x1xf32> to vector<128x128xf32>
    %200 = arith.subf %183, %199 : vector<128x128xf32>
    %cst_86 = arith.constant 9.99999974E-6 : f32
    %201 = vector.broadcast %cst_86 : f32 to vector<128x1xf32>
    %202 = arith.addf %198, %201 : vector<128x1xf32>
    %203 = math.rsqrt %202 : vector<128x1xf32>
    %204 = vector.broadcast %203 : vector<128x1xf32> to vector<128x128xf32>
    %205 = arith.mulf %200, %204 : vector<128x128xf32>
    %206 = vector.broadcast %185 : vector<1x128xf32> to vector<128x128xf32>
    %207 = arith.mulf %205, %206 : vector<128x128xf32>
    %208 = vector.broadcast %187 : vector<1x128xf32> to vector<128x128xf32>
    %209 = arith.addf %207, %208 : vector<128x128xf32>
    %210 = vector.shape_cast %209 : vector<128x128xf32> to vector<16x8x128xf32>
    %c0_87 = arith.constant 0 : index
    %c0_88 = arith.constant 0 : index
    %c0_89 = arith.constant 0 : index
    %211 = vector.load %arg18[%c0_87, %c0_88, %c0_89] : memref<16x8x128xf32, #tpu.memory_space<vmem>>, vector<16x8x128xf32>
    tpu.vector_store %arg18[%c0_87, %c0_88, %c0_89], %210 {strides = array<i32>} : memref<16x8x128xf32, #tpu.memory_space<vmem>>, vector<16x8x128xf32>,
    return
  }
  func.func @transform_0(%arg0: i32, %arg1: i32) -> (i32, i32, i32) {
    %c0_i32 = arith.constant 0 : i32
    %c0_i32_0 = arith.constant 0 : i32
    %c0_i32_1 = arith.constant 0 : i32
    return %arg0, %c0_i32, %c0_i32_0 : i32, i32, i32
  }
  func.func @transform_1(%arg0: i32, %arg1: i32) -> (i32, i32, i32) {
    %c0_i32 = arith.constant 0 : i32
    %c0_i32_0 = arith.constant 0 : i32
    %c0_i32_1 = arith.constant 0 : i32
    return %arg1, %c0_i32, %c0_i32_0 : i32, i32, i32
  }
  func.func @transform_2(%arg0: i32, %arg1: i32) -> (i32, i32, i32) {
    %c0_i32 = arith.constant 0 : i32
    %c0_i32_0 = arith.constant 0 : i32
    %c0_i32_1 = arith.constant 0 : i32
    return %arg1, %c0_i32, %c0_i32_0 : i32, i32, i32
  }
  func.func @transform_3(%arg0: i32, %arg1: i32) -> (i32, i32, i32) {
    %c0_i32 = arith.constant 0 : i32
    %c0_i32_0 = arith.constant 0 : i32
    %c0_i32_1 = arith.constant 0 : i32
    return %arg1, %c0_i32, %c0_i32_0 : i32, i32, i32
  }
  func.func @transform_4(%arg0: i32, %arg1: i32) -> (i32, i32, i32) {
    %c0_i32 = arith.constant 0 : i32
    %c0_i32_0 = arith.constant 0 : i32
    %c0_i32_1 = arith.constant 0 : i32
    return %arg1, %c0_i32, %c0_i32_0 : i32, i32, i32
  }
  func.func @transform_5(%arg0: i32, %arg1: i32) -> (i32, i32, i32) {
    %c0_i32 = arith.constant 0 : i32
    %c0_i32_0 = arith.constant 0 : i32
    %c0_i32_1 = arith.constant 0 : i32
    return %arg1, %c0_i32, %c0_i32_0 : i32, i32, i32
  }
  func.func @transform_6(%arg0: i32, %arg1: i32) -> (i32, i32, i32) {
    %c0_i32 = arith.constant 0 : i32
    %c0_i32_0 = arith.constant 0 : i32
    %c0_i32_1 = arith.constant 0 : i32
    return %arg1, %c0_i32, %c0_i32_0 : i32, i32, i32
  }
  func.func @transform_7(%arg0: i32, %arg1: i32) -> (i32, i32, i32) {
    %c0_i32 = arith.constant 0 : i32
    %c0_i32_0 = arith.constant 0 : i32
    %c0_i32_1 = arith.constant 0 : i32
    return %arg1, %c0_i32, %c0_i32_0 : i32, i32, i32
  }
  func.func @transform_8(%arg0: i32, %arg1: i32) -> (i32, i32, i32) {
    %c0_i32 = arith.constant 0 : i32
    %c0_i32_0 = arith.constant 0 : i32
    %c0_i32_1 = arith.constant 0 : i32
    return %arg1, %c0_i32, %c0_i32_0 : i32, i32, i32
  }
  func.func @transform_9(%arg0: i32, %arg1: i32) -> (i32, i32, i32) {
    %c0_i32 = arith.constant 0 : i32
    %c0_i32_0 = arith.constant 0 : i32
    %c0_i32_1 = arith.constant 0 : i32
    return %arg1, %c0_i32, %c0_i32_0 : i32, i32, i32
  }
  func.func @transform_10(%arg0: i32, %arg1: i32) -> (i32, i32, i32) {
    %c0_i32 = arith.constant 0 : i32
    %c0_i32_0 = arith.constant 0 : i32
    %c0_i32_1 = arith.constant 0 : i32
    return %arg1, %c0_i32, %c0_i32_0 : i32, i32, i32
  }
  func.func @transform_11(%arg0: i32, %arg1: i32) -> (i32, i32, i32) {
    %c0_i32 = arith.constant 0 : i32
    %c0_i32_0 = arith.constant 0 : i32
    %c0_i32_1 = arith.constant 0 : i32
    return %arg1, %c0_i32, %c0_i32_0 : i32, i32, i32
  }
  func.func @transform_12(%arg0: i32, %arg1: i32) -> (i32, i32, i32) {
    %c0_i32 = arith.constant 0 : i32
    %c0_i32_0 = arith.constant 0 : i32
    %c0_i32_1 = arith.constant 0 : i32
    return %arg1, %c0_i32, %c0_i32_0 : i32, i32, i32
  }
  func.func @transform_13(%arg0: i32, %arg1: i32) -> (i32, i32, i32) {
    %c0_i32 = arith.constant 0 : i32
    %c0_i32_0 = arith.constant 0 : i32
    %c0_i32_1 = arith.constant 0 : i32
    return %arg1, %c0_i32, %c0_i32_0 : i32, i32, i32
  }
  func.func @transform_14(%arg0: i32, %arg1: i32) -> (i32, i32, i32) {
    %c0_i32 = arith.constant 0 : i32
    %c0_i32_0 = arith.constant 0 : i32
    %c0_i32_1 = arith.constant 0 : i32
    return %arg1, %c0_i32, %c0_i32_0 : i32, i32, i32
  }
  func.func @transform_15(%arg0: i32, %arg1: i32) -> (i32, i32, i32) {
    %c0_i32 = arith.constant 0 : i32
    %c0_i32_0 = arith.constant 0 : i32
    %c0_i32_1 = arith.constant 0 : i32
    return %arg1, %c0_i32, %c0_i32_0 : i32, i32, i32
  }
  func.func @transform_16(%arg0: i32, %arg1: i32) -> (i32, i32, i32) {
    %c0_i32 = arith.constant 0 : i32
    %c0_i32_0 = arith.constant 0 : i32
    %c0_i32_1 = arith.constant 0 : i32
    return %arg0, %c0_i32, %c0_i32_0 : i32, i32, i32
  }
}

</mosaic_0001>

<bundles_post_ra>
// kernel: tpu_custom_call.1
= control target key start
LH: loop header
LB: loop body
LE: loop exit
PB: predicated region body
PF: predicated region fallthrough
CT: control target
= control target key end

     0   :  { %s17431_s0 = inlined_call_operand.hbm [shape: f32[32,8,128], index: 0, kind: input, shape index: {}]   ;;  %s17432_s1 = inlined_call_operand.hbm [shape: bf16[2,128,384], index: 1, kind: input, shape index: {}]   ;;  %s17433_s2 = inlined_call_operand.vmem [shape: f32[2,1,384], index: 2, kind: input, shape index: {}]   ;;  %s17434_s3 = inlined_call_operand.hbm [shape: bf16[2,128,128], index: 3, kind: input, shape index: {}]   ;;  %s17435_s4 = inlined_call_operand.hbm [shape: f32[2,1,128], index: 4, kind: input, shape index: {}]   ;;  %s17436_s5 = inlined_call_operand.vmem [shape: f32[2,1,128], index: 5, kind: input, shape index: {}]   ;;  %s17437_s6 = inlined_call_operand.vmem [shape: f32[2,1,128], index: 6, kind: input, shape index: {}]   ;;  %s17438_s7 = inlined_call_operand.vmem [shape: f32[2,1,128], index: 7, kind: input, shape index: {}]   ;;  %s17439_s8 = inlined_call_operand.vmem [shape: f32[2,1,128], index: 8, kind: input, shape index: {}]   ;;  %s17440_s9 = inlined_call_operand.vmem [shape: f32[2,1,128], index: 9, kind: input, shape index: {}]   ;;  %s17441_s10 = inlined_call_operand.vmem [shape: f32[2,1,128], index: 10, kind: input, shape index: {}]   ;;  %s17442_s11 = inlined_call_operand.vmem [shape: f32[2,1,128], index: 11, kind: input, shape index: {}]   ;;  %s17443_s12 = inlined_call_operand.hbm [shape: bf16[2,128,512], index: 12, kind: input, shape index: {}]   ;;  %s17444_s13 = inlined_call_operand.vmem [shape: f32[2,1,512], index: 13, kind: input, shape index: {}]   ;;  %s17445_s14 = inlined_call_operand.hbm [shape: bf16[2,512,128], index: 14, kind: input, shape index: {}]   ;;  %s17446_s15 = inlined_call_operand.vmem [shape: f32[2,1,128], index: 15, kind: input, shape index: {}]   ;;  %s17447_s16 = inlined_call_operand.hbm [shape: f32[32,8,128], index: 16, kind: output, shape index: {}]  }
   0x1   :  { %17557 = sst [smem:[#allocation94_spill]] %s17431_s0 }
   0x2   :  { %17558 = sst [smem:[#allocation95_spill]] %s17432_s1 }
   0x3   :  { %17559 = sst [smem:[#allocation96_spill]] %s17433_s2 }
   0x4   :  { %17560 = sst [smem:[#allocation97_spill]] %s17434_s3 }
   0x5   :  { %17561 = sst [smem:[#allocation98_spill]] %s17435_s4 }
   0x6   :  { %17562 = sst [smem:[#allocation99_spill]] %s17436_s5 }
   0x7   :  { %17563 = sst [smem:[#allocation100_spill]] %s17437_s6 }
   0x8   :  { %17564 = sst [smem:[#allocation101_spill]] %s17438_s7 }
   0x9   :  { %17565 = sst [smem:[#allocation102_spill]] %s17439_s8 }
   0xa   :  { %17566 = sst [smem:[#allocation103_spill]] %s17440_s9 }
   0xb   :  { %17567 = sst [smem:[#allocation104_spill]] %s17441_s10 }
   0xc   :  { %17568 = sst [smem:[#allocation105_spill]] %s17442_s11 }
   0xd   :  { %17569 = sst [smem:[#allocation106_spill]] %s17443_s12 }
   0xe   :  { %17570 = sst [smem:[#allocation107_spill]] %s17444_s13 }
   0xf   :  { %17571 = sst [smem:[#allocation108_spill]] %s17445_s14 }
  0x10   :  { %17572 = sst [smem:[#allocation109_spill]] %s17446_s15 }
  0x11   :  { %17573 = sst [smem:[#allocation110_spill]] %s17447_s16 }
  0x12   :  { %21 = vsyncpa [#allocation3], 0 }
  0x13   :  { %23 = vsyncpa [#allocation3 + $0x1], 0 }
  0x14   :  { %24 = vsyncpa [#allocation6], 0 }
  0x15   :  { %26 = vsyncpa [#allocation6 + $0x1], 0 }
  0x16   :  { %27 = vsyncpa [#allocation9], 0 }
  0x17   :  { %29 = vsyncpa [#allocation9 + $0x1], 0 }
  0x18   :  { %30 = vsyncpa [#allocation12], 0 }
  0x19   :  { %32 = vsyncpa [#allocation12 + $0x1], 0 }
  0x1a   :  { %33 = vsyncpa [#allocation4], 0 }
  0x1b   :  { %35 = vsyncpa [#allocation4 + $0x1], 0  ;;  %s13628_s21 = smov 0   ;;  %s13630_s22 = smov 0  }
  0x1c   :  { %s13632_s23 = smov 0   ;;  %s13634_s24 = smov 0  }
  0x1d   :  { %s13636_s25 = smov 0   ;;  %s13638_s26 = smov 0  }
  0x1e   :  { %s13640_s27 = smov 0   ;;  %s13642_s28 = smov 0  }
  0x1f   :  { %s13644_s29 = smov 0   ;;  %s13646_s30 = smov 0  }
  0x20   :  { %s13648_s0 = smov 0  }
  0x21 LB: > { %17574 = sst [smem:[#allocation19_spill]] %s13482_s22  ;;  %p17451_p0 = scmp.eq.s32.totalorder %s13518_s0, 0  ;;  %s13518_s0 = sphi %s13648_s0, %s41_s0   ;;  %s13514_s30 = sphi %s13646_s30, %s17843_s30   ;;  %s13510_s29 = sphi %s13644_s29, %s17842_s29   ;;  %s13506_s28 = sphi %s13642_s28, %s17841_s28   ;;  %s13502_s27 = sphi %s13640_s27, %s17840_s27   ;;  %s13498_s26 = sphi %s13638_s26, %s17839_s26   ;;  %s13494_s25 = sphi %s13636_s25, %s17838_s25   ;;  %s13490_s24 = sphi %s13634_s24, %s17837_s24   ;;  %s13486_s23 = sphi %s13632_s23, %s17836_s23   ;;  %s13482_s22 = sphi %s13630_s22, %s17835_s22   ;;  %s13478_s21 = sphi %s13628_s21, %s17834_s21  }
  0x22   : > { %17575 = sst [smem:[#allocation20_spill]] %s13486_s23  ;;  %p93_p1 = scmp.ne.s32.totalorder %s13486_s23, %s13482_s22 }
  0x23   : > { %17576 = sst [smem:[#allocation21_spill]] %s13490_s24  ;;  %p17450_p3 = scmp.lt.s32.totalorder %s13518_s0, 4 }
  0x24   : > { %17577 = sst [smem:[#allocation22_spill]] %s13494_s25  ;;  %p95_p4 = por %p93_p1, %p17451_p0 }
  0x25   : > { %17578 = sst [smem:[#allocation23_spill]] %s13498_s26  ;;  %s13694_s19 = sand.u32 1, %s13486_s23  }
  0x26   : > { %17579 = sst [smem:[#allocation24_spill]] %s13502_s27  ;;  %s12449_s20 = smul.u32 192, %s13694_s19 }
  0x27   : > { %17580 = sst [smem:[#allocation25_spill]] %s13506_s28  ;;  %p13699_p5 = pnand %p17450_p3, %p95_p4 }
  0x28   : > { %17581 = sst [smem:[#allocation26_spill]] %s13510_s29  ;;  %s12450_s28 = smul.u32 3072, %s13510_s29 }
  0x29   : > { %17582 = sst [smem:[#allocation27_spill]] %s13514_s30  ;;  %s17585_s1 = sld [smem:[#allocation95_spill]] }
  0x2a   : > { %17583 = sst [smem:[#allocation28_spill]] %s13518_s0  ;;  %s538_s18 = scalar_lea.vmem [#allocation5], %s12449_s20 }
  0x2b   : > { %s17584_s16 = scalar_select %p13699_p5, 1, 0 }
  0x2c   : > { %s545_s11 = sshll.u32 %s538_s18, 4  ;;  %s17586_s10 = sand.u32 1, %s13518_s0   ;;  %s13709_s11 = int_to_ptr.vmem [resolvable:$true] %s545_s11 }
  0x2d   : > { %s13713_s9 = scalar_lea.sflag [#allocation6], %s17586_s10  ;;  %p13719_p7 = pneg %p13699_p5 }
  0x2f   : > { %s13707_s17 = scalar_lea.hbm %s17585_s1, %s12450_s28  ;;  %s13209_s28 = scalar_lea.hbm %s17585_s1, 6144 }
  0x30   : > { %s13204_s8 = scalar_lea.hbm %s13707_s17, 3072  ;;  %p13210_p10 = scmp.lt.u32.totalorder %s13707_s17, %s17585_s1 }
  0x31   : > { %p13205_p6 = scmp.ne.s32.totalorder %s13707_s17, %s13204_s8  ;;  %p13211_p11 = scmp.lt.u32.totalorder %s13209_s28, %s13204_s8 }
  0x32   : > { %p13213_p13 = scmp.lt.u32.totalorder %s13204_s8, %s13707_s17 }
  0x33   : > { %p13207_p8 = pnand %p13719_p7, %p13205_p6  ;;  %p13212_p12 = por %p13211_p11, %p13210_p10 }
  0x35   : > { %p13208_p9 = pneg %p13207_p8  ;;  %p13214_p1 = por %p13213_p13, %p13212_p12 }
  0x37   : > { %p13215_p4 = pnand %p13214_p1, %p13208_p9 }
  0x39   : > { %13218 = shalt.err (!%p13215_p4)
}
  0x3a   : > { %s13219_s10 = scalar_lea.vmem %s13709_s11, 3072  ;;  %s13520_s13 = smov [#allocation5]  }
  0x3b   : > { %p13220_p6 = scmp.ne.s32.totalorder %s13709_s11, %s13219_s10  ;;  %s13224_s15 = sshll.u32 %s13520_s13, 4  ;;  %s13225_s15 = int_to_ptr.vmem [resolvable:$false] %s13224_s15 }
  0x3c   : > { %s13226_s18 = scalar_lea.vmem %s13225_s15, 6144  ;;  %p13227_p2 = scmp.lt.s32.totalorder %s13709_s11, %s13225_s15 }
  0x3d   : > { %p13222_p8 = pnand %p13220_p6, %p13719_p7  ;;  %p13228_p0 = scmp.lt.s32.totalorder %s13226_s18, %s13219_s10 }
  0x3f   : > { %p13223_p3 = pneg %p13222_p8  ;;  %p13229_p10 = por %p13228_p0, %p13227_p2 }
  0x41   : > { %p13230_p11 = pnand %p13229_p10, %p13223_p3 }
  0x43   : > { %13233 = shalt.err (!%p13230_p11)
}
  0x44   : > { %s13521_s8 = smov 192   ;;  %s13522_s28 = smov 12  }
  0x45   : > { %12473 = dma.hbm_to_vmem [thread:$0]  (!%p13699_p5), %s13707_s17, 3072, %s13709_s11, %s13713_s9, %s13521_s8, %s13521_s8, %s13522_s28  }
  0x46   : > { %p10934_p9 = scmp.ge.s32.totalorder %s13518_s0, 1  ;;  %p695_p12 = scmp.lt.s32.totalorder %s13518_s0, 5 }
  0x47   : > { %s10927_s10 = sshll.u32 %s13510_s29, 4  ;;  %s17590_s4 = sld [smem:[#allocation98_spill]] }
  0x48   : > { %p13745_p13 = pnand %p10934_p9, %p695_p12  ;;  %s586_s1 = scalar_lea.vmem [#allocation8], %s13694_s19 }
  0x49   : > { %s593_s7 = sshll.u32 %s586_s1, 4  ;;  %s17591_s11 = sand.u32 1, %s13518_s0   ;;  %s594_s7 = int_to_ptr.vmem [resolvable:$true] %s593_s7 }
  0x4a   : > { %s17588_s20 = scalar_select %p13745_p13, 1, 0 }
  0x4b   : > { %s13758_s17 = scalar_lea.sflag [#allocation9], %s17591_s11 }
  0x4c   : > { %17589 = sst [smem:[#allocation29_spill]] %s17588_s20 }
  0x4d   : > { %s13753_s18 = scalar_lea.hbm %s17590_s4, %s10927_s10  ;;  %s13239_s10 = scalar_lea.hbm %s17590_s4, 32 }
  0x4e   : > { %s13234_s8 = scalar_lea.hbm %s13753_s18, 16  ;;  %p13240_p1 = scmp.lt.u32.totalorder %s13753_s18, %s17590_s4 }
  0x4f   : > { %p13235_p0 = scmp.ne.s32.totalorder %s13753_s18, %s13234_s8  ;;  %p13241_p4 = scmp.lt.u32.totalorder %s13239_s10, %s13234_s8 }
  0x50   : > { %p13243_p8 = scmp.lt.u32.totalorder %s13234_s8, %s13753_s18 }
  0x51   : > { %p13237_p2 = pnand %p13235_p0, %p13719_p7  ;;  %p13242_p6 = por %p13241_p4, %p13240_p1 }
  0x53   : > { %p13238_p3 = pneg %p13237_p2  ;;  %p13244_p10 = por %p13243_p8, %p13242_p6 }
  0x55   : > { %p13245_p11 = pnand %p13244_p10, %p13238_p3 }
  0x57   : > { %13248 = shalt.err (!%p13245_p11)
}
  0x58   : > { %s13249_s1 = scalar_lea.vmem %s594_s7, 16  ;;  %s13523_s11 = smov [#allocation8]  }
  0x59   : > { %p13250_p9 = scmp.ne.s32.totalorder %s594_s7, %s13249_s1  ;;  %s13254_s5 = sshll.u32 %s13523_s11, 4  ;;  %s13255_s5 = int_to_ptr.vmem [resolvable:$false] %s13254_s5 }
  0x5a   : > { %s13256_s6 = scalar_lea.vmem %s13255_s5, 32  ;;  %p13257_p2 = scmp.lt.s32.totalorder %s594_s7, %s13255_s5 }
  0x5b   : > { %p13252_p12 = pnand %p13250_p9, %p13719_p7  ;;  %p13258_p13 = scmp.lt.s32.totalorder %s13256_s6, %s13249_s1 }
  0x5d   : > { %p13253_p0 = pneg %p13252_p12  ;;  %p13259_p5 = por %p13258_p13, %p13257_p2 }
  0x5f   : > { %p13260_p1 = pnand %p13259_p5, %p13253_p0 }
  0x61   : > { %13263 = shalt.err (!%p13260_p1)
}
  0x62   : > { %p17592_p4 = scmp.ne.s32.totalorder %s17584_s16, 0  ;;  %s13779_s5 = sadd.s32 4294967295, %s13518_s0  }
  0x63   : > { %17593 = sst [smem:[#allocation30_spill]] %s13779_s5  ;;  %s10917_s8 = sadd.s32 4294967294, %s13518_s0  }
  0x64   : > { %12479 = dma.hbm_to_vmem [thread:$0]  (!%p17592_p4), %s13753_s18, 16, %s594_s7, %s13758_s17  }
  0x65   : > { %s50_s28 = sadd.s32 1, %s13510_s29  ;;  %s53_s10 = sadd.s32 1, %s13514_s30 }
  0x66   : > { %p51_p5 = scmp.ge.s32.totalorder %s50_s28, 2  ;;  %s60_s13 = sadd.s32 1, %s13498_s26 }
  0x67   : > { %p67_p13 = scmp.ne.s32.totalorder %s13498_s26, %s13494_s25  ;;  %p17595_p3 = scmp.eq.s32.totalorder %s13518_s0, 0 }
  0x68   : > { %s17845_s28 = smov (%p51_p5, %s50_s28), 0  ;;  %s17847_s10 = smov (!%p51_p5, %s53_s10), %s13514_s30 }
  0x69   : > { %17594 = sst [smem:[#allocation31_spill]] %s17845_s28  ;;  %p13795_p6 = por %p17595_p3, %p67_p13 }
  0x6a   : > { %p73_p8 = scmp.ne.s32.totalorder %s13494_s25, %s13490_s24  ;;  %p55_p10 = scmp.ge.s32.totalorder %s17847_s10, 2 }
  0x6b   : > { %p74_p11 = scmp.eq.s32.totalorder %s13779_s5, 0  ;;  %s83_s18 = ssub.s32 %s13510_s29, %s17845_s28 }
  0x6c   : > { %p487_p9 = scmp.eq.s32.totalorder %s13779_s5, 3  ;;  %s17849_s10 = smov (%p55_p10, %s17847_s10), 0 }
  0x6d   : > { %17597 = sst [smem:[#allocation32_spill]] %s17849_s10  ;;  %p13810_p12 = por %p74_p11, %p73_p8 }
  0x6e   : > { %p84_p0 = scmp.eq.s32.totalorder %s83_s18, 0  ;;  %s57_s1 = ssub.s32 %s13514_s30, %s17849_s10 }
  0x6f   : > { %s17598_s15 = scalar_select %p13810_p12, 1, 0 }
  0x70   : > { %p17600_p2 = scmp.ne.s32.totalorder %s13482_s22, %s13478_s21  ;;  %p58_p5 = scmp.eq.s32.totalorder %s57_s1, 0 }
  0x71   : > { %17599 = sst [smem:[#allocation33_spill]] %s17598_s15  ;;  %p13826_p3 = por %p487_p9, %p67_p13 }
  0x72   : > { %p13819_p1 = por %p17600_p2, %p74_p11  ;;  %s17605_s4 = sadd.s32 1, %s13486_s23 }
  0x73   : > { %s17603_s6 = scalar_select %p13826_p3, 1, 0 }
  0x74   : > { %s17601_s11 = scalar_select %p13819_p1, 1, 0 }
  0x75   : > { %17604 = sst [smem:[#allocation35_spill]] %s17603_s6  ;;  %p493_p10 = scmp.eq.s32.totalorder %s10917_s8, 3 }
  0x76   : > { %17602 = sst [smem:[#allocation34_spill]] %s17601_s11  ;;  %s513_s18 = sand.u32 1, %s13498_s26  }
  0x77   : > { %s13833_s28 = scalar_select %p84_p0, %s13486_s23, %s17605_s4  }
  0x78   : > { %s13836_s27 = scalar_select %p58_p5, %s13498_s26, %s60_s13  }
  0x79   : > { %17606 = sst [smem:[#allocation36_spill]] %s13833_s28  ;;  %s10920_s10 = sshll.u32 %s513_s18, 7 }
  0x7a   : > { %17607 = sst [smem:[#allocation37_spill]] %s13836_s27  ;;  %p13842_p12 = por %p493_p10, %p73_p8 }
  0x7b   : > { %s11180_s11 = sshll.u32 %s13514_s30, 11  ;;  %s517_s1 = scalar_lea.vmem [#allocation2], %s10920_s10 }
  0x7c   : > { %s17608_s21 = scalar_select %p13842_p12, 1, 0 }
  0x7d   : > { %s524_s22 = sshll.u32 %s517_s1, 4  ;;  %s17610_s20 = sld [smem:[#allocation94_spill]]  ;;  %s13852_s22 = int_to_ptr.vmem [resolvable:$true] %s524_s22 }
  0x7e   : > { %17609 = sst [smem:[#allocation38_spill]] %s17608_s21  ;;  %p17611_p13 = scmp.lt.s32.totalorder %s13518_s0, 4 }
  0x7f   : > { %s10924_s8 = sshll.u32 %s13694_s19, 6  ;;  %s13863_s10 = scalar_lea.sflag [#allocation3], %s513_s18 }
  0x80   : > { %p13858_p8 = pnand %p17611_p13, %p13795_p6 }
  0x82   : > { %p13266_p9 = pneg %p13858_p8 }
  0x83   : > { %s13850_s6 = scalar_lea.hbm %s17610_s20, %s11180_s11  ;;  %s13269_s15 = scalar_lea.hbm %s17610_s20, 4096 }
  0x84   : > { %s13264_s5 = scalar_lea.hbm %s13850_s6, 2048  ;;  %p13270_p6 = scmp.lt.u32.totalorder %s13850_s6, %s17610_s20 }
  0x85   : > { %p13265_p11 = scmp.ne.s32.totalorder %s13850_s6, %s13264_s5  ;;  %p13271_p5 = scmp.lt.u32.totalorder %s13269_s15, %s13264_s5 }
  0x86   : > { %p13273_p13 = scmp.lt.u32.totalorder %s13264_s5, %s13850_s6 }
  0x87   : > { %p13267_p0 = pnand %p13266_p9, %p13265_p11  ;;  %p13272_p10 = por %p13271_p5, %p13270_p6 }
  0x89   : > { %p13268_p2 = pneg %p13267_p0  ;;  %p13274_p12 = por %p13273_p13, %p13272_p10 }
  0x8b   : > { %p13275_p3 = pnand %p13274_p12, %p13268_p2 }
  0x8d   : > { %13278 = shalt.err (!%p13275_p3)
}
  0x8e   : > { %s13279_s18 = scalar_lea.vmem %s13852_s22, 2048  ;;  %s13524_s13 = smov [#allocation2]  }
  0x8f   : > { %p13280_p11 = scmp.ne.s32.totalorder %s13852_s22, %s13279_s18  ;;  %s13284_s7 = sshll.u32 %s13524_s13, 4  ;;  %s13285_s7 = int_to_ptr.vmem [resolvable:$false] %s13284_s7 }
  0x90   : > { %s13286_s11 = scalar_lea.vmem %s13285_s7, 4096  ;;  %p13287_p4 = scmp.lt.s32.totalorder %s13852_s22, %s13285_s7 }
  0x91   : > { %p13282_p0 = pnand %p13280_p11, %p13266_p9  ;;  %p13288_p6 = scmp.lt.s32.totalorder %s13286_s11, %s13279_s18 }
  0x93   : > { %p13283_p1 = pneg %p13282_p0  ;;  %p13289_p5 = por %p13288_p6, %p13287_p4 }
  0x95   : > { %p13290_p10 = pnand %p13289_p5, %p13283_p1 }
  0x97   : > { %13293 = shalt.err (!%p13290_p10)
}
  0x98   : > { %s13525_s5 = smov 128   ;;  %s13526_s15 = smov 8  }
  0x99   : > { %12470 = dma.hbm_to_vmem [thread:$0]  (!%p13858_p8), %s13850_s6, 2048, %s13852_s22, %s13863_s10, %s13525_s5, %s13525_s5, %s13526_s15  }
  0x9a   : > { %s11181_s1 = sshll.u32 %s13510_s29, 10  ;;  %s566_s13 = scalar_lea.vmem [#allocation7], %s10924_s8 }
  0x9b   : > { %s573_s20 = sshll.u32 %s566_s13, 4  ;;  %s17613_s3 = sld [smem:[#allocation97_spill]]  ;;  %s13899_s20 = int_to_ptr.vmem [resolvable:$true] %s573_s20 }
  0xa1   : > { %s13897_s11 = scalar_lea.hbm %s17613_s3, %s11181_s1  ;;  %s13299_s4 = scalar_lea.hbm %s17613_s3, 2048 }
  0xa2   : > { %s13294_s30 = scalar_lea.hbm %s13897_s11, 1024  ;;  %p13300_p3 = scmp.lt.u32.totalorder %s13897_s11, %s17613_s3 }
  0xa3   : > { %p13295_p4 = scmp.ne.s32.totalorder %s13897_s11, %s13294_s30  ;;  %p13301_p8 = scmp.lt.u32.totalorder %s13299_s4, %s13294_s30 }
  0xa4   : > { %p13303_p2 = scmp.lt.u32.totalorder %s13294_s30, %s13897_s11 }
  0xa5   : > { %p13297_p12 = pnand %p13295_p4, %p13719_p7  ;;  %p13302_p9 = por %p13301_p8, %p13300_p3 }
  0xa7   : > { %p13298_p1 = pneg %p13297_p12  ;;  %p13304_p13 = por %p13303_p2, %p13302_p9 }
  0xa9   : > { %p13305_p11 = pnand %p13304_p13, %p13298_p1 }
  0xab   : > { %13308 = shalt.err (!%p13305_p11)
}
  0xac   : > { %s13309_s5 = scalar_lea.vmem %s13899_s20, 1024  ;;  %s13527_s15 = smov [#allocation7]  }
  0xad   : > { %p13310_p0 = scmp.ne.s32.totalorder %s13899_s20, %s13309_s5  ;;  %s13314_s1 = sshll.u32 %s13527_s15, 4  ;;  %s13315_s1 = int_to_ptr.vmem [resolvable:$false] %s13314_s1 }
  0xae   : > { %s13316_s13 = scalar_lea.vmem %s13315_s1, 2048  ;;  %p13317_p10 = scmp.lt.s32.totalorder %s13899_s20, %s13315_s1 }
  0xaf   : > { %p13312_p6 = pnand %p13310_p0, %p13719_p7  ;;  %p13318_p4 = scmp.lt.s32.totalorder %s13316_s13, %s13309_s5 }
  0xb1   : > { %p13313_p5 = pneg %p13312_p6  ;;  %p13319_p12 = por %p13318_p4, %p13317_p10 }
  0xb3   : > { %p13320_p3 = pnand %p13319_p12, %p13313_p5 }
  0xb5   : > { %13323 = shalt.err (!%p13320_p3)
}
  0xb6   : > { %s13528_s30 = smov 64   ;;  %s13529_s7 = smov 4  }
  0xb7   : > { %p17614_p1 = scmp.ne.s32.totalorder %s17584_s16, 0  ;;  %s10928_s18 = sshll.u32 %s13694_s19, 8 }
  0xb8   : > { %s11182_s22 = sshll.u32 %s13510_s29, 12  ;;  %s17615_s12 = sld [smem:[#allocation106_spill]] }
  0xb9   : > { %12476 = dma.hbm_to_vmem [thread:$0]  (!%p17614_p1), %s13897_s11, 1024, %s13899_s20, %s13713_s9, %s13528_s30, %s13528_s30, %s13529_s7  }
  0xba   : > { %s646_s10 = scalar_lea.vmem [#allocation10], %s10928_s18 }
  0xbb   : > { %s653_s5 = sshll.u32 %s646_s10, 4  ;;  %s13937_s5 = int_to_ptr.vmem [resolvable:$true] %s653_s5 }
  0xbe   : > { %s13933_s8 = scalar_lea.hbm %s17615_s12, %s11182_s22  ;;  %s13329_s11 = scalar_lea.hbm %s17615_s12, 8192 }
  0xbf   : > { %s13324_s15 = scalar_lea.hbm %s13933_s8, 4096  ;;  %p13330_p13 = scmp.lt.u32.totalorder %s13933_s8, %s17615_s12 }
  0xc0   : > { %p13325_p8 = scmp.ne.s32.totalorder %s13933_s8, %s13324_s15  ;;  %p13331_p11 = scmp.lt.u32.totalorder %s13329_s11, %s13324_s15 }
  0xc1   : > { %p13333_p6 = scmp.lt.u32.totalorder %s13324_s15, %s13933_s8 }
  0xc2   : > { %p13327_p9 = pnand %p13325_p8, %p13719_p7  ;;  %p13332_p0 = por %p13331_p11, %p13330_p13 }
  0xc4   : > { %p13328_p2 = pneg %p13327_p9  ;;  %p13334_p5 = por %p13333_p6, %p13332_p0 }
  0xc6   : > { %p13335_p10 = pnand %p13334_p5, %p13328_p2 }
  0xc8   : > { %13338 = shalt.err (!%p13335_p10)
}
  0xc9   : > { %s13339_s6 = scalar_lea.vmem %s13937_s5, 4096  ;;  %s13530_s4 = smov [#allocation10]  }
  0xca   : > { %p13340_p4 = scmp.ne.s32.totalorder %s13937_s5, %s13339_s6  ;;  %s13344_s10 = sshll.u32 %s13530_s4, 4  ;;  %s13345_s10 = int_to_ptr.vmem [resolvable:$false] %s13344_s10 }
  0xcb   : > { %s13346_s9 = scalar_lea.vmem %s13345_s10, 8192  ;;  %p13347_p8 = scmp.lt.s32.totalorder %s13937_s5, %s13345_s10 }
  0xcc   : > { %p13342_p12 = pnand %p13340_p4, %p13719_p7  ;;  %p13348_p9 = scmp.lt.s32.totalorder %s13346_s9, %s13339_s6 }
  0xce   : > { %p13343_p3 = pneg %p13342_p12  ;;  %p13349_p13 = por %p13348_p9, %p13347_p8 }
  0xd0   : > { %p13350_p11 = pnand %p13349_p13, %p13343_p3 }
  0xd2   : > { %13353 = shalt.err (!%p13350_p11)
}
  0xd3   : > { %s13531_s15 = smov 256   ;;  %s13532_s20 = smov 16  }
  0xd4   : > { %12482 = dma.hbm_to_vmem [thread:$0]  (!%p17614_p1), %s13933_s8, 4096, %s13937_s5, %s13758_s17, %s13531_s15, %s13531_s15, %s13532_s20  }
  0xd5   : > { %s17616_s14 = sld [smem:[#allocation108_spill]]  ;;  %s674_s6 = scalar_lea.vmem [#allocation11], %s10928_s18 }
  0xd6   : > { %s681_s4 = sshll.u32 %s674_s6, 4  ;;  %s671_s10 = scalar_lea.sflag [#allocation12], %s13694_s19  ;;  %s13970_s4 = int_to_ptr.vmem [resolvable:$true] %s681_s4 }
  0xdb   : > { %s13966_s13 = scalar_lea.hbm %s17616_s14, %s11182_s22  ;;  %s13359_s22 = scalar_lea.hbm %s17616_s14, 8192 }
  0xdc   : > { %s13354_s9 = scalar_lea.hbm %s13966_s13, 4096  ;;  %p13360_p5 = scmp.lt.u32.totalorder %s13966_s13, %s17616_s14 }
  0xdd   : > { %p13355_p2 = scmp.ne.s32.totalorder %s13966_s13, %s13354_s9  ;;  %p13361_p10 = scmp.lt.u32.totalorder %s13359_s22, %s13354_s9 }
  0xde   : > { %p13363_p12 = scmp.lt.u32.totalorder %s13354_s9, %s13966_s13 }
  0xdf   : > { %p13357_p0 = pnand %p13355_p2, %p13719_p7  ;;  %p13362_p4 = por %p13361_p10, %p13360_p5 }
  0xe1   : > { %p13358_p6 = pneg %p13357_p0  ;;  %p13364_p3 = por %p13363_p12, %p13362_p4 }
  0xe3   : > { %p13365_p8 = pnand %p13364_p3, %p13358_p6 }
  0xe5   : > { %13368 = shalt.err (!%p13365_p8)
}
  0xe6   : > { %s13369_s18 = scalar_lea.vmem %s13970_s4, 4096  ;;  %s13533_s20 = smov [#allocation11]  }
  0xe7   : > { %p13370_p9 = scmp.ne.s32.totalorder %s13970_s4, %s13369_s18  ;;  %s13374_s11 = sshll.u32 %s13533_s20, 4  ;;  %s13375_s11 = int_to_ptr.vmem [resolvable:$false] %s13374_s11 }
  0xe8   : > { %s13376_s1 = scalar_lea.vmem %s13375_s11, 8192  ;;  %p13377_p2 = scmp.lt.s32.totalorder %s13970_s4, %s13375_s11 }
  0xe9   : > { %p13372_p13 = pnand %p13370_p9, %p13719_p7  ;;  %p13378_p0 = scmp.lt.s32.totalorder %s13376_s1, %s13369_s18 }
  0xeb   : > { %p13373_p11 = pneg %p13372_p13  ;;  %p13379_p5 = por %p13378_p0, %p13377_p2 }
  0xed   : > { %p13380_p10 = pnand %p13379_p5, %p13373_p11 }
  0xef   : > { %13383 = shalt.err (!%p13380_p10)
}
  0xf0   : > { %12485 = dma.hbm_to_vmem [thread:$0]  (!%p17614_p1), %s13966_s13, 4096, %s13970_s4, %s671_s10, %s13528_s30, %s13528_s30, %s13529_s7  }
  0xf1   : > { %s17617_s2 = sld [smem:[#allocation29_spill]] }
  0xf7   : > { %p17618_p7 = scmp.ne.s32.totalorder %s17617_s2, 0 }
  0xf9   : > { %699 = sbr.rel (%p17618_p7) target bundleno = 5149 (0x141d), region = 84 }
 0x100   : > { %s17619_s6 = sld [smem:[#allocation33_spill]]  ;;  %s14002_s9 = sand.u32 1, %s13494_s25  }
 0x101   : > { %s17471_s17 = sshll.u32 %s14002_s9, 7  ;;  %s702_s16 = scalar_lea.sflag [#allocation3], %s14002_s9 }
 0x102   : > { %s14008_s8 = scalar_lea.vmem [#allocation2], %s17471_s17 }
 0x106   : > { %p17620_p6 = scmp.ne.s32.totalorder %s17619_s6, 0 }
 0x108   : > { %13457 = dma.done.wait (%p17620_p6), %s702_s16, 2048  }
 0x109   : > { %13459 = vsyncadd (%p17620_p6), %s702_s16, 4294965248  ;;  %s17621_s19 = sld [smem:[#allocation30_spill]]  ;;  %s17622_s30 = sld [smem:[#allocation19_spill]] }
 0x10a   : > { %s17623_s7 = sld [smem:[#allocation34_spill]] }
 0x10f   : > { %s710_s13 = sand.u32 1, %s17621_s19   ;;  %s14016_s4 = sand.u32 1, %s17622_s30  }
 0x110   : > { %s12451_s10 = smul.u32 192, %s14016_s4  ;;  %s711_s22 = scalar_lea.sflag [#allocation6], %s710_s13 }
 0x111   : > { %p17624_p1 = scmp.ne.s32.totalorder %s17623_s7, 0 }
 0x112   : > { %s14019_s5 = scalar_lea.vmem [#allocation5], %s12451_s10 }
 0x113   : > { %13461 = dma.done.wait (%p17624_p1), %s711_s22, 4096  }
 0x114   : > { %13463 = vsyncadd (%p17624_p1), %s711_s22, 4294963200  ;;  %s10936_s15 = sshll.u32 %s14016_s4, 6  ;;  %s729_s20 = scalar_lea.sflag [#allocation9], %s710_s13 }
 0x115   : > { %s14026_s18 = scalar_lea.vmem [#allocation7], %s10936_s15 }
 0x116   : > { %13465 = dma.done.wait (%p17624_p1), %s729_s20, 4112  }
 0x117   : > { %13467 = vsyncadd (%p17624_p1), %s729_s20, 4294963184  ;;  %s10937_s1 = sshll.u32 %s14016_s4, 8  ;;  %s746_s6 = scalar_lea.sflag [#allocation12], %s14016_s4 }
 0x118   : > { %s14034_s2 = scalar_lea.vmem [#allocation10], %s10937_s1  ;;  %s14037_s16 = scalar_lea.vmem [#allocation11], %s10937_s1 }
 0x119   : > { %13469 = dma.done.wait (%p17624_p1), %s746_s6, 4096  }
 0x11a   : > { %13471 = vsyncadd (%p17624_p1), %s746_s6, 4294963200  ;;  %s17625_s19 = sld [smem:[#allocation24_spill]]  ;;  %s17629_s26 = sld [smem:[#allocation96_spill]] }
 0x11b   : > { %s17631_s7 = sld [smem:[#allocation103_spill]]  ;;  %s17632_s1 = sld [smem:[#allocation104_spill]] }
 0x11c   : > { %s17633_s12 = sld [smem:[#allocation105_spill]]  ;;  %s17634_s29 = sld [smem:[#allocation107_spill]] }
 0x11d   : > { %s17635_s21 = sld [smem:[#allocation109_spill]]  ;;  %s17636_s0 = sshll.u32 %s14002_s9, 7 }
 0x11e   : > { %s14093_s10 = scalar_lea.vmem [#allocation13], %s17636_s0 }
 0x120   : > { %p855_p4 = scmp.lt.s32.totalorder %s17625_s19, 1  ;;  %p10941_p12 = scmp.ne.s32.totalorder %s17625_s19, 0 }
 0x121   : > { %v893_v0 = vld [vmem:[%s14008_s8] sm:$0xff] (!%p10941_p12)  ;;  %v894_v1 = vld [vmem:[%s14008_s8 + $0x8] sm:$0xff] (!%p10941_p12)  ;;  %v895_v2 = vld [vmem:[%s14008_s8 + $0x10] sm:$0xff] (!%p10941_p12) }
 0x122   : > { %s14045_s30 = scalar_select %p855_p4, %s17625_s19, 1 }
 0x123   : > { %892 = sbr.rel (%p10941_p12) target bundleno = 299 (0x12b), region = 112  ;;  %909 = vst [vmem:[%s14093_s10] sm:$0xff] (!%p10941_p12), %v893_v0  ;;  %910 = vst [vmem:[%s14093_s10 + $0x8] sm:$0xff] (!%p10941_p12), %v894_v1  ;;  %v896_v3 = vld [vmem:[%s14008_s8 + $0x18] sm:$0xff] (!%p10941_p12)  ;;  %v897_v4 = vld [vmem:[%s14008_s8 + $0x20] sm:$0xff] (!%p10941_p12) }
 0x124   : > { %s12452_s13 = smul.u32 3, %s14045_s30  ;;  %s873_s22 = scalar_lea.vmem %s17631_s7, %s14045_s30  ;;  %911 = vst [vmem:[%s14093_s10 + $0x10] sm:$0xff] (!%p10941_p12), %v895_v2  ;;  %v898_v5 = vld [vmem:[%s14008_s8 + $0x28] sm:$0xff] (!%p10941_p12)  ;;  %912 = vst [vmem:[%s14093_s10 + $0x18] sm:$0xff] (!%p10941_p12), %v896_v3  ;;  %v899_v6 = vld [vmem:[%s14008_s8 + $0x30] sm:$0xff] (!%p10941_p12) }
 0x125   : > { %s876_s6 = scalar_lea.vmem %s17632_s1, %s14045_s30  ;;  %s879_s17 = scalar_lea.vmem %s17633_s12, %s14045_s30  ;;  %913 = vst [vmem:[%s14093_s10 + $0x20] sm:$0xff] (!%p10941_p12), %v897_v4  ;;  %914 = vst [vmem:[%s14093_s10 + $0x28] sm:$0xff] (!%p10941_p12), %v898_v5  ;;  %v900_v7 = vld [vmem:[%s14008_s8 + $0x38] sm:$0xff] (!%p10941_p12)  ;;  %v901_v8 = vld [vmem:[%s14008_s8 + $0x40] sm:$0xff] (!%p10941_p12) }
 0x126   : > { %s14063_s25 = scalar_lea.vmem %s17629_s26, %s12452_s13  ;;  %s10940_s14 = sshll.u32 %s14045_s30, 2  ;;  %915 = vst [vmem:[%s14093_s10 + $0x30] sm:$0xff] (!%p10941_p12), %v899_v6  ;;  %916 = vst [vmem:[%s14093_s10 + $0x38] sm:$0xff] (!%p10941_p12), %v900_v7  ;;  %v902_v9 = vld [vmem:[%s14008_s8 + $0x48] sm:$0xff] (!%p10941_p12)  ;;  %v903_v10 = vld [vmem:[%s14008_s8 + $0x50] sm:$0xff] (!%p10941_p12) }
 0x127   : > { %s14085_s13 = scalar_lea.vmem %s17634_s29, %s10940_s14  ;;  %s886_s24 = scalar_lea.vmem %s17635_s21, %s14045_s30  ;;  %917 = vst [vmem:[%s14093_s10 + $0x40] sm:$0xff] (!%p10941_p12), %v901_v8  ;;  %v904_v11 = vld [vmem:[%s14008_s8 + $0x58] sm:$0xff] (!%p10941_p12)  ;;  %918 = vst [vmem:[%s14093_s10 + $0x48] sm:$0xff] (!%p10941_p12), %v902_v9  ;;  %v905_v12 = vld [vmem:[%s14008_s8 + $0x60] sm:$0xff] (!%p10941_p12) }
 0x128   : > { %919 = vst [vmem:[%s14093_s10 + $0x50] sm:$0xff] (!%p10941_p12), %v903_v10  ;;  %920 = vst [vmem:[%s14093_s10 + $0x58] sm:$0xff] (!%p10941_p12), %v904_v11  ;;  %v906_v13 = vld [vmem:[%s14008_s8 + $0x68] sm:$0xff] (!%p10941_p12)  ;;  %v907_v14 = vld [vmem:[%s14008_s8 + $0x70] sm:$0xff] (!%p10941_p12) }
 0x129   : > { %921 = vst [vmem:[%s14093_s10 + $0x60] sm:$0xff] (!%p10941_p12), %v905_v12  ;;  %922 = vst [vmem:[%s14093_s10 + $0x68] sm:$0xff] (!%p10941_p12), %v906_v13  ;;  %v908_v15 = vld [vmem:[%s14008_s8 + $0x78] sm:$0xff] (!%p10941_p12) }
 0x12a   : > { %923 = vst [vmem:[%s14093_s10 + $0x70] sm:$0xff] %v907_v14  ;;  %924 = vst [vmem:[%s14093_s10 + $0x78] sm:$0xff] %v908_v15 }
 0x12b PF: > { %v12716_v16 = vld [vmem:[%s14019_s5 + $0x4] ss:$12 sps:$4 sm:$0xff]   ;;  %v12718_v17 = vld [vmem:[%s14019_s5] ss:$12 sps:$4 sm:$0xff]   ;;  %v17483_v18 = vmov 0   ;;  %v17485_v1 = vmov 0.0   ;;  %v983_v2 = vlaneseq }
 0x12c   : > { %1158 = vmatprep.mubr.bf16.mxu0 %v17483_v18  ;;  %1126 = vmatprep.subr.bf16.mxu0 %v12716_v16  ;;  %v12719_v19 = vld [vmem:[%s14019_s5 + $0x1c] ss:$12 sps:$4 sm:$0xff]   ;;  %v12721_v20 = vld [vmem:[%s14019_s5 + $0x18] ss:$12 sps:$4 sm:$0xff]   ;;  %v12722_v21 = vld [vmem:[%s14019_s5 + $0x34] ss:$12 sps:$4 sm:$0xff]  }
 0x12d   : > { %1127 = vmatpush1.bf16.msra.mxu0 %v12718_v17  ;;  %v12724_v22 = vld [vmem:[%s14019_s5 + $0x30] ss:$12 sps:$4 sm:$0xff]   ;;  %v12725_v23 = vld [vmem:[%s14019_s5 + $0x4c] ss:$12 sps:$4 sm:$0xff]   ;;  %v925_v24 = vld [vmem:[%s14093_s10] sm:$0xff]  ;;  %vm13536_vm0 = vmmov 0  }
 0x12e   : > { %1128 = vmatprep.subr.bf16.mxu0 %v12719_v19  ;;  %v12727_v25 = vld [vmem:[%s14019_s5 + $0x48] ss:$12 sps:$4 sm:$0xff]   ;;  %v12728_v27 = vld [vmem:[%s14019_s5 + $0x64] ss:$12 sps:$4 sm:$0xff]   ;;  %v12730_v29 = vld [vmem:[%s14019_s5 + $0x60] ss:$12 sps:$4 sm:$0xff]  }
 0x12f   : > { %v926_v26 = vld [vmem:[%s14093_s10 + $0x8] sm:$0xff]  ;;  %v12733_v33 = vld [vmem:[%s14019_s5 + $0x78] ss:$12 sps:$4 sm:$0xff]   ;;  %v12734_v34 = vld [vmem:[%s14019_s5 + $0x94] ss:$12 sps:$4 sm:$0xff]   ;;  %v14182_v3 = vshrl.u32 %v983_v2, 7 }
 0x130   : > { %v941_v28 = vpack.c.bf16 %v926_v26, %v925_v24  ;;  %v12731_v30 = vld [vmem:[%s14019_s5 + $0x7c] ss:$12 sps:$4 sm:$0xff]   ;;  %v12741_v32 = vld [vmem:[%s14019_s5 + $0x20] ss:$12 sps:$4 sm:$0xff]   ;;  %v12742_v35 = vld [vmem:[%s14019_s5 + $0x38] ss:$12 sps:$4 sm:$0xff]  }
 0x131   : > { %1129 = vmatpush1.bf16.msra.mxu0 %v12721_v20  ;;  %v12740_v31 = vld [vmem:[%s14019_s5 + $0x8] ss:$12 sps:$4 sm:$0xff]   ;;  %v12736_v36 = vld [vmem:[%s14019_s5 + $0x90] ss:$12 sps:$4 sm:$0xff]   ;;  %v12737_v37 = vld [vmem:[%s14019_s5 + $0xac] ss:$12 sps:$4 sm:$0xff]  }
 0x132   : > { %1130 = vmatprep.subr.bf16.mxu0 %v12722_v21  ;;  %11617 = vmatprep.mubr.bf16.mxu1 %v941_v28  ;;  %v12743_v38 = vld [vmem:[%s14019_s5 + $0x50] ss:$12 sps:$4 sm:$0xff]   ;;  %v12739_v39 = vld [vmem:[%s14019_s5 + $0xa8] ss:$12 sps:$4 sm:$0xff]   ;;  %v12745_v41 = vld [vmem:[%s14019_s5 + $0x80] ss:$12 sps:$4 sm:$0xff]  }
 0x133   : > { %11601 = vmatprep.subr.bf16.mxu1 %v12740_v31  ;;  %v12744_v40 = vld [vmem:[%s14019_s5 + $0x68] ss:$12 sps:$4 sm:$0xff]   ;;  %v928_v43 = vld [vmem:[%s14093_s10 + $0x18] sm:$0xff]  ;;  %17637 = vst [vmem:[#allocation39_spill] sm:$0xff] %v14182_v3  ;;  %v17480_v4 = vsub.s32 1, %v14182_v3  ;;  %v17482_v7 = vsub.s32 0, %v14182_v3 }
 0x134   : > { %11602 = vmatpush3.bf16.msra.mxu1 %v12740_v31  ;;  %v927_v42 = vld [vmem:[%s14093_s10 + $0x10] sm:$0xff]  ;;  %v929_v47 = vld [vmem:[%s14093_s10 + $0x20] sm:$0xff]  ;;  %v930_v48 = vld [vmem:[%s14093_s10 + $0x28] sm:$0xff]  ;;  %vm1384_vm1 = vcmask 261120   ;;  %v17481_v21 = vsub.s32 2, %v14182_v3  ;;  %vm2333_vm2 = vcmask 1043456  }
 0x135   : > { %1131 = vmatpush1.bf16.msra.mxu0 %v12724_v22  ;;  %11603 = vmatprep.subr.bf16.mxu1 %v12741_v32  ;;  %v12746_v44 = vld [vmem:[%s14019_s5 + $0x98] ss:$12 sps:$4 sm:$0xff]   ;;  %v942_v45 = vpack.c.bf16 %v928_v43, %v927_v42  ;;  %v12747_v46 = vld [vmem:[%s14019_s5 + $0xb0] ss:$12 sps:$4 sm:$0xff]   ;;  %v943_v49 = vpack.c.bf16 %v930_v48, %v929_v47  ;;  %v981_v5 = vld [vmem:[%s14063_s25] sm:$0x7] }
 0x136   : > { %1132 = vmatprep.subr.bf16.mxu0 %v12725_v23  ;;  %v931_v50 = vld [vmem:[%s14093_s10 + $0x30] sm:$0xff]  ;;  %v932_v51 = vld [vmem:[%s14093_s10 + $0x38] sm:$0xff]  ;;  %v933_v52 = vld [vmem:[%s14093_s10 + $0x40] sm:$0xff]  ;;  %v14188_v6 = vrot.slane %v981_v5, %v17480_v4  ;;  %v14194_v13 = vrot.slane %v981_v5, %v17482_v7  ;;  %vm2137_vm3 = vcmask 64512   ;;  %s13537_s14 = smov 96   ;;  %s13538_s25 = smov 64  }
 0x137   : > { %v934_v53 = vld [vmem:[%s14093_s10 + $0x48] sm:$0xff]  ;;  %v944_v54 = vpack.c.bf16 %v932_v51, %v931_v50  ;;  %v935_v56 = vld [vmem:[%s14093_s10 + $0x50] sm:$0xff]  ;;  %v936_v57 = vld [vmem:[%s14093_s10 + $0x58] sm:$0xff]  ;;  %s13539_s8 = smov 32   ;;  %vm8651_vm4 = vcmask 523264   ;;  %vm8668_vm5 = vcmask 785408  }
 0x138   : > { %11604 = vmatpush3.bf16.msra.mxu1 %v12741_v32  ;;  %v945_v55 = vpack.c.bf16 %v934_v53, %v933_v52  ;;  %v937_v58 = vld [vmem:[%s14093_s10 + $0x60] sm:$0xff]  ;;  %v938_v59 = vld [vmem:[%s14093_s10 + $0x68] sm:$0xff]  ;;  %v946_v60 = vpack.c.bf16 %v936_v57, %v935_v56  ;;  %v939_v62 = vld [vmem:[%s14093_s10 + $0x70] sm:$0xff]  ;;  %s17809_s5 = scalar_lea.vmem [#allocation8], %s14016_s4  ;;  %s17810_s11 = sld [smem:[#allocation100_spill]] }
 0x139   : > { %1133 = vmatpush1.bf16.msra.mxu0 %v12727_v25  ;;  %11605 = vmatprep.subr.bf16.mxu1 %v12742_v35  ;;  %v947_v61 = vpack.c.bf16 %v938_v59, %v937_v58  ;;  %v940_v63 = vld [vmem:[%s14093_s10 + $0x78] sm:$0xff]  ;;  %s17812_s20 = sld [smem:[#allocation101_spill]]  ;;  %s17814_s27 = sld [smem:[#allocation99_spill]] }
 0x13a   : > { %1134 = vmatprep.subr.bf16.mxu0 %v12728_v27  ;;  %v948_v0 = vpack.c.bf16 %v940_v63, %v939_v62  ;;  %v14211_v27 = vrot.slane %v981_v5, %v17481_v21  ;;  %s17816_s23 = sld [smem:[#allocation102_spill]]  ;;  %s13540_s12 = smov [#allocation13]  }
 0x13b   : > { %s17828_s7 = sld [smem:[#allocation110_spill]] }
 0x13c   : > { %11606 = vmatpush3.bf16.msra.mxu1 %v12742_v35 }
 0x13d   : > { %1135 = vmatpush1.bf16.msra.mxu0 %v12730_v29  ;;  %11607 = vmatprep.subr.bf16.mxu1 %v12743_v38 }
 0x13e   : > { %1136 = vmatprep.subr.bf16.mxu0 %v12731_v30  ;;  %s17811_s19 = scalar_lea.vmem %s17810_s11, %s14045_s30  ;;  %s10630_s11 = sshll.u32 %s14093_s10, 4  ;;  %s17365_s11 = int_to_ptr.vmem [resolvable:$true] %s10630_s11 }
 0x13f   : > { %s17813_s1 = scalar_lea.vmem %s17812_s20, %s14045_s30  ;;  %s17815_s26 = scalar_lea.vmem %s17814_s27, %s14045_s30 }
 0x140   : > { %11608 = vmatpush3.bf16.msra.mxu1 %v12743_v38  ;;  %s17817_s28 = scalar_lea.vmem %s17816_s23, %s14045_s30  ;;  %s17826_s30 = sld [smem:[#allocation25_spill]] }
 0x141   : > { %1137 = vmatpush1.bf16.msra.mxu0 %v12733_v33  ;;  %11609 = vmatprep.subr.bf16.mxu1 %v12744_v40  ;;  %s13384_s3 = scalar_lea.vmem %s17365_s11, 2048  ;;  %s13388_s27 = sshll.u32 %s13540_s12, 4  ;;  %s13389_s27 = int_to_ptr.vmem [resolvable:$false] %s13388_s27 }
 0x142   : > { %1138 = vmatprep.subr.bf16.mxu0 %v12734_v34  ;;  %p13385_p3 = scmp.ne.s32.totalorder %s17365_s11, %s13384_s3  ;;  %p13391_p11 = scmp.lt.s32.totalorder %s17365_s11, %s13389_s27 }
 0x144   : > { %11610 = vmatpush3.bf16.msra.mxu1 %v12744_v40 }
 0x145   : > { %1139 = vmatpush1.bf16.msra.mxu0 %v12736_v36  ;;  %11611 = vmatprep.subr.bf16.mxu1 %v12745_v41 }
 0x146   : > { %1140 = vmatprep.subr.bf16.mxu0 %v12737_v37 }
 0x148   : > { %11612 = vmatpush3.bf16.msra.mxu1 %v12745_v41 }
 0x149   : > { %1141 = vmatpush1.bf16.msra.mxu0 %v12739_v39  ;;  %11613 = vmatprep.subr.bf16.mxu1 %v12746_v44 }
 0x14a   : > { %11657 = vmatprep.subr.bf16.mxu0 %v17485_v1 }
 0x14c   : > { %1159 = vmatmul.mubr.bf16.vlgmr.msra.gmra.mrb[0].mxu0 %v941_v28  ;;  %11614 = vmatpush3.bf16.msra.mxu1 %v12746_v44 }
 0x14d   : > { %1168 = vmatprep.mubr.bf16.mxu0 %v17483_v18  ;;  %11615 = vmatprep.subr.bf16.mxu1 %v12747_v46 }
 0x150   : > { %11616 = vmatpush3.bf16.msra.mxu1 %v12747_v46 }
 0x151   : > { %11633 = vmatprep.subr.bf16.mxu1 %v17485_v1 }
 0x153   : > { %11618 = vmatmul.mubr.bf16.vlgmr.msra.gmra.mrb[0].mxu1 %v942_v45 }
 0x154   : > { %1169 = vmatmul.mubr.bf16.gmra.mrb[4].mxu0 %v942_v45  ;;  %11621 = vmatprep.mubr.bf16.mxu1 %v943_v49 }
 0x155   : > { %1178 = vmatprep.mubr.bf16.mxu0 %v17483_v18 }
 0x15b   : > { %11622 = vmatmul.mubr.bf16.gmra.mrb[4].mxu1 %v944_v54 }
 0x15c   : > { %1179 = vmatmul.mubr.bf16.gmra.mrb[8].mxu0 %v943_v49  ;;  %11625 = vmatprep.mubr.bf16.mxu1 %v945_v55 }
 0x15d   : > { %1188 = vmatprep.mubr.bf16.mxu0 %v17483_v18 }
 0x163   : > { %11626 = vmatmul.mubr.bf16.gmra.mrb[8].mxu1 %v946_v60 }
 0x164   : > { %1189 = vmatmul.mubr.bf16.gmra.mrb[12].mxu0 %v944_v54  ;;  %11629 = vmatprep.mubr.bf16.mxu1 %v947_v61 }
 0x165   : > { %1198 = vmatprep.mubr.bf16.mxu0 %v17483_v18 }
 0x16b   : > { %11630 = vmatmul.mubr.bf16.gmra.mrb[12].mxu1 %v948_v0 }
 0x16c   : > { %1199 = vmatmul.mubr.bf16.gmra.mrb[16].mxu0 %v945_v55  ;;  %11635 = vmatprep.mubr.msk.bf16.mxu1 %vm13536_vm0, %v17485_v1 }
 0x16d   : > { %1208 = vmatprep.mubr.bf16.mxu0 %v17483_v18 }
 0x174   : > { %1209 = vmatmul.mubr.bf16.gmra.mrb[20].mxu0 %v946_v60 }
 0x175   : > { %1218 = vmatprep.mubr.bf16.mxu0 %v17483_v18 }
 0x17c   : > { %1219 = vmatmul.mubr.bf16.gmra.mrb[24].mxu0 %v947_v61 }
 0x17d   : > { %1228 = vmatprep.mubr.bf16.mxu0 %v17483_v18 }
 0x184   : > { %1229 = vmatmul.mubr.bf16.gmra.mrb[28].mxu0 %v948_v0 }
 0x185   : > { %11659 = vmatprep.mubr.msk.bf16.mxu0 %vm13536_vm0, %v17485_v1 }
 0x21f   : > { %v1160_v8 = vpop.f32.mrb[0].mxu0 }
 0x220   : > { %v1162_v9 = vpop.f32.mrb[1].mxu0  ;;  %v1161_v17 = vadd.f32 %v1160_v8, %v14194_v13 }
 0x221   : > { %v1163_v10 = vadd.f32 %v1162_v9, %v14188_v6  ;;  %v1164_v11 = vpop.f32.mrb[2].mxu0 }
 0x222   : > { %v1166_v12 = vpop.f32.mrb[3].mxu0  ;;  %v14206_v25 = vpack.c.bf16 %v1161_v17, %v1161_v17  ;;  %v1165_v29 = vadd.f32 %v1164_v11, %v14194_v13 }
 0x223   : > { %v14196_v14 = vpack.c.bf16 %v1163_v10, %v1163_v10  ;;  %v1167_v15 = vadd.f32 %v1166_v12, %v14188_v6 }
 0x224   : > { %v14236_v42 = vpack.c.bf16 %v1165_v29, %v1165_v29 }
 0x225   : > { %v1389_v16 = vsel %vm1384_vm1, %v14196_v14, 0  ;;  %v14204_v22 = vpack.c.bf16 %v1167_v15, %v1167_v15 }
 0x226   : > { %11634 = vmatpush3.bf16.xpose.msra.mxu1 %v1389_v16  ;;  %v11619_v32 = vpop.f32.mrb[0].mxu1 }
 0x227   : > { %v1170_v19 = vpop.f32.mrb[4].mxu0  ;;  %11639 = vmatprep.subr.bf16.mxu1 %v17485_v1  ;;  %v1435_v28 = vsel %vm1384_vm1, %v14204_v22, 0  ;;  %v14224_v34 = vadd.f32 %v11619_v32, %v14211_v27  ;;  %v14226_v35 = vpop.f32.mrb[1].mxu1 }
 0x228   : > { %v1172_v20 = vpop.f32.mrb[5].mxu0  ;;  %v11620_v38 = vpop.f32.mrb[2].mxu1  ;;  %v1171_v48 = vadd.f32 %v1170_v19, %v14194_v13  ;;  %v1274_v4 = vadd.f32 %v14226_v35, %v14211_v27 }
 0x229   : > { %v1174_v23 = vpop.f32.mrb[6].mxu0  ;;  %v1173_v26 = vadd.f32 %v1172_v20, %v14188_v6  ;;  %v14232_v40 = vadd.f32 %v11620_v38, %v14211_v27  ;;  %v14234_v41 = vpop.f32.mrb[3].mxu1 }
 0x22a   : > { %v1176_v24 = vpop.f32.mrb[7].mxu0  ;;  %v14269_v63 = vpack.c.bf16 %v1171_v48, %v1171_v48  ;;  %v1175_v11 = vadd.f32 %v1174_v23, %v14194_v13 }
 0x22b   : > { %v14220_v30 = vpack.c.bf16 %v1173_v26, %v1173_v26  ;;  %v1177_v45 = vadd.f32 %v1176_v24, %v14188_v6 }
 0x22d   : > { %11636 = vmatmul.mubr.msk.bf16.vlgmr.msra.gmra.mrb[16].mxu1 %vm1384_vm1, %v14206_v25  ;;  %v1481_v44 = vsel %vm1384_vm1, %v14220_v30, 0  ;;  %v14256_v54 = vpack.c.bf16 %v1177_v45, %v1177_v45 }
 0x22e   : > { %11640 = vmatpush3.bf16.xpose.msra.mxu1 %v1435_v28  ;;  %11641 = vmatprep.mubr.msk.bf16.mxu1 %vm13536_vm0, %v17485_v1  ;;  %v11623_v50 = vpop.f32.mrb[4].mxu1 }
 0x22f   : > { %v1180_v31 = vpop.f32.mrb[8].mxu0  ;;  %11645 = vmatprep.subr.bf16.mxu1 %v17485_v1  ;;  %v14254_v52 = vadd.f32 %v11623_v50, %v14211_v27  ;;  %v1289_v53 = vpop.f32.mrb[5].mxu1  ;;  %v1527_v9 = vsel %vm1384_vm1, %v14256_v54, 0 }
 0x230   : > { %v1182_v33 = vpop.f32.mrb[9].mxu0  ;;  %v1181_v46 = vadd.f32 %v1180_v31, %v14194_v13  ;;  %v14264_v58 = vadd.f32 %v1289_v53, %v14211_v27  ;;  %v11624_v59 = vpop.f32.mrb[6].mxu1 }
 0x231   : > { %v1183_v36 = vadd.f32 %v1182_v33, %v14188_v6  ;;  %v14229_v37 = vpop.f32.mrb[10].mxu0  ;;  %v14267_v61 = vadd.f32 %v11624_v59, %v14211_v27  ;;  %v1292_v62 = vpop.f32.mrb[7].mxu1 }
 0x232   : > { %v1186_v39 = vpop.f32.mrb[11].mxu0  ;;  %v14258_v55 = vpack.c.bf16 %v1181_v46, %v1181_v46  ;;  %v14274_v2 = vadd.f32 %v1292_v62, %v14211_v27  ;;  %v1185_v48 = vadd.f32 %v14229_v37, %v14194_v13 }
 0x233   : > { %v14238_v43 = vpack.c.bf16 %v1183_v36, %v1183_v36  ;;  %v1187_v5 = vadd.f32 %v1186_v39, %v14188_v6  ;;  %v14309_v36 = vpack.c.bf16 %v1175_v11, %v1175_v11 }
 0x235   : > { %11642 = vmatmul.mubr.msk.bf16.vlgmr.msra.gmra.mrb[20].mxu1 %vm1384_vm1, %v14236_v42  ;;  %v1573_v47 = vsel %vm1384_vm1, %v14238_v43, 0  ;;  %v14296_v20 = vpack.c.bf16 %v1187_v5, %v1187_v5 }
 0x236   : > { %11646 = vmatpush3.bf16.xpose.msra.mxu1 %v1481_v44  ;;  %11658 = vmatpush3.bf16.xpose.msra.mxu0 %v1573_v47  ;;  %v11627_v15 = vpop.f32.mrb[8].mxu1 }
 0x237   : > { %v1190_v49 = vpop.f32.mrb[12].mxu0  ;;  %11647 = vmatprep.mubr.msk.bf16.mxu1 %vm13536_vm0, %v17485_v1  ;;  %11651 = vmatprep.subr.bf16.mxu1 %v17485_v1  ;;  %v14294_v17 = vadd.f32 %v11627_v15, %v14211_v27  ;;  %v1305_v19 = vpop.f32.mrb[9].mxu1  ;;  %v1619_v46 = vsel %vm1384_vm1, %v14296_v20, 0 }
 0x238   : > { %v1192_v51 = vpop.f32.mrb[13].mxu0  ;;  %11669 = vmatprep.subr.bf16.mxu0 %v17485_v1  ;;  %v1191_v8 = vadd.f32 %v1190_v49, %v14194_v13  ;;  %v14304_v28 = vadd.f32 %v1305_v19, %v14211_v27  ;;  %v11628_v29 = vpop.f32.mrb[10].mxu1 }
 0x239   : > { %v1193_v56 = vadd.f32 %v1192_v51, %v14188_v6  ;;  %v14261_v57 = vpop.f32.mrb[14].mxu0  ;;  %v14307_v32 = vadd.f32 %v11628_v29, %v14211_v27  ;;  %v1308_v33 = vpop.f32.mrb[11].mxu1 }
 0x23a   : > { %v1196_v60 = vpop.f32.mrb[15].mxu0  ;;  %v14298_v23 = vpack.c.bf16 %v1191_v8, %v1191_v8  ;;  %v14314_v39 = vadd.f32 %v1308_v33, %v14211_v27 }
 0x23b   : > { %v14271_v0 = vpack.c.bf16 %v1193_v56, %v1193_v56  ;;  %v1197_v44 = vadd.f32 %v1196_v60, %v14188_v6 }
 0x23d   : > { %11648 = vmatmul.mubr.msk.bf16.vlgmr.msra.gmra.mrb[24].mxu1 %vm1384_vm1, %v14269_v63  ;;  %11660 = vmatmul.mubr.msk.bf16.vlgmr.msra.gmra.mrb[32].mxu0 %vm1384_vm1, %v14258_v55  ;;  %v1665_v10 = vsel %vm1384_vm1, %v14271_v0, 0  ;;  %v14337_v59 = vpack.c.bf16 %v1197_v44, %v1197_v44  ;;  %v1195_v44 = vadd.f32 %v14261_v57, %v14194_v13 }
 0x23e   : > { %11652 = vmatpush3.bf16.xpose.msra.mxu1 %v1527_v9  ;;  %11670 = vmatpush3.bf16.xpose.msra.mxu0 %v1665_v10  ;;  %v11631_v50 = vpop.f32.mrb[12].mxu1 }
 0x23f   : > { %v1200_v12 = vpop.f32.mrb[16].mxu0  ;;  %11653 = vmatprep.mubr.msk.bf16.mxu1 %vm13536_vm0, %v17485_v1  ;;  %11671 = vmatprep.mubr.msk.bf16.mxu0 %vm13536_vm0, %v17485_v1  ;;  %v14335_v53 = vadd.f32 %v11631_v50, %v14211_v27  ;;  %v1321_v56 = vpop.f32.mrb[13].mxu1  ;;  %v1711_v29 = vsel %vm1384_vm1, %v14337_v59, 0 }
 0x240   : > { %v1202_v16 = vpop.f32.mrb[17].mxu0  ;;  %11663 = vmatprep.subr.bf16.mxu1 %v17485_v1  ;;  %11681 = vmatprep.subr.bf16.mxu0 %v17485_v1  ;;  %v1201_v45 = vadd.f32 %v1200_v12, %v14194_v13  ;;  %v14345_v5 = vadd.f32 %v1321_v56, %v14211_v27  ;;  %v11632_v8 = vpop.f32.mrb[14].mxu1  ;;  %v14350_v12 = vpack.c.bf16 %v1185_v48, %v1185_v48 }
 0x241   : > { %v1203_v24 = vadd.f32 %v1202_v16, %v14188_v6  ;;  %v14301_v26 = vpop.f32.mrb[18].mxu0  ;;  %17638 = vst [vmem:[#allocation40_spill] sm:$0xff] %v14335_v53  ;;  %v14348_v10 = vadd.f32 %v11632_v8, %v14211_v27  ;;  %v1324_v11 = vpop.f32.mrb[15].mxu1 }
 0x242   : > { %v1206_v31 = vpop.f32.mrb[19].mxu0  ;;  %v14339_v37 = vpack.c.bf16 %v1201_v45, %v1201_v45  ;;  %v14355_v16 = vadd.f32 %v1324_v11, %v14211_v27 }
 0x243   : > { %v14311_v38 = vpack.c.bf16 %v1203_v24, %v1203_v24  ;;  %17639 = vst [vmem:[#allocation41_spill] sm:$0xff] %v14348_v10  ;;  %v1207_v19 = vadd.f32 %v1206_v31, %v14188_v6 }
 0x244   : > { %17640 = vst [vmem:[#allocation42_spill] sm:$0xff] %v14355_v16 }
 0x245   : > { %11654 = vmatmul.mubr.msk.bf16.vlgmr.msra.gmra.mrb[28].mxu1 %vm1384_vm1, %v14309_v36  ;;  %11672 = vmatmul.mubr.msk.bf16.vlgmr.msra.gmra.mrb[36].mxu0 %vm1384_vm1, %v14298_v23  ;;  %v1757_v47 = vsel %vm1384_vm1, %v14311_v38, 0 }
 0x246   : > { %11664 = vmatpush3.bf16.xpose.msra.mxu1 %v1619_v46  ;;  %11682 = vmatpush3.bf16.xpose.msra.mxu0 %v1757_v47  ;;  %v14375_v46 = vpack.c.bf16 %v1207_v19, %v1207_v19 }
 0x247   : > { %v1210_v49 = vpop.f32.mrb[20].mxu0  ;;  %11665 = vmatprep.mubr.msk.bf16.mxu1 %vm13536_vm0, %v17485_v1  ;;  %11683 = vmatprep.mubr.msk.bf16.mxu0 %vm13536_vm0, %v17485_v1 }
 0x248   : > { %v1212_v51 = vpop.f32.mrb[21].mxu0  ;;  %11675 = vmatprep.subr.bf16.mxu1 %v17485_v1  ;;  %11693 = vmatprep.subr.bf16.mxu0 %v17485_v1  ;;  %v1211_v24 = vadd.f32 %v1210_v49, %v14194_v13  ;;  %17641 = vst [vmem:[#allocation43_spill] sm:$0xff] %v14375_v46  ;;  %v1803_v19 = vsel %vm1384_vm1, %v14375_v46, 0 }
 0x249   : > { %v1213_v60 = vadd.f32 %v1212_v51, %v14188_v6  ;;  %v14342_v62 = vpop.f32.mrb[22].mxu0  ;;  %v14381_v51 = vpack.c.bf16 %v1195_v44, %v1195_v44 }
 0x24a   : > { %v1216_v9 = vpop.f32.mrb[23].mxu0  ;;  %v14377_v47 = vpack.c.bf16 %v1211_v24, %v1211_v24 }
 0x24b   : > { %v14352_v15 = vpack.c.bf16 %v1213_v60, %v1213_v60  ;;  %v1217_v8 = vadd.f32 %v1216_v9, %v14188_v6 }
 0x24d   : > { %11666 = vmatmul.mubr.msk.bf16.vlgmr.msra.gmra.mrb[32].mxu1 %vm1384_vm1, %v14350_v12  ;;  %11684 = vmatmul.mubr.msk.bf16.vlgmr.msra.gmra.mrb[40].mxu0 %vm1384_vm1, %v14339_v37  ;;  %v1849_v33 = vsel %vm1384_vm1, %v14352_v15, 0  ;;  %v14404_v44 = vpack.c.bf16 %v1217_v8, %v1217_v8 }
 0x24e   : > { %11676 = vmatpush3.bf16.xpose.msra.mxu1 %v1711_v29  ;;  %11694 = vmatpush3.bf16.xpose.msra.mxu0 %v1849_v33  ;;  %v1205_v29 = vadd.f32 %v14301_v26, %v14194_v13 }
 0x24f   : > { %v1220_v31 = vpop.f32.mrb[24].mxu0  ;;  %11677 = vmatprep.mubr.msk.bf16.mxu1 %vm13536_vm0, %v17485_v1  ;;  %11695 = vmatprep.mubr.msk.bf16.mxu0 %vm13536_vm0, %v17485_v1  ;;  %17643 = vst [vmem:[#allocation45_spill] sm:$0xff] %v14404_v44 }
 0x250   : > { %v1222_v45 = vpop.f32.mrb[25].mxu0  ;;  %11687 = vmatprep.subr.bf16.mxu1 %v17485_v1  ;;  %11705 = vmatprep.subr.bf16.mxu0 %v17485_v1  ;;  %v1221_v11 = vadd.f32 %v1220_v31, %v14194_v13 }
 0x251   : > { %v1223_v48 = vadd.f32 %v1222_v45, %v14188_v6  ;;  %v1224_v49 = vpop.f32.mrb[26].mxu0 }
 0x252   : > { %v1225_v57 = vadd.f32 %v1224_v49, %v14194_v13  ;;  %v1226_v50 = vpop.f32.mrb[27].mxu0  ;;  %v14406_v31 = vpack.c.bf16 %v1221_v11, %v1221_v11  ;;  %v1895_v11 = vsel %vm1384_vm1, %v14404_v44, 0 }
 0x253   : > { %v14383_v56 = vpack.c.bf16 %v1223_v48, %v1223_v48  ;;  %v1227_v60 = vadd.f32 %v1226_v50, %v14188_v6  ;;  %v14410_v50 = vpack.c.bf16 %v1205_v29, %v1205_v29 }
 0x254   : > { %17644 = vst [vmem:[#allocation46_spill] sm:$0xff] %v14406_v31 }
 0x255   : > { %17642 = vst [vmem:[#allocation44_spill] sm:$0xff] %v14383_v56  ;;  %11678 = vmatmul.mubr.msk.bf16.vlgmr.msra.gmra.mrb[36].mxu1 %vm1384_vm1, %v14381_v51  ;;  %11696 = vmatmul.mubr.msk.bf16.vlgmr.msra.gmra.mrb[44].mxu0 %vm1384_vm1, %v14377_v47  ;;  %v1941_v24 = vsel %vm1384_vm1, %v14383_v56, 0  ;;  %17645 = vst [vmem:[#allocation47_spill] sm:$0xff] %v14410_v50  ;;  %v14428_v35 = vpack.c.bf16 %v1227_v60, %v1227_v60  ;;  %v14458_v60 = vpack.c.bf16 %v1225_v57, %v1225_v57 }
 0x256   : > { %11688 = vmatpush3.bf16.xpose.msra.mxu1 %v1803_v19  ;;  %11706 = vmatpush3.bf16.xpose.msra.mxu0 %v1941_v24 }
 0x257   : > { %v1230_v9 = vpop.f32.mrb[28].mxu0  ;;  %11689 = vmatprep.mubr.msk.bf16.mxu1 %vm13536_vm0, %v17485_v1  ;;  %11707 = vmatprep.mubr.msk.bf16.mxu0 %vm13536_vm0, %v17485_v1  ;;  %17647 = vst [vmem:[#allocation49_spill] sm:$0xff] %v14428_v35  ;;  %17652 = vst [vmem:[#allocation54_spill] sm:$0xff] %v14458_v60 }
 0x258   : > { %v1232_v33 = vpop.f32.mrb[29].mxu0  ;;  %11699 = vmatprep.subr.bf16.mxu1 %v17485_v1  ;;  %11717 = vmatprep.subr.bf16.mxu0 %v17485_v1  ;;  %v1231_v8 = vadd.f32 %v1230_v9, %v14194_v13  ;;  %v14435_v9 = vpack.c.bf16 %v1274_v4, %v1274_v4 }
 0x259   : > { %v1233_v45 = vadd.f32 %v1232_v33, %v14188_v6  ;;  %v1234_v48 = vpop.f32.mrb[30].mxu0 }
 0x25a   : > { %v1235_v26 = vadd.f32 %v1234_v48, %v14194_v13  ;;  %v1236_v49 = vpop.f32.mrb[31].mxu0  ;;  %17648 = vst [vmem:[#allocation50_spill] sm:$0xff] %v14435_v9  ;;  %v14438_v33 = vpack.c.bf16 %v1231_v8, %v1231_v8 }
 0x25b   : > { %v14412_v19 = vpack.c.bf16 %v1233_v45, %v1233_v45  ;;  %v1237_v24 = vadd.f32 %v1236_v49, %v14188_v6  ;;  %v1215_v6 = vadd.f32 %v14342_v62, %v14194_v13  ;;  %v1987_v13 = vsel %vm1384_vm1, %v14428_v35, 0 }
 0x25c   : > { %17649 = vst [vmem:[#allocation51_spill] sm:$0xff] %v14438_v33  ;;  %v2335_v62 = vsel %vm2333_vm2, %v14435_v9, 0  ;;  %v1277_v49 = vadd.f32 %v14234_v41, %v14211_v27  ;;  %v14471_v8 = vpack.c.bf16 %v1235_v26, %v1235_v26 }
 0x25d   : > { %17646 = vst [vmem:[#allocation48_spill] sm:$0xff] %v14412_v19  ;;  %11690 = vmatmul.mubr.msk.bf16.vlgmr.msra.gmra.mrb[40].mxu1 %vm1384_vm1, %v14410_v50  ;;  %11708 = vmatmul.mubr.msk.bf16.vlgmr.msra.gmra.mrb[48].mxu0 %vm1384_vm1, %v14406_v31  ;;  %v2033_v29 = vsel %vm1384_vm1, %v14412_v19, 0  ;;  %v14440_v45 = vpack.c.bf16 %v1215_v6, %v1215_v6  ;;  %v14452_v4 = vpack.c.bf16 %v1237_v24, %v1237_v24 }
 0x25e   : > { %11700 = vmatpush3.bf16.xpose.msra.mxu1 %v1895_v11  ;;  %11718 = vmatpush3.bf16.xpose.msra.mxu0 %v2033_v29  ;;  %v14468_v24 = vpack.c.bf16 %v1277_v49, %v1277_v49  ;;  %17654 = vst [vmem:[#allocation56_spill] sm:$0xff] %v14471_v8 }
 0x25f   : > { %11701 = vmatprep.mubr.msk.bf16.mxu1 %vm13536_vm0, %v17485_v1  ;;  %11719 = vmatprep.mubr.msk.bf16.mxu0 %vm13536_vm0, %v17485_v1  ;;  %17650 = vst [vmem:[#allocation52_spill] sm:$0xff] %v14440_v45  ;;  %17651 = vst [vmem:[#allocation53_spill] sm:$0xff] %v14452_v4  ;;  %v2079_v48 = vsel %vm1384_vm1, %v14452_v4, 0 }
 0x260   : > { %11711 = vmatprep.subr.bf16.mxu1 %v17485_v1  ;;  %11729 = vmatprep.subr.bf16.mxu0 %v17485_v1  ;;  %17653 = vst [vmem:[#allocation55_spill] sm:$0xff] %v14468_v24  ;;  %v2381_v57 = vsel %vm2333_vm2, %v14468_v24, 0 }
 0x265   : > { %11702 = vmatmul.mubr.msk.bf16.vlgmr.msra.gmra.mrb[44].mxu1 %vm1384_vm1, %v14440_v45  ;;  %11720 = vmatmul.mubr.msk.bf16.vlgmr.msra.gmra.mrb[52].mxu0 %vm1384_vm1, %v14438_v33 }
 0x266   : > { %11712 = vmatpush3.bf16.xpose.msra.mxu1 %v1987_v13  ;;  %11713 = vmatprep.mubr.msk.bf16.mxu1 %vm13536_vm0, %v17485_v1 }
 0x267   : > { %11723 = vmatprep.subr.bf16.mxu1 %v17485_v1  ;;  %11730 = vmatpush3.bf16.msra.mxu0 %v2335_v62 }
 0x268   : > { %11731 = vmatprep.mubr.msk.bf16.mxu0 %vm13536_vm0, %v17485_v1  ;;  %11741 = vmatprep.subr.bf16.mxu0 %v17485_v1 }
 0x26d   : > { %11714 = vmatmul.mubr.msk.bf16.vlgmr.msra.gmra.mrb[48].mxu1 %vm1384_vm1, %v14458_v60 }
 0x26e   : > { %11724 = vmatpush3.bf16.xpose.msra.mxu1 %v2079_v48  ;;  %11725 = vmatprep.mubr.msk.bf16.mxu1 %vm13536_vm0, %v17485_v1 }
 0x26f   : > { %11735 = vmatprep.subr.bf16.mxu1 %v17485_v1 }
 0x275   : > { %11726 = vmatmul.mubr.msk.bf16.vlgmr.msra.gmra.mrb[52].mxu1 %vm1384_vm1, %v14471_v8 }
 0x276   : > { %11736 = vmatpush3.bf16.msra.mxu1 %v2381_v57  ;;  %11737 = vmatprep.mubr.msk.bf16.mxu1 %vm13536_vm0, %v17485_v1 }
 0x277   : > { %11747 = vmatprep.subr.bf16.mxu1 %v17485_v1 }
 0x300   : > { %v1425_v27 = vpop.f32.mrb[16].mxu1 }
 0x301   : > { %v11637_v41 = vpop.f32.mrb[17].mxu1  ;;  %v14480_v11 = vmul.f32 0.17677669, %v1425_v27 }
 0x302   : > { %v1428_v29 = vpop.f32.mrb[18].mxu1 }
 0x303   : > { %v11638_v26 = vpop.f32.mrb[19].mxu1  ;;  %v2138_v6 = vsel %vm2137_vm3, %v14480_v11, -inf }
 0x304   : > { %2139 = vmax.xlane.f32.xlu0 %v2138_v6 }
 0x308   : > { %v1471_v13 = vpop.f32.mrb[20].mxu1 }
 0x309   : > { %v11643_v62 = vpop.f32.mrb[21].mxu1  ;;  %v14484_v48 = vmul.f32 0.17677669, %v1471_v13 }
 0x30a   : > { %v1474_v49 = vpop.f32.mrb[22].mxu1 }
 0x30b   : > { %v11644_v57 = vpop.f32.mrb[23].mxu1  ;;  %v2141_v21 = vsel %vm2137_vm3, %v14484_v48, -inf }
 0x30c   : > { %2142 = vmax.xlane.f32.xlu0 %v2141_v21 }
 0x310   : > { %v1517_v7 = vpop.f32.mrb[24].mxu1  ;;  %v1609_v41 = vpop.f32.mrb[32].mxu0 }
 0x311   : > { %v14488_v27 = vmul.f32 0.17677669, %v1609_v41  ;;  %v14490_v29 = vmul.f32 0.17677669, %v1517_v7  ;;  %v11649_v26 = vpop.f32.mrb[25].mxu1  ;;  %v11661_v18 = vpop.f32.mrb[33].mxu0 }
 0x312   : > { %v1520_v1 = vpop.f32.mrb[26].mxu1  ;;  %v1612_v6 = vpop.f32.mrb[34].mxu0 }
 0x313   : > { %v2150_v13 = vsel %vm2137_vm3, %v14488_v27, -inf  ;;  %v2144_v62 = vsel %vm2137_vm3, %v14490_v29, -inf  ;;  %v11650_v49 = vpop.f32.mrb[27].mxu1  ;;  %v11662_v57 = vpop.f32.mrb[35].mxu0 }
 0x314   : > { %2151 = vmax.xlane.f32.xlu0 %v2150_v13  ;;  %2145 = vmax.xlane.f32.xlu1 %v2144_v62 }
 0x318   : > { %v1563_v21 = vpop.f32.mrb[28].mxu1  ;;  %v1701_v3 = vpop.f32.mrb[36].mxu0 }
 0x319   : > { %v14496_v41 = vmul.f32 0.17677669, %v1701_v3  ;;  %v14498_v7 = vmul.f32 0.17677669, %v1563_v21  ;;  %v11655_v26 = vpop.f32.mrb[29].mxu1  ;;  %v11673_v18 = vpop.f32.mrb[37].mxu0 }
 0x31a   : > { %v1566_v1 = vpop.f32.mrb[30].mxu1  ;;  %v1704_v6 = vpop.f32.mrb[38].mxu0 }
 0x31b   : > { %v2156_v10 = vsel %vm2137_vm3, %v14496_v41, -inf  ;;  %v2147_v24 = vsel %vm2137_vm3, %v14498_v7, -inf  ;;  %v11656_v49 = vpop.f32.mrb[31].mxu1  ;;  %v11674_v57 = vpop.f32.mrb[39].mxu0 }
 0x31c   : > { %2157 = vmax.xlane.f32.xlu0 %v2156_v10  ;;  %2148 = vmax.xlane.f32.xlu1 %v2147_v24 }
 0x320   : > { %v1655_v13 = vpop.f32.mrb[32].mxu1  ;;  %v1793_v62 = vpop.f32.mrb[40].mxu0 }
 0x321   : > { %v14504_v3 = vmul.f32 0.17677669, %v1793_v62  ;;  %v14506_v21 = vmul.f32 0.17677669, %v1655_v13  ;;  %v11667_v26 = vpop.f32.mrb[33].mxu1  ;;  %v11685_v18 = vpop.f32.mrb[41].mxu0 }
 0x322   : > { %v1658_v1 = vpop.f32.mrb[34].mxu1  ;;  %v1796_v6 = vpop.f32.mrb[42].mxu0 }
 0x323   : > { %v2162_v8 = vsel %vm2137_vm3, %v14504_v3, -inf  ;;  %v2153_v4 = vsel %vm2137_vm3, %v14506_v21, -inf  ;;  %v11668_v49 = vpop.f32.mrb[35].mxu1  ;;  %v11686_v57 = vpop.f32.mrb[43].mxu0 }
 0x324   : > { %2163 = vmax.xlane.f32.xlu0 %v2162_v8  ;;  %2154 = vmax.xlane.f32.xlu1 %v2153_v4 }
 0x328   : > { %v1747_v10 = vpop.f32.mrb[36].mxu1  ;;  %v1885_v24 = vpop.f32.mrb[44].mxu0 }
 0x329   : > { %v14512_v62 = vmul.f32 0.17677669, %v1885_v24  ;;  %v14514_v13 = vmul.f32 0.17677669, %v1747_v10  ;;  %v11679_v26 = vpop.f32.mrb[37].mxu1  ;;  %v11697_v18 = vpop.f32.mrb[45].mxu0 }
 0x32a   : > { %v1750_v1 = vpop.f32.mrb[38].mxu1  ;;  %v1888_v6 = vpop.f32.mrb[46].mxu0 }
 0x32b   : > { %v2168_v60 = vsel %vm2137_vm3, %v14512_v62, -inf  ;;  %v2159_v35 = vsel %vm2137_vm3, %v14514_v13, -inf  ;;  %v11680_v49 = vpop.f32.mrb[39].mxu1  ;;  %v11698_v57 = vpop.f32.mrb[47].mxu0 }
 0x32c   : > { %2169 = vmax.xlane.f32.xlu0 %v2168_v60  ;;  %2160 = vmax.xlane.f32.xlu1 %v2159_v35 }
 0x330   : > { %v1839_v4 = vpop.f32.mrb[40].mxu1  ;;  %v1977_v8 = vpop.f32.mrb[48].mxu0 }
 0x331   : > { %v14520_v24 = vmul.f32 0.17677669, %v1977_v8  ;;  %v14522_v10 = vmul.f32 0.17677669, %v1839_v4  ;;  %v11691_v26 = vpop.f32.mrb[41].mxu1  ;;  %v11709_v18 = vpop.f32.mrb[49].mxu0 }
 0x332   : > { %v1842_v1 = vpop.f32.mrb[42].mxu1  ;;  %v1980_v6 = vpop.f32.mrb[50].mxu0 }
 0x333   : > { %v2174_v45 = vsel %vm2137_vm3, %v14520_v24, -inf  ;;  %v2165_v44 = vsel %vm2137_vm3, %v14522_v10, -inf  ;;  %v11692_v49 = vpop.f32.mrb[43].mxu1  ;;  %v11710_v57 = vpop.f32.mrb[51].mxu0 }
 0x334   : > { %2175 = vmax.xlane.f32.xlu0 %v2174_v45  ;;  %2166 = vmax.xlane.f32.xlu1 %v2165_v44 }
 0x338   : > { %v1931_v35 = vpop.f32.mrb[44].mxu1  ;;  %v2069_v60 = vpop.f32.mrb[52].mxu0 }
 0x339   : > { %v14528_v8 = vmul.f32 0.17677669, %v2069_v60  ;;  %v14530_v4 = vmul.f32 0.17677669, %v1931_v35  ;;  %v11703_v26 = vpop.f32.mrb[45].mxu1  ;;  %v11721_v18 = vpop.f32.mrb[53].mxu0 }
 0x33a   : > { %v1934_v1 = vpop.f32.mrb[46].mxu1  ;;  %v2072_v6 = vpop.f32.mrb[54].mxu0 }
 0x33b   : > { %v2180_v50 = vsel %vm2137_vm3, %v14528_v8, -inf  ;;  %v2171_v16 = vsel %vm2137_vm3, %v14530_v4, -inf  ;;  %v11704_v49 = vpop.f32.mrb[47].mxu1  ;;  %v11722_v57 = vpop.f32.mrb[55].mxu0 }
 0x33c   : > { %2181 = vmax.xlane.f32.xlu0 %v2180_v50  ;;  %2172 = vmax.xlane.f32.xlu1 %v2171_v16 }
 0x340   : > { %v2023_v44 = vpop.f32.mrb[48].mxu1 }
 0x341   : > { %v14536_v45 = vmul.f32 0.17677669, %v2023_v44  ;;  %v11715_v60 = vpop.f32.mrb[49].mxu1 }
 0x342   : > { %v2026_v35 = vpop.f32.mrb[50].mxu1 }
 0x343   : > { %v2177_v26 = vsel %vm2137_vm3, %v14536_v45, -inf  ;;  %v11716_v18 = vpop.f32.mrb[51].mxu1 }
 0x344   : > { %2178 = vmax.xlane.f32.xlu1 %v2177_v26 }
 0x348   : > { %v2115_v1 = vpop.f32.mrb[52].mxu1 }
 0x349   : > { %v14540_v6 = vmul.f32 0.17677669, %v2115_v1  ;;  %v11727_v53 = vpop.f32.mrb[53].mxu1 }
 0x34a   : > { %v2118_v46 = vpop.f32.mrb[54].mxu1 }
 0x34b   : > { %v2183_v49 = vsel %vm2137_vm3, %v14540_v6, -inf  ;;  %v11728_v50 = vpop.f32.mrb[55].mxu1 }
 0x34c   : > { %2184 = vmax.xlane.f32.xlu1 %v2183_v49 }
 0x391   : > { %v2140_v16 = vpop.xlane.xlu0 %2139 }
 0x392   : > { %v2186_v57 = vsub.f32 %v14480_v11, %v2140_v16 }
 0x394   : > { %v2202_v44 = vmul.f32 1.442695, %v2186_v57 }
 0x396   : > { %12836 = vpow2.f32 %v2202_v44 }
 0x399   : > { %v2143_v60 = vpop.xlane.xlu0 %2142 }
 0x39a   : > { %v2187_v35 = vsub.f32 %v14484_v48, %v2143_v60 }
 0x39c   : > { %v2204_v18 = vmul.f32 1.442695, %v2187_v35 }
 0x39e   : > { %12838 = vpow2.f32 %v2204_v18 }
 0x3a0   : > { %v14546_v26 = vpop.eup %12836 }
 0x3a1   : > { %v2152_v1 = vpop.xlane.xlu0 %2151  ;;  %v2146_v53 = vpop.xlane.xlu1 %2145  ;;  %v2234_v46 = vsel %vm2137_vm3, %v14546_v26, 0.0 }
 0x3a2   : > { %v2190_v50 = vsub.f32 %v14488_v27, %v2152_v1  ;;  %v2188_v49 = vsub.f32 %v14490_v29, %v2146_v53  ;;  %2235 = vadd.xlane.f32.xlu0 %v2234_v46 }
 0x3a4   : > { %v2206_v11 = vmul.f32 1.442695, %v2188_v49  ;;  %v2210_v16 = vmul.f32 1.442695, %v2190_v50 }
 0x3a6   : > { %12840 = vpow2.f32 %v2206_v11 }
 0x3a7   : > { %12842 = vpow2.f32 %v2210_v16 }
 0x3a8   : > { %v14552_v57 = vpop.eup %12838 }
 0x3a9   : > { %v2158_v48 = vpop.xlane.xlu0 %2157  ;;  %v2149_v44 = vpop.xlane.xlu1 %2148  ;;  %v2237_v60 = vsel %vm2137_vm3, %v14552_v57, 0.0 }
 0x3aa   : > { %v2192_v35 = vsub.f32 %v14496_v41, %v2158_v48  ;;  %v2189_v18 = vsub.f32 %v14498_v7, %v2149_v44  ;;  %2238 = vadd.xlane.f32.xlu1 %v2237_v60 }
 0x3ac   : > { %v2214_v27 = vmul.f32 1.442695, %v2192_v35  ;;  %v2208_v1 = vmul.f32 1.442695, %v2189_v18 }
 0x3ae   : > { %12844 = vpow2.f32 %v2214_v27 }
 0x3af   : > { %12846 = vpow2.f32 %v2208_v1 }
 0x3b0   : > { %v14558_v29 = vpop.eup %12840 }
 0x3b1   : > { %v2164_v53 = vpop.xlane.xlu0 %2163  ;;  %v2155_v46 = vpop.xlane.xlu1 %2154  ;;  %v2240_v11 = vsel %vm2137_vm3, %v14558_v29, 0.0 }
 0x3b2   : > { %v2194_v50 = vsub.f32 %v14504_v3, %v2164_v53  ;;  %v2191_v49 = vsub.f32 %v14506_v21, %v2155_v46  ;;  %v14564_v16 = vpop.eup %12842  ;;  %2241 = vadd.xlane.f32.xlu0 %v2240_v11 }
 0x3b3   : > { %v2246_v48 = vsel %vm2137_vm3, %v14564_v16, 0.0 }
 0x3b4   : > { %v2218_v41 = vmul.f32 1.442695, %v2194_v50  ;;  %v2212_v7 = vmul.f32 1.442695, %v2191_v49 }
 0x3b6   : > { %12848 = vpow2.f32 %v2218_v41  ;;  %2247 = vadd.xlane.f32.xlu0 %v2246_v48 }
 0x3b7   : > { %12850 = vpow2.f32 %v2212_v7 }
 0x3b8   : > { %v14568_v44 = vpop.eup %12844 }
 0x3b9   : > { %v14570_v60 = vpop.eup %12846  ;;  %v2170_v3 = vpop.xlane.xlu0 %2169  ;;  %v2252_v35 = vsel %vm2137_vm3, %v14568_v44, 0.0 }
 0x3ba   : > { %v2161_v21 = vpop.xlane.xlu1 %2160  ;;  %v2196_v18 = vsub.f32 %v14512_v62, %v2170_v3  ;;  %v2243_v1 = vsel %vm2137_vm3, %v14570_v60, 0.0  ;;  %2253 = vadd.xlane.f32.xlu0 %v2252_v35 }
 0x3bb   : > { %v2193_v27 = vsub.f32 %v14514_v13, %v2161_v21  ;;  %2244 = vadd.xlane.f32.xlu1 %v2243_v1 }
 0x3bc   : > { %v2222_v53 = vmul.f32 1.442695, %v2196_v18 }
 0x3bd   : > { %v2216_v46 = vmul.f32 1.442695, %v2193_v27 }
 0x3be   : > { %12852 = vpow2.f32 %v2222_v53 }
 0x3bf   : > { %12854 = vpow2.f32 %v2216_v46 }
 0x3c0   : > { %v14578_v50 = vpop.eup %12848 }
 0x3c1   : > { %v14580_v49 = vpop.eup %12850  ;;  %v2176_v11 = vpop.xlane.xlu0 %2175  ;;  %v2258_v62 = vsel %vm2137_vm3, %v14578_v50, 0.0 }
 0x3c2   : > { %v2167_v41 = vpop.xlane.xlu1 %2166  ;;  %v2198_v13 = vsub.f32 %v14520_v24, %v2176_v11  ;;  %2259 = vadd.xlane.f32.xlu0 %v2258_v62  ;;  %v2249_v48 = vsel %vm2137_vm3, %v14580_v49, 0.0 }
 0x3c3   : > { %v2195_v7 = vsub.f32 %v14522_v10, %v2167_v41  ;;  %2250 = vadd.xlane.f32.xlu1 %v2249_v48 }
 0x3c4   : > { %v2226_v3 = vmul.f32 1.442695, %v2198_v13 }
 0x3c5   : > { %v2220_v21 = vmul.f32 1.442695, %v2195_v7 }
 0x3c6   : > { %12856 = vpow2.f32 %v2226_v3 }
 0x3c7   : > { %12858 = vpow2.f32 %v2220_v21 }
 0x3c8   : > { %v14588_v35 = vpop.eup %12852 }
 0x3c9   : > { %v14590_v18 = vpop.eup %12854  ;;  %v2182_v27 = vpop.xlane.xlu0 %2181  ;;  %v2264_v24 = vsel %vm2137_vm3, %v14588_v35, 0.0 }
 0x3ca   : > { %v2173_v1 = vpop.xlane.xlu1 %2172  ;;  %v2200_v10 = vsub.f32 %v14528_v8, %v2182_v27  ;;  %2265 = vadd.xlane.f32.xlu0 %v2264_v24  ;;  %v2255_v46 = vsel %vm2137_vm3, %v14590_v18, 0.0 }
 0x3cb   : > { %v2197_v53 = vsub.f32 %v14530_v4, %v2173_v1  ;;  %2256 = vadd.xlane.f32.xlu1 %v2255_v46  ;;  %v14657_v46 = vpack.c.bf16 %v14224_v34, %v14224_v34 }
 0x3cc   : > { %v2230_v11 = vmul.f32 1.442695, %v2200_v10 }
 0x3cd   : > { %v2224_v41 = vmul.f32 1.442695, %v2197_v53  ;;  %17655 = vst [vmem:[#allocation57_spill] sm:$0xff] %v14657_v46 }
 0x3ce   : > { %12860 = vpow2.f32 %v2230_v11 }
 0x3cf   : > { %12862 = vpow2.f32 %v2224_v41 }
 0x3d0   : > { %v14598_v62 = vpop.eup %12856 }
 0x3d1   : > { %v14600_v13 = vpop.eup %12858  ;;  %v2270_v7 = vsel %vm2137_vm3, %v14598_v62, 0.0  ;;  %v2179_v27 = vpop.xlane.xlu1 %2178 }
 0x3d2   : > { %2271 = vadd.xlane.f32.xlu0 %v2270_v7  ;;  %v2261_v8 = vsel %vm2137_vm3, %v14600_v13, 0.0  ;;  %v2199_v1 = vsub.f32 %v14536_v45, %v2179_v27  ;;  %v14664_v7 = vpack.c.bf16 %v14264_v58, %v14264_v58 }
 0x3d3   : > { %2262 = vadd.xlane.f32.xlu1 %v2261_v8 }
 0x3d4   : > { %v2228_v24 = vmul.f32 1.442695, %v2199_v1  ;;  %17656 = vst [vmem:[#allocation58_spill] sm:$0xff] %v14664_v7 }
 0x3d6   : > { %12864 = vpow2.f32 %v2228_v24  ;;  %v17659_v24 = vmov 0.0  }
 0x3d8   : > { %v14606_v4 = vpop.eup %12860 }
 0x3d9   : > { %v14608_v48 = vpop.eup %12862  ;;  %v2276_v3 = vsel %vm2137_vm3, %v14606_v4, 0.0  ;;  %v2185_v53 = vpop.xlane.xlu1 %2184 }
 0x3da   : > { %2277 = vadd.xlane.f32.xlu0 %v2276_v3  ;;  %v2267_v21 = vsel %vm2137_vm3, %v14608_v48, 0.0  ;;  %v2201_v11 = vsub.f32 %v14540_v6, %v2185_v53  ;;  %v14670_v3 = vpack.c.bf16 %v14254_v52, %v14254_v52  ;;  %v2427_v52 = vsel %vm2333_vm2, %v14657_v46, 0 }
 0x3db   : > { %2268 = vadd.xlane.f32.xlu1 %v2267_v21  ;;  %v14676_v21 = vpack.c.bf16 %v14304_v28, %v14304_v28 }
 0x3dc   : > { %v2232_v8 = vmul.f32 1.442695, %v2201_v11  ;;  %17657 = vst [vmem:[#allocation59_spill] sm:$0xff] %v14670_v3 }
 0x3dd   : > { %17658 = vst [vmem:[#allocation60_spill] sm:$0xff] %v14676_v21 }
 0x3e0   : > { %v14631_v10 = vpop.eup %12864 }
 0x3e1   : > { %v2273_v45 = vsel %vm2137_vm3, %v14631_v10, 0.0 }
 0x3ec   : > { %3123 = vrot.lane.b32.xlu1 %v14204_v22, %s13537_s14 }
 0x3f0   : > { %3071 = vrot.lane.b32.xlu0 %v14196_v14, %s13537_s14 }
 0x3f4   : > { %3175 = vrot.lane.b32.xlu0 %v14220_v30, %s13537_s14 }
 0x3f8   : > { %3172 = vrot.lane.b32.xlu0 %v14269_v63, %s13537_s14 }
 0x3fc   : > { %3279 = vrot.lane.b32.xlu0 %v14238_v43, %s13537_s14 }
 0x400   : > { %3276 = vrot.lane.b32.xlu0 %v14258_v55, %s13537_s14 }
 0x404   : > { %3383 = vrot.lane.b32.xlu0 %v14271_v0, %s13537_s14 }
 0x408   : > { %3380 = vrot.lane.b32.xlu0 %v14298_v23, %s13537_s14 }
 0x40c   : > { %3487 = vrot.lane.b32.xlu0 %v14311_v38, %s13537_s14 }
 0x410   : > { %2274 = vadd.xlane.f32.xlu1 %v2273_v45  ;;  %3484 = vrot.lane.b32.xlu0 %v14339_v37, %s13537_s14 }
 0x414   : > { %3591 = vrot.lane.b32.xlu0 %v14352_v15, %s13537_s14 }
 0x418   : > { %3588 = vrot.lane.b32.xlu0 %v14377_v47, %s13537_s14 }
 0x41c   : > { %3695 = vrot.lane.b32.xlu0 %v14383_v56, %s13537_s14 }
 0x420   : > { %3692 = vrot.lane.b32.xlu0 %v14406_v31, %s13537_s14 }
 0x421   : > { %3068 = vrot.lane.b32.xlu1 %v14206_v25, %s13537_s14 }
 0x424   : > { %3799 = vrot.lane.b32.xlu0 %v14412_v19, %s13537_s14 }
 0x428   : > { %3796 = vrot.lane.b32.xlu0 %v14438_v33, %s13537_s14 }
 0x42c   : > { %4108 = vrot.lane.b32.xlu0 %v14435_v9, %s13537_s14 }
 0x42f   : > { %v2236_v41 = vpop.xlane.xlu0 %2235 }
 0x430   : > { %12866 = vrcp.f32 %v2236_v41  ;;  %4206 = vrot.lane.b32.xlu0 %v14657_v46, %s13537_s14 }
 0x431   : > { %12868 = vpow2.f32 %v2232_v8 }
 0x434   : > { %4304 = vrot.lane.b32.xlu0 %v14664_v7, %s13537_s14 }
 0x437   : > { %v2239_v34 = vpop.xlane.xlu1 %2238 }
 0x438   : > { %12870 = vrcp.f32 %v2239_v34  ;;  %4402 = vrot.lane.b32.xlu0 %v14670_v3, %s13537_s14 }
 0x43a   : > { %v12867_v6 = vpop.eup %12866 }
 0x43b   : > { %v2298_v58 = vmul.f32 %v12867_v6, %v14546_v26  ;;  %v14686_v45 = vpop.eup %12868  ;;  %v14691_v26 = vpack.c.bf16 %v14232_v40, %v14232_v40 }
 0x43c   : > { %4500 = vrot.lane.b32.xlu0 %v14676_v21, %s13537_s14  ;;  %v2279_v41 = vsel %vm2137_vm3, %v14686_v45, 0.0 }
 0x43d   : > { %v2314_v27 = vpack.c.bf16 %v2298_v58, %v2298_v58  ;;  %17660 = vst [vmem:[#allocation61_spill] sm:$0xff] %v14691_v26  ;;  %v2473_v34 = vsel %vm2333_vm2, %v14691_v26, 0 }
 0x43f   : > { %11732 = vmatmul.mubr.msk.bf16.vlgmr.msra.gmra.mrb[56].mxu0 %vm2137_vm3, %v2314_v27  ;;  %v2242_v1 = vpop.xlane.xlu0 %2241 }
 0x440   : > { %11742 = vmatpush3.bf16.msra.mxu0 %v2427_v52  ;;  %11743 = vmatprep.mubr.msk.bf16.mxu0 %vm13536_vm0, %v17659_v24  ;;  %12872 = vrcp.f32 %v2242_v1  ;;  %v2519_v1 = vsel %vm2333_vm2, %v14664_v7, 0 }
 0x441   : > { %11753 = vmatprep.subr.bf16.mxu0 %v17659_v24 }
 0x442   : > { %v12871_v28 = vpop.eup %12870 }
 0x443   : > { %v2299_v53 = vmul.f32 %v12871_v28, %v14552_v57  ;;  %v2248_v11 = vpop.xlane.xlu0 %2247 }
 0x444   : > { %12874 = vrcp.f32 %v2248_v11 }
 0x445   : > { %2280 = vadd.xlane.f32.xlu1 %v2279_v41  ;;  %v2315_v8 = vpack.c.bf16 %v2299_v53, %v2299_v53  ;;  %v14712_v41 = vpack.c.bf16 %v14274_v2, %v14274_v2 }
 0x447   : > { %11738 = vmatmul.mubr.msk.bf16.vlgmr.msra.gmra.mrb[56].mxu1 %vm2137_vm3, %v2315_v8  ;;  %v2254_v40 = vpop.xlane.xlu0 %2253  ;;  %17661 = vst [vmem:[#allocation62_spill] sm:$0xff] %v14712_v41  ;;  %v2565_v2 = vsel %vm2333_vm2, %v14712_v41, 0 }
 0x448   : > { %11748 = vmatpush3.bf16.msra.mxu1 %v2473_v34  ;;  %v2245_v6 = vpop.xlane.xlu1 %2244  ;;  %11749 = vmatprep.mubr.msk.bf16.mxu1 %vm13536_vm0, %v17659_v24 }
 0x449   : > { %11759 = vmatprep.subr.bf16.mxu1 %v17659_v24  ;;  %12876 = vrcp.f32 %v2245_v6 }
 0x44a   : > { %v12873_v57 = vpop.eup %12872  ;;  %12878 = vrcp.f32 %v2254_v40 }
 0x44b   : > { %v2300_v58 = vmul.f32 %v12873_v57, %v14558_v29  ;;  %v2611_v57 = vsel %vm2333_vm2, %v14670_v3, 0 }
 0x44d   : > { %v2316_v27 = vpack.c.bf16 %v2300_v58, %v2300_v58 }
 0x44e   : > { %v12875_v52 = vpop.eup %12874 }
 0x44f   : > { %11744 = vmatmul.mubr.msk.bf16.vlgmr.msra.gmra.mrb[60].mxu0 %vm2137_vm3, %v2316_v27  ;;  %v2260_v53 = vpop.xlane.xlu0 %2259  ;;  %v2302_v11 = vmul.f32 %v12875_v52, %v14564_v16 }
 0x450   : > { %v2251_v28 = vpop.xlane.xlu1 %2250  ;;  %11754 = vmatpush3.bf16.msra.mxu0 %v2519_v1  ;;  %11755 = vmatprep.mubr.msk.bf16.mxu0 %vm13536_vm0, %v17659_v24  ;;  %v14735_v1 = vpack.c.bf16 %v14267_v61, %v14267_v61 }
 0x451   : > { %12880 = vrcp.f32 %v2251_v28  ;;  %11765 = vmatprep.subr.bf16.mxu0 %v17659_v24  ;;  %v2318_v34 = vpack.c.bf16 %v2302_v11, %v2302_v11  ;;  %v2703_v11 = vsel %vm2333_vm2, %v14676_v21, 0 }
 0x452   : > { %12882 = vrcp.f32 %v2260_v53  ;;  %17662 = vst [vmem:[#allocation63_spill] sm:$0xff] %v14735_v1  ;;  %v2657_v61 = vsel %vm2333_vm2, %v14735_v1, 0 }
 0x453   : > { %v12877_v29 = vpop.eup %12876 }
 0x454   : > { %v2301_v8 = vmul.f32 %v12877_v29, %v14570_v60  ;;  %v12879_v6 = vpop.eup %12878 }
 0x455   : > { %v2304_v58 = vmul.f32 %v12879_v6, %v14568_v44  ;;  %v14754_v6 = vpack.c.bf16 %v14294_v17, %v14294_v17 }
 0x456   : > { %3120 = vrot.lane.b32.xlu1 %v14236_v42, %s13537_s14  ;;  %v2317_v40 = vpack.c.bf16 %v2301_v8, %v2301_v8 }
 0x457   : > { %11756 = vmatmul.mubr.msk.bf16.vlgmr.msra.gmra.mrb[64].mxu0 %vm2137_vm3, %v2318_v34  ;;  %v2266_v60 = vpop.xlane.xlu0 %2265  ;;  %v2320_v44 = vpack.c.bf16 %v2304_v58, %v2304_v58  ;;  %17663 = vst [vmem:[#allocation64_spill] sm:$0xff] %v14754_v6  ;;  %v2795_v17 = vsel %vm2333_vm2, %v14754_v6, 0 }
 0x458   : > { %v2257_v16 = vpop.xlane.xlu1 %2256  ;;  %11766 = vmatpush3.bf16.msra.mxu0 %v2611_v57  ;;  %11750 = vmatmul.mubr.msk.bf16.vlgmr.msra.gmra.mrb[60].mxu1 %vm2137_vm3, %v2317_v40 }
 0x459   : > { %12884 = vrcp.f32 %v2257_v16  ;;  %11760 = vmatpush3.bf16.msra.mxu1 %v2565_v2  ;;  %11761 = vmatprep.mubr.msk.bf16.mxu1 %vm13536_vm0, %v17659_v24 }
 0x45a   : > { %3227 = vrot.lane.b32.xlu1 %v14256_v54, %s13537_s14  ;;  %11767 = vmatprep.mubr.msk.bf16.mxu0 %vm13536_vm0, %v17659_v24  ;;  %12886 = vrcp.f32 %v2266_v60 }
 0x45b   : > { %v12881_v27 = vpop.eup %12880  ;;  %11771 = vmatprep.subr.bf16.mxu1 %v17659_v24  ;;  %11777 = vmatprep.subr.bf16.mxu0 %v17659_v24 }
 0x45c   : > { %v2303_v52 = vmul.f32 %v12881_v27, %v14580_v49  ;;  %v12883_v53 = vpop.eup %12882 }
 0x45d   : > { %v2306_v8 = vmul.f32 %v12883_v53, %v14578_v50  ;;  %v14761_v50 = vpack.c.bf16 %v14314_v39, %v14314_v39 }
 0x45e   : > { %3224 = vrot.lane.b32.xlu1 %v14309_v36, %s13537_s14  ;;  %v2319_v28 = vpack.c.bf16 %v2303_v52, %v2303_v52  ;;  %v14780_v52 = vpack.c.bf16 %v14345_v5, %v14345_v5 }
 0x45f   : > { %11768 = vmatmul.mubr.msk.bf16.vlgmr.msra.gmra.mrb[68].mxu0 %vm2137_vm3, %v2320_v44  ;;  %v2272_v49 = vpop.xlane.xlu0 %2271  ;;  %17664 = vst [vmem:[#allocation65_spill] sm:$0xff] %v14761_v50  ;;  %v2322_v57 = vpack.c.bf16 %v2306_v8, %v2306_v8  ;;  %v2749_v39 = vsel %vm2333_vm2, %v14761_v50, 0 }
 0x460   : > { %v2263_v29 = vpop.xlane.xlu1 %2262  ;;  %11778 = vmatpush3.bf16.msra.mxu0 %v2703_v11  ;;  %11762 = vmatmul.mubr.msk.bf16.vlgmr.msra.gmra.mrb[64].mxu1 %vm2137_vm3, %v2319_v28  ;;  %17665 = vst [vmem:[#allocation66_spill] sm:$0xff] %v14780_v52  ;;  %v2887_v5 = vsel %vm2333_vm2, %v14780_v52, 0 }
 0x461   : > { %12888 = vrcp.f32 %v2263_v29  ;;  %11772 = vmatpush3.bf16.msra.mxu1 %v2657_v61  ;;  %11773 = vmatprep.mubr.msk.bf16.mxu1 %vm13536_vm0, %v17659_v24 }
 0x462   : > { %3331 = vrot.lane.b32.xlu1 %v14296_v20, %s13537_s14  ;;  %11779 = vmatprep.mubr.msk.bf16.mxu0 %vm13536_vm0, %v17659_v24  ;;  %12890 = vrcp.f32 %v2272_v49  ;;  %v17668_v49 = vld [vmem:[#allocation40_spill] sm:$0xff] }
 0x463   : > { %v12885_v34 = vpop.eup %12884  ;;  %11783 = vmatprep.subr.bf16.mxu1 %v17659_v24  ;;  %11789 = vmatprep.subr.bf16.mxu0 %v17659_v24  ;;  %v14806_v8 = vpack.c.bf16 %v17668_v49, %v17668_v49  ;;  %v17678_v49 = vld [vmem:[#allocation55_spill] sm:$0xff] }
 0x464   : > { %v2305_v40 = vmul.f32 %v12885_v34, %v14590_v18  ;;  %v12887_v2 = vpop.eup %12886 }
 0x465   : > { %v2308_v58 = vmul.f32 %v12887_v2, %v14588_v35  ;;  %v14787_v35 = vpack.c.bf16 %v14307_v32, %v14307_v32  ;;  %v17667_v32 = vld [vmem:[#allocation43_spill] sm:$0xff] }
 0x466   : > { %3328 = vrot.lane.b32.xlu1 %v14350_v12, %s13537_s14  ;;  %v2321_v16 = vpack.c.bf16 %v2305_v40, %v2305_v40  ;;  %v17669_v40 = vld [vmem:[#allocation42_spill] sm:$0xff] }
 0x467   : > { %11780 = vmatmul.mubr.msk.bf16.vlgmr.msra.gmra.mrb[72].mxu0 %vm2137_vm3, %v2322_v57  ;;  %v2278_v18 = vpop.xlane.xlu0 %2277  ;;  %17666 = vst [vmem:[#allocation67_spill] sm:$0xff] %v14787_v35  ;;  %v2324_v28 = vpack.c.bf16 %v2308_v58, %v2308_v58  ;;  %v17671_v57 = vld [vmem:[#allocation47_spill] sm:$0xff] }
 0x468   : > { %v2269_v60 = vpop.xlane.xlu1 %2268  ;;  %11790 = vmatpush3.bf16.msra.mxu0 %v2795_v17  ;;  %11774 = vmatmul.mubr.msk.bf16.vlgmr.msra.gmra.mrb[68].mxu1 %vm2137_vm3, %v2321_v16 }
 0x469   : > { %12892 = vrcp.f32 %v2269_v60  ;;  %11784 = vmatpush3.bf16.msra.mxu1 %v2749_v39  ;;  %11785 = vmatprep.mubr.msk.bf16.mxu1 %vm13536_vm0, %v17659_v24  ;;  %v2979_v60 = vsel %vm2333_vm2, %v14806_v8, 0  ;;  %v17672_v39 = vld [vmem:[#allocation45_spill] sm:$0xff] }
 0x46a   : > { %3435 = vrot.lane.b32.xlu1 %v14337_v59, %s13537_s14  ;;  %11791 = vmatprep.mubr.msk.bf16.mxu0 %vm13536_vm0, %v17659_v24  ;;  %12894 = vrcp.f32 %v2278_v18 }
 0x46b   : > { %v12889_v27 = vpop.eup %12888  ;;  %11795 = vmatprep.subr.bf16.mxu1 %v17659_v24  ;;  %11801 = vmatprep.subr.bf16.mxu0 %v17659_v24  ;;  %v3072_v58 = vpop.permute.xlu0 %3071 }
 0x46c   : > { %v2307_v44 = vmul.f32 %v12889_v27, %v14600_v13  ;;  %v12891_v11 = vpop.eup %12890  ;;  %v2841_v13 = vsel %vm2333_vm2, %v14787_v35, 0  ;;  %v17673_v27 = vld [vmem:[#allocation52_spill] sm:$0xff] }
 0x46d   : > { %v2310_v29 = vmul.f32 %v12891_v11, %v14598_v62  ;;  %v14813_v62 = vpack.c.bf16 %v17669_v40, %v17669_v40  ;;  %v17675_v11 = vld [vmem:[#allocation54_spill] sm:$0xff]  ;;  %v14851_v40 = vpop.permute.xlu1 %3123 }
 0x46e   : > { %3432 = vrot.lane.b32.xlu1 %v14381_v51, %s13537_s14  ;;  %v2323_v53 = vpack.c.bf16 %v2307_v44, %v2307_v44 }
 0x46f   : > { %11792 = vmatmul.mubr.msk.bf16.vlgmr.msra.gmra.mrb[76].mxu0 %vm2137_vm3, %v2324_v28  ;;  %17670 = vst [vmem:[#allocation43_spill] sm:$0xff] %v14813_v62  ;;  %v2326_v16 = vpack.c.bf16 %v2310_v29, %v2310_v29  ;;  %v3077_v28 = vsel %vm1384_vm1, %v3072_v58, 0  ;;  %v17677_v29 = vld [vmem:[#allocation56_spill] sm:$0xff] }
 0x470   : > { %11802 = vmatpush3.bf16.msra.mxu0 %v2887_v5  ;;  %11786 = vmatmul.mubr.msk.bf16.vlgmr.msra.gmra.mrb[72].mxu1 %vm2137_vm3, %v2323_v53  ;;  %v3176_v53 = vpop.permute.xlu0 %3175 }
 0x471   : > { %11796 = vmatpush3.bf16.msra.mxu1 %v2841_v13  ;;  %11797 = vmatprep.mubr.msk.bf16.mxu1 %vm13536_vm0, %v17659_v24  ;;  %v17676_v13 = vld [vmem:[#allocation53_spill] sm:$0xff] }
 0x472   : > { %3539 = vrot.lane.b32.xlu1 %v17667_v32, %s13537_s14  ;;  %11803 = vmatprep.mubr.msk.bf16.mxu0 %vm13536_vm0, %v17659_v24 }
 0x473   : > { %v12893_v61 = vpop.eup %12892  ;;  %11807 = vmatprep.subr.bf16.mxu1 %v17659_v24  ;;  %11813 = vmatprep.subr.bf16.mxu0 %v17659_v24 }
 0x474   : > { %v2309_v34 = vmul.f32 %v12893_v61, %v14608_v48  ;;  %v12895_v17 = vpop.eup %12894  ;;  %v2933_v48 = vsel %vm2333_vm2, %v14813_v62, 0  ;;  %v3173_v5 = vpop.permute.xlu0 %3172 }
 0x475   : > { %v2312_v18 = vmul.f32 %v12895_v17, %v14606_v4  ;;  %v17674_v4 = vld [vmem:[#allocation49_spill] sm:$0xff] }
 0x476   : > { %3536 = vrot.lane.b32.xlu1 %v17671_v57, %s13537_s14  ;;  %v2325_v2 = vpack.c.bf16 %v2309_v34, %v2309_v34 }
 0x477   : > { %11804 = vmatmul.mubr.msk.bf16.vlgmr.msra.gmra.mrb[80].mxu0 %vm2137_vm3, %v2326_v16  ;;  %v2328_v44 = vpack.c.bf16 %v2312_v18, %v2312_v18 }
 0x478   : > { %11814 = vmatpush3.bf16.msra.mxu0 %v2979_v60  ;;  %11798 = vmatmul.mubr.msk.bf16.vlgmr.msra.gmra.mrb[76].mxu1 %vm2137_vm3, %v2325_v2  ;;  %v3280_v61 = vpop.permute.xlu0 %3279 }
 0x479   : > { %11808 = vmatpush3.bf16.msra.mxu1 %v2933_v48  ;;  %11815 = vmatprep.mubr.msk.bf16.mxu0 %vm13536_vm0, %v17659_v24  ;;  %v3181_v48 = vsel %vm1384_vm1, %v3176_v53, 0 }
 0x47a   : > { %3643 = vrot.lane.b32.xlu1 %v17672_v39, %s13537_s14  ;;  %11825 = vmatprep.subr.bf16.mxu0 %v17659_v24 }
 0x47b   : > { %11809 = vmatprep.mubr.msk.bf16.mxu1 %vm13536_vm0, %v17659_v24  ;;  %11819 = vmatprep.subr.bf16.mxu1 %v17659_v24 }
 0x47c   : > { %v3277_v34 = vpop.permute.xlu0 %3276 }
 0x47e   : > { %3640 = vrot.lane.b32.xlu1 %v17673_v27, %s13537_s14 }
 0x47f   : > { %11816 = vmatmul.mubr.msk.bf16.vlgmr.msra.gmra.mrb[84].mxu0 %vm2137_vm3, %v2328_v44  ;;  %v17679_v44 = vld [vmem:[#allocation41_spill] sm:$0xff] }
 0x480   : > { %11827 = vmatprep.mubr.msk.bf16.mxu0 %vm13536_vm0, %v17659_v24  ;;  %v3384_v16 = vpop.permute.xlu0 %3383 }
 0x481   : > { %11826 = vmatpush3.bf16.xpose.msra.mxu0 %v3077_v28  ;;  %v14868_v28 = vpack.c.bf16 %v17679_v44, %v17679_v44 }
 0x482   : > { %3747 = vrot.lane.b32.xlu1 %v17674_v4, %s13537_s14  ;;  %11837 = vmatprep.subr.bf16.mxu0 %v17659_v24 }
 0x484   : > { %v3381_v17 = vpop.permute.xlu0 %3380 }
 0x486   : > { %3744 = vrot.lane.b32.xlu1 %v17675_v11, %s13537_s14 }
 0x488   : > { %v3488_v18 = vpop.permute.xlu0 %3487 }
 0x489   : > { %v3493_v44 = vsel %vm1384_vm1, %v3488_v18, 0 }
 0x48a   : > { %3851 = vrot.lane.b32.xlu1 %v17676_v13, %s13537_s14 }
 0x48e   : > { %3848 = vrot.lane.b32.xlu1 %v17677_v29, %s13537_s14 }
 0x492   : > { %4157 = vrot.lane.b32.xlu1 %v17678_v49, %s13537_s14 }
 0x496   : > { %4255 = vrot.lane.b32.xlu1 %v14691_v26, %s13537_s14 }
 0x49a   : > { %4353 = vrot.lane.b32.xlu1 %v14712_v41, %s13537_s14 }
 0x49d   : > { %v2275_v2 = vpop.xlane.xlu1 %2274 }
 0x49e   : > { %12896 = vrcp.f32 %v2275_v2  ;;  %4451 = vrot.lane.b32.xlu1 %v14735_v1, %s13537_s14  ;;  %v3285_v2 = vsel %vm1384_vm1, %v3280_v61, 0 }
 0x4a1   : > { %v3069_v60 = vpop.permute.xlu1 %3068 }
 0x4a2   : > { %4549 = vrot.lane.b32.xlu1 %v14761_v50, %s13537_s14  ;;  %11828 = vmatmul.mubr.msk.bf16.vlgmr.msra.gmra.mrb[88].mxu0 %vm1384_vm1, %v3069_v60 }
 0x4a3   : > { %11838 = vmatpush3.bf16.xpose.msra.mxu0 %v3181_v48  ;;  %11839 = vmatprep.mubr.msk.bf16.mxu0 %vm13536_vm0, %v17659_v24  ;;  %v3485_v48 = vpop.permute.xlu0 %3484 }
 0x4a4   : > { %11849 = vmatprep.subr.bf16.mxu0 %v17659_v24 }
 0x4a6   : > { %4598 = vrot.lane.b32.xlu1 %v14754_v6, %s13537_s14 }
 0x4a7   : > { %v3592_v61 = vpop.permute.xlu0 %3591 }
 0x4a8   : > { %v12897_v58 = vpop.eup %12896 }
 0x4a9   : > { %v2311_v53 = vmul.f32 %v12897_v58, %v14631_v10  ;;  %v3025_v10 = vsel %vm2333_vm2, %v14868_v28, 0 }
 0x4aa   : > { %4647 = vrot.lane.b32.xlu1 %v14787_v35, %s13537_s14  ;;  %11840 = vmatmul.mubr.msk.bf16.vlgmr.msra.gmra.mrb[92].mxu0 %vm1384_vm1, %v3173_v5  ;;  %v3389_v5 = vsel %vm1384_vm1, %v3384_v16, 0 }
 0x4ab   : > { %11850 = vmatpush3.bf16.xpose.msra.mxu0 %v3285_v2  ;;  %v2327_v60 = vpack.c.bf16 %v2311_v53, %v2311_v53  ;;  %11851 = vmatprep.mubr.msk.bf16.mxu0 %vm13536_vm0, %v17659_v24  ;;  %v3589_v58 = vpop.permute.xlu0 %3588 }
 0x4ac   : > { %11861 = vmatprep.subr.bf16.mxu0 %v17659_v24 }
 0x4ad   : > { %11810 = vmatmul.mubr.msk.bf16.vlgmr.msra.gmra.mrb[80].mxu1 %vm2137_vm3, %v2327_v60 }
 0x4ae   : > { %11820 = vmatpush3.bf16.msra.mxu1 %v3025_v10  ;;  %11821 = vmatprep.mubr.msk.bf16.mxu1 %vm13536_vm0, %v17659_v24 }
 0x4af   : > { %11831 = vmatprep.subr.bf16.mxu1 %v17659_v24  ;;  %v3696_v16 = vpop.permute.xlu0 %3695 }
 0x4b2   : > { %11852 = vmatmul.mubr.msk.bf16.vlgmr.msra.gmra.mrb[96].mxu0 %vm1384_vm1, %v3277_v34  ;;  %v3597_v34 = vsel %vm1384_vm1, %v3592_v61, 0 }
 0x4b3   : > { %11862 = vmatpush3.bf16.xpose.msra.mxu0 %v3389_v5  ;;  %11863 = vmatprep.mubr.msk.bf16.mxu0 %vm13536_vm0, %v17659_v24  ;;  %v3693_v18 = vpop.permute.xlu0 %3692 }
 0x4b4   : > { %11873 = vmatprep.subr.bf16.mxu0 %v17659_v24 }
 0x4b7   : > { %v3800_v53 = vpop.permute.xlu0 %3799 }
 0x4b8   : > { %v3805_v60 = vsel %vm1384_vm1, %v3800_v53, 0 }
 0x4ba   : > { %11864 = vmatmul.mubr.msk.bf16.vlgmr.msra.gmra.mrb[100].mxu0 %vm1384_vm1, %v3381_v17  ;;  %v3701_v17 = vsel %vm1384_vm1, %v3696_v16, 0 }
 0x4bb   : > { %11874 = vmatpush3.bf16.xpose.msra.mxu0 %v3493_v44  ;;  %11875 = vmatprep.mubr.msk.bf16.mxu0 %vm13536_vm0, %v17659_v24  ;;  %v3797_v2 = vpop.permute.xlu0 %3796 }
 0x4bc   : > { %11885 = vmatprep.subr.bf16.mxu0 %v17659_v24 }
 0x4bf   : > { %v4109_v5 = vpop.permute.xlu0 %4108 }
 0x4c0   : > { %v4114_v61 = vsel %vm2333_vm2, %v4109_v5, 0 }
 0x4c2   : > { %11876 = vmatmul.mubr.msk.bf16.vlgmr.msra.gmra.mrb[104].mxu0 %vm1384_vm1, %v3485_v48 }
 0x4c3   : > { %11886 = vmatpush3.bf16.xpose.msra.mxu0 %v3597_v34  ;;  %11887 = vmatprep.mubr.msk.bf16.mxu0 %vm13536_vm0, %v17659_v24  ;;  %v15051_v19 = vpop.permute.xlu0 %4206 }
 0x4c4   : > { %11897 = vmatprep.subr.bf16.mxu0 %v17659_v24 }
 0x4ca   : > { %11888 = vmatmul.mubr.msk.bf16.vlgmr.msra.gmra.mrb[108].mxu0 %vm1384_vm1, %v3589_v58 }
 0x4cb   : > { %11898 = vmatpush3.bf16.xpose.msra.mxu0 %v3701_v17  ;;  %11899 = vmatprep.mubr.msk.bf16.mxu0 %vm13536_vm0, %v17659_v24  ;;  %v3129_v17 = vsel %vm1384_vm1, %v14851_v40, 0 }
 0x4cc   : > { %11909 = vmatprep.subr.bf16.mxu0 %v17659_v24 }
 0x4d2   : > { %11900 = vmatmul.mubr.msk.bf16.vlgmr.msra.gmra.mrb[112].mxu0 %vm1384_vm1, %v3693_v18  ;;  %v2281_v48 = vpop.xlane.xlu1 %2280 }
 0x4d3   : > { %11910 = vmatpush3.bf16.xpose.msra.mxu0 %v3805_v60  ;;  %12898 = vrcp.f32 %v2281_v48  ;;  %11911 = vmatprep.mubr.msk.bf16.mxu0 %vm13536_vm0, %v17659_v24 }
 0x4d4   : > { %11921 = vmatprep.subr.bf16.mxu0 %v17659_v24 }
 0x4d6   : > { %v3121_v10 = vpop.permute.xlu1 %3120 }
 0x4da   : > { %11912 = vmatmul.mubr.msk.bf16.vlgmr.msra.gmra.mrb[116].mxu0 %vm1384_vm1, %v3797_v2  ;;  %v3228_v58 = vpop.permute.xlu1 %3227 }
 0x4db   : > { %11922 = vmatpush3.bf16.msra.mxu0 %v4114_v61  ;;  %11923 = vmatprep.mubr.msk.bf16.mxu0 %vm13536_vm0, %v17659_v24  ;;  %v3233_v60 = vsel %vm1384_vm1, %v3228_v58, 0 }
 0x4dc   : > { %11933 = vmatprep.subr.bf16.mxu0 %v17659_v24 }
 0x4dd   : > { %v12899_v44 = vpop.eup %12898 }
 0x4de   : > { %v3225_v16 = vpop.permute.xlu1 %3224  ;;  %v2313_v34 = vmul.f32 %v12899_v44, %v14686_v45 }
 0x4e0   : > { %v2329_v18 = vpack.c.bf16 %v2313_v34, %v2313_v34 }
 0x4e2   : > { %11822 = vmatmul.mubr.msk.bf16.vlgmr.msra.gmra.mrb[84].mxu1 %vm2137_vm3, %v2329_v18  ;;  %v3332_v53 = vpop.permute.xlu1 %3331 }
 0x4e3   : > { %11832 = vmatpush3.bf16.xpose.msra.mxu1 %v3129_v17  ;;  %11833 = vmatprep.mubr.msk.bf16.mxu1 %vm13536_vm0, %v17659_v24  ;;  %v3337_v40 = vsel %vm1384_vm1, %v3332_v53, 0 }
 0x4e4   : > { %11843 = vmatprep.subr.bf16.mxu1 %v17659_v24 }
 0x4e6   : > { %v3329_v2 = vpop.permute.xlu1 %3328 }
 0x4ea   : > { %11834 = vmatmul.mubr.msk.bf16.vlgmr.msra.gmra.mrb[88].mxu1 %vm1384_vm1, %v3121_v10  ;;  %v3436_v48 = vpop.permute.xlu1 %3435 }
 0x4eb   : > { %11844 = vmatpush3.bf16.xpose.msra.mxu1 %v3233_v60  ;;  %11845 = vmatprep.mubr.msk.bf16.mxu1 %vm13536_vm0, %v17659_v24  ;;  %v3441_v61 = vsel %vm1384_vm1, %v3436_v48, 0 }
 0x4ec   : > { %11855 = vmatprep.subr.bf16.mxu1 %v17659_v24 }
 0x4ee   : > { %v3433_v45 = vpop.permute.xlu1 %3432 }
 0x4f2   : > { %11846 = vmatmul.mubr.msk.bf16.vlgmr.msra.gmra.mrb[92].mxu1 %vm1384_vm1, %v3225_v16  ;;  %v3540_v5 = vpop.permute.xlu1 %3539 }
 0x4f3   : > { %11856 = vmatpush3.bf16.xpose.msra.mxu1 %v3337_v40  ;;  %11857 = vmatprep.mubr.msk.bf16.mxu1 %vm13536_vm0, %v17659_v24  ;;  %v3545_v16 = vsel %vm1384_vm1, %v3540_v5, 0 }
 0x4f4   : > { %11867 = vmatprep.subr.bf16.mxu1 %v17659_v24 }
 0x4f6   : > { %v3537_v10 = vpop.permute.xlu1 %3536 }
 0x4fa   : > { %11858 = vmatmul.mubr.msk.bf16.vlgmr.msra.gmra.mrb[96].mxu1 %vm1384_vm1, %v3329_v2  ;;  %v3644_v58 = vpop.permute.xlu1 %3643 }
 0x4fb   : > { %11868 = vmatpush3.bf16.xpose.msra.mxu1 %v3441_v61  ;;  %11869 = vmatprep.mubr.msk.bf16.mxu1 %vm13536_vm0, %v17659_v24  ;;  %v3649_v18 = vsel %vm1384_vm1, %v3644_v58, 0 }
 0x4fc   : > { %11879 = vmatprep.subr.bf16.mxu1 %v17659_v24 }
 0x4fe   : > { %v3641_v44 = vpop.permute.xlu1 %3640 }
 0x502   : > { %11870 = vmatmul.mubr.msk.bf16.vlgmr.msra.gmra.mrb[100].mxu1 %vm1384_vm1, %v3433_v45  ;;  %v3748_v34 = vpop.permute.xlu1 %3747 }
 0x503   : > { %11880 = vmatpush3.bf16.xpose.msra.mxu1 %v3545_v16  ;;  %11881 = vmatprep.mubr.msk.bf16.mxu1 %vm13536_vm0, %v17659_v24  ;;  %v3753_v53 = vsel %vm1384_vm1, %v3748_v34, 0 }
 0x504   : > { %11891 = vmatprep.subr.bf16.mxu1 %v17659_v24 }
 0x506   : > { %v3745_v17 = vpop.permute.xlu1 %3744 }
 0x50a   : > { %11882 = vmatmul.mubr.msk.bf16.vlgmr.msra.gmra.mrb[104].mxu1 %vm1384_vm1, %v3537_v10  ;;  %v3852_v60 = vpop.permute.xlu1 %3851 }
 0x50b   : > { %11892 = vmatpush3.bf16.xpose.msra.mxu1 %v3649_v18  ;;  %11893 = vmatprep.mubr.msk.bf16.mxu1 %vm13536_vm0, %v17659_v24  ;;  %v3857_v10 = vsel %vm1384_vm1, %v3852_v60, 0 }
 0x50c   : > { %11903 = vmatprep.subr.bf16.mxu1 %v17659_v24 }
 0x50e   : > { %v3849_v5 = vpop.permute.xlu1 %3848 }
 0x512   : > { %11894 = vmatmul.mubr.msk.bf16.vlgmr.msra.gmra.mrb[108].mxu1 %vm1384_vm1, %v3641_v44  ;;  %v14948_v2 = vpop.f32.mrb[56].mxu0  ;;  %v4158_v34 = vpop.permute.xlu1 %4157 }
 0x513   : > { %17680 = vst [vmem:[#allocation40_spill] sm:$0xff] %v14948_v2  ;;  %11904 = vmatpush3.bf16.xpose.msra.mxu1 %v3753_v53  ;;  %v11733_v48 = vpop.f32.mrb[57].mxu0  ;;  %11905 = vmatprep.mubr.msk.bf16.mxu1 %vm13536_vm0, %v17659_v24  ;;  %v4163_v18 = vsel %vm2333_vm2, %v4158_v34, 0 }
 0x514   : > { %v2374_v45 = vpop.f32.mrb[58].mxu0  ;;  %11915 = vmatprep.subr.bf16.mxu1 %v17659_v24 }
 0x515   : > { %v11734_v40 = vpop.f32.mrb[59].mxu0 }
 0x51a   : > { %11906 = vmatmul.mubr.msk.bf16.vlgmr.msra.gmra.mrb[112].mxu1 %vm1384_vm1, %v3745_v17  ;;  %v14955_v61 = vpop.f32.mrb[56].mxu1 }
 0x51b   : > { %17681 = vst [vmem:[#allocation42_spill] sm:$0xff] %v14955_v61  ;;  %11916 = vmatpush3.bf16.xpose.msra.mxu1 %v3857_v10  ;;  %v11739_v58 = vpop.f32.mrb[57].mxu1  ;;  %11917 = vmatprep.mubr.msk.bf16.mxu1 %vm13536_vm0, %v17659_v24 }
 0x51c   : > { %v2420_v44 = vpop.f32.mrb[58].mxu1  ;;  %11927 = vmatprep.subr.bf16.mxu1 %v17659_v24 }
 0x51d   : > { %v11740_v16 = vpop.f32.mrb[59].mxu1 }
 0x522   : > { %11918 = vmatmul.mubr.msk.bf16.vlgmr.msra.gmra.mrb[116].mxu1 %vm1384_vm1, %v3849_v5  ;;  %v14962_v53 = vpop.f32.mrb[60].mxu0 }
 0x523   : > { %11928 = vmatpush3.bf16.msra.mxu1 %v4163_v18  ;;  %17682 = vst [vmem:[#allocation47_spill] sm:$0xff] %v14962_v53  ;;  %11929 = vmatprep.mubr.msk.bf16.mxu1 %vm13536_vm0, %v17659_v24  ;;  %v11745_v17 = vpop.f32.mrb[61].mxu0 }
 0x524   : > { %11939 = vmatprep.subr.bf16.mxu1 %v17659_v24  ;;  %v2466_v60 = vpop.f32.mrb[62].mxu0 }
 0x525   : > { %v11746_v48 = vpop.f32.mrb[63].mxu0 }
 0x52a   : > { %v14967_v45 = vpop.f32.mrb[64].mxu0 }
 0x52b   : > { %17683 = vst [vmem:[#allocation45_spill] sm:$0xff] %v14967_v45  ;;  %v14969_v40 = vpop.f32.mrb[60].mxu1  ;;  %v11757_v10 = vpop.f32.mrb[65].mxu0 }
 0x52c   : > { %17684 = vst [vmem:[#allocation52_spill] sm:$0xff] %v14969_v40  ;;  %v11751_v58 = vpop.f32.mrb[61].mxu1  ;;  %v2558_v44 = vpop.f32.mrb[66].mxu0 }
 0x52d   : > { %v2512_v16 = vpop.f32.mrb[62].mxu1  ;;  %v11758_v5 = vpop.f32.mrb[67].mxu0 }
 0x52e   : > { %v11752_v34 = vpop.f32.mrb[63].mxu1 }
 0x532   : > { %v14971_v18 = vpop.f32.mrb[68].mxu0 }
 0x533   : > { %17685 = vst [vmem:[#allocation49_spill] sm:$0xff] %v14971_v18  ;;  %v14973_v53 = vpop.f32.mrb[64].mxu1  ;;  %v11769_v2 = vpop.f32.mrb[69].mxu0 }
 0x534   : > { %17686 = vst [vmem:[#allocation54_spill] sm:$0xff] %v14973_v53  ;;  %v11763_v17 = vpop.f32.mrb[65].mxu1  ;;  %v2650_v61 = vpop.f32.mrb[70].mxu0 }
 0x535   : > { %v2604_v21 = vpop.f32.mrb[66].mxu1  ;;  %v11770_v60 = vpop.f32.mrb[71].mxu0 }
 0x536   : > { %v11764_v48 = vpop.f32.mrb[67].mxu1 }
 0x53a   : > { %v14975_v3 = vpop.f32.mrb[72].mxu0 }
 0x53b   : > { %17687 = vst [vmem:[#allocation53_spill] sm:$0xff] %v14975_v3  ;;  %v14977_v45 = vpop.f32.mrb[68].mxu1  ;;  %v11781_v10 = vpop.f32.mrb[73].mxu0 }
 0x53c   : > { %17688 = vst [vmem:[#allocation56_spill] sm:$0xff] %v14977_v45  ;;  %v11775_v58 = vpop.f32.mrb[69].mxu1  ;;  %v2742_v44 = vpop.f32.mrb[74].mxu0 }
 0x53d   : > { %v2696_v16 = vpop.f32.mrb[70].mxu1  ;;  %v11782_v5 = vpop.f32.mrb[75].mxu0 }
 0x53e   : > { %v11776_v34 = vpop.f32.mrb[71].mxu1 }
 0x542   : > { %v14979_v40 = vpop.f32.mrb[76].mxu0 }
 0x543   : > { %17689 = vst [vmem:[#allocation41_spill] sm:$0xff] %v14979_v40  ;;  %v14981_v18 = vpop.f32.mrb[72].mxu1  ;;  %v11793_v2 = vpop.f32.mrb[77].mxu0 }
 0x544   : > { %17690 = vst [vmem:[#allocation68_spill] sm:$0xff] %v14981_v18  ;;  %v11787_v17 = vpop.f32.mrb[73].mxu1  ;;  %v2834_v61 = vpop.f32.mrb[78].mxu0 }
 0x545   : > { %v2788_v21 = vpop.f32.mrb[74].mxu1  ;;  %v11794_v60 = vpop.f32.mrb[79].mxu0 }
 0x546   : > { %v11788_v48 = vpop.f32.mrb[75].mxu1 }
 0x54a   : > { %v14983_v53 = vpop.f32.mrb[80].mxu0 }
 0x54b   : > { %17691 = vst [vmem:[#allocation69_spill] sm:$0xff] %v14983_v53  ;;  %v14985_v3 = vpop.f32.mrb[76].mxu1  ;;  %v11805_v10 = vpop.f32.mrb[81].mxu0 }
 0x54c   : > { %17692 = vst [vmem:[#allocation70_spill] sm:$0xff] %v14985_v3  ;;  %v11799_v58 = vpop.f32.mrb[77].mxu1  ;;  %v2926_v44 = vpop.f32.mrb[82].mxu0 }
 0x54d   : > { %v2880_v16 = vpop.f32.mrb[78].mxu1  ;;  %v11806_v5 = vpop.f32.mrb[83].mxu0 }
 0x54e   : > { %v11800_v34 = vpop.f32.mrb[79].mxu1 }
 0x552   : > { %v14987_v45 = vpop.f32.mrb[84].mxu0 }
 0x553   : > { %17693 = vst [vmem:[#allocation71_spill] sm:$0xff] %v14987_v45  ;;  %v11817_v40 = vpop.f32.mrb[85].mxu0 }
 0x554   : > { %v3018_v18 = vpop.f32.mrb[86].mxu0 }
 0x555   : > { %v11818_v2 = vpop.f32.mrb[87].mxu0 }
 0x575   : > { %v3113_v17 = vpop.f32.mrb[88].mxu0 }
 0x576   : > { %v11829_v61 = vpop.f32.mrb[89].mxu0  ;;  %v14989_v21 = vmul.f32 0.17677669, %v3113_v17 }
 0x577   : > { %v3116_v60 = vpop.f32.mrb[90].mxu0 }
 0x578   : > { %v11830_v48 = vpop.f32.mrb[91].mxu0  ;;  %v3915_v53 = vsel %vm2137_vm3, %v14989_v21, -inf }
 0x579   : > { %3916 = vmax.xlane.f32.xlu0 %v3915_v53 }
 0x57d   : > { %v3217_v10 = vpop.f32.mrb[92].mxu0 }
 0x57e   : > { %v11841_v58 = vpop.f32.mrb[93].mxu0  ;;  %v14993_v44 = vmul.f32 0.17677669, %v3217_v10 }
 0x57f   : > { %v3220_v16 = vpop.f32.mrb[94].mxu0 }
 0x580   : > { %v14995_v5 = vpop.f32.mrb[80].mxu1  ;;  %v11842_v40 = vpop.f32.mrb[95].mxu0  ;;  %v3921_v18 = vsel %vm2137_vm3, %v14993_v44, -inf }
 0x581   : > { %17694 = vst [vmem:[#allocation72_spill] sm:$0xff] %v14995_v5  ;;  %3922 = vmax.xlane.f32.xlu0 %v3921_v18  ;;  %v11811_v34 = vpop.f32.mrb[81].mxu1 }
 0x582   : > { %v2972_v2 = vpop.f32.mrb[82].mxu1 }
 0x583   : > { %v11812_v17 = vpop.f32.mrb[83].mxu1 }
 0x585   : > { %v3321_v61 = vpop.f32.mrb[96].mxu0 }
 0x586   : > { %v11853_v60 = vpop.f32.mrb[97].mxu0 }
 0x587   : > { %v3324_v48 = vpop.f32.mrb[98].mxu0 }
 0x588   : > { %v11854_v45 = vpop.f32.mrb[99].mxu0 }
 0x58d   : > { %v3425_v53 = vpop.f32.mrb[100].mxu0 }
 0x58e   : > { %v11865_v3 = vpop.f32.mrb[101].mxu0 }
 0x58f   : > { %v3428_v58 = vpop.f32.mrb[102].mxu0 }
 0x590   : > { %v11866_v10 = vpop.f32.mrb[103].mxu0 }
 0x595   : > { %v3529_v7 = vpop.f32.mrb[104].mxu0 }
 0x596   : > { %v11877_v16 = vpop.f32.mrb[105].mxu0 }
 0x597   : > { %v3532_v35 = vpop.f32.mrb[106].mxu0 }
 0x598   : > { %v11878_v5 = vpop.f32.mrb[107].mxu0 }
 0x59d   : > { %v3633_v40 = vpop.f32.mrb[108].mxu0 }
 0x59e   : > { %v11889_v46 = vpop.f32.mrb[109].mxu0 }
 0x59f   : > { %v3636_v6 = vpop.f32.mrb[110].mxu0 }
 0x5a0   : > { %v11890_v9 = vpop.f32.mrb[111].mxu0 }
 0x5a5   : > { %v3737_v18 = vpop.f32.mrb[112].mxu0 }
 0x5a6   : > { %v11901_v34 = vpop.f32.mrb[113].mxu0 }
 0x5a7   : > { %v3740_v2 = vpop.f32.mrb[114].mxu0 }
 0x5a8   : > { %v11902_v17 = vpop.f32.mrb[115].mxu0 }
 0x5ad   : > { %v3841_v50 = vpop.f32.mrb[116].mxu0 }
 0x5ae   : > { %v11913_v60 = vpop.f32.mrb[117].mxu0 }
 0x5af   : > { %v3844_v48 = vpop.f32.mrb[118].mxu0 }
 0x5b0   : > { %v11914_v45 = vpop.f32.mrb[119].mxu0  ;;  %v15007_v48 = vmul.f32 0.17677669, %v3321_v61 }
 0x5b5   : > { %v14999_v33 = vpop.f32.mrb[84].mxu1 }
 0x5b6   : > { %17695 = vst [vmem:[#allocation73_spill] sm:$0xff] %v14999_v33  ;;  %v11823_v3 = vpop.f32.mrb[85].mxu1 }
 0x5b7   : > { %v3064_v58 = vpop.f32.mrb[86].mxu1 }
 0x5b8   : > { %v11824_v10 = vpop.f32.mrb[87].mxu1  ;;  %v15011_v58 = vmul.f32 0.17677669, %v3425_v53  ;;  %v15023_v53 = vmul.f32 0.17677669, %v3633_v40 }
 0x5b9   : > { %v3927_v10 = vsel %vm2137_vm3, %v15007_v48, -inf  ;;  %v15035_v40 = vmul.f32 0.17677669, %v3841_v50 }
 0x5bd   : > { %v3165_v16 = vpop.f32.mrb[88].mxu1 }
 0x5be   : > { %v11835_v35 = vpop.f32.mrb[89].mxu1  ;;  %v15001_v5 = vmul.f32 0.17677669, %v3165_v16 }
 0x5bf   : > { %v3168_v46 = vpop.f32.mrb[90].mxu1 }
 0x5c0   : > { %v11836_v6 = vpop.f32.mrb[91].mxu1  ;;  %v3918_v9 = vsel %vm2137_vm3, %v15001_v5, -inf }
 0x5c1   : > { %3919 = vmax.xlane.f32.xlu1 %v3918_v9  ;;  %v15017_v9 = vmul.f32 0.17677669, %v3529_v7 }
 0x5c5   : > { %v3269_v34 = vpop.f32.mrb[92].mxu1 }
 0x5c6   : > { %v11847_v2 = vpop.f32.mrb[93].mxu1  ;;  %v15005_v17 = vmul.f32 0.17677669, %v3269_v34  ;;  %v3933_v34 = vsel %vm2137_vm3, %v15011_v58, -inf }
 0x5c7   : > { %v3272_v60 = vpop.f32.mrb[94].mxu1 }
 0x5c8   : > { %v11848_v45 = vpop.f32.mrb[95].mxu1  ;;  %v3924_v3 = vsel %vm2137_vm3, %v15005_v17, -inf  ;;  %v3939_v60 = vsel %vm2137_vm3, %v15017_v9, -inf }
 0x5c9   : > { %3925 = vmax.xlane.f32.xlu0 %v3924_v3 }
 0x5cd   : > { %3928 = vmax.xlane.f32.xlu0 %v3927_v10  ;;  %v3373_v16 = vpop.f32.mrb[96].mxu1 }
 0x5ce   : > { %v15015_v35 = vmul.f32 0.17677669, %v3373_v16  ;;  %v11859_v46 = vpop.f32.mrb[97].mxu1  ;;  %v15029_v16 = vmul.f32 0.17677669, %v3737_v18 }
 0x5cf   : > { %v3376_v6 = vpop.f32.mrb[98].mxu1 }
 0x5d0   : > { %v11860_v61 = vpop.f32.mrb[99].mxu1  ;;  %v3930_v2 = vsel %vm2137_vm3, %v15015_v35, -inf  ;;  %v3945_v6 = vsel %vm2137_vm3, %v15023_v53, -inf }
 0x5d1   : > { %3934 = vmax.xlane.f32.xlu0 %v3933_v34  ;;  %3931 = vmax.xlane.f32.xlu1 %v3930_v2  ;;  %v3951_v34 = vsel %vm2137_vm3, %v15029_v16, -inf }
 0x5d5   : > { %3940 = vmax.xlane.f32.xlu0 %v3939_v60  ;;  %v3477_v45 = vpop.f32.mrb[100].mxu1 }
 0x5d6   : > { %v15027_v3 = vmul.f32 0.17677669, %v3477_v45  ;;  %v11871_v7 = vpop.f32.mrb[101].mxu1 }
 0x5d7   : > { %v3480_v10 = vpop.f32.mrb[102].mxu1 }
 0x5d8   : > { %v11872_v46 = vpop.f32.mrb[103].mxu1  ;;  %v3936_v61 = vsel %vm2137_vm3, %v15027_v3, -inf  ;;  %v3957_v10 = vsel %vm2137_vm3, %v15035_v40, -inf }
 0x5d9   : > { %3946 = vmax.xlane.f32.xlu0 %v3945_v6  ;;  %3937 = vmax.xlane.f32.xlu1 %v3936_v61 }
 0x5dd   : > { %3952 = vmax.xlane.f32.xlu0 %v3951_v34  ;;  %v3581_v2 = vpop.f32.mrb[104].mxu1 }
 0x5de   : > { %v15039_v60 = vmul.f32 0.17677669, %v3581_v2  ;;  %v11883_v18 = vpop.f32.mrb[105].mxu1 }
 0x5df   : > { %v3584_v45 = vpop.f32.mrb[106].mxu1 }
 0x5e0   : > { %v11884_v7 = vpop.f32.mrb[107].mxu1  ;;  %v3942_v46 = vsel %vm2137_vm3, %v15039_v60, -inf }
 0x5e1   : > { %3958 = vmax.xlane.f32.xlu0 %v3957_v10  ;;  %3943 = vmax.xlane.f32.xlu1 %v3942_v46 }
 0x5e5   : > { %v3685_v50 = vpop.f32.mrb[108].mxu1 }
 0x5e6   : > { %v15045_v6 = vmul.f32 0.17677669, %v3685_v50  ;;  %v11895_v61 = vpop.f32.mrb[109].mxu1  ;;  %v15055_v50 = vpop.permute.xlu0 %4304 }
 0x5e7   : > { %v3688_v33 = vpop.f32.mrb[110].mxu1 }
 0x5e8   : > { %v11896_v34 = vpop.f32.mrb[111].mxu1  ;;  %v3948_v2 = vsel %vm2137_vm3, %v15045_v6, -inf }
 0x5e9   : > { %3949 = vmax.xlane.f32.xlu1 %v3948_v2 }
 0x5ea   : > { %v15059_v2 = vpop.permute.xlu0 %4402 }
 0x5eb   : > { %17696 = vst [vmem:[#allocation74_spill] sm:$0xff] %v15059_v2 }
 0x5ed   : > { %v3789_v18 = vpop.f32.mrb[112].mxu1 }
 0x5ee   : > { %v15049_v45 = vmul.f32 0.17677669, %v3789_v18  ;;  %v11907_v7 = vpop.f32.mrb[113].mxu1  ;;  %v15061_v18 = vpop.permute.xlu0 %4500 }
 0x5ef   : > { %v3792_v1 = vpop.f32.mrb[114].mxu1  ;;  %17697 = vst [vmem:[#allocation75_spill] sm:$0xff] %v15061_v18 }
 0x5f0   : > { %v11908_v41 = vpop.f32.mrb[115].mxu1  ;;  %v3954_v10 = vsel %vm2137_vm3, %v15049_v45, -inf }
 0x5f1   : > { %3955 = vmax.xlane.f32.xlu1 %v3954_v10 }
 0x5f5   : > { %v3893_v46 = vpop.f32.mrb[116].mxu1 }
 0x5f6   : > { %v11919_v33 = vpop.f32.mrb[117].mxu1 }
 0x5f7   : > { %4696 = vrot.lane.b32.xlu0 %v14780_v52, %s13537_s14  ;;  %v3896_v61 = vpop.f32.mrb[118].mxu1 }
 0x5f8   : > { %v11920_v34 = vpop.f32.mrb[119].mxu1 }
 0x602   : > { %4745 = vrot.lane.b32.xlu1 %v14813_v62, %s13537_s14 }
 0x606   : > { %v3917_v41 = vpop.xlane.xlu0 %3916 }
 0x607   : > { %v3963_v1 = vsub.f32 %v14989_v21, %v3917_v41  ;;  %v15075_v21 = vmul.f32 0.17677669, %v3893_v46 }
 0x609   : > { %v3979_v7 = vmul.f32 1.442695, %v3963_v1  ;;  %v3960_v41 = vsel %vm2137_vm3, %v15075_v21, -inf }
 0x60b   : > { %12900 = vpow2.f32 %v3979_v7 }
 0x60e   : > { %v3923_v10 = vpop.xlane.xlu0 %3922 }
 0x60f   : > { %v3965_v33 = vsub.f32 %v14993_v44, %v3923_v10  ;;  %v15079_v44 = vpop.permute.xlu1 %4255 }
 0x611   : > { %v3983_v31 = vmul.f32 1.442695, %v3965_v33 }
 0x613   : > { %12902 = vpow2.f32 %v3983_v31  ;;  %v15081_v31 = vpop.permute.xlu1 %4353 }
 0x615   : > { %v15067_v52 = vpop.eup %12900 }
 0x616   : > { %v4011_v61 = vsel %vm2137_vm3, %v15067_v52, 0.0 }
 0x617   : > { %4012 = vadd.xlane.f32.xlu0 %v4011_v61  ;;  %v15083_v1 = vpop.permute.xlu1 %4451 }
 0x618   : > { %17698 = vst [vmem:[#allocation76_spill] sm:$0xff] %v15083_v1 }
 0x61b   : > { %v15085_v7 = vpop.permute.xlu1 %4549 }
 0x61c   : > { %17699 = vst [vmem:[#allocation77_spill] sm:$0xff] %v15085_v7 }
 0x61d   : > { %v15071_v34 = vpop.eup %12902 }
 0x61e   : > { %v4017_v62 = vsel %vm2137_vm3, %v15071_v34, 0.0 }
 0x61f   : > { %4018 = vadd.xlane.f32.xlu0 %v4017_v62  ;;  %v15087_v10 = vpop.permute.xlu1 %4598 }
 0x620   : > { %17700 = vst [vmem:[#allocation78_spill] sm:$0xff] %v15087_v10 }
 0x623   : > { %v15089_v33 = vpop.permute.xlu1 %4647 }
 0x624   : > { %17701 = vst [vmem:[#allocation79_spill] sm:$0xff] %v15089_v33 }
 0x626   : > { %3961 = vmax.xlane.f32.xlu1 %v3960_v41 }
 0x64e   : > { %v3920_v61 = vpop.xlane.xlu1 %3919 }
 0x64f   : > { %v3964_v62 = vsub.f32 %v15001_v5, %v3920_v61 }
 0x651   : > { %v3981_v46 = vmul.f32 1.442695, %v3964_v62 }
 0x653   : > { %12904 = vpow2.f32 %v3981_v46 }
 0x656   : > { %v3926_v18 = vpop.xlane.xlu0 %3925 }
 0x657   : > { %v3966_v41 = vsub.f32 %v15005_v17, %v3926_v18 }
 0x659   : > { %v3985_v26 = vmul.f32 1.442695, %v3966_v41 }
 0x65a   : > { %v3929_v56 = vpop.xlane.xlu0 %3928 }
 0x65b   : > { %12906 = vpow2.f32 %v3985_v26  ;;  %v3967_v49 = vsub.f32 %v15007_v48, %v3929_v56 }
 0x65d   : > { %v15094_v1 = vpop.eup %12904  ;;  %v3987_v7 = vmul.f32 1.442695, %v3967_v49 }
 0x65e   : > { %v3935_v2 = vpop.xlane.xlu0 %3934  ;;  %v3932_v10 = vpop.xlane.xlu1 %3931  ;;  %v4014_v33 = vsel %vm2137_vm3, %v15094_v1, 0.0 }
 0x65f   : > { %12908 = vpow2.f32 %v3987_v7  ;;  %v3969_v5 = vsub.f32 %v15011_v58, %v3935_v2  ;;  %v3968_v61 = vsub.f32 %v15015_v35, %v3932_v10  ;;  %4015 = vadd.xlane.f32.xlu1 %v4014_v33 }
 0x661   : > { %v3991_v17 = vmul.f32 1.442695, %v3969_v5  ;;  %v3989_v18 = vmul.f32 1.442695, %v3968_v61 }
 0x662   : > { %v3941_v62 = vpop.xlane.xlu0 %3940 }
 0x663   : > { %12910 = vpow2.f32 %v3991_v17  ;;  %v3971_v26 = vsub.f32 %v15017_v9, %v3941_v62 }
 0x664   : > { %12912 = vpow2.f32 %v3989_v18 }
 0x665   : > { %v15100_v56 = vpop.eup %12906  ;;  %v3995_v2 = vmul.f32 1.442695, %v3971_v26 }
 0x666   : > { %v3947_v49 = vpop.xlane.xlu0 %3946  ;;  %v3938_v48 = vpop.xlane.xlu1 %3937  ;;  %v4020_v46 = vsel %vm2137_vm3, %v15100_v56, 0.0 }
 0x667   : > { %v3970_v7 = vsub.f32 %v15027_v3, %v3938_v48  ;;  %4021 = vadd.xlane.f32.xlu1 %v4020_v46  ;;  %v3973_v10 = vsub.f32 %v15023_v53, %v3947_v49 }
 0x669   : > { %v15106_v58 = vpop.eup %12908  ;;  %v3993_v35 = vmul.f32 1.442695, %v3970_v7  ;;  %v3999_v61 = vmul.f32 1.442695, %v3973_v10 }
 0x66a   : > { %v4023_v33 = vsel %vm2137_vm3, %v15106_v58, 0.0  ;;  %v3953_v41 = vpop.xlane.xlu0 %3952 }
 0x66b   : > { %4024 = vadd.xlane.f32.xlu0 %v4023_v33  ;;  %12914 = vpow2.f32 %v3993_v35  ;;  %v3975_v3 = vsub.f32 %v15029_v16, %v3953_v41 }
 0x66c   : > { %12916 = vpow2.f32 %v3995_v2 }
 0x66d   : > { %v15111_v9 = vpop.eup %12910  ;;  %12918 = vpow2.f32 %v3999_v61  ;;  %v4003_v49 = vmul.f32 1.442695, %v3975_v3 }
 0x66e   : > { %v15113_v5 = vpop.eup %12912  ;;  %v3944_v17 = vpop.xlane.xlu1 %3943  ;;  %v4029_v18 = vsel %vm2137_vm3, %v15111_v9, 0.0 }
 0x66f   : > { %v3972_v53 = vsub.f32 %v15039_v60, %v3944_v17  ;;  %4030 = vadd.xlane.f32.xlu0 %v4029_v18  ;;  %v4026_v62 = vsel %vm2137_vm3, %v15113_v5, 0.0 }
 0x670   : > { %4027 = vadd.xlane.f32.xlu1 %v4026_v62 }
 0x671   : > { %v3997_v26 = vmul.f32 1.442695, %v3972_v53 }
 0x673   : > { %12920 = vpow2.f32 %v3997_v26 }
 0x674   : > { %12922 = vpow2.f32 %v4003_v49 }
 0x675   : > { %v15121_v48 = vpop.eup %12914 }
 0x676   : > { %v3950_v46 = vpop.xlane.xlu1 %3949  ;;  %v4032_v7 = vsel %vm2137_vm3, %v15121_v48, 0.0  ;;  %v15126_v35 = vpop.eup %12916 }
 0x677   : > { %v3974_v16 = vsub.f32 %v15045_v6, %v3950_v46  ;;  %4033 = vadd.xlane.f32.xlu1 %v4032_v7  ;;  %v4035_v2 = vsel %vm2137_vm3, %v15126_v35, 0.0  ;;  %v15130_v10 = vpop.eup %12918  ;;  %v3959_v46 = vpop.xlane.xlu0 %3958 }
 0x678   : > { %v4041_v3 = vsel %vm2137_vm3, %v15130_v10, 0.0  ;;  %v3977_v7 = vsub.f32 %v15035_v40, %v3959_v46 }
 0x679   : > { %v4001_v60 = vmul.f32 1.442695, %v3974_v16 }
 0x67b   : > { %12924 = vpow2.f32 %v4001_v60  ;;  %4036 = vadd.xlane.f32.xlu1 %v4035_v2  ;;  %v15153_v16 = vpop.permute.xlu0 %4696  ;;  %v4007_v2 = vmul.f32 1.442695, %v3977_v7 }
 0x67d   : > { %v15132_v33 = vpop.eup %12920 }
 0x67e   : > { %v3956_v41 = vpop.xlane.xlu1 %3955  ;;  %v4038_v6 = vsel %vm2137_vm3, %v15132_v33, 0.0  ;;  %v15139_v17 = vpop.eup %12922 }
 0x67f   : > { %v3976_v61 = vsub.f32 %v15049_v45, %v3956_v41  ;;  %4039 = vadd.xlane.f32.xlu0 %v4038_v6  ;;  %4042 = vadd.xlane.f32.xlu1 %v4041_v3  ;;  %v4047_v53 = vsel %vm2137_vm3, %v15139_v17, 0.0 }
 0x681   : > { %v4005_v18 = vmul.f32 1.442695, %v3976_v61 }
 0x682   : > { %v15158_v6 = vpop.permute.xlu1 %4745 }
 0x683   : > { %12926 = vpow2.f32 %v4005_v18  ;;  %4048 = vadd.xlane.f32.xlu1 %v4047_v53 }
 0x685   : > { %v15143_v62 = vpop.eup %12924 }
 0x686   : > { %v4044_v45 = vsel %vm2137_vm3, %v15143_v62, 0.0 }
 0x687   : > { %4045 = vadd.xlane.f32.xlu0 %v4044_v45  ;;  %v4212_v45 = vsel %vm2333_vm2, %v15051_v19, 0 }
 0x68d   : > { %v15147_v26 = vpop.eup %12926 }
 0x68e   : > { %v4050_v49 = vsel %vm2137_vm3, %v15147_v26, 0.0 }
 0x68f   : > { %4051 = vadd.xlane.f32.xlu0 %v4050_v49 }
 0x694   : > { %4843 = vrot.lane.b32.xlu1 %v14868_v28, %s13537_s14 }
 0x6a4   : > { %v4013_v60 = vpop.xlane.xlu0 %4012 }
 0x6a5   : > { %12928 = vrcp.f32 %v4013_v60  ;;  %4794 = vrot.lane.b32.xlu0 %v14806_v8, %s13537_s14  ;;  %v4310_v60 = vsel %vm2333_vm2, %v15055_v50, 0 }
 0x6a6   : > { %12930 = vpow2.f32 %v4007_v2 }
 0x6ac   : > { %v4019_v41 = vpop.xlane.xlu0 %4018 }
 0x6ad   : > { %12932 = vrcp.f32 %v4019_v41 }
 0x6af   : > { %v12929_v61 = vpop.eup %12928 }
 0x6b0   : > { %v4075_v3 = vmul.f32 %v12929_v61, %v15067_v52  ;;  %v15165_v49 = vpop.eup %12930 }
 0x6b1   : > { %v4053_v52 = vsel %vm2137_vm3, %v15165_v49, 0.0 }
 0x6b2   : > { %v4091_v18 = vpack.c.bf16 %v4075_v3, %v4075_v3 }
 0x6b3   : > { %v3962_v53 = vpop.xlane.xlu1 %3961 }
 0x6b4   : > { %v3978_v40 = vsub.f32 %v15075_v21, %v3962_v53  ;;  %11924 = vmatmul.mubr.msk.bf16.vlgmr.msra.gmra.mrb[120].mxu0 %vm2137_vm3, %v4091_v18 }
 0x6b5   : > { %11934 = vmatpush3.bf16.msra.mxu0 %v4212_v45  ;;  %11935 = vmatprep.mubr.msk.bf16.mxu0 %vm13536_vm0, %v17659_v24  ;;  %v4261_v45 = vsel %vm2333_vm2, %v15079_v44, 0 }
 0x6b6   : > { %v4009_v46 = vmul.f32 1.442695, %v3978_v40  ;;  %11945 = vmatprep.subr.bf16.mxu0 %v17659_v24 }
 0x6b7   : > { %v12933_v7 = vpop.eup %12932 }
 0x6b8   : > { %12934 = vpow2.f32 %v4009_v46  ;;  %v4077_v19 = vmul.f32 %v12933_v7, %v15071_v34  ;;  %4054 = vadd.xlane.f32.xlu1 %v4053_v52 }
 0x6ba   : > { %v4093_v21 = vpack.c.bf16 %v4077_v19, %v4077_v19  ;;  %v4359_v19 = vsel %vm2333_vm2, %v15081_v31, 0 }
 0x6bc   : > { %11936 = vmatmul.mubr.msk.bf16.vlgmr.msra.gmra.mrb[124].mxu0 %vm2137_vm3, %v4093_v21 }
 0x6bd   : > { %11946 = vmatpush3.bf16.msra.mxu0 %v4310_v60  ;;  %11947 = vmatprep.mubr.msk.bf16.mxu0 %vm13536_vm0, %v17659_v24 }
 0x6be   : > { %11957 = vmatprep.subr.bf16.mxu0 %v17659_v24 }
 0x6c2   : > { %v15179_v2 = vpop.eup %12934 }
 0x6c3   : > { %v4056_v41 = vsel %vm2137_vm3, %v15179_v2, 0.0 }
 0x6c4   : > { %4057 = vadd.xlane.f32.xlu0 %v4056_v41 }
 0x6c9   : > { %4943 = vrot.lane.b32.xlu1 %v14204_v22, %s13538_s25 }
 0x6cd   : > { %4941 = vrot.lane.b32.xlu1 %v14236_v42, %s13538_s25 }
 0x6d1   : > { %5043 = vrot.lane.b32.xlu1 %v14256_v54, %s13538_s25 }
 0x6d5   : > { %5041 = vrot.lane.b32.xlu1 %v14309_v36, %s13538_s25 }
 0x6d9   : > { %5143 = vrot.lane.b32.xlu1 %v14296_v20, %s13538_s25 }
 0x6da   : > { %4893 = vrot.lane.b32.xlu0 %v14196_v14, %s13538_s25 }
 0x6dd   : > { %5141 = vrot.lane.b32.xlu1 %v14350_v12, %s13538_s25 }
 0x6de   : > { %4891 = vrot.lane.b32.xlu0 %v14206_v25, %s13538_s25 }
 0x6e1   : > { %5243 = vrot.lane.b32.xlu1 %v14337_v59, %s13538_s25 }
 0x6e2   : > { %4993 = vrot.lane.b32.xlu0 %v14220_v30, %s13538_s25 }
 0x6e5   : > { %5241 = vrot.lane.b32.xlu1 %v14381_v51, %s13538_s25 }
 0x6e6   : > { %4991 = vrot.lane.b32.xlu0 %v14269_v63, %s13538_s25 }
 0x6e9   : > { %5343 = vrot.lane.b32.xlu1 %v17667_v32, %s13538_s25 }
 0x6ea   : > { %5093 = vrot.lane.b32.xlu0 %v14238_v43, %s13538_s25 }
 0x6ec   : > { %v4016_v50 = vpop.xlane.xlu1 %4015 }
 0x6ed   : > { %12936 = vrcp.f32 %v4016_v50  ;;  %5341 = vrot.lane.b32.xlu1 %v17671_v57, %s13538_s25  ;;  %v17702_v50 = vld [vmem:[#allocation74_spill] sm:$0xff] }
 0x6ee   : > { %5091 = vrot.lane.b32.xlu0 %v14258_v55, %s13538_s25 }
 0x6f1   : > { %5443 = vrot.lane.b32.xlu1 %v17672_v39, %s13538_s25 }
 0x6f2   : > { %5193 = vrot.lane.b32.xlu0 %v14271_v0, %s13538_s25 }
 0x6f4   : > { %v4022_v34 = vpop.xlane.xlu1 %4021 }
 0x6f5   : > { %12938 = vrcp.f32 %v4022_v34  ;;  %5441 = vrot.lane.b32.xlu1 %v17673_v27, %s13538_s25 }
 0x6f6   : > { %5191 = vrot.lane.b32.xlu0 %v14298_v23, %s13538_s25 }
 0x6f7   : > { %v12937_v61 = vpop.eup %12936 }
 0x6f8   : > { %v4025_v3 = vpop.xlane.xlu0 %4024  ;;  %v4076_v18 = vmul.f32 %v12937_v61, %v15094_v1 }
 0x6f9   : > { %12940 = vrcp.f32 %v4025_v3  ;;  %5543 = vrot.lane.b32.xlu1 %v17674_v4, %s13538_s25  ;;  %v17703_v3 = vld [vmem:[#allocation55_spill] sm:$0xff] }
 0x6fa   : > { %5293 = vrot.lane.b32.xlu0 %v14311_v38, %s13538_s25  ;;  %v4092_v53 = vpack.c.bf16 %v4076_v18, %v4076_v18  ;;  %v17704_v18 = vld [vmem:[#allocation44_spill] sm:$0xff] }
 0x6fc   : > { %v4031_v40 = vpop.xlane.xlu0 %4030  ;;  %11930 = vmatmul.mubr.msk.bf16.vlgmr.msra.gmra.mrb[120].mxu1 %vm2137_vm3, %v4092_v53 }
 0x6fd   : > { %12942 = vrcp.f32 %v4031_v40  ;;  %11940 = vmatpush3.bf16.msra.mxu1 %v4261_v45  ;;  %v4028_v46 = vpop.xlane.xlu1 %4027  ;;  %11941 = vmatprep.mubr.msk.bf16.mxu1 %vm13536_vm0, %v17659_v24  ;;  %v17705_v40 = vld [vmem:[#allocation76_spill] sm:$0xff] }
 0x6fe   : > { %12944 = vrcp.f32 %v4028_v46  ;;  %5541 = vrot.lane.b32.xlu1 %v17675_v11, %s13538_s25  ;;  %5291 = vrot.lane.b32.xlu0 %v14339_v37, %s13538_s25  ;;  %v4457_v46 = vsel %vm2333_vm2, %v17705_v40, 0  ;;  %v17713_v40 = vld [vmem:[#allocation51_spill] sm:$0xff] }
 0x6ff   : > { %v12939_v1 = vpop.eup %12938  ;;  %11951 = vmatprep.subr.bf16.mxu1 %v17659_v24 }
 0x700   : > { %v4078_v44 = vmul.f32 %v12939_v1, %v15100_v56 }
 0x702   : > { %5643 = vrot.lane.b32.xlu1 %v17676_v13, %s13538_s25  ;;  %5393 = vrot.lane.b32.xlu0 %v14352_v15, %s13538_s25  ;;  %v4094_v7 = vpack.c.bf16 %v4078_v44, %v4078_v44  ;;  %v17706_v44 = vld [vmem:[#allocation61_spill] sm:$0xff] }
 0x703   : > { %v12941_v52 = vpop.eup %12940 }
 0x704   : > { %11942 = vmatmul.mubr.msk.bf16.vlgmr.msra.gmra.mrb[124].mxu1 %vm2137_vm3, %v4094_v7  ;;  %v4079_v21 = vmul.f32 %v12941_v52, %v15106_v58  ;;  %v4034_v60 = vpop.xlane.xlu1 %4033  ;;  %v4408_v58 = vsel %vm2333_vm2, %v17702_v50, 0  ;;  %v17707_v52 = vld [vmem:[#allocation46_spill] sm:$0xff] }
 0x705   : > { %11952 = vmatpush3.bf16.msra.mxu1 %v4359_v19  ;;  %11953 = vmatprep.mubr.msk.bf16.mxu1 %vm13536_vm0, %v17659_v24  ;;  %12946 = vrcp.f32 %v4034_v60  ;;  %v17708_v19 = vld [vmem:[#allocation75_spill] sm:$0xff] }
 0x706   : > { %5641 = vrot.lane.b32.xlu1 %v17677_v29, %s13538_s25  ;;  %5391 = vrot.lane.b32.xlu0 %v14377_v47, %s13538_s25  ;;  %v4095_v56 = vpack.c.bf16 %v4079_v21, %v4079_v21  ;;  %v4506_v21 = vsel %vm2333_vm2, %v17708_v19, 0  ;;  %v17715_v19 = vld [vmem:[#allocation65_spill] sm:$0xff] }
 0x707   : > { %v12943_v41 = vpop.eup %12942  ;;  %11963 = vmatprep.subr.bf16.mxu1 %v17659_v24 }
 0x708   : > { %v12945_v31 = vpop.eup %12944  ;;  %11948 = vmatmul.mubr.msk.bf16.vlgmr.msra.gmra.mrb[128].mxu0 %vm2137_vm3, %v4095_v56  ;;  %v4037_v34 = vpop.xlane.xlu1 %4036  ;;  %v4081_v53 = vmul.f32 %v12943_v41, %v15111_v9  ;;  %v17709_v56 = vld [vmem:[#allocation62_spill] sm:$0xff] }
 0x709   : > { %11958 = vmatpush3.bf16.msra.mxu0 %v4408_v58  ;;  %v4080_v61 = vmul.f32 %v12945_v31, %v15113_v5  ;;  %11959 = vmatprep.mubr.msk.bf16.mxu0 %vm13536_vm0, %v17659_v24  ;;  %12948 = vrcp.f32 %v4037_v34  ;;  %v17710_v31 = vld [vmem:[#allocation48_spill] sm:$0xff] }
 0x70a   : > { %5947 = vrot.lane.b32.xlu1 %v17703_v3, %s13538_s25  ;;  %5493 = vrot.lane.b32.xlu0 %v17704_v18, %s13538_s25  ;;  %v4097_v7 = vpack.c.bf16 %v4081_v53, %v4081_v53 }
 0x70b   : > { %v4096_v45 = vpack.c.bf16 %v4080_v61, %v4080_v61  ;;  %11969 = vmatprep.subr.bf16.mxu0 %v17659_v24  ;;  %v17711_v61 = vld [vmem:[#allocation77_spill] sm:$0xff] }
 0x70c   : > { %v4040_v1 = vpop.xlane.xlu0 %4039  ;;  %v4043_v5 = vpop.xlane.xlu1 %4042  ;;  %v4555_v53 = vsel %vm2333_vm2, %v17711_v61, 0 }
 0x70d   : > { %11954 = vmatmul.mubr.msk.bf16.vlgmr.msra.gmra.mrb[128].mxu1 %vm2137_vm3, %v4096_v45  ;;  %12950 = vrcp.f32 %v4040_v1  ;;  %v17712_v45 = vld [vmem:[#allocation63_spill] sm:$0xff] }
 0x70e   : > { %11964 = vmatpush3.bf16.msra.mxu1 %v4457_v46  ;;  %6043 = vrot.lane.b32.xlu1 %v17706_v44, %s13538_s25  ;;  %12952 = vrcp.f32 %v4043_v5 }
 0x70f   : > { %5491 = vrot.lane.b32.xlu0 %v17707_v52, %s13538_s25  ;;  %11965 = vmatprep.mubr.msk.bf16.mxu1 %vm13536_vm0, %v17659_v24  ;;  %v12947_v9 = vpop.eup %12946 }
 0x710   : > { %11960 = vmatmul.mubr.msk.bf16.vlgmr.msra.gmra.mrb[132].mxu0 %vm2137_vm3, %v4097_v7  ;;  %11975 = vmatprep.subr.bf16.mxu1 %v17659_v24  ;;  %v4082_v60 = vmul.f32 %v12947_v9, %v15121_v48  ;;  %v4049_v41 = vpop.xlane.xlu1 %4048  ;;  %v17714_v7 = vld [vmem:[#allocation78_spill] sm:$0xff] }
 0x711   : > { %11970 = vmatpush3.bf16.msra.mxu0 %v4506_v21  ;;  %11971 = vmatprep.mubr.msk.bf16.mxu0 %vm13536_vm0, %v17659_v24  ;;  %v4604_v9 = vsel %vm2333_vm2, %v17714_v7, 0  ;;  %v17716_v21 = vld [vmem:[#allocation50_spill] sm:$0xff] }
 0x712   : > { %6139 = vrot.lane.b32.xlu1 %v17709_v56, %s13538_s25  ;;  %11981 = vmatprep.subr.bf16.mxu0 %v17659_v24  ;;  %v4098_v50 = vpack.c.bf16 %v4082_v60, %v4082_v60 }
 0x713   : > { %5593 = vrot.lane.b32.xlu0 %v17710_v31, %s13538_s25  ;;  %v12949_v58 = vpop.eup %12948 }
 0x714   : > { %v4046_v34 = vpop.xlane.xlu0 %4045  ;;  %v4083_v48 = vmul.f32 %v12949_v58, %v15126_v35  ;;  %v17717_v58 = vld [vmem:[#allocation79_spill] sm:$0xff] }
 0x715   : > { %12954 = vrcp.f32 %v4046_v34  ;;  %11966 = vmatmul.mubr.msk.bf16.vlgmr.msra.gmra.mrb[132].mxu1 %vm2137_vm3, %v4098_v50  ;;  %v4653_v34 = vsel %vm2333_vm2, %v17717_v58, 0 }
 0x716   : > { %12956 = vrcp.f32 %v4049_v41  ;;  %11976 = vmatpush3.bf16.msra.mxu1 %v4555_v53  ;;  %6235 = vrot.lane.b32.xlu1 %v17712_v45, %s13538_s25  ;;  %v4099_v46 = vpack.c.bf16 %v4083_v48, %v4083_v48  ;;  %v17719_v53 = vld [vmem:[#allocation57_spill] sm:$0xff] }
 0x717   : > { %5591 = vrot.lane.b32.xlu0 %v17713_v40, %s13538_s25  ;;  %11977 = vmatprep.mubr.msk.bf16.mxu1 %vm13536_vm0, %v17659_v24  ;;  %v12951_v1 = vpop.eup %12950 }
 0x718   : > { %11987 = vmatprep.subr.bf16.mxu1 %v17659_v24  ;;  %v12953_v5 = vpop.eup %12952  ;;  %11972 = vmatmul.mubr.msk.bf16.vlgmr.msra.gmra.mrb[136].mxu0 %vm2137_vm3, %v4099_v46  ;;  %v4084_v35 = vmul.f32 %v12951_v1, %v15132_v33  ;;  %v17718_v33 = vld [vmem:[#allocation64_spill] sm:$0xff]  ;;  %v4702_v1 = vsel %vm2333_vm2, %v15153_v16, 0 }
 0x719   : > { %11982 = vmatpush3.bf16.msra.mxu0 %v4604_v9  ;;  %11983 = vmatprep.mubr.msk.bf16.mxu0 %vm13536_vm0, %v17659_v24  ;;  %v4085_v41 = vmul.f32 %v12953_v5, %v15130_v10  ;;  %v17720_v5 = vld [vmem:[#allocation67_spill] sm:$0xff]  ;;  %v17721_v9 = vld [vmem:[#allocation58_spill] sm:$0xff] }
 0x71a   : > { %6331 = vrot.lane.b32.xlu1 %v17715_v19, %s13538_s25  ;;  %v4100_v60 = vpack.c.bf16 %v4084_v35, %v4084_v35  ;;  %11993 = vmatprep.subr.bf16.mxu0 %v17659_v24 }
 0x71b   : > { %5899 = vrot.lane.b32.xlu0 %v17716_v21, %s13538_s25  ;;  %v4101_v48 = vpack.c.bf16 %v4085_v41, %v4085_v41  ;;  %v17722_v41 = vld [vmem:[#allocation59_spill] sm:$0xff] }
 0x71c   : > { %v4052_v50 = vpop.xlane.xlu0 %4051 }
 0x71d   : > { %12958 = vrcp.f32 %v4052_v50  ;;  %11978 = vmatmul.mubr.msk.bf16.vlgmr.msra.gmra.mrb[136].mxu1 %vm2137_vm3, %v4100_v60 }
 0x71e   : > { %11988 = vmatpush3.bf16.msra.mxu1 %v4653_v34  ;;  %6379 = vrot.lane.b32.xlu1 %v17718_v33, %s13538_s25 }
 0x71f   : > { %v12955_v61 = vpop.eup %12954  ;;  %5995 = vrot.lane.b32.xlu0 %v17719_v53, %s13538_s25  ;;  %11989 = vmatprep.mubr.msk.bf16.mxu1 %vm13536_vm0, %v17659_v24 }
 0x720   : > { %v12957_v10 = vpop.eup %12956  ;;  %11999 = vmatprep.subr.bf16.mxu1 %v17659_v24  ;;  %v4086_v46 = vmul.f32 %v12955_v61, %v15143_v62  ;;  %11984 = vmatmul.mubr.msk.bf16.vlgmr.msra.gmra.mrb[140].mxu0 %vm2137_vm3, %v4101_v48  ;;  %v4751_v62 = vsel %vm2333_vm2, %v15158_v6, 0  ;;  %v4795_v16 = vpop.permute.xlu0 %4794  ;;  %v17723_v61 = vld [vmem:[#allocation60_spill] sm:$0xff] }
 0x721   : > { %11994 = vmatpush3.bf16.msra.mxu0 %v4702_v1  ;;  %11995 = vmatprep.mubr.msk.bf16.mxu0 %vm13536_vm0, %v17659_v24  ;;  %v4087_v35 = vmul.f32 %v12957_v10, %v15139_v17  ;;  %v4800_v58 = vsel %vm2333_vm2, %v4795_v16, 0  ;;  %v4844_v6 = vpop.permute.xlu1 %4843 }
 0x722   : > { %6427 = vrot.lane.b32.xlu1 %v17720_v5, %s13538_s25  ;;  %v4102_v7 = vpack.c.bf16 %v4086_v46, %v4086_v46  ;;  %12005 = vmatprep.subr.bf16.mxu0 %v17659_v24  ;;  %v4849_v48 = vsel %vm2333_vm2, %v4844_v6, 0 }
 0x723   : > { %6091 = vrot.lane.b32.xlu0 %v17721_v9, %s13538_s25  ;;  %v4103_v50 = vpack.c.bf16 %v4087_v35, %v4087_v35 }
 0x725   : > { %11990 = vmatmul.mubr.msk.bf16.vlgmr.msra.gmra.mrb[140].mxu1 %vm2137_vm3, %v4102_v7 }
 0x726   : > { %12000 = vmatpush3.bf16.msra.mxu1 %v4751_v62  ;;  %12001 = vmatprep.mubr.msk.bf16.mxu1 %vm13536_vm0, %v17659_v24 }
 0x727   : > { %v12959_v60 = vpop.eup %12958  ;;  %6187 = vrot.lane.b32.xlu0 %v17722_v41, %s13538_s25  ;;  %12011 = vmatprep.subr.bf16.mxu1 %v17659_v24 }
 0x728   : > { %v4088_v17 = vmul.f32 %v12959_v60, %v15147_v26  ;;  %11996 = vmatmul.mubr.msk.bf16.vlgmr.msra.gmra.mrb[144].mxu0 %vm2137_vm3, %v4103_v50 }
 0x729   : > { %12006 = vmatpush3.bf16.msra.mxu0 %v4800_v58  ;;  %12007 = vmatprep.mubr.msk.bf16.mxu0 %vm13536_vm0, %v17659_v24 }
 0x72a   : > { %v4104_v34 = vpack.c.bf16 %v4088_v17, %v4088_v17  ;;  %12017 = vmatprep.subr.bf16.mxu0 %v17659_v24 }
 0x72b   : > { %6283 = vrot.lane.b32.xlu0 %v17723_v61, %s13538_s25 }
 0x72d   : > { %12002 = vmatmul.mubr.msk.bf16.vlgmr.msra.gmra.mrb[144].mxu1 %vm2137_vm3, %v4104_v34 }
 0x72e   : > { %12012 = vmatpush3.bf16.msra.mxu1 %v4849_v48  ;;  %12013 = vmatprep.mubr.msk.bf16.mxu1 %vm13536_vm0, %v17659_v24 }
 0x72f   : > { %12023 = vmatprep.subr.bf16.mxu1 %v17659_v24 }
 0x745   : > { %v4055_v26 = vpop.xlane.xlu1 %4054 }
 0x746   : > { %12960 = vrcp.f32 %v4055_v26 }
 0x749   : > { %v4944_v10 = vpop.permute.xlu1 %4943 }
 0x74d   : > { %v4942_v46 = vpop.permute.xlu1 %4941 }
 0x750   : > { %v12961_v1 = vpop.eup %12960 }
 0x751   : > { %v4058_v7 = vpop.xlane.xlu0 %4057  ;;  %v5044_v35 = vpop.permute.xlu1 %5043  ;;  %v4089_v62 = vmul.f32 %v12961_v1, %v15165_v49 }
 0x752   : > { %12962 = vrcp.f32 %v4058_v7 }
 0x753   : > { %v4105_v16 = vpack.c.bf16 %v4089_v62, %v4089_v62  ;;  %v4949_v62 = vsel %vm1384_vm1, %v4944_v10, 0 }
 0x755   : > { %v4894_v60 = vpop.permute.xlu0 %4893  ;;  %12008 = vmatmul.mubr.msk.bf16.vlgmr.msra.gmra.mrb[148].mxu0 %vm2137_vm3, %v4105_v16  ;;  %v5042_v17 = vpop.permute.xlu1 %5041 }
 0x756   : > { %v4899_v50 = vsel %vm1384_vm1, %v4894_v60, 0  ;;  %12019 = vmatprep.mubr.msk.bf16.mxu0 %vm13536_vm0, %v17659_v24 }
 0x757   : > { %12018 = vmatpush3.bf16.xpose.msra.mxu0 %v4899_v50 }
 0x758   : > { %12029 = vmatprep.subr.bf16.mxu0 %v17659_v24 }
 0x759   : > { %v4892_v58 = vpop.permute.xlu0 %4891  ;;  %v5144_v6 = vpop.permute.xlu1 %5143 }
 0x75c   : > { %v12963_v34 = vpop.eup %12962 }
 0x75d   : > { %v4994_v48 = vpop.permute.xlu0 %4993  ;;  %v4090_v26 = vmul.f32 %v12963_v34, %v15179_v2  ;;  %v5142_v1 = vpop.permute.xlu1 %5141 }
 0x75e   : > { %v4999_v49 = vsel %vm1384_vm1, %v4994_v48, 0  ;;  %12020 = vmatmul.mubr.msk.bf16.vlgmr.msra.gmra.mrb[152].mxu0 %vm1384_vm1, %v4892_v58  ;;  %v5049_v58 = vsel %vm1384_vm1, %v5044_v35, 0 }
 0x75f   : > { %12030 = vmatpush3.bf16.xpose.msra.mxu0 %v4999_v49  ;;  %v4106_v7 = vpack.c.bf16 %v4090_v26, %v4090_v26  ;;  %12031 = vmatprep.mubr.msk.bf16.mxu0 %vm13536_vm0, %v17659_v24 }
 0x760   : > { %12041 = vmatprep.subr.bf16.mxu0 %v17659_v24 }
 0x761   : > { %v4992_v16 = vpop.permute.xlu0 %4991  ;;  %12014 = vmatmul.mubr.msk.bf16.vlgmr.msra.gmra.mrb[148].mxu1 %vm2137_vm3, %v4106_v7  ;;  %v5244_v60 = vpop.permute.xlu1 %5243 }
 0x762   : > { %12024 = vmatpush3.bf16.xpose.msra.mxu1 %v4949_v62  ;;  %12025 = vmatprep.mubr.msk.bf16.mxu1 %vm13536_vm0, %v17659_v24 }
 0x763   : > { %12035 = vmatprep.subr.bf16.mxu1 %v17659_v24 }
 0x765   : > { %v5094_v2 = vpop.permute.xlu0 %5093  ;;  %v5242_v10 = vpop.permute.xlu1 %5241 }
 0x766   : > { %v5099_v50 = vsel %vm1384_vm1, %v5094_v2, 0  ;;  %12032 = vmatmul.mubr.msk.bf16.vlgmr.msra.gmra.mrb[156].mxu0 %vm1384_vm1, %v4992_v16 }
 0x767   : > { %12042 = vmatpush3.bf16.xpose.msra.mxu0 %v5099_v50  ;;  %12043 = vmatprep.mubr.msk.bf16.mxu0 %vm13536_vm0, %v17659_v24 }
 0x768   : > { %12053 = vmatprep.subr.bf16.mxu0 %v17659_v24 }
 0x769   : > { %v5092_v34 = vpop.permute.xlu0 %5091  ;;  %12026 = vmatmul.mubr.msk.bf16.vlgmr.msra.gmra.mrb[152].mxu1 %vm1384_vm1, %v4942_v46  ;;  %v5344_v26 = vpop.permute.xlu1 %5343  ;;  %v5149_v46 = vsel %vm1384_vm1, %v5144_v6, 0 }
 0x76a   : > { %12036 = vmatpush3.bf16.xpose.msra.mxu1 %v5049_v58  ;;  %12037 = vmatprep.mubr.msk.bf16.mxu1 %vm13536_vm0, %v17659_v24 }
 0x76b   : > { %12047 = vmatprep.subr.bf16.mxu1 %v17659_v24 }
 0x76d   : > { %v5194_v48 = vpop.permute.xlu0 %5193  ;;  %v5342_v7 = vpop.permute.xlu1 %5341 }
 0x76e   : > { %v5199_v49 = vsel %vm1384_vm1, %v5194_v48, 0  ;;  %12044 = vmatmul.mubr.msk.bf16.vlgmr.msra.gmra.mrb[160].mxu0 %vm1384_vm1, %v5092_v34 }
 0x76f   : > { %12054 = vmatpush3.bf16.xpose.msra.mxu0 %v5199_v49  ;;  %12055 = vmatprep.mubr.msk.bf16.mxu0 %vm13536_vm0, %v17659_v24 }
 0x770   : > { %12065 = vmatprep.subr.bf16.mxu0 %v17659_v24 }
 0x771   : > { %v5192_v35 = vpop.permute.xlu0 %5191  ;;  %12038 = vmatmul.mubr.msk.bf16.vlgmr.msra.gmra.mrb[156].mxu1 %vm1384_vm1, %v5042_v17  ;;  %v5249_v17 = vsel %vm1384_vm1, %v5244_v60, 0  ;;  %v5444_v2 = vpop.permute.xlu1 %5443 }
 0x772   : > { %12048 = vmatpush3.bf16.xpose.msra.mxu1 %v5149_v46  ;;  %12049 = vmatprep.mubr.msk.bf16.mxu1 %vm13536_vm0, %v17659_v24 }
 0x773   : > { %12059 = vmatprep.subr.bf16.mxu1 %v17659_v24 }
 0x775   : > { %v5294_v62 = vpop.permute.xlu0 %5293  ;;  %v5442_v60 = vpop.permute.xlu1 %5441 }
 0x776   : > { %v5299_v16 = vsel %vm1384_vm1, %v5294_v62, 0  ;;  %12056 = vmatmul.mubr.msk.bf16.vlgmr.msra.gmra.mrb[164].mxu0 %vm1384_vm1, %v5192_v35 }
 0x777   : > { %12066 = vmatpush3.bf16.xpose.msra.mxu0 %v5299_v16  ;;  %12067 = vmatprep.mubr.msk.bf16.mxu0 %vm13536_vm0, %v17659_v24 }
 0x778   : > { %12077 = vmatprep.subr.bf16.mxu0 %v17659_v24 }
 0x779   : > { %v5292_v6 = vpop.permute.xlu0 %5291  ;;  %12050 = vmatmul.mubr.msk.bf16.vlgmr.msra.gmra.mrb[160].mxu1 %vm1384_vm1, %v5142_v1  ;;  %v5349_v1 = vsel %vm1384_vm1, %v5344_v26, 0  ;;  %v5544_v49 = vpop.permute.xlu1 %5543 }
 0x77a   : > { %12060 = vmatpush3.bf16.xpose.msra.mxu1 %v5249_v17  ;;  %12061 = vmatprep.mubr.msk.bf16.mxu1 %vm13536_vm0, %v17659_v24 }
 0x77b   : > { %12071 = vmatprep.subr.bf16.mxu1 %v17659_v24 }
 0x77d   : > { %v5394_v50 = vpop.permute.xlu0 %5393 }
 0x77e   : > { %v5399_v58 = vsel %vm1384_vm1, %v5394_v50, 0  ;;  %12068 = vmatmul.mubr.msk.bf16.vlgmr.msra.gmra.mrb[168].mxu0 %vm1384_vm1, %v5292_v6  ;;  %v5542_v6 = vpop.permute.xlu1 %5541 }
 0x77f   : > { %12078 = vmatpush3.bf16.xpose.msra.mxu0 %v5399_v58  ;;  %12079 = vmatprep.mubr.msk.bf16.mxu0 %vm13536_vm0, %v17659_v24 }
 0x780   : > { %12089 = vmatprep.subr.bf16.mxu0 %v17659_v24 }
 0x781   : > { %v5392_v34 = vpop.permute.xlu0 %5391  ;;  %12062 = vmatmul.mubr.msk.bf16.vlgmr.msra.gmra.mrb[164].mxu1 %vm1384_vm1, %v5242_v10  ;;  %v5449_v10 = vsel %vm1384_vm1, %v5444_v2, 0  ;;  %v5549_v2 = vsel %vm1384_vm1, %v5544_v49, 0 }
 0x782   : > { %12072 = vmatpush3.bf16.xpose.msra.mxu1 %v5349_v1  ;;  %12073 = vmatprep.mubr.msk.bf16.mxu1 %vm13536_vm0, %v17659_v24 }
 0x783   : > { %12083 = vmatprep.subr.bf16.mxu1 %v17659_v24 }
 0x785   : > { %v5494_v48 = vpop.permute.xlu0 %5493 }
 0x786   : > { %v5499_v46 = vsel %vm1384_vm1, %v5494_v48, 0  ;;  %12080 = vmatmul.mubr.msk.bf16.vlgmr.msra.gmra.mrb[172].mxu0 %vm1384_vm1, %v5392_v34 }
 0x787   : > { %v15412_v35 = vpop.f32.mrb[120].mxu0  ;;  %12090 = vmatpush3.bf16.xpose.msra.mxu0 %v5499_v46  ;;  %12091 = vmatprep.mubr.msk.bf16.mxu0 %vm13536_vm0, %v17659_v24  ;;  %v5644_v46 = vpop.permute.xlu1 %5643 }
 0x788   : > { %17724 = vst [vmem:[#allocation74_spill] sm:$0xff] %v15412_v35  ;;  %v11925_v26 = vpop.f32.mrb[121].mxu0  ;;  %12101 = vmatprep.subr.bf16.mxu0 %v17659_v24 }
 0x789   : > { %v4153_v62 = vpop.f32.mrb[122].mxu0  ;;  %v5492_v16 = vpop.permute.xlu0 %5491  ;;  %12074 = vmatmul.mubr.msk.bf16.vlgmr.msra.gmra.mrb[168].mxu1 %vm1384_vm1, %v5342_v7 }
 0x78a   : > { %12084 = vmatpush3.bf16.xpose.msra.mxu1 %v5449_v10  ;;  %v11926_v17 = vpop.f32.mrb[123].mxu0  ;;  %12085 = vmatprep.mubr.msk.bf16.mxu1 %vm13536_vm0, %v17659_v24 }
 0x78b   : > { %12095 = vmatprep.subr.bf16.mxu1 %v17659_v24  ;;  %v5642_v49 = vpop.permute.xlu1 %5641 }
 0x78d   : > { %v5594_v50 = vpop.permute.xlu0 %5593 }
 0x78e   : > { %v5599_v58 = vsel %vm1384_vm1, %v5594_v50, 0  ;;  %12092 = vmatmul.mubr.msk.bf16.vlgmr.msra.gmra.mrb[176].mxu0 %vm1384_vm1, %v5492_v16 }
 0x78f   : > { %v15424_v1 = vpop.f32.mrb[124].mxu0  ;;  %12102 = vmatpush3.bf16.xpose.msra.mxu0 %v5599_v58  ;;  %12103 = vmatprep.mubr.msk.bf16.mxu0 %vm13536_vm0, %v17659_v24  ;;  %v5948_v16 = vpop.permute.xlu1 %5947 }
 0x790   : > { %17725 = vst [vmem:[#allocation76_spill] sm:$0xff] %v15424_v1  ;;  %v11937_v7 = vpop.f32.mrb[125].mxu0  ;;  %12113 = vmatprep.subr.bf16.mxu0 %v17659_v24  ;;  %v5953_v17 = vsel %vm2333_vm2, %v5948_v16, 0 }
 0x791   : > { %v4251_v34 = vpop.f32.mrb[126].mxu0  ;;  %v5592_v48 = vpop.permute.xlu0 %5591  ;;  %12086 = vmatmul.mubr.msk.bf16.vlgmr.msra.gmra.mrb[172].mxu1 %vm1384_vm1, %v5442_v60  ;;  %v5649_v60 = vsel %vm1384_vm1, %v5644_v46, 0 }
 0x792   : > { %12096 = vmatpush3.bf16.xpose.msra.mxu1 %v5549_v2  ;;  %v11938_v26 = vpop.f32.mrb[127].mxu0  ;;  %12097 = vmatprep.mubr.msk.bf16.mxu1 %vm13536_vm0, %v17659_v24 }
 0x793   : > { %12107 = vmatprep.subr.bf16.mxu1 %v17659_v24 }
 0x795   : > { %v5900_v10 = vpop.permute.xlu0 %5899 }
 0x796   : > { %v5905_v62 = vsel %vm2333_vm2, %v5900_v10, 0  ;;  %12104 = vmatmul.mubr.msk.bf16.vlgmr.msra.gmra.mrb[180].mxu0 %vm1384_vm1, %v5592_v48 }
 0x797   : > { %12114 = vmatpush3.bf16.msra.mxu0 %v5905_v62  ;;  %12115 = vmatprep.mubr.msk.bf16.mxu0 %vm13536_vm0, %v17659_v24 }
 0x798   : > { %12125 = vmatprep.subr.bf16.mxu0 %v17659_v24 }
 0x799   : > { %12098 = vmatmul.mubr.msk.bf16.vlgmr.msra.gmra.mrb[176].mxu1 %vm1384_vm1, %v5542_v6 }
 0x79a   : > { %12108 = vmatpush3.bf16.xpose.msra.mxu1 %v5649_v60  ;;  %12109 = vmatprep.mubr.msk.bf16.mxu1 %vm13536_vm0, %v17659_v24 }
 0x79b   : > { %12119 = vmatprep.subr.bf16.mxu1 %v17659_v24 }
 0x7a1   : > { %12110 = vmatmul.mubr.msk.bf16.vlgmr.msra.gmra.mrb[180].mxu1 %vm1384_vm1, %v5642_v49 }
 0x7a2   : > { %12120 = vmatpush3.bf16.msra.mxu1 %v5953_v17  ;;  %12121 = vmatprep.mubr.msk.bf16.mxu1 %vm13536_vm0, %v17659_v24 }
 0x7a3   : > { %12131 = vmatprep.subr.bf16.mxu1 %v17659_v24 }
 0x7cf   : > { %v15449_v50 = vpop.f32.mrb[120].mxu1 }
 0x7d0   : > { %17726 = vst [vmem:[#allocation75_spill] sm:$0xff] %v15449_v50  ;;  %v11931_v58 = vpop.f32.mrb[121].mxu1 }
 0x7d1   : > { %v4202_v7 = vpop.f32.mrb[122].mxu1 }
 0x7d2   : > { %v11932_v2 = vpop.f32.mrb[123].mxu1 }
 0x7d7   : > { %v15453_v34 = vpop.f32.mrb[124].mxu1 }
 0x7d8   : > { %17727 = vst [vmem:[#allocation77_spill] sm:$0xff] %v15453_v34  ;;  %v11943_v46 = vpop.f32.mrb[125].mxu1 }
 0x7d9   : > { %v4300_v26 = vpop.f32.mrb[126].mxu1 }
 0x7da   : > { %v11944_v10 = vpop.f32.mrb[127].mxu1 }
 0x7db   : > { %v15457_v62 = vpop.f32.mrb[128].mxu0 }
 0x7dc   : > { %17728 = vst [vmem:[#allocation78_spill] sm:$0xff] %v15457_v62  ;;  %v11949_v49 = vpop.f32.mrb[129].mxu0 }
 0x7dd   : > { %v4349_v60 = vpop.f32.mrb[130].mxu0 }
 0x7de   : > { %v11950_v16 = vpop.f32.mrb[131].mxu0 }
 0x7e0   : > { %v15459_v17 = vpop.f32.mrb[128].mxu1 }
 0x7e1   : > { %17729 = vst [vmem:[#allocation79_spill] sm:$0xff] %v15459_v17  ;;  %v11955_v7 = vpop.f32.mrb[129].mxu1 }
 0x7e2   : > { %v4398_v2 = vpop.f32.mrb[130].mxu1 }
 0x7e3   : > { %v11956_v6 = vpop.f32.mrb[131].mxu1  ;;  %v15463_v35 = vpop.f32.mrb[132].mxu0 }
 0x7e4   : > { %17730 = vst [vmem:[#allocation80_spill] sm:$0xff] %v15463_v35  ;;  %v11961_v50 = vpop.f32.mrb[133].mxu0 }
 0x7e5   : > { %v4447_v48 = vpop.f32.mrb[134].mxu0 }
 0x7e6   : > { %v11962_v46 = vpop.f32.mrb[135].mxu0 }
 0x7e8   : > { %v15465_v26 = vpop.f32.mrb[132].mxu1 }
 0x7e9   : > { %17731 = vst [vmem:[#allocation81_spill] sm:$0xff] %v15465_v26  ;;  %v11967_v49 = vpop.f32.mrb[133].mxu1 }
 0x7ea   : > { %v4496_v60 = vpop.f32.mrb[134].mxu1 }
 0x7eb   : > { %v11968_v16 = vpop.f32.mrb[135].mxu1  ;;  %v15469_v1 = vpop.f32.mrb[136].mxu0 }
 0x7ec   : > { %17732 = vst [vmem:[#allocation82_spill] sm:$0xff] %v15469_v1  ;;  %v11973_v34 = vpop.f32.mrb[137].mxu0 }
 0x7ed   : > { %v4545_v58 = vpop.f32.mrb[138].mxu0 }
 0x7ee   : > { %v11974_v7 = vpop.f32.mrb[139].mxu0 }
 0x7f0   : > { %v15471_v2 = vpop.f32.mrb[136].mxu1 }
 0x7f1   : > { %17733 = vst [vmem:[#allocation83_spill] sm:$0xff] %v15471_v2  ;;  %v11979_v6 = vpop.f32.mrb[137].mxu1 }
 0x7f2   : > { %v4594_v48 = vpop.f32.mrb[138].mxu1 }
 0x7f3   : > { %v11980_v46 = vpop.f32.mrb[139].mxu1  ;;  %v15475_v62 = vpop.f32.mrb[140].mxu0 }
 0x7f4   : > { %17734 = vst [vmem:[#allocation84_spill] sm:$0xff] %v15475_v62  ;;  %v11985_v17 = vpop.f32.mrb[141].mxu0 }
 0x7f5   : > { %v4643_v10 = vpop.f32.mrb[142].mxu0 }
 0x7f6   : > { %v11986_v49 = vpop.f32.mrb[143].mxu0 }
 0x7f8   : > { %v15477_v60 = vpop.f32.mrb[140].mxu1 }
 0x7f9   : > { %17735 = vst [vmem:[#allocation85_spill] sm:$0xff] %v15477_v60  ;;  %v11991_v58 = vpop.f32.mrb[141].mxu1 }
 0x7fa   : > { %v4692_v16 = vpop.f32.mrb[142].mxu1 }
 0x7fb   : > { %v11992_v7 = vpop.f32.mrb[143].mxu1  ;;  %v15481_v35 = vpop.f32.mrb[144].mxu0 }
 0x7fc   : > { %17736 = vst [vmem:[#allocation86_spill] sm:$0xff] %v15481_v35  ;;  %v11997_v26 = vpop.f32.mrb[145].mxu0 }
 0x7fd   : > { %v4741_v50 = vpop.f32.mrb[146].mxu0 }
 0x7fe   : > { %v11998_v6 = vpop.f32.mrb[147].mxu0 }
 0x800   : > { %v15483_v48 = vpop.f32.mrb[144].mxu1 }
 0x801   : > { %17737 = vst [vmem:[#allocation87_spill] sm:$0xff] %v15483_v48  ;;  %v12003_v10 = vpop.f32.mrb[145].mxu1 }
 0x802   : > { %v4790_v46 = vpop.f32.mrb[146].mxu1 }
 0x803   : > { %v12004_v49 = vpop.f32.mrb[147].mxu1 }
 0x828   : > { %v15487_v1 = vpop.f32.mrb[148].mxu0 }
 0x829   : > { %17738 = vst [vmem:[#allocation88_spill] sm:$0xff] %v15487_v1  ;;  %v12009_v2 = vpop.f32.mrb[149].mxu0 }
 0x82a   : > { %v4839_v34 = vpop.f32.mrb[150].mxu0 }
 0x82b   : > { %v12010_v58 = vpop.f32.mrb[151].mxu0 }
 0x831   : > { %v4935_v16 = vpop.f32.mrb[152].mxu0 }
 0x832   : > { %v15489_v7 = vmul.f32 0.17677669, %v4935_v16  ;;  %v12021_v62 = vpop.f32.mrb[153].mxu0 }
 0x833   : > { %v4938_v26 = vpop.f32.mrb[154].mxu0 }
 0x834   : > { %v15491_v50 = vpop.f32.mrb[148].mxu1  ;;  %v12022_v6 = vpop.f32.mrb[155].mxu0  ;;  %v5707_v60 = vsel %vm2137_vm3, %v15489_v7, -inf }
 0x835   : > { %17739 = vst [vmem:[#allocation89_spill] sm:$0xff] %v15491_v50  ;;  %5708 = vmax.xlane.f32.xlu0 %v5707_v60  ;;  %v12015_v46 = vpop.f32.mrb[149].mxu1 }
 0x836   : > { %v4888_v49 = vpop.f32.mrb[150].mxu1 }
 0x837   : > { %v12016_v2 = vpop.f32.mrb[151].mxu1 }
 0x839   : > { %v5035_v34 = vpop.f32.mrb[156].mxu0 }
 0x83a   : > { %v15497_v58 = vmul.f32 0.17677669, %v5035_v34  ;;  %v12033_v16 = vpop.f32.mrb[157].mxu0 }
 0x83b   : > { %v5038_v17 = vpop.f32.mrb[158].mxu0 }
 0x83c   : > { %v4985_v62 = vpop.f32.mrb[152].mxu1  ;;  %v12034_v26 = vpop.f32.mrb[159].mxu0  ;;  %v5713_v6 = vsel %vm2137_vm3, %v15497_v58, -inf }
 0x83d   : > { %v15501_v35 = vmul.f32 0.17677669, %v4985_v62  ;;  %5714 = vmax.xlane.f32.xlu0 %v5713_v6  ;;  %v12027_v48 = vpop.f32.mrb[153].mxu1 }
 0x83e   : > { %v4988_v5 = vpop.f32.mrb[154].mxu1 }
 0x83f   : > { %v12028_v10 = vpop.f32.mrb[155].mxu1  ;;  %v5710_v60 = vsel %vm2137_vm3, %v15501_v35, -inf }
 0x840   : > { %5711 = vmax.xlane.f32.xlu1 %v5710_v60 }
 0x841   : > { %v5135_v46 = vpop.f32.mrb[160].mxu0 }
 0x842   : > { %v12045_v49 = vpop.f32.mrb[161].mxu0  ;;  %v15507_v50 = vmul.f32 0.17677669, %v5135_v46 }
 0x843   : > { %v5138_v2 = vpop.f32.mrb[162].mxu0 }
 0x844   : > { %v5085_v34 = vpop.f32.mrb[156].mxu1  ;;  %v12046_v17 = vpop.f32.mrb[163].mxu0  ;;  %v5719_v49 = vsel %vm2137_vm3, %v15507_v50, -inf }
 0x845   : > { %v15505_v16 = vmul.f32 0.17677669, %v5085_v34  ;;  %v12039_v26 = vpop.f32.mrb[157].mxu1 }
 0x846   : > { %v5088_v1 = vpop.f32.mrb[158].mxu1 }
 0x847   : > { %v12040_v62 = vpop.f32.mrb[159].mxu1  ;;  %v5716_v5 = vsel %vm2137_vm3, %v15505_v16, -inf }
 0x848   : > { %5717 = vmax.xlane.f32.xlu0 %v5716_v5 }
 0x849   : > { %v5235_v48 = vpop.f32.mrb[164].mxu0 }
 0x84a   : > { %v12057_v10 = vpop.f32.mrb[165].mxu0  ;;  %v15511_v6 = vmul.f32 0.17677669, %v5235_v48 }
 0x84b   : > { %v5238_v60 = vpop.f32.mrb[166].mxu0 }
 0x84c   : > { %v12058_v2 = vpop.f32.mrb[167].mxu0  ;;  %5720 = vmax.xlane.f32.xlu0 %v5719_v49  ;;  %v5185_v34 = vpop.f32.mrb[160].mxu1  ;;  %v5725_v62 = vsel %vm2137_vm3, %v15511_v6, -inf }
 0x84d   : > { %v15515_v17 = vmul.f32 0.17677669, %v5185_v34  ;;  %v12051_v1 = vpop.f32.mrb[161].mxu1 }
 0x84e   : > { %v5188_v46 = vpop.f32.mrb[162].mxu1 }
 0x84f   : > { %v12052_v26 = vpop.f32.mrb[163].mxu1  ;;  %v5722_v5 = vsel %vm2137_vm3, %v15515_v17, -inf }
 0x850   : > { %5726 = vmax.xlane.f32.xlu0 %v5725_v62  ;;  %5723 = vmax.xlane.f32.xlu1 %v5722_v5 }
 0x851   : > { %v5335_v48 = vpop.f32.mrb[168].mxu0 }
 0x852   : > { %v15521_v10 = vmul.f32 0.17677669, %v5335_v48  ;;  %v12069_v60 = vpop.f32.mrb[169].mxu0 }
 0x853   : > { %v5338_v2 = vpop.f32.mrb[170].mxu0 }
 0x854   : > { %v5285_v49 = vpop.f32.mrb[164].mxu1  ;;  %v12070_v33 = vpop.f32.mrb[171].mxu0  ;;  %v5731_v34 = vsel %vm2137_vm3, %v15521_v10, -inf }
 0x855   : > { %v15525_v1 = vmul.f32 0.17677669, %v5285_v49  ;;  %5732 = vmax.xlane.f32.xlu0 %v5731_v34  ;;  %v12063_v46 = vpop.f32.mrb[165].mxu1 }
 0x856   : > { %v5288_v26 = vpop.f32.mrb[166].mxu1 }
 0x857   : > { %v12064_v61 = vpop.f32.mrb[167].mxu1  ;;  %v5728_v62 = vsel %vm2137_vm3, %v15525_v1, -inf }
 0x858   : > { %5729 = vmax.xlane.f32.xlu1 %v5728_v62 }
 0x859   : > { %v5435_v5 = vpop.f32.mrb[172].mxu0 }
 0x85a   : > { %v15529_v48 = vmul.f32 0.17677669, %v5435_v5  ;;  %v12081_v60 = vpop.f32.mrb[173].mxu0 }
 0x85b   : > { %v5438_v2 = vpop.f32.mrb[174].mxu0 }
 0x85c   : > { %v5385_v19 = vpop.f32.mrb[168].mxu1  ;;  %v12082_v33 = vpop.f32.mrb[175].mxu0  ;;  %v5737_v41 = vsel %vm2137_vm3, %v15529_v48, -inf }
 0x85d   : > { %v15533_v49 = vmul.f32 0.17677669, %v5385_v19  ;;  %5738 = vmax.xlane.f32.xlu0 %v5737_v41  ;;  %v12075_v34 = vpop.f32.mrb[169].mxu1 }
 0x85e   : > { %v5388_v46 = vpop.f32.mrb[170].mxu1 }
 0x85f   : > { %v12076_v61 = vpop.f32.mrb[171].mxu1  ;;  %v5734_v26 = vsel %vm2137_vm3, %v15533_v49, -inf }
 0x860   : > { %5735 = vmax.xlane.f32.xlu1 %v5734_v26 }
 0x861   : > { %v5535_v62 = vpop.f32.mrb[176].mxu0 }
 0x862   : > { %v15537_v5 = vmul.f32 0.17677669, %v5535_v62  ;;  %v12093_v60 = vpop.f32.mrb[177].mxu0 }
 0x863   : > { %v5538_v2 = vpop.f32.mrb[178].mxu0 }
 0x864   : > { %v5485_v9 = vpop.f32.mrb[172].mxu1  ;;  %v12094_v33 = vpop.f32.mrb[179].mxu0  ;;  %v5743_v53 = vsel %vm2137_vm3, %v15537_v5, -inf }
 0x865   : > { %v15541_v19 = vmul.f32 0.17677669, %v5485_v9  ;;  %5744 = vmax.xlane.f32.xlu0 %v5743_v53  ;;  %v12087_v41 = vpop.f32.mrb[173].mxu1 }
 0x866   : > { %v5488_v34 = vpop.f32.mrb[174].mxu1 }
 0x867   : > { %v12088_v46 = vpop.f32.mrb[175].mxu1  ;;  %v5740_v61 = vsel %vm2137_vm3, %v15541_v19, -inf }
 0x868   : > { %5741 = vmax.xlane.f32.xlu1 %v5740_v61 }
 0x869   : > { %v5635_v26 = vpop.f32.mrb[180].mxu0 }
 0x86a   : > { %v15545_v62 = vmul.f32 0.17677669, %v5635_v26  ;;  %v12105_v60 = vpop.f32.mrb[181].mxu0 }
 0x86b   : > { %v5638_v2 = vpop.f32.mrb[182].mxu0 }
 0x86c   : > { %v5585_v21 = vpop.f32.mrb[176].mxu1  ;;  %v12106_v33 = vpop.f32.mrb[183].mxu0  ;;  %v5749_v40 = vsel %vm2137_vm3, %v15545_v62, -inf  ;;  %v17740_v2 = vld [vmem:[#allocation43_spill] sm:$0xff] }
 0x86d   : > { %v15549_v9 = vmul.f32 0.17677669, %v5585_v21  ;;  %5750 = vmax.xlane.f32.xlu0 %v5749_v40  ;;  %v12099_v53 = vpop.f32.mrb[177].mxu1  ;;  %v17741_v33 = vld [vmem:[#allocation66_spill] sm:$0xff] }
 0x86e   : > { %v5588_v41 = vpop.f32.mrb[178].mxu1  ;;  %v15561_v53 = vpop.permute.xlu1 %6043 }
 0x86f   : > { %v12100_v34 = vpop.f32.mrb[179].mxu1  ;;  %v5746_v46 = vsel %vm2137_vm3, %v15549_v9, -inf  ;;  %v15563_v41 = vpop.permute.xlu0 %5995 }
 0x870   : > { %5747 = vmax.xlane.f32.xlu1 %v5746_v46 }
 0x872   : > { %v15565_v34 = vpop.permute.xlu1 %6139 }
 0x874   : > { %v5685_v61 = vpop.f32.mrb[180].mxu1 }
 0x875   : > { %v12111_v26 = vpop.f32.mrb[181].mxu1  ;;  %v15557_v21 = vmul.f32 0.17677669, %v5685_v61 }
 0x876   : > { %v5688_v45 = vpop.f32.mrb[182].mxu1  ;;  %v15569_v46 = vpop.permute.xlu1 %6235 }
 0x877   : > { %v12112_v60 = vpop.f32.mrb[183].mxu1  ;;  %v5752_v40 = vsel %vm2137_vm3, %v15557_v21, -inf  ;;  %v15567_v45 = vpop.permute.xlu0 %6091  ;;  %17742 = vst [vmem:[#allocation90_spill] sm:$0xff] %v15569_v46 }
 0x87a   : > { %v15573_v60 = vpop.permute.xlu1 %6331 }
 0x87b   : > { %v15571_v26 = vpop.permute.xlu0 %6187  ;;  %17744 = vst [vmem:[#allocation92_spill] sm:$0xff] %v15573_v60 }
 0x87c   : > { %17743 = vst [vmem:[#allocation91_spill] sm:$0xff] %v15571_v26 }
 0x87f   : > { %v15575_v61 = vpop.permute.xlu0 %6283 }
 0x881   : > { %6523 = vrot.lane.b32.xlu1 %v17740_v2, %s13538_s25  ;;  %v15577_v2 = vpop.permute.xlu1 %6379 }
 0x882   : > { %17745 = vst [vmem:[#allocation93_spill] sm:$0xff] %v15577_v2 }
 0x883   : > { %6475 = vrot.lane.b32.xlu0 %v17741_v33, %s13538_s25 }
 0x885   : > { %v15580_v56 = vpop.permute.xlu1 %6427 }
 0x8a5   : > { %5753 = vmax.xlane.f32.xlu1 %v5752_v40 }
 0x8c2   : > { %v5709_v33 = vpop.xlane.xlu0 %5708 }
 0x8c3   : > { %v5755_v40 = vsub.f32 %v15489_v7, %v5709_v33 }
 0x8c5   : > { %v5771_v31 = vmul.f32 1.442695, %v5755_v40 }
 0x8c7   : > { %12964 = vpow2.f32 %v5771_v31 }
 0x8ca   : > { %v5715_v52 = vpop.xlane.xlu0 %5714 }
 0x8cb   : > { %v5757_v44 = vsub.f32 %v15497_v58, %v5715_v52 }
 0x8cd   : > { %v5775_v18 = vmul.f32 1.442695, %v5757_v44  ;;  %v5712_v46 = vpop.xlane.xlu1 %5711 }
 0x8ce   : > { %v5756_v3 = vsub.f32 %v15501_v35, %v5712_v46 }
 0x8cf   : > { %12966 = vpow2.f32 %v5775_v18 }
 0x8d0   : > { %v5773_v60 = vmul.f32 1.442695, %v5756_v3 }
 0x8d1   : > { %v15584_v26 = vpop.eup %12964 }
 0x8d2   : > { %12968 = vpow2.f32 %v5773_v60  ;;  %v5803_v2 = vsel %vm2137_vm3, %v15584_v26, 0.0 }
 0x8d3   : > { %5804 = vadd.xlane.f32.xlu0 %v5803_v2 }
 0x8d5   : > { %v5718_v7 = vpop.xlane.xlu0 %5717 }
 0x8d6   : > { %v5758_v31 = vsub.f32 %v15505_v16, %v5718_v7 }
 0x8d8   : > { %v5777_v33 = vmul.f32 1.442695, %v5758_v31 }
 0x8d9   : > { %v15589_v40 = vpop.eup %12966  ;;  %v5721_v52 = vpop.xlane.xlu0 %5720 }
 0x8da   : > { %12970 = vpow2.f32 %v5777_v33  ;;  %v5759_v44 = vsub.f32 %v15507_v50, %v5721_v52  ;;  %v5809_v3 = vsel %vm2137_vm3, %v15589_v40, 0.0 }
 0x8db   : > { %5810 = vadd.xlane.f32.xlu0 %v5809_v3 }
 0x8dc   : > { %v15594_v18 = vpop.eup %12968  ;;  %v5779_v35 = vmul.f32 1.442695, %v5759_v44 }
 0x8dd   : > { %v5727_v58 = vpop.xlane.xlu0 %5726  ;;  %v5724_v46 = vpop.xlane.xlu1 %5723  ;;  %v5806_v2 = vsel %vm2137_vm3, %v15594_v18, 0.0 }
 0x8de   : > { %12972 = vpow2.f32 %v5779_v35  ;;  %v5761_v16 = vsub.f32 %v15511_v6, %v5727_v58  ;;  %v5760_v60 = vsub.f32 %v15515_v17, %v5724_v46  ;;  %5807 = vadd.xlane.f32.xlu1 %v5806_v2 }
 0x8e0   : > { %v5783_v7 = vmul.f32 1.442695, %v5761_v16  ;;  %v5781_v50 = vmul.f32 1.442695, %v5760_v60 }
 0x8e2   : > { %12974 = vpow2.f32 %v5783_v7  ;;  %v5733_v31 = vpop.xlane.xlu0 %5732 }
 0x8e3   : > { %12976 = vpow2.f32 %v5781_v50  ;;  %v5763_v52 = vsub.f32 %v15521_v10, %v5733_v31 }
 0x8e4   : > { %v15600_v33 = vpop.eup %12970 }
 0x8e5   : > { %v5730_v44 = vpop.xlane.xlu1 %5729  ;;  %v5812_v3 = vsel %vm2137_vm3, %v15600_v33, 0.0  ;;  %v5787_v17 = vmul.f32 1.442695, %v5763_v52 }
 0x8e6   : > { %v5762_v35 = vsub.f32 %v15525_v1, %v5730_v44  ;;  %5813 = vadd.xlane.f32.xlu1 %v5812_v3 }
 0x8e8   : > { %v15606_v6 = vpop.eup %12972  ;;  %v5785_v58 = vmul.f32 1.442695, %v5762_v35 }
 0x8e9   : > { %v5815_v46 = vsel %vm2137_vm3, %v15606_v6, 0.0 }
 0x8ea   : > { %12978 = vpow2.f32 %v5785_v58  ;;  %5816 = vadd.xlane.f32.xlu0 %v5815_v46  ;;  %v5739_v2 = vpop.xlane.xlu0 %5738 }
 0x8eb   : > { %v5765_v16 = vsub.f32 %v15529_v48, %v5739_v2  ;;  %12980 = vpow2.f32 %v5787_v17 }
 0x8ec   : > { %v15611_v10 = vpop.eup %12974 }
 0x8ed   : > { %v15613_v60 = vpop.eup %12976  ;;  %v5791_v7 = vmul.f32 1.442695, %v5765_v16  ;;  %v5736_v1 = vpop.xlane.xlu1 %5735  ;;  %v5821_v50 = vsel %vm2137_vm3, %v15611_v10, 0.0 }
 0x8ee   : > { %v5764_v31 = vsub.f32 %v15533_v49, %v5736_v1  ;;  %5822 = vadd.xlane.f32.xlu0 %v5821_v50  ;;  %v5818_v52 = vsel %vm2137_vm3, %v15613_v60, 0.0 }
 0x8ef   : > { %5819 = vadd.xlane.f32.xlu1 %v5818_v52  ;;  %12982 = vpow2.f32 %v5791_v7 }
 0x8f0   : > { %v5789_v44 = vmul.f32 1.442695, %v5764_v31 }
 0x8f2   : > { %12984 = vpow2.f32 %v5789_v44  ;;  %v5745_v48 = vpop.xlane.xlu0 %5744 }
 0x8f3   : > { %v5767_v3 = vsub.f32 %v15537_v5, %v5745_v48 }
 0x8f4   : > { %v15621_v35 = vpop.eup %12978 }
 0x8f5   : > { %v5795_v17 = vmul.f32 1.442695, %v5767_v3  ;;  %v5742_v58 = vpop.xlane.xlu1 %5741  ;;  %v5824_v46 = vsel %vm2137_vm3, %v15621_v35, 0.0  ;;  %v15625_v2 = vpop.eup %12980 }
 0x8f6   : > { %v5766_v49 = vsub.f32 %v15541_v19, %v5742_v58  ;;  %5825 = vadd.xlane.f32.xlu1 %v5824_v46  ;;  %v5827_v7 = vsel %vm2137_vm3, %v15625_v2, 0.0 }
 0x8f7   : > { %12986 = vpow2.f32 %v5795_v17 }
 0x8f8   : > { %v5793_v16 = vmul.f32 1.442695, %v5766_v49 }
 0x8f9   : > { %v15630_v1 = vpop.eup %12982 }
 0x8fa   : > { %12988 = vpow2.f32 %v5793_v16  ;;  %5828 = vadd.xlane.f32.xlu1 %v5827_v7  ;;  %v5833_v52 = vsel %vm2137_vm3, %v15630_v1, 0.0  ;;  %v5751_v49 = vpop.xlane.xlu0 %5750 }
 0x8fb   : > { %v5769_v16 = vsub.f32 %v15545_v62, %v5751_v49 }
 0x8fc   : > { %v15632_v5 = vpop.eup %12984 }
 0x8fd   : > { %v5748_v50 = vpop.xlane.xlu1 %5747  ;;  %v5830_v31 = vsel %vm2137_vm3, %v15632_v5, 0.0  ;;  %v5799_v7 = vmul.f32 1.442695, %v5769_v16  ;;  %v17749_v16 = vld [vmem:[#allocation90_spill] sm:$0xff] }
 0x8fe   : > { %v5768_v19 = vsub.f32 %v15549_v9, %v5748_v50  ;;  %5831 = vadd.xlane.f32.xlu0 %v5830_v31  ;;  %5834 = vadd.xlane.f32.xlu1 %v5833_v52 }
 0x900   : > { %v5797_v44 = vmul.f32 1.442695, %v5768_v19 }
 0x901   : > { %v15639_v48 = vpop.eup %12986  ;;  %v15656_v50 = vpop.permute.xlu1 %6523 }
 0x902   : > { %12990 = vpow2.f32 %v5797_v44  ;;  %v5839_v3 = vsel %vm2137_vm3, %v15639_v48, 0.0 }
 0x903   : > { %5840 = vadd.xlane.f32.xlu1 %v5839_v3  ;;  %12992 = vpow2.f32 %v5799_v7  ;;  %v6241_v7 = vsel %vm2333_vm2, %v17749_v16, 0 }
 0x904   : > { %v15643_v17 = vpop.eup %12988 }
 0x905   : > { %v5836_v58 = vsel %vm2137_vm3, %v15643_v17, 0.0 }
 0x906   : > { %5837 = vadd.xlane.f32.xlu0 %v5836_v58 }
 0x90c   : > { %v15647_v46 = vpop.eup %12990 }
 0x90d   : > { %v5842_v9 = vsel %vm2137_vm3, %v15647_v46, 0.0  ;;  %v15659_v19 = vpop.eup %12992 }
 0x90e   : > { %5843 = vadd.xlane.f32.xlu0 %v5842_v9  ;;  %v5845_v3 = vsel %vm2137_vm3, %v15659_v19, 0.0 }
 0x914   : > { %6619 = vrot.lane.b32.xlu1 %v14868_v28, %s13538_s25 }
 0x924   : > { %6571 = vrot.lane.b32.xlu0 %v14806_v8, %s13538_s25 }
 0x932   : > { %v5754_v31 = vpop.xlane.xlu1 %5753 }
 0x933   : > { %v5770_v52 = vsub.f32 %v15557_v21, %v5754_v31  ;;  %v15679_v21 = vpop.permute.xlu0 %6475 }
 0x935   : > { %v5801_v44 = vmul.f32 1.442695, %v5770_v52 }
 0x937   : > { %12994 = vpow2.f32 %v5801_v44  ;;  %v6289_v44 = vsel %vm2333_vm2, %v15575_v61, 0  ;;  %v17753_v61 = vld [vmem:[#allocation48_spill] sm:$0xff] }
 0x938   : > { %5846 = vadd.xlane.f32.xlu1 %v5845_v3 }
 0x941   : > { %v15663_v58 = vpop.eup %12994 }
 0x942   : > { %v5848_v62 = vsel %vm2137_vm3, %v15663_v58, 0.0 }
 0x943   : > { %5849 = vadd.xlane.f32.xlu0 %v5848_v62 }
 0x949   : > { %6719 = vrot.lane.b32.xlu1 %v14204_v22, %s13539_s8 }
 0x94d   : > { %6717 = vrot.lane.b32.xlu1 %v14236_v42, %s13539_s8 }
 0x951   : > { %6819 = vrot.lane.b32.xlu1 %v14256_v54, %s13539_s8 }
 0x955   : > { %6817 = vrot.lane.b32.xlu1 %v14309_v36, %s13539_s8 }
 0x959   : > { %6919 = vrot.lane.b32.xlu1 %v14296_v20, %s13539_s8  ;;  %6669 = vrot.lane.b32.xlu0 %v14196_v14, %s13539_s8 }
 0x95d   : > { %6917 = vrot.lane.b32.xlu1 %v14350_v12, %s13539_s8  ;;  %6667 = vrot.lane.b32.xlu0 %v14206_v25, %s13539_s8 }
 0x960   : > { %v5805_v22 = vpop.xlane.xlu0 %5804 }
 0x961   : > { %12996 = vrcp.f32 %v5805_v22  ;;  %7019 = vrot.lane.b32.xlu1 %v14337_v59, %s13539_s8  ;;  %6769 = vrot.lane.b32.xlu0 %v14220_v30, %s13539_s8  ;;  %v17752_v22 = vld [vmem:[#allocation62_spill] sm:$0xff] }
 0x965   : > { %7017 = vrot.lane.b32.xlu1 %v14381_v51, %s13539_s8  ;;  %6767 = vrot.lane.b32.xlu0 %v14269_v63, %s13539_s8  ;;  %v6001_v63 = vsel %vm2333_vm2, %v15563_v41, 0  ;;  %v6097_v51 = vsel %vm2333_vm2, %v15567_v45, 0  ;;  %v6145_v41 = vsel %vm2333_vm2, %v15565_v34, 0  ;;  %v17746_v34 = vld [vmem:[#allocation91_spill] sm:$0xff] }
 0x968   : > { %v5811_v14 = vpop.xlane.xlu0 %5810 }
 0x969   : > { %12998 = vrcp.f32 %v5811_v14  ;;  %7119 = vrot.lane.b32.xlu1 %v17667_v32, %s13539_s8  ;;  %6869 = vrot.lane.b32.xlu0 %v14238_v43, %s13539_s8 }
 0x96b   : > { %v12997_v25 = vpop.eup %12996  ;;  %v5808_v42 = vpop.xlane.xlu1 %5807 }
 0x96c   : > { %13000 = vrcp.f32 %v5808_v42  ;;  %v5867_v54 = vmul.f32 %v12997_v25, %v15584_v26  ;;  %v6193_v26 = vsel %vm2333_vm2, %v17746_v34, 0 }
 0x96d   : > { %7117 = vrot.lane.b32.xlu1 %v17671_v57, %s13539_s8  ;;  %6867 = vrot.lane.b32.xlu0 %v14258_v55, %s13539_s8 }
 0x96e   : > { %v5883_v30 = vpack.c.bf16 %v5867_v54, %v5867_v54 }
 0x970   : > { %12116 = vmatmul.mubr.msk.bf16.vlgmr.msra.gmra.mrb[184].mxu0 %vm2137_vm3, %v5883_v30 }
 0x971   : > { %12126 = vmatpush3.bf16.msra.mxu0 %v6001_v63  ;;  %7219 = vrot.lane.b32.xlu1 %v17672_v39, %s13539_s8  ;;  %v17755_v63 = vld [vmem:[#allocation63_spill] sm:$0xff] }
 0x972   : > { %6969 = vrot.lane.b32.xlu0 %v14271_v0, %s13539_s8  ;;  %12127 = vmatprep.mubr.msk.bf16.mxu0 %vm13536_vm0, %v17659_v24 }
 0x973   : > { %v12999_v43 = vpop.eup %12998  ;;  %v5814_v20 = vpop.xlane.xlu1 %5813  ;;  %12137 = vmatprep.subr.bf16.mxu0 %v17659_v24 }
 0x974   : > { %13002 = vrcp.f32 %v5814_v20  ;;  %v5869_v55 = vmul.f32 %v12999_v43, %v15589_v40 }
 0x975   : > { %7217 = vrot.lane.b32.xlu1 %v17673_v27, %s13539_s8 }
 0x976   : > { %v13001_v36 = vpop.eup %13000  ;;  %6967 = vrot.lane.b32.xlu0 %v14298_v23, %s13539_s8  ;;  %v5885_v59 = vpack.c.bf16 %v5869_v55, %v5869_v55  ;;  %v6049_v23 = vsel %vm2333_vm2, %v15561_v53, 0  ;;  %v17756_v55 = vld [vmem:[#allocation51_spill] sm:$0xff] }
 0x977   : > { %v5817_v12 = vpop.xlane.xlu0 %5816  ;;  %v5868_v0 = vmul.f32 %v13001_v36, %v15594_v18 }
 0x978   : > { %13004 = vrcp.f32 %v5817_v12  ;;  %12128 = vmatmul.mubr.msk.bf16.vlgmr.msra.gmra.mrb[188].mxu0 %vm2137_vm3, %v5885_v59 }
 0x979   : > { %12138 = vmatpush3.bf16.msra.mxu0 %v6097_v51  ;;  %7319 = vrot.lane.b32.xlu1 %v17674_v4, %s13539_s8  ;;  %v5884_v32 = vpack.c.bf16 %v5868_v0, %v5868_v0 }
 0x97a   : > { %7069 = vrot.lane.b32.xlu0 %v14311_v38, %s13539_s8  ;;  %12139 = vmatprep.mubr.msk.bf16.mxu0 %vm13536_vm0, %v17659_v24 }
 0x97b   : > { %v5823_v57 = vpop.xlane.xlu0 %5822  ;;  %12122 = vmatmul.mubr.msk.bf16.vlgmr.msra.gmra.mrb[184].mxu1 %vm2137_vm3, %v5884_v32  ;;  %12149 = vmatprep.subr.bf16.mxu0 %v17659_v24  ;;  %v17758_v32 = vld [vmem:[#allocation50_spill] sm:$0xff] }
 0x97c   : > { %13006 = vrcp.f32 %v5823_v57  ;;  %12132 = vmatpush3.bf16.msra.mxu1 %v6049_v23  ;;  %v5820_v39 = vpop.xlane.xlu1 %5819  ;;  %12133 = vmatprep.mubr.msk.bf16.mxu1 %vm13536_vm0, %v17659_v24  ;;  %v6433_v57 = vsel %vm2333_vm2, %v15580_v56, 0 }
 0x97d   : > { %13008 = vrcp.f32 %v5820_v39  ;;  %7317 = vrot.lane.b32.xlu1 %v17675_v11, %s13539_s8  ;;  %12143 = vmatprep.subr.bf16.mxu1 %v17659_v24 }
 0x97e   : > { %v13003_v38 = vpop.eup %13002  ;;  %7067 = vrot.lane.b32.xlu0 %v14339_v37, %s13539_s8 }
 0x97f   : > { %v5870_v27 = vmul.f32 %v13003_v38, %v15600_v33  ;;  %v17748_v33 = vld [vmem:[#allocation44_spill] sm:$0xff] }
 0x981   : > { %7419 = vrot.lane.b32.xlu1 %v17676_v13, %s13539_s8  ;;  %v5886_v4 = vpack.c.bf16 %v5870_v27, %v5870_v27  ;;  %v17759_v27 = vld [vmem:[#allocation57_spill] sm:$0xff] }
 0x982   : > { %v13005_v53 = vpop.eup %13004  ;;  %7169 = vrot.lane.b32.xlu0 %v14352_v15, %s13539_s8 }
 0x983   : > { %12134 = vmatmul.mubr.msk.bf16.vlgmr.msra.gmra.mrb[188].mxu1 %vm2137_vm3, %v5886_v4  ;;  %v5826_v11 = vpop.xlane.xlu1 %5825  ;;  %v5871_v45 = vmul.f32 %v13005_v53, %v15606_v6 }
 0x984   : > { %12144 = vmatpush3.bf16.msra.mxu1 %v6145_v41  ;;  %13010 = vrcp.f32 %v5826_v11  ;;  %12145 = vmatprep.mubr.msk.bf16.mxu1 %vm13536_vm0, %v17659_v24  ;;  %v17760_v41 = vld [vmem:[#allocation58_spill] sm:$0xff]  ;;  %v6529_v11 = vsel %vm2333_vm2, %v15656_v50, 0 }
 0x985   : > { %7417 = vrot.lane.b32.xlu1 %v17677_v29, %s13539_s8  ;;  %v5887_v37 = vpack.c.bf16 %v5871_v45, %v5871_v45  ;;  %12155 = vmatprep.subr.bf16.mxu1 %v17659_v24  ;;  %v17747_v29 = vld [vmem:[#allocation55_spill] sm:$0xff] }
 0x986   : > { %v13007_v15 = vpop.eup %13006  ;;  %7167 = vrot.lane.b32.xlu0 %v14377_v47, %s13539_s8 }
 0x987   : > { %v13009_v13 = vpop.eup %13008  ;;  %12140 = vmatmul.mubr.msk.bf16.vlgmr.msra.gmra.mrb[192].mxu0 %vm2137_vm3, %v5887_v37  ;;  %v5829_v40 = vpop.xlane.xlu1 %5828  ;;  %v5873_v47 = vmul.f32 %v13007_v15, %v15611_v10  ;;  %v17751_v10 = vld [vmem:[#allocation46_spill] sm:$0xff]  ;;  %v17761_v37 = vld [vmem:[#allocation59_spill] sm:$0xff] }
 0x988   : > { %12150 = vmatpush3.bf16.msra.mxu0 %v6193_v26  ;;  %13012 = vrcp.f32 %v5829_v40  ;;  %v5872_v18 = vmul.f32 %v13009_v13, %v15613_v60  ;;  %12151 = vmatprep.mubr.msk.bf16.mxu0 %vm13536_vm0, %v17659_v24  ;;  %v17750_v60 = vld [vmem:[#allocation61_spill] sm:$0xff] }
 0x989   : > { %7723 = vrot.lane.b32.xlu1 %v17747_v29, %s13539_s8  ;;  %12161 = vmatprep.subr.bf16.mxu0 %v17659_v24  ;;  %v5889_v31 = vpack.c.bf16 %v5873_v47, %v5873_v47 }
 0x98a   : > { %7269 = vrot.lane.b32.xlu0 %v17748_v33, %s13539_s8  ;;  %v5888_v6 = vpack.c.bf16 %v5872_v18, %v5872_v18 }
 0x98b   : > { %v5832_v9 = vpop.xlane.xlu0 %5831  ;;  %v5835_v49 = vpop.xlane.xlu1 %5834 }
 0x98c   : > { %13014 = vrcp.f32 %v5832_v9  ;;  %12146 = vmatmul.mubr.msk.bf16.vlgmr.msra.gmra.mrb[192].mxu1 %vm2137_vm3, %v5888_v6 }
 0x98d   : > { %12156 = vmatpush3.bf16.msra.mxu1 %v6241_v7  ;;  %13016 = vrcp.f32 %v5835_v49  ;;  %7819 = vrot.lane.b32.xlu1 %v17750_v60, %s13539_s8 }
 0x98e   : > { %v13011_v52 = vpop.eup %13010  ;;  %7267 = vrot.lane.b32.xlu0 %v17751_v10, %s13539_s8  ;;  %12157 = vmatprep.mubr.msk.bf16.mxu1 %vm13536_vm0, %v17659_v24 }
 0x98f   : > { %12152 = vmatmul.mubr.msk.bf16.vlgmr.msra.gmra.mrb[196].mxu0 %vm2137_vm3, %v5889_v31  ;;  %12167 = vmatprep.subr.bf16.mxu1 %v17659_v24  ;;  %v5874_v3 = vmul.f32 %v13011_v52, %v15621_v35  ;;  %v17754_v35 = vld [vmem:[#allocation92_spill] sm:$0xff] }
 0x990   : > { %12162 = vmatpush3.bf16.msra.mxu0 %v6289_v44  ;;  %v5841_v62 = vpop.xlane.xlu1 %5840  ;;  %12163 = vmatprep.mubr.msk.bf16.mxu0 %vm13536_vm0, %v17659_v24  ;;  %v6337_v30 = vsel %vm2333_vm2, %v17754_v35, 0 }
 0x991   : > { %7915 = vrot.lane.b32.xlu1 %v17752_v22, %s13539_s8  ;;  %v5890_v14 = vpack.c.bf16 %v5874_v3, %v5874_v3  ;;  %12173 = vmatprep.subr.bf16.mxu0 %v17659_v24  ;;  %13018 = vrcp.f32 %v5841_v62 }
 0x992   : > { %v13013_v25 = vpop.eup %13012  ;;  %7369 = vrot.lane.b32.xlu0 %v17753_v61, %s13539_s8 }
 0x993   : > { %v5838_v42 = vpop.xlane.xlu0 %5837  ;;  %v5875_v54 = vmul.f32 %v13013_v25, %v15625_v2  ;;  %v17757_v2 = vld [vmem:[#allocation93_spill] sm:$0xff] }
 0x994   : > { %13020 = vrcp.f32 %v5838_v42  ;;  %12158 = vmatmul.mubr.msk.bf16.vlgmr.msra.gmra.mrb[196].mxu1 %vm2137_vm3, %v5890_v14  ;;  %v6385_v59 = vsel %vm2333_vm2, %v17757_v2, 0  ;;  %v6620_v15 = vpop.permute.xlu1 %6619 }
 0x995   : > { %12168 = vmatpush3.bf16.msra.mxu1 %v6337_v30  ;;  %8011 = vrot.lane.b32.xlu1 %v17755_v63, %s13539_s8  ;;  %v5891_v43 = vpack.c.bf16 %v5875_v54, %v5875_v54  ;;  %v6625_v34 = vsel %vm2333_vm2, %v6620_v15, 0 }
 0x996   : > { %v13015_v20 = vpop.eup %13014  ;;  %7367 = vrot.lane.b32.xlu0 %v17756_v55, %s13539_s8  ;;  %12169 = vmatprep.mubr.msk.bf16.mxu1 %vm13536_vm0, %v17659_v24 }
 0x997   : > { %v13017_v36 = vpop.eup %13016  ;;  %12164 = vmatmul.mubr.msk.bf16.vlgmr.msra.gmra.mrb[200].mxu0 %vm2137_vm3, %v5891_v43  ;;  %12179 = vmatprep.subr.bf16.mxu1 %v17659_v24  ;;  %v5876_v12 = vmul.f32 %v13015_v20, %v15632_v5 }
 0x998   : > { %12174 = vmatpush3.bf16.msra.mxu0 %v6385_v59  ;;  %12175 = vmatprep.mubr.msk.bf16.mxu0 %vm13536_vm0, %v17659_v24  ;;  %v5877_v51 = vmul.f32 %v13017_v36, %v15630_v1  ;;  %v6481_v1 = vsel %vm2333_vm2, %v15679_v21, 0 }
 0x999   : > { %v5892_v0 = vpack.c.bf16 %v5876_v12, %v5876_v12  ;;  %12185 = vmatprep.subr.bf16.mxu0 %v17659_v24 }
 0x99a   : > { %7675 = vrot.lane.b32.xlu0 %v17758_v32, %s13539_s8  ;;  %v5893_v39 = vpack.c.bf16 %v5877_v51, %v5877_v51 }
 0x99b   : > { %v5844_v23 = vpop.xlane.xlu0 %5843  ;;  %v13019_v5 = vpop.eup %13018 }
 0x99c   : > { %13022 = vrcp.f32 %v5844_v23  ;;  %12170 = vmatmul.mubr.msk.bf16.vlgmr.msra.gmra.mrb[200].mxu1 %vm2137_vm3, %v5892_v0  ;;  %v5879_v53 = vmul.f32 %v13019_v5, %v15639_v48 }
 0x99d   : > { %12180 = vmatpush3.bf16.msra.mxu1 %v6433_v57  ;;  %12181 = vmatprep.mubr.msk.bf16.mxu1 %vm13536_vm0, %v17659_v24 }
 0x99e   : > { %v13021_v38 = vpop.eup %13020  ;;  %7771 = vrot.lane.b32.xlu0 %v17759_v27, %s13539_s8  ;;  %12191 = vmatprep.subr.bf16.mxu1 %v17659_v24 }
 0x99f   : > { %12176 = vmatmul.mubr.msk.bf16.vlgmr.msra.gmra.mrb[204].mxu0 %vm2137_vm3, %v5893_v39  ;;  %v5878_v56 = vmul.f32 %v13021_v38, %v15643_v17  ;;  %v6572_v21 = vpop.permute.xlu0 %6571  ;;  %v5895_v17 = vpack.c.bf16 %v5879_v53, %v5879_v53 }
 0x9a0   : > { %12186 = vmatpush3.bf16.msra.mxu0 %v6481_v1  ;;  %12187 = vmatprep.mubr.msk.bf16.mxu0 %vm13536_vm0, %v17659_v24  ;;  %v6577_v48 = vsel %vm2333_vm2, %v6572_v21, 0 }
 0x9a1   : > { %v5894_v4 = vpack.c.bf16 %v5878_v56, %v5878_v56  ;;  %12197 = vmatprep.subr.bf16.mxu0 %v17659_v24 }
 0x9a2   : > { %7867 = vrot.lane.b32.xlu0 %v17760_v41, %s13539_s8 }
 0x9a4   : > { %12182 = vmatmul.mubr.msk.bf16.vlgmr.msra.gmra.mrb[204].mxu1 %vm2137_vm3, %v5894_v4 }
 0x9a5   : > { %12192 = vmatpush3.bf16.msra.mxu1 %v6529_v11  ;;  %12193 = vmatprep.mubr.msk.bf16.mxu1 %vm13536_vm0, %v17659_v24 }
 0x9a6   : > { %v13023_v45 = vpop.eup %13022  ;;  %7963 = vrot.lane.b32.xlu0 %v17761_v37, %s13539_s8  ;;  %12203 = vmatprep.subr.bf16.mxu1 %v17659_v24 }
 0x9a7   : > { %12188 = vmatmul.mubr.msk.bf16.vlgmr.msra.gmra.mrb[208].mxu0 %vm2137_vm3, %v5895_v17  ;;  %v5880_v50 = vmul.f32 %v13023_v45, %v15647_v46 }
 0x9a8   : > { %12198 = vmatpush3.bf16.msra.mxu0 %v6577_v48  ;;  %12199 = vmatprep.mubr.msk.bf16.mxu0 %vm13536_vm0, %v17659_v24 }
 0x9a9   : > { %v5896_v13 = vpack.c.bf16 %v5880_v50, %v5880_v50  ;;  %12209 = vmatprep.subr.bf16.mxu0 %v17659_v24 }
 0x9ac   : > { %12194 = vmatmul.mubr.msk.bf16.vlgmr.msra.gmra.mrb[208].mxu1 %vm2137_vm3, %v5896_v13 }
 0x9ad   : > { %12204 = vmatpush3.bf16.msra.mxu1 %v6625_v34  ;;  %12205 = vmatprep.mubr.msk.bf16.mxu1 %vm13536_vm0, %v17659_v24 }
 0x9ae   : > { %12215 = vmatprep.subr.bf16.mxu1 %v17659_v24 }
 0x9c5   : > { %v5847_v26 = vpop.xlane.xlu1 %5846 }
 0x9c6   : > { %13024 = vrcp.f32 %v5847_v26 }
 0x9c9   : > { %v6720_v46 = vpop.permute.xlu1 %6719 }
 0x9ca   : > { %v6725_v62 = vsel %vm1384_vm1, %v6720_v46, 0 }
 0x9cd   : > { %v6718_v40 = vpop.permute.xlu1 %6717 }
 0x9d0   : > { %v13025_v18 = vpop.eup %13024  ;;  %v5850_v29 = vpop.xlane.xlu0 %5849 }
 0x9d1   : > { %13026 = vrcp.f32 %v5850_v29  ;;  %v6820_v47 = vpop.permute.xlu1 %6819  ;;  %v5881_v33 = vmul.f32 %v13025_v18, %v15659_v19 }
 0x9d2   : > { %v6825_v42 = vsel %vm1384_vm1, %v6820_v47, 0 }
 0x9d3   : > { %v5897_v6 = vpack.c.bf16 %v5881_v33, %v5881_v33 }
 0x9d4   : > { %v6670_v9 = vpop.permute.xlu0 %6669 }
 0x9d5   : > { %v6675_v49 = vsel %vm1384_vm1, %v6670_v9, 0  ;;  %12200 = vmatmul.mubr.msk.bf16.vlgmr.msra.gmra.mrb[212].mxu0 %vm2137_vm3, %v5897_v6  ;;  %v6818_v16 = vpop.permute.xlu1 %6817 }
 0x9d6   : > { %12210 = vmatpush3.bf16.xpose.msra.mxu0 %v6675_v49  ;;  %12211 = vmatprep.mubr.msk.bf16.mxu0 %vm13536_vm0, %v17659_v24 }
 0x9d7   : > { %12221 = vmatprep.subr.bf16.mxu0 %v17659_v24 }
 0x9d8   : > { %v6668_v7 = vpop.permute.xlu0 %6667 }
 0x9d9   : > { %v6920_v60 = vpop.permute.xlu1 %6919 }
 0x9da   : > { %v6925_v43 = vsel %vm1384_vm1, %v6920_v60, 0 }
 0x9db   : > { %v13027_v31 = vpop.eup %13026 }
 0x9dc   : > { %v6770_v52 = vpop.permute.xlu0 %6769  ;;  %v5882_v10 = vmul.f32 %v13027_v31, %v15663_v58 }
 0x9dd   : > { %v6775_v19 = vsel %vm1384_vm1, %v6770_v52, 0  ;;  %12212 = vmatmul.mubr.msk.bf16.vlgmr.msra.gmra.mrb[216].mxu0 %vm1384_vm1, %v6668_v7  ;;  %v6918_v44 = vpop.permute.xlu1 %6917 }
 0x9de   : > { %12222 = vmatpush3.bf16.xpose.msra.mxu0 %v6775_v19  ;;  %v5898_v3 = vpack.c.bf16 %v5882_v10, %v5882_v10  ;;  %12223 = vmatprep.mubr.msk.bf16.mxu0 %vm13536_vm0, %v17659_v24 }
 0x9df   : > { %12233 = vmatprep.subr.bf16.mxu0 %v17659_v24 }
 0x9e0   : > { %v6768_v22 = vpop.permute.xlu0 %6767  ;;  %12206 = vmatmul.mubr.msk.bf16.vlgmr.msra.gmra.mrb[212].mxu1 %vm2137_vm3, %v5898_v3 }
 0x9e1   : > { %12216 = vmatpush3.bf16.xpose.msra.mxu1 %v6725_v62  ;;  %v7020_v14 = vpop.permute.xlu1 %7019  ;;  %12217 = vmatprep.mubr.msk.bf16.mxu1 %vm13536_vm0, %v17659_v24 }
 0x9e2   : > { %12227 = vmatprep.subr.bf16.mxu1 %v17659_v24  ;;  %v7025_v59 = vsel %vm1384_vm1, %v7020_v14, 0 }
 0x9e4   : > { %v6870_v58 = vpop.permute.xlu0 %6869 }
 0x9e5   : > { %v6875_v25 = vsel %vm1384_vm1, %v6870_v58, 0  ;;  %12224 = vmatmul.mubr.msk.bf16.vlgmr.msra.gmra.mrb[220].mxu0 %vm1384_vm1, %v6768_v22  ;;  %v7018_v61 = vpop.permute.xlu1 %7017 }
 0x9e6   : > { %12234 = vmatpush3.bf16.xpose.msra.mxu0 %v6875_v25  ;;  %12235 = vmatprep.mubr.msk.bf16.mxu0 %vm13536_vm0, %v17659_v24 }
 0x9e7   : > { %12245 = vmatprep.subr.bf16.mxu0 %v17659_v24 }
 0x9e8   : > { %v6868_v54 = vpop.permute.xlu0 %6867  ;;  %12218 = vmatmul.mubr.msk.bf16.vlgmr.msra.gmra.mrb[216].mxu1 %vm1384_vm1, %v6718_v40 }
 0x9e9   : > { %12228 = vmatpush3.bf16.xpose.msra.mxu1 %v6825_v42  ;;  %12229 = vmatprep.mubr.msk.bf16.mxu1 %vm13536_vm0, %v17659_v24  ;;  %v7120_v30 = vpop.permute.xlu1 %7119 }
 0x9ea   : > { %12239 = vmatprep.subr.bf16.mxu1 %v17659_v24  ;;  %v7125_v57 = vsel %vm1384_vm1, %v7120_v30, 0 }
 0x9ec   : > { %v6970_v35 = vpop.permute.xlu0 %6969 }
 0x9ed   : > { %v6975_v63 = vsel %vm1384_vm1, %v6970_v35, 0  ;;  %12236 = vmatmul.mubr.msk.bf16.vlgmr.msra.gmra.mrb[224].mxu0 %vm1384_vm1, %v6868_v54  ;;  %v7118_v55 = vpop.permute.xlu1 %7117 }
 0x9ee   : > { %12246 = vmatpush3.bf16.xpose.msra.mxu0 %v6975_v63  ;;  %12247 = vmatprep.mubr.msk.bf16.mxu0 %vm13536_vm0, %v17659_v24 }
 0x9ef   : > { %12257 = vmatprep.subr.bf16.mxu0 %v17659_v24 }
 0x9f0   : > { %v6968_v20 = vpop.permute.xlu0 %6967  ;;  %12230 = vmatmul.mubr.msk.bf16.vlgmr.msra.gmra.mrb[220].mxu1 %vm1384_vm1, %v6818_v16 }
 0x9f1   : > { %12240 = vmatpush3.bf16.xpose.msra.mxu1 %v6925_v43  ;;  %12241 = vmatprep.mubr.msk.bf16.mxu1 %vm13536_vm0, %v17659_v24  ;;  %v7220_v0 = vpop.permute.xlu1 %7219 }
 0x9f2   : > { %12251 = vmatprep.subr.bf16.mxu1 %v17659_v24  ;;  %v7225_v1 = vsel %vm1384_vm1, %v7220_v0, 0 }
 0x9f4   : > { %v7070_v36 = vpop.permute.xlu0 %7069 }
 0x9f5   : > { %v7075_v2 = vsel %vm1384_vm1, %v7070_v36, 0  ;;  %12248 = vmatmul.mubr.msk.bf16.vlgmr.msra.gmra.mrb[228].mxu0 %vm1384_vm1, %v6968_v20  ;;  %v7218_v23 = vpop.permute.xlu1 %7217 }
 0x9f6   : > { %12258 = vmatpush3.bf16.xpose.msra.mxu0 %v7075_v2  ;;  %12259 = vmatprep.mubr.msk.bf16.mxu0 %vm13536_vm0, %v17659_v24 }
 0x9f7   : > { %12269 = vmatprep.subr.bf16.mxu0 %v17659_v24 }
 0x9f8   : > { %v7068_v12 = vpop.permute.xlu0 %7067  ;;  %12242 = vmatmul.mubr.msk.bf16.vlgmr.msra.gmra.mrb[224].mxu1 %vm1384_vm1, %v6918_v44 }
 0x9f9   : > { %12252 = vmatpush3.bf16.xpose.msra.mxu1 %v7025_v59  ;;  %12253 = vmatprep.mubr.msk.bf16.mxu1 %vm13536_vm0, %v17659_v24  ;;  %v7320_v38 = vpop.permute.xlu1 %7319 }
 0x9fa   : > { %12263 = vmatprep.subr.bf16.mxu1 %v17659_v24  ;;  %v7325_v11 = vsel %vm1384_vm1, %v7320_v38, 0 }
 0x9fc   : > { %v7170_v51 = vpop.permute.xlu0 %7169 }
 0x9fd   : > { %v7175_v32 = vsel %vm1384_vm1, %v7170_v51, 0  ;;  %12260 = vmatmul.mubr.msk.bf16.vlgmr.msra.gmra.mrb[232].mxu0 %vm1384_vm1, %v7068_v12  ;;  %v7318_v4 = vpop.permute.xlu1 %7317 }
 0x9fe   : > { %12270 = vmatpush3.bf16.xpose.msra.mxu0 %v7175_v32  ;;  %12271 = vmatprep.mubr.msk.bf16.mxu0 %vm13536_vm0, %v17659_v24 }
 0x9ff   : > { %12281 = vmatprep.subr.bf16.mxu0 %v17659_v24 }
 0xa00   : > { %v7168_v5 = vpop.permute.xlu0 %7167  ;;  %12254 = vmatmul.mubr.msk.bf16.vlgmr.msra.gmra.mrb[228].mxu1 %vm1384_vm1, %v7018_v61 }
 0xa01   : > { %12264 = vmatpush3.bf16.xpose.msra.mxu1 %v7125_v57  ;;  %12265 = vmatprep.mubr.msk.bf16.mxu1 %vm13536_vm0, %v17659_v24  ;;  %v7420_v17 = vpop.permute.xlu1 %7419 }
 0xa02   : > { %12275 = vmatprep.subr.bf16.mxu1 %v17659_v24  ;;  %v7425_v50 = vsel %vm1384_vm1, %v7420_v17, 0 }
 0xa04   : > { %v7270_v39 = vpop.permute.xlu0 %7269 }
 0xa05   : > { %v7275_v27 = vsel %vm1384_vm1, %v7270_v39, 0  ;;  %12272 = vmatmul.mubr.msk.bf16.vlgmr.msra.gmra.mrb[236].mxu0 %vm1384_vm1, %v7168_v5  ;;  %v7418_v48 = vpop.permute.xlu1 %7417 }
 0xa06   : > { %12282 = vmatpush3.bf16.xpose.msra.mxu0 %v7275_v27  ;;  %12283 = vmatprep.mubr.msk.bf16.mxu0 %vm13536_vm0, %v17659_v24 }
 0xa07   : > { %12293 = vmatprep.subr.bf16.mxu0 %v17659_v24 }
 0xa08   : > { %v7268_v56 = vpop.permute.xlu0 %7267  ;;  %12266 = vmatmul.mubr.msk.bf16.vlgmr.msra.gmra.mrb[232].mxu1 %vm1384_vm1, %v7118_v55 }
 0xa09   : > { %12276 = vmatpush3.bf16.xpose.msra.mxu1 %v7225_v1  ;;  %12277 = vmatprep.mubr.msk.bf16.mxu1 %vm13536_vm0, %v17659_v24  ;;  %v7724_v15 = vpop.permute.xlu1 %7723 }
 0xa0a   : > { %12287 = vmatprep.subr.bf16.mxu1 %v17659_v24  ;;  %v7729_v13 = vsel %vm2333_vm2, %v7724_v15, 0 }
 0xa0c   : > { %v7370_v53 = vpop.permute.xlu0 %7369 }
 0xa0d   : > { %v7375_v41 = vsel %vm1384_vm1, %v7370_v53, 0  ;;  %12284 = vmatmul.mubr.msk.bf16.vlgmr.msra.gmra.mrb[240].mxu0 %vm1384_vm1, %v7268_v56 }
 0xa0e   : > { %12294 = vmatpush3.bf16.xpose.msra.mxu0 %v7375_v41  ;;  %12295 = vmatprep.mubr.msk.bf16.mxu0 %vm13536_vm0, %v17659_v24 }
 0xa0f   : > { %12305 = vmatprep.subr.bf16.mxu0 %v17659_v24 }
 0xa10   : > { %v7368_v21 = vpop.permute.xlu0 %7367  ;;  %12278 = vmatmul.mubr.msk.bf16.vlgmr.msra.gmra.mrb[236].mxu1 %vm1384_vm1, %v7218_v23 }
 0xa11   : > { %12288 = vmatpush3.bf16.xpose.msra.mxu1 %v7325_v11  ;;  %12289 = vmatprep.mubr.msk.bf16.mxu1 %vm13536_vm0, %v17659_v24 }
 0xa12   : > { %12299 = vmatprep.subr.bf16.mxu1 %v17659_v24 }
 0xa14   : > { %v7676_v45 = vpop.permute.xlu0 %7675 }
 0xa15   : > { %v7681_v37 = vsel %vm2333_vm2, %v7676_v45, 0  ;;  %12296 = vmatmul.mubr.msk.bf16.vlgmr.msra.gmra.mrb[244].mxu0 %vm1384_vm1, %v7368_v21 }
 0xa16   : > { %12306 = vmatpush3.bf16.msra.mxu0 %v7681_v37  ;;  %12307 = vmatprep.mubr.msk.bf16.mxu0 %vm13536_vm0, %v17659_v24 }
 0xa17   : > { %12317 = vmatprep.subr.bf16.mxu0 %v17659_v24 }
 0xa18   : > { %12290 = vmatmul.mubr.msk.bf16.vlgmr.msra.gmra.mrb[240].mxu1 %vm1384_vm1, %v7318_v4 }
 0xa19   : > { %12300 = vmatpush3.bf16.xpose.msra.mxu1 %v7425_v50  ;;  %12301 = vmatprep.mubr.msk.bf16.mxu1 %vm13536_vm0, %v17659_v24 }
 0xa1a   : > { %12311 = vmatprep.subr.bf16.mxu1 %v17659_v24 }
 0xa20   : > { %12302 = vmatmul.mubr.msk.bf16.vlgmr.msra.gmra.mrb[244].mxu1 %vm1384_vm1, %v7418_v48 }
 0xa21   : > { %12312 = vmatpush3.bf16.msra.mxu1 %v7729_v13  ;;  %12313 = vmatprep.mubr.msk.bf16.mxu1 %vm13536_vm0, %v17659_v24 }
 0xa22   : > { %12323 = vmatprep.subr.bf16.mxu1 %v17659_v24 }
 0xa43   : > { %v15937_v34 = vpop.f32.mrb[184].mxu0 }
 0xa44   : > { %v12117_v26 = vpop.f32.mrb[185].mxu0 }
 0xa45   : > { %v5944_v46 = vpop.f32.mrb[186].mxu0 }
 0xa46   : > { %v12118_v40 = vpop.f32.mrb[187].mxu0 }
 0xa4b   : > { %v15939_v18 = vpop.f32.mrb[188].mxu0 }
 0xa4c   : > { %v12129_v29 = vpop.f32.mrb[189].mxu0 }
 0xa4d   : > { %v6040_v47 = vpop.f32.mrb[190].mxu0 }
 0xa4e   : > { %v15941_v33 = vpop.f32.mrb[184].mxu1  ;;  %v12130_v6 = vpop.f32.mrb[191].mxu0 }
 0xa4f   : > { %v12606_v9 = vpack.i.bf16 %v15941_v33, %v15937_v34  ;;  %v12123_v49 = vpop.f32.mrb[185].mxu1 }
 0xa50   : > { %v5992_v16 = vpop.f32.mrb[186].mxu1 }
 0xa51   : > { %v12124_v7 = vpop.f32.mrb[187].mxu1 }
 0xa56   : > { %v15945_v60 = vpop.f32.mrb[188].mxu1 }
 0xa57   : > { %v12611_v31 = vpack.i.bf16 %v15945_v60, %v15939_v18  ;;  %v12135_v52 = vpop.f32.mrb[189].mxu1 }
 0xa58   : > { %v6088_v10 = vpop.f32.mrb[190].mxu1 }
 0xa59   : > { %v12136_v19 = vpop.f32.mrb[191].mxu1 }
 0xa5a   : > { %v15949_v44 = vpop.f32.mrb[192].mxu0 }
 0xa5b   : > { %v12141_v3 = vpop.f32.mrb[193].mxu0 }
 0xa5c   : > { %v6136_v62 = vpop.f32.mrb[194].mxu0 }
 0xa5d   : > { %v12142_v22 = vpop.f32.mrb[195].mxu0 }
 0xa5f   : > { %v15951_v14 = vpop.f32.mrb[192].mxu1 }
 0xa60   : > { %v12636_v58 = vpack.i.bf16 %v15951_v14, %v15949_v44  ;;  %v12147_v25 = vpop.f32.mrb[193].mxu1 }
 0xa61   : > { %v6184_v61 = vpop.f32.mrb[194].mxu1 }
 0xa62   : > { %v12148_v42 = vpop.f32.mrb[195].mxu1  ;;  %v15955_v54 = vpop.f32.mrb[196].mxu0 }
 0xa63   : > { %v12153_v35 = vpop.f32.mrb[197].mxu0 }
 0xa64   : > { %v6232_v30 = vpop.f32.mrb[198].mxu0 }
 0xa65   : > { %v12154_v63 = vpop.f32.mrb[199].mxu0 }
 0xa67   : > { %v15957_v43 = vpop.f32.mrb[196].mxu1 }
 0xa68   : > { %v12641_v20 = vpack.i.bf16 %v15957_v43, %v15955_v54  ;;  %v12159_v55 = vpop.f32.mrb[197].mxu1 }
 0xa69   : > { %v6280_v36 = vpop.f32.mrb[198].mxu1 }
 0xa6a   : > { %v12160_v2 = vpop.f32.mrb[199].mxu1  ;;  %v15961_v59 = vpop.f32.mrb[200].mxu0 }
 0xa6b   : > { %v12165_v12 = vpop.f32.mrb[201].mxu0 }
 0xa6c   : > { %v6328_v0 = vpop.f32.mrb[202].mxu0 }
 0xa6d   : > { %v12166_v51 = vpop.f32.mrb[203].mxu0 }
 0xa6f   : > { %v15963_v32 = vpop.f32.mrb[200].mxu1 }
 0xa70   : > { %v12666_v23 = vpack.i.bf16 %v15963_v32, %v15961_v59  ;;  %v12171_v57 = vpop.f32.mrb[201].mxu1 }
 0xa71   : > { %v6376_v5 = vpop.f32.mrb[202].mxu1 }
 0xa72   : > { %v12172_v39 = vpop.f32.mrb[203].mxu1  ;;  %v15967_v38 = vpop.f32.mrb[204].mxu0 }
 0xa73   : > { %v12177_v27 = vpop.f32.mrb[205].mxu0 }
 0xa74   : > { %v6424_v1 = vpop.f32.mrb[206].mxu0 }
 0xa75   : > { %v12178_v56 = vpop.f32.mrb[207].mxu0 }
 0xa77   : > { %v15969_v4 = vpop.f32.mrb[204].mxu1 }
 0xa78   : > { %v12671_v53 = vpack.i.bf16 %v15969_v4, %v15967_v38  ;;  %v12183_v41 = vpop.f32.mrb[205].mxu1  ;;  %v17790_v4 = vld [vmem:[#allocation89_spill] sm:$0xff] }
 0xa79   : > { %v6472_v11 = vpop.f32.mrb[206].mxu1 }
 0xa7a   : > { %v12184_v21 = vpop.f32.mrb[207].mxu1  ;;  %v15973_v17 = vpop.f32.mrb[208].mxu0 }
 0xa7b   : > { %v12189_v45 = vpop.f32.mrb[209].mxu0 }
 0xa7c   : > { %v6520_v37 = vpop.f32.mrb[210].mxu0 }
 0xa7d   : > { %v12190_v48 = vpop.f32.mrb[211].mxu0 }
 0xa7f   : > { %v15975_v50 = vpop.f32.mrb[208].mxu1 }
 0xa80   : > { %v12696_v15 = vpack.i.bf16 %v15975_v50, %v15973_v17  ;;  %v12195_v13 = vpop.f32.mrb[209].mxu1 }
 0xa81   : > { %v6568_v26 = vpop.f32.mrb[210].mxu1 }
 0xa82   : > { %v12196_v46 = vpop.f32.mrb[211].mxu1 }
 0xaa8   : > { %v15979_v40 = vpop.f32.mrb[212].mxu0 }
 0xaa9   : > { %v12201_v29 = vpop.f32.mrb[213].mxu0 }
 0xaaa   : > { %v6616_v47 = vpop.f32.mrb[214].mxu0 }
 0xaab   : > { %v12202_v6 = vpop.f32.mrb[215].mxu0 }
 0xab0   : > { %v6711_v49 = vpop.f32.mrb[216].mxu0 }
 0xab1   : > { %v15981_v16 = vmul.f32 0.17677669, %v6711_v49  ;;  %v12213_v7 = vpop.f32.mrb[217].mxu0 }
 0xab2   : > { %v6714_v52 = vpop.f32.mrb[218].mxu0 }
 0xab3   : > { %v15983_v10 = vpop.f32.mrb[212].mxu1  ;;  %v12214_v19 = vpop.f32.mrb[219].mxu0  ;;  %v7483_v3 = vsel %vm2137_vm3, %v15981_v16, -inf }
 0xab4   : > { %v12701_v62 = vpack.i.bf16 %v15983_v10, %v15979_v40  ;;  %7484 = vmax.xlane.f32.xlu0 %v7483_v3  ;;  %v12207_v22 = vpop.f32.mrb[213].mxu1 }
 0xab5   : > { %v6664_v25 = vpop.f32.mrb[214].mxu1 }
 0xab6   : > { %v12208_v61 = vpop.f32.mrb[215].mxu1 }
 0xab8   : > { %v6811_v42 = vpop.f32.mrb[220].mxu0 }
 0xab9   : > { %v15989_v35 = vmul.f32 0.17677669, %v6811_v42  ;;  %v12225_v30 = vpop.f32.mrb[221].mxu0 }
 0xaba   : > { %v6814_v63 = vpop.f32.mrb[222].mxu0 }
 0xabb   : > { %v6761_v55 = vpop.f32.mrb[216].mxu1  ;;  %v12226_v36 = vpop.f32.mrb[223].mxu0  ;;  %v7489_v2 = vsel %vm2137_vm3, %v15989_v35, -inf }
 0xabc   : > { %v15993_v12 = vmul.f32 0.17677669, %v6761_v55  ;;  %7490 = vmax.xlane.f32.xlu0 %v7489_v2  ;;  %v12219_v0 = vpop.f32.mrb[217].mxu1 }
 0xabd   : > { %v6764_v51 = vpop.f32.mrb[218].mxu1 }
 0xabe   : > { %v12220_v57 = vpop.f32.mrb[219].mxu1  ;;  %v7486_v5 = vsel %vm2137_vm3, %v15993_v12, -inf }
 0xabf   : > { %7487 = vmax.xlane.f32.xlu1 %v7486_v5 }
 0xac0   : > { %v6911_v39 = vpop.f32.mrb[224].mxu0 }
 0xac1   : > { %v12237_v27 = vpop.f32.mrb[225].mxu0  ;;  %v15999_v37 = vmul.f32 0.17677669, %v6911_v39 }
 0xac2   : > { %v6914_v1 = vpop.f32.mrb[226].mxu0 }
 0xac3   : > { %v6861_v56 = vpop.f32.mrb[220].mxu1  ;;  %v12238_v41 = vpop.f32.mrb[227].mxu0  ;;  %v7495_v6 = vsel %vm2137_vm3, %v15999_v37, -inf }
 0xac4   : > { %v15997_v11 = vmul.f32 0.17677669, %v6861_v56  ;;  %v12231_v21 = vpop.f32.mrb[221].mxu1 }
 0xac5   : > { %v6864_v45 = vpop.f32.mrb[222].mxu1 }
 0xac6   : > { %v12232_v48 = vpop.f32.mrb[223].mxu1  ;;  %v7492_v13 = vsel %vm2137_vm3, %v15997_v11, -inf }
 0xac7   : > { %7493 = vmax.xlane.f32.xlu0 %v7492_v13 }
 0xac8   : > { %v7011_v26 = vpop.f32.mrb[228].mxu0 }
 0xac9   : > { %v12249_v46 = vpop.f32.mrb[229].mxu0  ;;  %v16003_v29 = vmul.f32 0.17677669, %v7011_v26 }
 0xaca   : > { %v7014_v47 = vpop.f32.mrb[230].mxu0 }
 0xacb   : > { %v12250_v49 = vpop.f32.mrb[231].mxu0  ;;  %7496 = vmax.xlane.f32.xlu0 %v7495_v6  ;;  %v6961_v7 = vpop.f32.mrb[224].mxu1  ;;  %v7501_v25 = vsel %vm2137_vm3, %v16003_v29, -inf }
 0xacc   : > { %v16007_v52 = vmul.f32 0.17677669, %v6961_v7  ;;  %v12243_v19 = vpop.f32.mrb[225].mxu1 }
 0xacd   : > { %v6964_v3 = vpop.f32.mrb[226].mxu1 }
 0xace   : > { %v12244_v22 = vpop.f32.mrb[227].mxu1  ;;  %v7498_v61 = vsel %vm2137_vm3, %v16007_v52, -inf }
 0xacf   : > { %7502 = vmax.xlane.f32.xlu0 %v7501_v25  ;;  %7499 = vmax.xlane.f32.xlu1 %v7498_v61 }
 0xad0   : > { %v7111_v42 = vpop.f32.mrb[232].mxu0 }
 0xad1   : > { %v16013_v30 = vmul.f32 0.17677669, %v7111_v42  ;;  %v12261_v63 = vpop.f32.mrb[233].mxu0 }
 0xad2   : > { %v7114_v55 = vpop.f32.mrb[234].mxu0 }
 0xad3   : > { %v7061_v36 = vpop.f32.mrb[228].mxu1  ;;  %v12262_v2 = vpop.f32.mrb[235].mxu0  ;;  %v7507_v0 = vsel %vm2137_vm3, %v16013_v30, -inf }
 0xad4   : > { %v16017_v51 = vmul.f32 0.17677669, %v7061_v36  ;;  %7508 = vmax.xlane.f32.xlu0 %v7507_v0  ;;  %v12255_v57 = vpop.f32.mrb[229].mxu1 }
 0xad5   : > { %v7064_v5 = vpop.f32.mrb[230].mxu1 }
 0xad6   : > { %v12256_v39 = vpop.f32.mrb[231].mxu1  ;;  %v7504_v27 = vsel %vm2137_vm3, %v16017_v51, -inf }
 0xad7   : > { %7505 = vmax.xlane.f32.xlu1 %v7504_v27 }
 0xad8   : > { %v7211_v1 = vpop.f32.mrb[236].mxu0 }
 0xad9   : > { %v16021_v56 = vmul.f32 0.17677669, %v7211_v1  ;;  %v12273_v41 = vpop.f32.mrb[237].mxu0 }
 0xada   : > { %v7214_v21 = vpop.f32.mrb[238].mxu0 }
 0xadb   : > { %v7161_v45 = vpop.f32.mrb[232].mxu1  ;;  %v12274_v48 = vpop.f32.mrb[239].mxu0  ;;  %v7513_v13 = vsel %vm2137_vm3, %v16021_v56, -inf }
 0xadc   : > { %v16025_v26 = vmul.f32 0.17677669, %v7161_v45  ;;  %7514 = vmax.xlane.f32.xlu0 %v7513_v13  ;;  %v12267_v46 = vpop.f32.mrb[233].mxu1 }
 0xadd   : > { %v7164_v47 = vpop.f32.mrb[234].mxu1 }
 0xade   : > { %v12268_v6 = vpop.f32.mrb[235].mxu1  ;;  %v7510_v49 = vsel %vm2137_vm3, %v16025_v26, -inf }
 0xadf   : > { %7511 = vmax.xlane.f32.xlu1 %v7510_v49 }
 0xae0   : > { %v7311_v7 = vpop.f32.mrb[240].mxu0 }
 0xae1   : > { %v16029_v19 = vmul.f32 0.17677669, %v7311_v7  ;;  %v12285_v3 = vpop.f32.mrb[241].mxu0 }
 0xae2   : > { %v7314_v22 = vpop.f32.mrb[242].mxu0 }
 0xae3   : > { %v7261_v25 = vpop.f32.mrb[236].mxu1  ;;  %v12286_v61 = vpop.f32.mrb[243].mxu0  ;;  %v7519_v42 = vsel %vm2137_vm3, %v16029_v19, -inf  ;;  %v17762_v22 = vld [vmem:[#allocation65_spill] sm:$0xff] }
 0xae4   : > { %v16033_v63 = vmul.f32 0.17677669, %v7261_v25  ;;  %7520 = vmax.xlane.f32.xlu0 %v7519_v42  ;;  %v12279_v55 = vpop.f32.mrb[237].mxu1  ;;  %v17763_v25 = vld [vmem:[#allocation60_spill] sm:$0xff]  ;;  %v17765_v42 = vld [vmem:[#allocation67_spill] sm:$0xff] }
 0xae5   : > { %v7264_v36 = vpop.f32.mrb[238].mxu1  ;;  %v17764_v61 = vld [vmem:[#allocation64_spill] sm:$0xff] }
 0xae6   : > { %v12280_v2 = vpop.f32.mrb[239].mxu1  ;;  %v7516_v0 = vsel %vm2137_vm3, %v16033_v63, -inf }
 0xae7   : > { %7517 = vmax.xlane.f32.xlu1 %v7516_v0  ;;  %v16057_v2 = vpop.permute.xlu0 %7771 }
 0xae8   : > { %v7411_v57 = vpop.f32.mrb[244].mxu0 }
 0xae9   : > { %v16037_v5 = vmul.f32 0.17677669, %v7411_v57  ;;  %v12297_v39 = vpop.f32.mrb[245].mxu0  ;;  %v16061_v57 = vpop.permute.xlu1 %7819 }
 0xaea   : > { %v7414_v27 = vpop.f32.mrb[246].mxu0 }
 0xaeb   : > { %v7361_v1 = vpop.f32.mrb[240].mxu1  ;;  %v12298_v41 = vpop.f32.mrb[247].mxu0  ;;  %v7525_v21 = vsel %vm2137_vm3, %v16037_v5, -inf }
 0xaec   : > { %v16041_v45 = vmul.f32 0.17677669, %v7361_v1  ;;  %7526 = vmax.xlane.f32.xlu0 %v7525_v21  ;;  %v12291_v48 = vpop.f32.mrb[241].mxu1  ;;  %v16059_v0 = vpop.permute.xlu0 %7867 }
 0xaed   : > { %v7364_v13 = vpop.f32.mrb[242].mxu1  ;;  %v16065_v1 = vpop.permute.xlu1 %7915 }
 0xaee   : > { %v12292_v46 = vpop.f32.mrb[243].mxu1  ;;  %v7522_v47 = vsel %vm2137_vm3, %v16041_v45, -inf }
 0xaef   : > { %7523 = vmax.xlane.f32.xlu1 %v7522_v47 }
 0xaf0   : > { %v16063_v39 = vpop.permute.xlu0 %7963 }
 0xaf1   : > { %v16068_v48 = vpop.permute.xlu1 %8011 }
 0xaf3   : > { %v7461_v6 = vpop.f32.mrb[244].mxu1 }
 0xaf4   : > { %v12303_v49 = vpop.f32.mrb[245].mxu1  ;;  %v16053_v55 = vmul.f32 0.17677669, %v7461_v6 }
 0xaf5   : > { %v7464_v7 = vpop.f32.mrb[246].mxu1 }
 0xaf6   : > { %v12304_v3 = vpop.f32.mrb[247].mxu1  ;;  %v7528_v36 = vsel %vm2137_vm3, %v16053_v55, -inf }
 0xb00   : > { %8107 = vrot.lane.b32.xlu1 %v17762_v22, %s13539_s8 }
 0xb02   : > { %8059 = vrot.lane.b32.xlu0 %v17763_v25, %s13539_s8 }
 0xb04   : > { %8155 = vrot.lane.b32.xlu1 %v17764_v61, %s13539_s8 }
 0xb08   : > { %8203 = vrot.lane.b32.xlu1 %v17765_v42, %s13539_s8 }
 0xb2c   : > { %7529 = vmax.xlane.f32.xlu1 %v7528_v36 }
 0xb41   : > { %v7485_v27 = vpop.xlane.xlu0 %7484 }
 0xb42   : > { %v7531_v41 = vsub.f32 %v15981_v16, %v7485_v27 }
 0xb44   : > { %v7547_v21 = vmul.f32 1.442695, %v7531_v41 }
 0xb46   : > { %13028 = vpow2.f32 %v7547_v21 }
 0xb49   : > { %v7491_v13 = vpop.xlane.xlu0 %7490 }
 0xb4a   : > { %v7533_v46 = vsub.f32 %v15989_v35, %v7491_v13 }
 0xb4c   : > { %v7551_v47 = vmul.f32 1.442695, %v7533_v46  ;;  %v7488_v6 = vpop.xlane.xlu1 %7487 }
 0xb4d   : > { %v7532_v49 = vsub.f32 %v15993_v12, %v7488_v6 }
 0xb4e   : > { %13030 = vpow2.f32 %v7551_v47 }
 0xb4f   : > { %v7549_v7 = vmul.f32 1.442695, %v7532_v49 }
 0xb50   : > { %v16072_v3 = vpop.eup %13028 }
 0xb51   : > { %13032 = vpow2.f32 %v7549_v7  ;;  %v7579_v22 = vsel %vm2137_vm3, %v16072_v3, 0.0 }
 0xb52   : > { %7580 = vadd.xlane.f32.xlu0 %v7579_v22 }
 0xb54   : > { %v7494_v16 = vpop.xlane.xlu0 %7493 }
 0xb55   : > { %v7534_v25 = vsub.f32 %v15997_v11, %v7494_v16 }
 0xb57   : > { %v7553_v61 = vmul.f32 1.442695, %v7534_v25 }
 0xb58   : > { %v16077_v42 = vpop.eup %13030  ;;  %v7497_v35 = vpop.xlane.xlu0 %7496 }
 0xb59   : > { %13034 = vpow2.f32 %v7553_v61  ;;  %v7535_v36 = vsub.f32 %v15999_v37, %v7497_v35  ;;  %v7585_v12 = vsel %vm2137_vm3, %v16077_v42, 0.0 }
 0xb5a   : > { %7586 = vadd.xlane.f32.xlu0 %v7585_v12 }
 0xb5b   : > { %v16082_v27 = vpop.eup %13032  ;;  %v7555_v41 = vmul.f32 1.442695, %v7535_v36 }
 0xb5c   : > { %v7503_v21 = vpop.xlane.xlu0 %7502  ;;  %v7500_v13 = vpop.xlane.xlu1 %7499  ;;  %v7582_v46 = vsel %vm2137_vm3, %v16082_v27, 0.0 }
 0xb5d   : > { %13036 = vpow2.f32 %v7555_v41  ;;  %v7537_v11 = vsub.f32 %v16003_v29, %v7503_v21  ;;  %v7536_v47 = vsub.f32 %v16007_v52, %v7500_v13  ;;  %7583 = vadd.xlane.f32.xlu1 %v7582_v46 }
 0xb5f   : > { %v7559_v6 = vmul.f32 1.442695, %v7537_v11  ;;  %v7557_v37 = vmul.f32 1.442695, %v7536_v47 }
 0xb61   : > { %13038 = vpow2.f32 %v7559_v6  ;;  %v7509_v49 = vpop.xlane.xlu0 %7508 }
 0xb62   : > { %13040 = vpow2.f32 %v7557_v37  ;;  %v7539_v22 = vsub.f32 %v16013_v30, %v7509_v49 }
 0xb63   : > { %v16088_v7 = vpop.eup %13034 }
 0xb64   : > { %v7506_v16 = vpop.xlane.xlu1 %7505  ;;  %v7588_v25 = vsel %vm2137_vm3, %v16088_v7, 0.0  ;;  %v7563_v52 = vmul.f32 1.442695, %v7539_v22 }
 0xb65   : > { %v7538_v61 = vsub.f32 %v16017_v51, %v7506_v16  ;;  %7589 = vadd.xlane.f32.xlu1 %v7588_v25 }
 0xb67   : > { %v16094_v29 = vpop.eup %13036  ;;  %v7561_v35 = vmul.f32 1.442695, %v7538_v61 }
 0xb68   : > { %v7591_v36 = vsel %vm2137_vm3, %v16094_v29, 0.0 }
 0xb69   : > { %13042 = vpow2.f32 %v7561_v35  ;;  %7592 = vadd.xlane.f32.xlu0 %v7591_v36  ;;  %v7515_v12 = vpop.xlane.xlu0 %7514 }
 0xb6a   : > { %v7541_v41 = vsub.f32 %v16021_v56, %v7515_v12  ;;  %13044 = vpow2.f32 %v7563_v52 }
 0xb6b   : > { %v16099_v30 = vpop.eup %13038 }
 0xb6c   : > { %v16101_v21 = vpop.eup %13040  ;;  %v7567_v13 = vmul.f32 1.442695, %v7541_v41  ;;  %v7512_v51 = vpop.xlane.xlu1 %7511  ;;  %v7597_v46 = vsel %vm2137_vm3, %v16099_v30, 0.0  ;;  %v17766_v41 = vld [vmem:[#allocation43_spill] sm:$0xff] }
 0xb6d   : > { %v7540_v11 = vsub.f32 %v16025_v26, %v7512_v51  ;;  %7598 = vadd.xlane.f32.xlu0 %v7597_v46  ;;  %v7594_v47 = vsel %vm2137_vm3, %v16101_v21, 0.0  ;;  %v17767_v51 = vld [vmem:[#allocation66_spill] sm:$0xff] }
 0xb6e   : > { %7595 = vadd.xlane.f32.xlu1 %v7594_v47  ;;  %13046 = vpow2.f32 %v7567_v13 }
 0xb6f   : > { %v7565_v6 = vmul.f32 1.442695, %v7540_v11 }
 0xb71   : > { %13048 = vpow2.f32 %v7565_v6  ;;  %v7521_v13 = vpop.xlane.xlu0 %7520 }
 0xb72   : > { %v7543_v46 = vsub.f32 %v16029_v19, %v7521_v13 }
 0xb73   : > { %v16108_v56 = vpop.eup %13042 }
 0xb74   : > { %v7518_v37 = vpop.xlane.xlu1 %7517  ;;  %v7600_v49 = vsel %vm2137_vm3, %v16108_v56, 0.0  ;;  %v16112_v22 = vpop.eup %13044  ;;  %v7571_v47 = vmul.f32 1.442695, %v7543_v46 }
 0xb75   : > { %v7542_v16 = vsub.f32 %v16033_v63, %v7518_v37  ;;  %7601 = vadd.xlane.f32.xlu1 %v7600_v49  ;;  %v7603_v25 = vsel %vm2137_vm3, %v16112_v22, 0.0 }
 0xb77   : > { %v7569_v26 = vmul.f32 1.442695, %v7542_v16 }
 0xb78   : > { %v16117_v61 = vpop.eup %13046 }
 0xb79   : > { %13050 = vpow2.f32 %v7569_v26  ;;  %7604 = vadd.xlane.f32.xlu1 %v7603_v25  ;;  %v7609_v36 = vsel %vm2137_vm3, %v16117_v61, 0.0  ;;  %v7527_v11 = vpop.xlane.xlu0 %7526 }
 0xb7a   : > { %v7545_v6 = vsub.f32 %v16037_v5, %v7527_v11  ;;  %13052 = vpow2.f32 %v7571_v47 }
 0xb7b   : > { %v16119_v52 = vpop.eup %13048 }
 0xb7c   : > { %v7606_v35 = vsel %vm2137_vm3, %v16119_v52, 0.0  ;;  %v7524_v37 = vpop.xlane.xlu1 %7523  ;;  %v7575_v49 = vmul.f32 1.442695, %v7545_v6 }
 0xb7d   : > { %7607 = vadd.xlane.f32.xlu0 %v7606_v35  ;;  %7610 = vadd.xlane.f32.xlu1 %v7609_v36  ;;  %v7544_v16 = vsub.f32 %v16041_v45, %v7524_v37  ;;  %v17768_v37 = vld [vmem:[#allocation77_spill] sm:$0xff] }
 0xb7e   : > { %13054 = vpow2.f32 %v7575_v49  ;;  %v17769_v49 = vld [vmem:[#allocation76_spill] sm:$0xff] }
 0xb7f   : > { %v7573_v26 = vmul.f32 1.442695, %v7544_v16  ;;  %v17770_v16 = vpack.i.bf16 %v17768_v37, %v17769_v49 }
 0xb80   : > { %v16136_v25 = vpop.permute.xlu1 %8107 }
 0xb81   : > { %13056 = vpow2.f32 %v7573_v26 }
 0xb83   : > { %v16125_v63 = vpop.eup %13050 }
 0xb84   : > { %v7612_v12 = vsel %vm2137_vm3, %v16125_v63, 0.0  ;;  %v16138_v35 = vpop.eup %13052  ;;  %v16140_v36 = vpop.permute.xlu1 %8155 }
 0xb85   : > { %7613 = vadd.xlane.f32.xlu0 %v7612_v12  ;;  %v7615_v19 = vsel %vm2137_vm3, %v16138_v35, 0.0 }
 0xb88   : > { %v16144_v12 = vpop.eup %13054  ;;  %v16146_v5 = vpop.permute.xlu1 %8203 }
 0xb89   : > { %v7621_v45 = vsel %vm2137_vm3, %v16144_v12, 0.0 }
 0xb8e   : > { %8299 = vrot.lane.b32.xlu1 %v17766_v41, %s13539_s8  ;;  %v16150_v41 = vpop.eup %13056 }
 0xb9b   : > { %8251 = vrot.lane.b32.xlu0 %v17767_v51, %s13539_s8  ;;  %v7618_v51 = vsel %vm2137_vm3, %v16150_v41, 0.0 }
 0xbb2   : > { %7616 = vadd.xlane.f32.xlu1 %v7615_v19  ;;  %v17772_v19 = vld [vmem:[#allocation74_spill] sm:$0xff] }
 0xbb6   : > { %7622 = vadd.xlane.f32.xlu1 %v7621_v45 }
 0xbb9   : > { %v7530_v13 = vpop.xlane.xlu1 %7529 }
 0xbba   : > { %v7546_v46 = vsub.f32 %v16053_v55, %v7530_v13  ;;  %7619 = vadd.xlane.f32.xlu0 %v7618_v51  ;;  %v16169_v55 = vpop.permute.xlu0 %8059 }
 0xbbc   : > { %v7577_v11 = vmul.f32 1.442695, %v7546_v46 }
 0xbbe   : > { %13058 = vpow2.f32 %v7577_v11 }
 0xbc7   : > { %8395 = vrot.lane.b32.xlu1 %v14868_v28, %s13539_s8  ;;  %v17771_v28 = vld [vmem:[#allocation75_spill] sm:$0xff] }
 0xbc8   : > { %v16157_v47 = vpop.eup %13058  ;;  %v17773_v45 = vpack.i.bf16 %v17771_v28, %v17772_v19 }
 0xbc9   : > { %v7624_v6 = vsel %vm2137_vm3, %v16157_v47, 0.0 }
 0xbca   : > { %7625 = vadd.xlane.f32.xlu0 %v7624_v6 }
 0xbcb   : > { %12602 = vrot.lane.b32.xlu1 %v17770_v16, %s13539_s8 }
 0xbcf   : > { %12612 = vrot.lane.b32.xlu1 %v12611_v31, %s13538_s25 }
 0xbdf   : > { %v7581_v26 = vpop.xlane.xlu0 %7580 }
 0xbe0   : > { %13060 = vrcp.f32 %v7581_v26  ;;  %8347 = vrot.lane.b32.xlu0 %v14806_v8, %s13539_s8  ;;  %v7777_v8 = vsel %vm2333_vm2, %v16057_v2, 0  ;;  %v7873_v2 = vsel %vm2333_vm2, %v16059_v0, 0 }
 0xbe4   : > { %12597 = vrot.lane.b32.xlu0 %v17773_v45, %s13539_s8 }
 0xbe7   : > { %v7587_v13 = vpop.xlane.xlu0 %7586 }
 0xbe8   : > { %13062 = vrcp.f32 %v7587_v13  ;;  %12607 = vrot.lane.b32.xlu0 %v12606_v9, %s13538_s25 }
 0xbea   : > { %v13061_v18 = vpop.eup %13060  ;;  %v7584_v60 = vpop.xlane.xlu1 %7583 }
 0xbeb   : > { %13064 = vrcp.f32 %v7584_v60  ;;  %v7643_v31 = vmul.f32 %v13061_v18, %v16072_v3  ;;  %v7969_v60 = vsel %vm2333_vm2, %v16063_v39, 0  ;;  %v8017_v39 = vsel %vm2333_vm2, %v16068_v48, 0 }
 0xbed   : > { %v7659_v51 = vpack.c.bf16 %v7643_v31, %v7643_v31 }
 0xbef   : > { %12308 = vmatmul.mubr.msk.bf16.vlgmr.msra.gmra.mrb[248].mxu0 %vm2137_vm3, %v7659_v51 }
 0xbf0   : > { %12318 = vmatpush3.bf16.msra.mxu0 %v7777_v8  ;;  %12319 = vmatprep.mubr.msk.bf16.mxu0 %vm13536_vm0, %v17659_v24 }
 0xbf1   : > { %12329 = vmatprep.subr.bf16.mxu0 %v17659_v24 }
 0xbf2   : > { %v13063_v46 = vpop.eup %13062  ;;  %v7590_v34 = vpop.xlane.xlu1 %7589 }
 0xbf3   : > { %13066 = vrcp.f32 %v7590_v34  ;;  %v7645_v33 = vmul.f32 %v13063_v46, %v16077_v42  ;;  %v7825_v42 = vsel %vm2333_vm2, %v16061_v57, 0  ;;  %v7921_v57 = vsel %vm2333_vm2, %v16065_v1, 0 }
 0xbf5   : > { %v13065_v9 = vpop.eup %13064  ;;  %v7661_v11 = vpack.c.bf16 %v7645_v33, %v7645_v33 }
 0xbf6   : > { %v7593_v3 = vpop.xlane.xlu0 %7592  ;;  %v7644_v6 = vmul.f32 %v13065_v9, %v16082_v27 }
 0xbf7   : > { %13068 = vrcp.f32 %v7593_v3  ;;  %12320 = vmatmul.mubr.msk.bf16.vlgmr.msra.gmra.mrb[252].mxu0 %vm2137_vm3, %v7661_v11 }
 0xbf8   : > { %12330 = vmatpush3.bf16.msra.mxu0 %v7873_v2  ;;  %v7660_v37 = vpack.c.bf16 %v7644_v6, %v7644_v6  ;;  %12331 = vmatprep.mubr.msk.bf16.mxu0 %vm13536_vm0, %v17659_v24  ;;  %v8113_v6 = vsel %vm2333_vm2, %v16136_v25, 0 }
 0xbf9   : > { %12341 = vmatprep.subr.bf16.mxu0 %v17659_v24 }
 0xbfa   : > { %v7599_v49 = vpop.xlane.xlu0 %7598  ;;  %12314 = vmatmul.mubr.msk.bf16.vlgmr.msra.gmra.mrb[248].mxu1 %vm2137_vm3, %v7660_v37  ;;  %v8161_v37 = vsel %vm2333_vm2, %v16140_v36, 0 }
 0xbfb   : > { %13070 = vrcp.f32 %v7599_v49  ;;  %12324 = vmatpush3.bf16.msra.mxu1 %v7825_v42  ;;  %v7596_v27 = vpop.xlane.xlu1 %7595  ;;  %12325 = vmatprep.mubr.msk.bf16.mxu1 %vm13536_vm0, %v17659_v24  ;;  %v8209_v49 = vsel %vm2333_vm2, %v16146_v5, 0 }
 0xbfc   : > { %13072 = vrcp.f32 %v7596_v27  ;;  %12335 = vmatprep.subr.bf16.mxu1 %v17659_v24 }
 0xbfd   : > { %v13067_v0 = vpop.eup %13066 }
 0xbfe   : > { %v7646_v16 = vmul.f32 %v13067_v0, %v16088_v7 }
 0xc00   : > { %v7662_v26 = vpack.c.bf16 %v7646_v16, %v7646_v16 }
 0xc01   : > { %v13069_v28 = vpop.eup %13068 }
 0xc02   : > { %v7647_v19 = vmul.f32 %v13069_v28, %v16094_v29  ;;  %12326 = vmatmul.mubr.msk.bf16.vlgmr.msra.gmra.mrb[252].mxu1 %vm2137_vm3, %v7662_v26  ;;  %v7602_v45 = vpop.xlane.xlu1 %7601 }
 0xc03   : > { %12336 = vmatpush3.bf16.msra.mxu1 %v7921_v57  ;;  %13074 = vrcp.f32 %v7602_v45  ;;  %12337 = vmatprep.mubr.msk.bf16.mxu1 %vm13536_vm0, %v17659_v24 }
 0xc04   : > { %v7663_v13 = vpack.c.bf16 %v7647_v19, %v7647_v19  ;;  %12347 = vmatprep.subr.bf16.mxu1 %v17659_v24 }
 0xc05   : > { %v13071_v18 = vpop.eup %13070 }
 0xc06   : > { %v13073_v7 = vpop.eup %13072  ;;  %12332 = vmatmul.mubr.msk.bf16.vlgmr.msra.gmra.mrb[0].mxu0 %vm2137_vm3, %v7663_v13  ;;  %v7605_v1 = vpop.xlane.xlu1 %7604  ;;  %v7649_v31 = vmul.f32 %v13071_v18, %v16099_v30  ;;  %v8065_v30 = vsel %vm2333_vm2, %v16169_v55, 0 }
 0xc07   : > { %v7648_v29 = vmul.f32 %v13073_v7, %v16101_v21  ;;  %12342 = vmatpush3.bf16.msra.mxu0 %v7969_v60  ;;  %13076 = vrcp.f32 %v7605_v1  ;;  %12343 = vmatprep.mubr.msk.bf16.mxu0 %vm13536_vm0, %v17659_v24 }
 0xc08   : > { %12353 = vmatprep.subr.bf16.mxu0 %v17659_v24  ;;  %v7665_v34 = vpack.c.bf16 %v7649_v31, %v7649_v31 }
 0xc09   : > { %v7664_v51 = vpack.c.bf16 %v7648_v29, %v7648_v29 }
 0xc0a   : > { %v7608_v8 = vpop.xlane.xlu0 %7607  ;;  %v7611_v46 = vpop.xlane.xlu1 %7610 }
 0xc0b   : > { %13078 = vrcp.f32 %v7608_v8  ;;  %12338 = vmatmul.mubr.msk.bf16.vlgmr.msra.gmra.mrb[0].mxu1 %vm2137_vm3, %v7664_v51 }
 0xc0c   : > { %12348 = vmatpush3.bf16.msra.mxu1 %v8017_v39  ;;  %13080 = vrcp.f32 %v7611_v46  ;;  %12349 = vmatprep.mubr.msk.bf16.mxu1 %vm13536_vm0, %v17659_v24 }
 0xc0d   : > { %v13075_v21 = vpop.eup %13074  ;;  %12359 = vmatprep.subr.bf16.mxu1 %v17659_v24 }
 0xc0e   : > { %v7650_v33 = vmul.f32 %v13075_v21, %v16108_v56  ;;  %12344 = vmatmul.mubr.msk.bf16.vlgmr.msra.gmra.mrb[4].mxu0 %vm2137_vm3, %v7665_v34  ;;  %v8300_v5 = vpop.permute.xlu1 %8299 }
 0xc0f   : > { %12354 = vmatpush3.bf16.msra.mxu0 %v8065_v30  ;;  %12355 = vmatprep.mubr.msk.bf16.mxu0 %vm13536_vm0, %v17659_v24  ;;  %v8305_v26 = vsel %vm2333_vm2, %v8300_v5, 0  ;;  %v17774_v30 = vmov 0   ;;  %v17776_v5 = vld [vmem:[#allocation78_spill] sm:$0xff] }
 0xc10   : > { %v7666_v48 = vpack.c.bf16 %v7650_v33, %v7650_v33  ;;  %12365 = vmatprep.subr.bf16.mxu0 %v17659_v24  ;;  %v12750_v33 = vld [vmem:[%s14026_s18 + $0x10] sm:$0xff]  }
 0xc11   : > { %v13077_v9 = vpop.eup %13076 }
 0xc12   : > { %v7651_v11 = vmul.f32 %v13077_v9, %v16112_v22  ;;  %v7614_v3 = vpop.xlane.xlu0 %7613  ;;  %v12752_v9 = vld [vmem:[%s14026_s18 + $0x20] sm:$0xff]  }
 0xc13   : > { %13082 = vrcp.f32 %v7614_v3  ;;  %12350 = vmatmul.mubr.msk.bf16.vlgmr.msra.gmra.mrb[4].mxu1 %vm2137_vm3, %v7666_v48  ;;  %v12751_v48 = vld [vmem:[%s14026_s18 + $0x18] sm:$0xff]   ;;  %v12753_v3 = vld [vmem:[%s14026_s18 + $0x28] sm:$0xff]  }
 0xc14   : > { %v7667_v56 = vpack.c.bf16 %v7651_v11, %v7651_v11  ;;  %12360 = vmatpush3.bf16.msra.mxu1 %v8113_v6  ;;  %12361 = vmatprep.mubr.msk.bf16.mxu1 %vm13536_vm0, %v17659_v24 }
 0xc15   : > { %v13079_v55 = vpop.eup %13078  ;;  %12371 = vmatprep.subr.bf16.mxu1 %v17659_v24 }
 0xc16   : > { %v13081_v2 = vpop.eup %13080  ;;  %v7652_v22 = vmul.f32 %v13079_v55, %v16119_v52  ;;  %12356 = vmatmul.mubr.msk.bf16.vlgmr.msra.gmra.mrb[8].mxu0 %vm2137_vm3, %v7667_v56  ;;  %v8252_v27 = vpop.permute.xlu0 %8251  ;;  %v12754_v55 = vld [vmem:[%s14026_s18 + $0x30] sm:$0xff]  }
 0xc17   : > { %12366 = vmatpush3.bf16.msra.mxu0 %v8161_v37  ;;  %12367 = vmatprep.mubr.msk.bf16.mxu0 %vm13536_vm0, %v17659_v24  ;;  %v7653_v42 = vmul.f32 %v13081_v2, %v16117_v61  ;;  %v8257_v61 = vsel %vm2333_vm2, %v8252_v27, 0 }
 0xc18   : > { %v7668_v25 = vpack.c.bf16 %v7652_v22, %v7652_v22  ;;  %12377 = vmatprep.subr.bf16.mxu0 %v17659_v24 }
 0xc19   : > { %v7669_v36 = vpack.c.bf16 %v7653_v42, %v7653_v42 }
 0xc1b   : > { %12362 = vmatmul.mubr.msk.bf16.vlgmr.msra.gmra.mrb[8].mxu1 %vm2137_vm3, %v7668_v25  ;;  %v12755_v25 = vld [vmem:[%s14026_s18 + $0x38] sm:$0xff]  }
 0xc1c   : > { %12372 = vmatpush3.bf16.msra.mxu1 %v8209_v49  ;;  %12373 = vmatprep.mubr.msk.bf16.mxu1 %vm13536_vm0, %v17659_v24 }
 0xc1d   : > { %v13083_v52 = vpop.eup %13082  ;;  %12383 = vmatprep.subr.bf16.mxu1 %v17659_v24 }
 0xc1e   : > { %v7654_v0 = vmul.f32 %v13083_v52, %v16125_v63  ;;  %12368 = vmatmul.mubr.msk.bf16.vlgmr.msra.gmra.mrb[12].mxu0 %vm2137_vm3, %v7669_v36 }
 0xc1f   : > { %12378 = vmatpush3.bf16.msra.mxu0 %v8257_v61  ;;  %12379 = vmatprep.mubr.msk.bf16.mxu0 %vm13536_vm0, %v17659_v24  ;;  %v17775_v61 = vld [vmem:[#allocation79_spill] sm:$0xff] }
 0xc20   : > { %v7670_v16 = vpack.c.bf16 %v7654_v0, %v7654_v0  ;;  %12389 = vmatprep.subr.bf16.mxu0 %v17659_v24 }
 0xc23   : > { %12374 = vmatmul.mubr.msk.bf16.vlgmr.msra.gmra.mrb[12].mxu1 %vm2137_vm3, %v7670_v16  ;;  %v17777_v16 = vpack.i.bf16 %v17775_v61, %v17776_v5 }
 0xc24   : > { %12384 = vmatpush3.bf16.msra.mxu1 %v8305_v26  ;;  %12385 = vmatprep.mubr.msk.bf16.mxu1 %vm13536_vm0, %v17659_v24 }
 0xc25   : > { %12395 = vmatprep.subr.bf16.mxu1 %v17659_v24 }
 0xc3f   : > { %v7617_v63 = vpop.xlane.xlu1 %7616 }
 0xc40   : > { %13084 = vrcp.f32 %v7617_v63 }
 0xc43   : > { %v7623_v19 = vpop.xlane.xlu1 %7622 }
 0xc47   : > { %v7620_v28 = vpop.xlane.xlu0 %7619  ;;  %v8396_v60 = vpop.permute.xlu1 %8395 }
 0xc48   : > { %13086 = vrcp.f32 %v7620_v28  ;;  %v8401_v31 = vsel %vm2333_vm2, %v8396_v60, 0  ;;  %v17778_v60 = vld [vmem:[#allocation81_spill] sm:$0xff] }
 0xc49   : > { %13088 = vrcp.f32 %v7623_v19 }
 0xc4a   : > { %v13085_v57 = vpop.eup %13084 }
 0xc4b   : > { %v7655_v45 = vmul.f32 %v13085_v57, %v16138_v35 }
 0xc4d   : > { %v7671_v13 = vpack.c.bf16 %v7655_v45, %v7655_v45 }
 0xc4f   : > { %12380 = vmatmul.mubr.msk.bf16.vlgmr.msra.gmra.mrb[16].mxu0 %vm2137_vm3, %v7671_v13 }
 0xc50   : > { %12391 = vmatprep.mubr.msk.bf16.mxu0 %vm13536_vm0, %v17659_v24 }
 0xc52   : > { %v13087_v18 = vpop.eup %13086 }
 0xc53   : > { %v7656_v7 = vmul.f32 %v13087_v18, %v16150_v41  ;;  %v13089_v29 = vpop.eup %13088 }
 0xc54   : > { %v7657_v35 = vmul.f32 %v13089_v29, %v16144_v12  ;;  %v12749_v12 = vld [vmem:[%s14026_s18 + $0x8] sm:$0xff]  }
 0xc55   : > { %v7672_v1 = vpack.c.bf16 %v7656_v7, %v7656_v7 }
 0xc56   : > { %v7673_v46 = vpack.c.bf16 %v7657_v35, %v7657_v35 }
 0xc57   : > { %v7626_v51 = vpop.xlane.xlu0 %7625  ;;  %12386 = vmatmul.mubr.msk.bf16.vlgmr.msra.gmra.mrb[16].mxu1 %vm2137_vm3, %v7672_v1  ;;  %v17779_v1 = vld [vmem:[#allocation80_spill] sm:$0xff] }
 0xc58   : > { %13090 = vrcp.f32 %v7626_v51  ;;  %12396 = vmatpush3.bf16.msra.mxu1 %v8401_v31  ;;  %12397 = vmatprep.mubr.msk.bf16.mxu1 %vm13536_vm0, %v17659_v24  ;;  %v12748_v24 = vld [vmem:[%s14026_s18] sm:$0xff]   ;;  %v17780_v29 = vpack.i.bf16 %v17778_v60, %v17779_v1 }
 0xc5b   : > { %v8348_v8 = vpop.permute.xlu0 %8347 }
 0xc5c   : > { %v8353_v41 = vsel %vm2333_vm2, %v8348_v8, 0 }
 0xc5d   : > { %12390 = vmatpush3.bf16.msra.mxu0 %v8353_v41 }
 0xc5e   : > { %12401 = vmatprep.subr.bf16.mxu0 %v12748_v24 }
 0xc5f   : > { %v12598_v60 = vpop.permute.xlu0 %12597 }
 0xc60   : > { %12392 = vmatmul.mubr.msk.bf16.vlgmr.msra.gmra.mrb[20].mxu0 %vm2137_vm3, %v7673_v46 }
 0xc61   : > { %12402 = vmatpush3.bf16.msra.mxu0 %v12748_v24 }
 0xc62   : > { %v13091_v39 = vpop.eup %13090  ;;  %12403 = vmatprep.subr.bf16.mxu0 %v12749_v12 }
 0xc63   : > { %v7658_v34 = vmul.f32 %v13091_v39, %v16157_v47  ;;  %v17781_v39 = vld [vmem:[#allocation83_spill] sm:$0xff] }
 0xc65   : > { %v7674_v21 = vpack.c.bf16 %v7658_v34, %v7658_v34  ;;  %12404 = vmatpush3.bf16.msra.mxu0 %v12749_v12  ;;  %v17782_v34 = vld [vmem:[#allocation82_spill] sm:$0xff] }
 0xc66   : > { %12405 = vmatprep.subr.bf16.mxu0 %v12750_v33 }
 0xc67   : > { %12398 = vmatmul.mubr.msk.bf16.vlgmr.msra.gmra.mrb[20].mxu1 %vm2137_vm3, %v7674_v21  ;;  %v17783_v21 = vpack.i.bf16 %v17781_v39, %v17782_v34  ;;  %v17794_v39 = vld [vmem:[#allocation40_spill] sm:$0xff] }
 0xc68   : > { %9599 = vmatprep.mubr.bf16.mxu1 %v17774_v30 }
 0xc69   : > { %12406 = vmatpush3.bf16.msra.mxu0 %v12750_v33 }
 0xc6a   : > { %12407 = vmatprep.subr.bf16.mxu0 %v12751_v48 }
 0xc6d   : > { %12408 = vmatpush3.bf16.msra.mxu0 %v12751_v48 }
 0xc6e   : > { %12409 = vmatprep.subr.bf16.mxu0 %v12752_v9 }
 0xc71   : > { %12410 = vmatpush3.bf16.msra.mxu0 %v12752_v9 }
 0xc72   : > { %12411 = vmatprep.subr.bf16.mxu0 %v12753_v3 }
 0xc75   : > { %12412 = vmatpush3.bf16.msra.mxu0 %v12753_v3  ;;  %v17785_v3 = vld [vmem:[#allocation84_spill] sm:$0xff] }
 0xc76   : > { %12413 = vmatprep.subr.bf16.mxu0 %v12754_v55 }
 0xc79   : > { %12414 = vmatpush3.bf16.msra.mxu0 %v12754_v55 }
 0xc7a   : > { %12415 = vmatprep.subr.bf16.mxu0 %v12755_v25 }
 0xc7d   : > { %12416 = vmatpush3.bf16.msra.mxu0 %v12755_v25 }
 0xcc2   : > { %v7717_v47 = vpop.f32.mrb[248].mxu0 }
 0xcc3   : > { %v12309_v11 = vpop.f32.mrb[249].mxu0 }
 0xcc4   : > { %v7720_v6 = vpop.f32.mrb[250].mxu0  ;;  %v17784_v11 = vld [vmem:[#allocation85_spill] sm:$0xff] }
 0xcc5   : > { %v12310_v56 = vpop.f32.mrb[251].mxu0  ;;  %v17786_v6 = vpack.i.bf16 %v17784_v11, %v17785_v3 }
 0xcca   : > { %v7813_v2 = vpop.f32.mrb[252].mxu0 }
 0xccb   : > { %v12321_v37 = vpop.f32.mrb[253].mxu0 }
 0xccc   : > { %v7816_v22 = vpop.f32.mrb[254].mxu0 }
 0xccd   : > { %v7765_v42 = vpop.f32.mrb[248].mxu1  ;;  %v12322_v49 = vpop.f32.mrb[255].mxu0 }
 0xcce   : > { %v12616_v27 = vpack.i.bf16 %v7765_v42, %v7717_v47  ;;  %v12315_v36 = vpop.f32.mrb[249].mxu1  ;;  %v17787_v42 = vld [vmem:[#allocation87_spill] sm:$0xff]  ;;  %v17788_v49 = vld [vmem:[#allocation86_spill] sm:$0xff] }
 0xccf   : > { %v7768_v52 = vpop.f32.mrb[250].mxu1 }
 0xcd0   : > { %12617 = vrot.lane.b32.xlu0 %v12616_v27, %s13537_s14  ;;  %v12316_v0 = vpop.f32.mrb[251].mxu1  ;;  %v17789_v27 = vpack.i.bf16 %v17787_v42, %v17788_v49 }
 0xcd4   : > { %12627 = vrot.lane.b32.xlu0 %v17777_v16, %s13539_s8 }
 0xcd5   : > { %v7861_v26 = vpop.f32.mrb[252].mxu1 }
 0xcd6   : > { %v12621_v63 = vpack.i.bf16 %v7861_v26, %v7813_v2  ;;  %v12327_v28 = vpop.f32.mrb[253].mxu1 }
 0xcd7   : > { %v7864_v57 = vpop.f32.mrb[254].mxu1 }
 0xcd8   : > { %12637 = vrot.lane.b32.xlu0 %v12636_v58, %s13538_s25  ;;  %12622 = vrot.lane.b32.xlu1 %v12621_v63, %s13537_s14  ;;  %v12328_v19 = vpop.f32.mrb[255].mxu1 }
 0xcd9   : > { %v7909_v45 = vpop.f32.mrb[0].mxu0 }
 0xcda   : > { %v12333_v13 = vpop.f32.mrb[1].mxu0 }
 0xcdb   : > { %v7912_v18 = vpop.f32.mrb[2].mxu0 }
 0xcdc   : > { %v12334_v7 = vpop.f32.mrb[3].mxu0  ;;  %12632 = vrot.lane.b32.xlu1 %v17780_v29, %s13539_s8 }
 0xcde   : > { %v7957_v31 = vpop.f32.mrb[0].mxu1 }
 0xcdf   : > { %v12646_v51 = vpack.i.bf16 %v7957_v31, %v7909_v45  ;;  %v12339_v35 = vpop.f32.mrb[1].mxu1 }
 0xce0   : > { %v7960_v8 = vpop.f32.mrb[2].mxu1  ;;  %12642 = vrot.lane.b32.xlu1 %v12641_v20, %s13538_s25  ;;  %v12600_v35 = vunpack.i.h.bf16 %v12598_v60 }
 0xce1   : > { %12647 = vrot.lane.b32.xlu0 %v12646_v51, %s13537_s14  ;;  %v12340_v44 = vpop.f32.mrb[3].mxu1  ;;  %v8005_v14 = vpop.f32.mrb[4].mxu0  ;;  %v12599_v8 = vunpack.i.l.bf16 %v12598_v60 }
 0xce2   : > { %v12345_v58 = vpop.f32.mrb[5].mxu0  ;;  %v12603_v51 = vpop.permute.xlu1 %12602 }
 0xce3   : > { %v8008_v41 = vpop.f32.mrb[6].mxu0  ;;  %v8635_v34 = vsel %vm1384_vm1, %v17794_v39, %v12599_v8 }
 0xce4   : > { %v12346_v46 = vpop.f32.mrb[7].mxu0  ;;  %v17793_v41 = vld [vmem:[#allocation42_spill] sm:$0xff] }
 0xce5   : > { %12657 = vrot.lane.b32.xlu0 %v17783_v21, %s13539_s8  ;;  %v8636_v46 = vsel %vm1384_vm1, %v17793_v41, %v12600_v35 }
 0xce6   : > { %v8053_v24 = vpop.f32.mrb[4].mxu1 }
 0xce7   : > { %v12651_v12 = vpack.i.bf16 %v8053_v24, %v8005_v14  ;;  %v12351_v33 = vpop.f32.mrb[5].mxu1 }
 0xce8   : > { %v8056_v48 = vpop.f32.mrb[6].mxu1 }
 0xce9   : > { %12667 = vrot.lane.b32.xlu0 %v12666_v23, %s13538_s25  ;;  %12652 = vrot.lane.b32.xlu1 %v12651_v12, %s13537_s14  ;;  %v12352_v54 = vpop.f32.mrb[7].mxu1  ;;  %v8101_v43 = vpop.f32.mrb[8].mxu0 }
 0xcea   : > { %v12357_v20 = vpop.f32.mrb[9].mxu0  ;;  %v12613_v48 = vpop.permute.xlu1 %12612 }
 0xceb   : > { %v8104_v9 = vpop.f32.mrb[10].mxu0  ;;  %v12615_v11 = vunpack.i.h.bf16 %v12613_v48  ;;  %v12614_v3 = vunpack.i.l.bf16 %v12613_v48 }
 0xcec   : > { %v12358_v47 = vpop.f32.mrb[11].mxu0  ;;  %v12605_v9 = vunpack.i.h.bf16 %v12603_v51 }
 0xced   : > { %12662 = vrot.lane.b32.xlu1 %v17786_v6, %s13539_s8  ;;  %v12604_v47 = vunpack.i.l.bf16 %v12603_v51 }
 0xcee   : > { %v8149_v56 = vpop.f32.mrb[8].mxu1 }
 0xcef   : > { %v12676_v55 = vpack.i.bf16 %v8149_v56, %v8101_v43  ;;  %v12363_v2 = vpop.f32.mrb[9].mxu1 }
 0xcf0   : > { %v8152_v37 = vpop.f32.mrb[10].mxu1 }
 0xcf1   : > { %12672 = vrot.lane.b32.xlu1 %v12671_v53, %s13538_s25  ;;  %12677 = vrot.lane.b32.xlu0 %v12676_v55, %s13537_s14  ;;  %v12364_v59 = vpop.f32.mrb[11].mxu1  ;;  %v8197_v32 = vpop.f32.mrb[12].mxu0  ;;  %v17791_v53 = vld [vmem:[#allocation88_spill] sm:$0xff]  ;;  %v17796_v37 = vld [vmem:[#allocation47_spill] sm:$0xff] }
 0xcf2   : > { %v12369_v23 = vpop.f32.mrb[13].mxu0  ;;  %v17792_v5 = vpack.i.bf16 %v17790_v4, %v17791_v53  ;;  %v17795_v55 = vld [vmem:[#allocation52_spill] sm:$0xff]  ;;  %v8637_v59 = vsel %vm1384_vm1, %v17796_v37, %v12604_v47 }
 0xcf3   : > { %v8200_v22 = vpop.f32.mrb[14].mxu0  ;;  %v8638_v2 = vsel %vm1384_vm1, %v17795_v55, %v12605_v9 }
 0xcf4   : > { %v12370_v25 = vpop.f32.mrb[15].mxu0  ;;  %v8654_v22 = vsel %vm8651_vm4, %v8637_v59, %v12614_v3 }
 0xcf5   : > { %12687 = vrot.lane.b32.xlu0 %v17789_v27, %s13539_s8  ;;  %v8655_v25 = vsel %vm8651_vm4, %v8638_v2, %v12615_v11 }
 0xcf6   : > { %v8245_v36 = vpop.f32.mrb[12].mxu1 }
 0xcf7   : > { %v12681_v52 = vpack.i.bf16 %v8245_v36, %v8197_v32  ;;  %v12375_v0 = vpop.f32.mrb[13].mxu1 }
 0xcf8   : > { %v8248_v61 = vpop.f32.mrb[14].mxu1 }
 0xcf9   : > { %12697 = vrot.lane.b32.xlu0 %v12696_v15, %s13538_s25  ;;  %12682 = vrot.lane.b32.xlu1 %v12681_v52, %s13537_s14  ;;  %v12376_v38 = vpop.f32.mrb[15].mxu1 }
 0xcfd   : > { %12692 = vrot.lane.b32.xlu1 %v17792_v5, %s13539_s8  ;;  %v17797_v5 = vld [vmem:[#allocation54_spill] sm:$0xff] }
 0xd01   : > { %12702 = vrot.lane.b32.xlu1 %v12701_v62, %s13538_s25  ;;  %v12608_v62 = vpop.permute.xlu0 %12607 }
 0xd02   : > { %v12610_v44 = vunpack.i.h.bf16 %v12608_v62  ;;  %v12609_v14 = vunpack.i.l.bf16 %v12608_v62 }
 0xd04   : > { %v8652_v12 = vsel %vm8651_vm4, %v8635_v34, %v12609_v14  ;;  %v8653_v33 = vsel %vm8651_vm4, %v8636_v46, %v12610_v44 }
 0xd22   : > { %v8293_v16 = vpop.f32.mrb[16].mxu0 }
 0xd23   : > { %v12381_v26 = vpop.f32.mrb[17].mxu0 }
 0xd24   : > { %v8296_v63 = vpop.f32.mrb[18].mxu0  ;;  %v17798_v26 = vld [vmem:[#allocation45_spill] sm:$0xff] }
 0xd25   : > { %v12382_v28 = vpop.f32.mrb[19].mxu0 }
 0xd2a   : > { %v8341_v57 = vpop.f32.mrb[16].mxu1 }
 0xd2b   : > { %v12706_v17 = vpack.i.bf16 %v8341_v57, %v8293_v16  ;;  %v12387_v50 = vpop.f32.mrb[17].mxu1 }
 0xd2c   : > { %v8344_v15 = vpop.f32.mrb[18].mxu1 }
 0xd2d   : > { %12707 = vrot.lane.b32.xlu0 %v12706_v17, %s13537_s14  ;;  %v12388_v19 = vpop.f32.mrb[19].mxu1 }
 0xd33   : > { %v8389_v45 = vpop.f32.mrb[20].mxu0 }
 0xd34   : > { %v12393_v13 = vpop.f32.mrb[21].mxu0 }
 0xd35   : > { %v8392_v18 = vpop.f32.mrb[22].mxu0 }
 0xd36   : > { %v12394_v7 = vpop.f32.mrb[23].mxu0 }
 0xd3a   : > { %v8437_v1 = vpop.f32.mrb[20].mxu1 }
 0xd3b   : > { %v12711_v29 = vpack.i.bf16 %v8437_v1, %v8389_v45  ;;  %v12399_v40 = vpop.f32.mrb[21].mxu1 }
 0xd3c   : > { %v8440_v10 = vpop.f32.mrb[22].mxu1 }
 0xd3d   : > { %12712 = vrot.lane.b32.xlu1 %v12711_v29, %s13537_s14  ;;  %v12400_v31 = vpop.f32.mrb[23].mxu1  ;;  %v17799_v10 = vld [vmem:[#allocation56_spill] sm:$0xff] }
 0xd3e   : > { %v17800_v31 = vld [vmem:[#allocation49_spill] sm:$0xff] }
 0xd42   : > { %v12618_v58 = vpop.permute.xlu0 %12617 }
 0xd43   : > { %v12620_v21 = vunpack.i.h.bf16 %v12618_v58  ;;  %v12619_v24 = vunpack.i.l.bf16 %v12618_v58 }
 0xd45   : > { %v8669_v54 = vsel %vm8668_vm5, %v8652_v12, %v12619_v24  ;;  %v8670_v43 = vsel %vm8668_vm5, %v8653_v33, %v12620_v21 }
 0xd46   : > { %v8685_v20 = vpack.c.bf16 %v8670_v43, %v8669_v54  ;;  %v12628_v6 = vpop.permute.xlu0 %12627  ;;  %v17801_v54 = vld [vmem:[#allocation68_spill] sm:$0xff] }
 0xd47   : > { %v12630_v52 = vunpack.i.h.bf16 %v12628_v6  ;;  %v12629_v0 = vunpack.i.l.bf16 %v12628_v6 }
 0xd48   : > { %12417 = vmatprep.mubr.bf16.mxu0 %v8685_v20  ;;  %v17802_v20 = vld [vmem:[#allocation53_spill] sm:$0xff] }
 0xd49   : > { %v8640_v16 = vsel %vm1384_vm1, %v17797_v5, %v12630_v52  ;;  %v8639_v63 = vsel %vm1384_vm1, %v17798_v26, %v12629_v0 }
 0xd4a   : > { %v12623_v56 = vpop.permute.xlu1 %12622  ;;  %v12638_v27 = vpop.permute.xlu0 %12637 }
 0xd4b   : > { %v12625_v32 = vunpack.i.h.bf16 %v12623_v56  ;;  %v12624_v23 = vunpack.i.l.bf16 %v12623_v56  ;;  %v12640_v38 = vunpack.i.h.bf16 %v12638_v27  ;;  %v12639_v4 = vunpack.i.l.bf16 %v12638_v27  ;;  %v17804_v27 = vld [vmem:[#allocation41_spill] sm:$0xff] }
 0xd4d   : > { %v8672_v42 = vsel %vm8668_vm5, %v8655_v25, %v12625_v32  ;;  %v8671_v49 = vsel %vm8668_vm5, %v8654_v22, %v12624_v23  ;;  %v8656_v17 = vsel %vm8651_vm4, %v8639_v63, %v12639_v4  ;;  %v8657_v50 = vsel %vm8651_vm4, %v8640_v16, %v12640_v38 }
 0xd4e   : > { %v8686_v36 = vpack.c.bf16 %v8672_v42, %v8671_v49  ;;  %v12633_v61 = vpop.permute.xlu1 %12632  ;;  %v17803_v42 = vld [vmem:[#allocation70_spill] sm:$0xff] }
 0xd4f   : > { %v12635_v18 = vunpack.i.h.bf16 %v12633_v61  ;;  %v12634_v7 = vunpack.i.l.bf16 %v12633_v61 }
 0xd50   : > { %12418 = vmatmul.mubr.bf16.vlgmr.msra.gmra.mrb[24].mxu0 %v8686_v36 }
 0xd51   : > { %v8642_v62 = vsel %vm1384_vm1, %v17799_v10, %v12635_v18  ;;  %v8641_v51 = vsel %vm1384_vm1, %v17800_v31, %v12634_v7 }
 0xd52   : > { %v12643_v15 = vpop.permute.xlu1 %12642 }
 0xd53   : > { %v12648_v53 = vpop.permute.xlu0 %12647  ;;  %v12645_v1 = vunpack.i.h.bf16 %v12643_v15  ;;  %v12644_v29 = vunpack.i.l.bf16 %v12643_v15  ;;  %v17805_v15 = vld [vmem:[#allocation72_spill] sm:$0xff] }
 0xd54   : > { %v12650_v28 = vunpack.i.h.bf16 %v12648_v53  ;;  %v12649_v57 = vunpack.i.l.bf16 %v12648_v53 }
 0xd55   : > { %v8658_v44 = vsel %vm8651_vm4, %v8641_v51, %v12644_v29  ;;  %v8659_v14 = vsel %vm8651_vm4, %v8642_v62, %v12645_v1 }
 0xd56   : > { %v8673_v19 = vsel %vm8668_vm5, %v8656_v17, %v12649_v57  ;;  %v8674_v45 = vsel %vm8668_vm5, %v8657_v50, %v12650_v28 }
 0xd57   : > { %v8687_v13 = vpack.c.bf16 %v8674_v45, %v8673_v19  ;;  %v12658_v60 = vpop.permute.xlu0 %12657  ;;  %v17806_v45 = vld [vmem:[#allocation69_spill] sm:$0xff] }
 0xd58   : > { %v12660_v34 = vunpack.i.h.bf16 %v12658_v60  ;;  %v12659_v21 = vunpack.i.l.bf16 %v12658_v60 }
 0xd59   : > { %12421 = vmatprep.mubr.bf16.mxu0 %v8687_v13 }
 0xd5a   : > { %v8644_v43 = vsel %vm1384_vm1, %v17801_v54, %v12660_v34  ;;  %v8643_v9 = vsel %vm1384_vm1, %v17802_v20, %v12659_v21 }
 0xd5b   : > { %v12653_v40 = vpop.permute.xlu1 %12652  ;;  %v12668_v58 = vpop.permute.xlu0 %12667 }
 0xd5c   : > { %v12655_v35 = vunpack.i.h.bf16 %v12653_v40  ;;  %v12654_v8 = vunpack.i.l.bf16 %v12653_v40  ;;  %v12670_v12 = vunpack.i.h.bf16 %v12668_v58  ;;  %v12669_v33 = vunpack.i.l.bf16 %v12668_v58  ;;  %v17807_v58 = vld [vmem:[#allocation73_spill] sm:$0xff] }
 0xd5e   : > { %v8676_v41 = vsel %vm8668_vm5, %v8659_v14, %v12655_v35  ;;  %v8675_v46 = vsel %vm8668_vm5, %v8658_v44, %v12654_v8  ;;  %v8660_v3 = vsel %vm8651_vm4, %v8643_v9, %v12669_v33  ;;  %v8661_v6 = vsel %vm8651_vm4, %v8644_v43, %v12670_v12  ;;  %v16409_v43 = vld [vmem:[%s17809_s5] ss:$0 sm:$0xff] }
 0xd5f   : > { %v8688_v39 = vpack.c.bf16 %v8676_v41, %v8675_v46  ;;  %v12663_v24 = vpop.permute.xlu1 %12662  ;;  %v17808_v46 = vld [vmem:[#allocation71_spill] sm:$0xff] }
 0xd60   : > { %v12665_v59 = vunpack.i.h.bf16 %v12663_v24  ;;  %v12664_v32 = vunpack.i.l.bf16 %v12663_v24 }
 0xd61   : > { %12422 = vmatmul.mubr.bf16.gmra.mrb[28].mxu0 %v8688_v39 }
 0xd62   : > { %v8646_v49 = vsel %vm1384_vm1, %v17803_v42, %v12665_v59  ;;  %v8645_v36 = vsel %vm1384_vm1, %v17804_v27, %v12664_v32  ;;  %v13190_v32 = vld [vmem:[%s14093_s10 + $0x10] sm:$0xff] }
 0xd63   : > { %v12678_v48 = vpop.permute.xlu0 %12677  ;;  %v12673_v56 = vpop.permute.xlu1 %12672 }
 0xd64   : > { %v12680_v47 = vunpack.i.h.bf16 %v12678_v48  ;;  %v12679_v11 = vunpack.i.l.bf16 %v12678_v48  ;;  %v12675_v23 = vunpack.i.h.bf16 %v12673_v56  ;;  %v12674_v22 = vunpack.i.l.bf16 %v12673_v56  ;;  %v13188_v56 = vld [vmem:[%s14093_s10] sm:$0xff] }
 0xd66   : > { %v8677_v55 = vsel %vm8668_vm5, %v8660_v3, %v12679_v11  ;;  %v8678_v2 = vsel %vm8668_vm5, %v8661_v6, %v12680_v47  ;;  %v8662_v61 = vsel %vm8651_vm4, %v8645_v36, %v12674_v22  ;;  %v8663_v38 = vsel %vm8651_vm4, %v8646_v49, %v12675_v23 }
 0xd67   : > { %v8689_v37 = vpack.c.bf16 %v8678_v2, %v8677_v55  ;;  %v12688_v16 = vpop.permute.xlu0 %12687 }
 0xd68   : > { %v12690_v63 = vunpack.i.h.bf16 %v12688_v16  ;;  %v12689_v28 = vunpack.i.l.bf16 %v12688_v16  ;;  %v13193_v16 = vld [vmem:[%s14093_s10 + $0x28] sm:$0xff] }
 0xd69   : > { %12425 = vmatprep.mubr.bf16.mxu0 %v8689_v37  ;;  %v13189_v37 = vld [vmem:[%s14093_s10 + $0x8] sm:$0xff] }
 0xd6a   : > { %v8648_v19 = vsel %vm1384_vm1, %v17805_v15, %v12690_v63  ;;  %v8647_v13 = vsel %vm1384_vm1, %v17806_v45, %v12689_v28  ;;  %v13194_v63 = vld [vmem:[%s14093_s10 + $0x30] sm:$0xff] }
 0xd6b   : > { %v12683_v25 = vpop.permute.xlu1 %12682  ;;  %v12698_v26 = vpop.permute.xlu0 %12697 }
 0xd6c   : > { %v12685_v52 = vunpack.i.h.bf16 %v12683_v25  ;;  %v12684_v0 = vunpack.i.l.bf16 %v12683_v25  ;;  %v12700_v57 = vunpack.i.h.bf16 %v12698_v26  ;;  %v12699_v17 = vunpack.i.l.bf16 %v12698_v26  ;;  %v13191_v25 = vld [vmem:[%s14093_s10 + $0x18] sm:$0xff] }
 0xd6e   : > { %v8680_v4 = vsel %vm8668_vm5, %v8663_v38, %v12685_v52  ;;  %v8679_v53 = vsel %vm8668_vm5, %v8662_v61, %v12684_v0  ;;  %v8664_v60 = vsel %vm8651_vm4, %v8647_v13, %v12699_v17  ;;  %v8665_v1 = vsel %vm8651_vm4, %v8648_v19, %v12700_v57  ;;  %v13192_v38 = vld [vmem:[%s14093_s10 + $0x20] sm:$0xff]  ;;  %v13195_v57 = vld [vmem:[%s14093_s10 + $0x38] sm:$0xff] }
 0xd6f   : > { %v8690_v5 = vpack.c.bf16 %v8680_v4, %v8679_v53  ;;  %v12693_v62 = vpop.permute.xlu1 %12692 }
 0xd70   : > { %v12695_v51 = vunpack.i.h.bf16 %v12693_v62  ;;  %v12694_v35 = vunpack.i.l.bf16 %v12693_v62  ;;  %v13198_v62 = vld [vmem:[%s14093_s10 + $0x50] sm:$0xff] }
 0xd71   : > { %12426 = vmatmul.mubr.bf16.gmra.mrb[32].mxu0 %v8690_v5 }
 0xd72   : > { %v8650_v41 = vsel %vm1384_vm1, %v17807_v58, %v12695_v51  ;;  %v8649_v39 = vsel %vm1384_vm1, %v17808_v46, %v12694_v35  ;;  %v13199_v51 = vld [vmem:[%s14093_s10 + $0x58] sm:$0xff] }
 0xd73   : > { %v12703_v31 = vpop.permute.xlu1 %12702 }
 0xd74   : > { %v12705_v8 = vunpack.i.h.bf16 %v12703_v31  ;;  %v12704_v44 = vunpack.i.l.bf16 %v12703_v31 }
 0xd76   : > { %v8666_v24 = vsel %vm8651_vm4, %v8649_v39, %v12704_v44  ;;  %v8667_v12 = vsel %vm8651_vm4, %v8650_v41, %v12705_v8  ;;  %v13200_v39 = vld [vmem:[%s14093_s10 + $0x60] sm:$0xff] }
 0xd9f   : > { %v12708_v50 = vpop.permute.xlu0 %12707 }
 0xda0   : > { %v12710_v18 = vunpack.i.h.bf16 %v12708_v50  ;;  %v12709_v7 = vunpack.i.l.bf16 %v12708_v50 }
 0xda2   : > { %v8681_v29 = vsel %vm8668_vm5, %v8664_v60, %v12709_v7  ;;  %v8682_v40 = vsel %vm8668_vm5, %v8665_v1, %v12710_v18  ;;  %v13196_v7 = vld [vmem:[%s14093_s10 + $0x40] sm:$0xff] }
 0xda3   : > { %v8691_v10 = vpack.c.bf16 %v8682_v40, %v8681_v29  ;;  %v13197_v40 = vld [vmem:[%s14093_s10 + $0x48] sm:$0xff] }
 0xda5   : > { %12429 = vmatprep.mubr.bf16.mxu0 %v8691_v10 }
 0xdaf   : > { %v12713_v14 = vpop.permute.xlu1 %12712 }
 0xdb0   : > { %v12715_v34 = vunpack.i.h.bf16 %v12713_v14  ;;  %v12714_v21 = vunpack.i.l.bf16 %v12713_v14 }
 0xdb2   : > { %v8684_v33 = vsel %vm8668_vm5, %v8667_v12, %v12715_v34  ;;  %v8683_v48 = vsel %vm8668_vm5, %v8666_v24, %v12714_v21  ;;  %v13201_v12 = vld [vmem:[%s14093_s10 + $0x68] sm:$0xff] }
 0xdb3   : > { %v8692_v54 = vpack.c.bf16 %v8684_v33, %v8683_v48  ;;  %v13202_v48 = vld [vmem:[%s14093_s10 + $0x70] sm:$0xff] }
 0xdb5   : > { %12430 = vmatmul.mubr.bf16.gmra.mrb[36].mxu0 %v8692_v54 }
 0xdb6   : > { %9712 = vmatprep.mubr.bf16.mxu0 %v17774_v30 }
 0xe23   : > { %v12419_v20 = vpop.f32.mrb[24].mxu0 }
 0xe24   : > { %v8798_v9 = vpop.f32.mrb[25].mxu0  ;;  %v8807_v6 = vadd.f32 %v12419_v20, %v16409_v43  ;;  %v13203_v20 = vld [vmem:[%s14093_s10 + $0x78] sm:$0xff] }
 0xe25   : > { %v8799_v47 = vadd.f32 %v16409_v43, %v8798_v9  ;;  %v12420_v11 = vpop.f32.mrb[26].mxu0 }
 0xe26   : > { %v8801_v3 = vpop.f32.mrb[27].mxu0  ;;  %v16422_v23 = vadd.f32 %v13190_v32, %v8807_v6  ;;  %v8810_v22 = vadd.f32 %v12420_v11, %v16409_v43 }
 0xe27   : > { %v16414_v55 = vadd.f32 %v13188_v56, %v8799_v47  ;;  %v8802_v2 = vadd.f32 %v16409_v43, %v8801_v3 }
 0xe28   : > { %v16428_v42 = vadd.f32 %v13191_v25, %v8810_v22 }
 0xe29   : > { %v16418_v59 = vadd.f32 %v13189_v37, %v8802_v2  ;;  %8879 = vadd.xlane.f32.xlu0 %v16414_v55 }
 0xe2b   : > { %8881 = vadd.xlane.f32.xlu1 %v16418_v59 }
 0xe2d   : > { %8883 = vadd.xlane.f32.xlu0 %v16422_v23 }
 0xe31   : > { %8885 = vadd.xlane.f32.xlu0 %v16428_v42 }
 0xe34   : > { %v12423_v49 = vpop.f32.mrb[28].mxu0 }
 0xe35   : > { %v8814_v27 = vpop.f32.mrb[29].mxu0  ;;  %v8823_v61 = vadd.f32 %v12423_v49, %v16409_v43 }
 0xe36   : > { %v8815_v36 = vadd.f32 %v16409_v43, %v8814_v27  ;;  %v12424_v52 = vpop.f32.mrb[30].mxu0 }
 0xe37   : > { %v8817_v0 = vpop.f32.mrb[31].mxu0  ;;  %v8826_v5 = vadd.f32 %v12424_v52, %v16409_v43  ;;  %v16443_v28 = vadd.f32 %v13194_v63, %v8823_v61 }
 0xe38   : > { %v16434_v4 = vadd.f32 %v13192_v38, %v8815_v36  ;;  %v8818_v53 = vadd.f32 %v16409_v43, %v8817_v0 }
 0xe39   : > { %v16447_v17 = vadd.f32 %v13195_v57, %v8826_v5 }
 0xe3a   : > { %v16439_v26 = vadd.f32 %v13193_v16, %v8818_v53  ;;  %8887 = vadd.xlane.f32.xlu0 %v16434_v4 }
 0xe3c   : > { %8889 = vadd.xlane.f32.xlu1 %v16439_v26 }
 0xe3e   : > { %8891 = vadd.xlane.f32.xlu0 %v16443_v28 }
 0xe40   : > { %8893 = vadd.xlane.f32.xlu1 %v16447_v17 }
 0xe44   : > { %v12427_v50 = vpop.f32.mrb[32].mxu0 }
 0xe45   : > { %v8830_v15 = vpop.f32.mrb[33].mxu0  ;;  %v8839_v18 = vadd.f32 %v12427_v50, %v16409_v43 }
 0xe46   : > { %v8831_v19 = vadd.f32 %v16409_v43, %v8830_v15  ;;  %v12428_v45 = vpop.f32.mrb[34].mxu0 }
 0xe47   : > { %v8833_v13 = vpop.f32.mrb[35].mxu0  ;;  %v8842_v29 = vadd.f32 %v12428_v45, %v16409_v43  ;;  %v16463_v31 = vadd.f32 %v13198_v62, %v8839_v18 }
 0xe48   : > { %v16454_v60 = vadd.f32 %v13196_v7, %v8831_v19  ;;  %v8834_v1 = vadd.f32 %v16409_v43, %v8833_v13 }
 0xe49   : > { %v16467_v35 = vadd.f32 %v13199_v51, %v8842_v29 }
 0xe4a   : > { %v16459_v10 = vadd.f32 %v13197_v40, %v8834_v1  ;;  %8895 = vadd.xlane.f32.xlu0 %v16454_v60 }
 0xe4c   : > { %8897 = vadd.xlane.f32.xlu1 %v16459_v10 }
 0xe4e   : > { %8899 = vadd.xlane.f32.xlu0 %v16463_v31 }
 0xe50   : > { %8901 = vadd.xlane.f32.xlu1 %v16467_v35 }
 0xe88   : > { %v12431_v8 = vpop.f32.mrb[36].mxu0 }
 0xe89   : > { %v8846_v44 = vpop.f32.mrb[37].mxu0  ;;  %v8855_v46 = vadd.f32 %v12431_v8, %v16409_v43 }
 0xe8a   : > { %v8847_v14 = vadd.f32 %v16409_v43, %v8846_v44  ;;  %v12432_v58 = vpop.f32.mrb[38].mxu0 }
 0xe8b   : > { %v8849_v41 = vpop.f32.mrb[39].mxu0  ;;  %v8858_v24 = vadd.f32 %v12432_v58, %v16409_v43  ;;  %v16483_v54 = vadd.f32 %v13202_v48, %v8855_v46 }
 0xe8c   : > { %v16474_v34 = vadd.f32 %v13200_v39, %v8847_v14  ;;  %v8850_v21 = vadd.f32 %v16409_v43, %v8849_v41 }
 0xe8d   : > { %v16487_v9 = vadd.f32 %v13203_v20, %v8858_v24 }
 0xe8e   : > { %v16479_v33 = vadd.f32 %v13201_v12, %v8850_v21  ;;  %8903 = vadd.xlane.f32.xlu0 %v16474_v34 }
 0xe90   : > { %8905 = vadd.xlane.f32.xlu1 %v16479_v33 }
 0xe92   : > { %8907 = vadd.xlane.f32.xlu0 %v16483_v54 }
 0xe94   : > { %8909 = vadd.xlane.f32.xlu1 %v16487_v9 }
 0xeb6   : > { %v8880_v47 = vpop.xlane.xlu0 %8879 }
 0xeb7   : > { %v8912_v11 = vmul.f32 0.0078125, %v8880_v47 }
 0xeb8   : > { %v8882_v43 = vpop.xlane.xlu1 %8881 }
 0xeb9   : > { %v16492_v3 = vsub.f32 %v16414_v55, %v8912_v11  ;;  %v8913_v6 = vmul.f32 0.0078125, %v8882_v43 }
 0xeba   : > { %v8884_v56 = vpop.xlane.xlu0 %8883 }
 0xebb   : > { %v16495_v2 = vsub.f32 %v16418_v59, %v8913_v6  ;;  %v8914_v37 = vmul.f32 0.0078125, %v8884_v56  ;;  %v8944_v32 = vmul.f32 %v16492_v3, %v16492_v3 }
 0xebd   : > { %v16500_v22 = vsub.f32 %v16422_v23, %v8914_v37  ;;  %8960 = vadd.xlane.f32.xlu0 %v8944_v32  ;;  %v8945_v25 = vmul.f32 %v16495_v2, %v16495_v2 }
 0xebe   : > { %v8886_v49 = vpop.xlane.xlu0 %8885 }
 0xebf   : > { %v8915_v27 = vmul.f32 0.0078125, %v8886_v49  ;;  %8962 = vadd.xlane.f32.xlu1 %v8945_v25  ;;  %v8946_v55 = vmul.f32 %v16500_v22, %v16500_v22 }
 0xec1   : > { %v16507_v59 = vsub.f32 %v16428_v42, %v8915_v27  ;;  %8964 = vadd.xlane.f32.xlu0 %v8946_v55 }
 0xec3   : > { %v8947_v36 = vmul.f32 %v16507_v59, %v16507_v59 }
 0xec5   : > { %8966 = vadd.xlane.f32.xlu1 %v8947_v36 }
 0xec7   : > { %v8888_v23 = vpop.xlane.xlu0 %8887 }
 0xec8   : > { %v8916_v52 = vmul.f32 0.0078125, %v8888_v23 }
 0xec9   : > { %v8890_v0 = vpop.xlane.xlu1 %8889 }
 0xeca   : > { %v16512_v61 = vsub.f32 %v16434_v4, %v8916_v52  ;;  %v8917_v38 = vmul.f32 0.0078125, %v8890_v0  ;;  %v16576_v0 = vld [vmem:[%s17811_s19] ss:$0 sm:$0xff] }
 0xecb   : > { %v8892_v53 = vpop.xlane.xlu0 %8891 }
 0xecc   : > { %v16515_v5 = vsub.f32 %v16439_v26, %v8917_v38  ;;  %v8918_v16 = vmul.f32 0.0078125, %v8892_v53  ;;  %v8948_v42 = vmul.f32 %v16512_v61, %v16512_v61 }
 0xecd   : > { %v8894_v63 = vpop.xlane.xlu1 %8893 }
 0xece   : > { %v16520_v57 = vsub.f32 %v16443_v28, %v8918_v16  ;;  %v8919_v50 = vmul.f32 0.0078125, %v8894_v63  ;;  %8968 = vadd.xlane.f32.xlu0 %v8948_v42  ;;  %v8949_v15 = vmul.f32 %v16515_v5, %v16515_v5  ;;  %v16584_v42 = vld [vmem:[%s17813_s1] ss:$0 sm:$0xff]  ;;  %s10617_s1 = scalar_lea.sflag [#allocation4], %s14002_s9 }
 0xed0   : > { %v16525_v4 = vsub.f32 %v16447_v17, %v8919_v50  ;;  %8970 = vadd.xlane.f32.xlu1 %v8949_v15  ;;  %v8950_v26 = vmul.f32 %v16520_v57, %v16520_v57 }
 0xed2   : > { %8972 = vadd.xlane.f32.xlu0 %v8950_v26  ;;  %v8951_v19 = vmul.f32 %v16525_v4, %v16525_v4 }
 0xed4   : > { %8974 = vadd.xlane.f32.xlu1 %v8951_v19 }
 0xed7   : > { %v8896_v45 = vpop.xlane.xlu0 %8895 }
 0xed8   : > { %v8920_v28 = vmul.f32 0.0078125, %v8896_v45 }
 0xed9   : > { %v8898_v13 = vpop.xlane.xlu1 %8897 }
 0xeda   : > { %v16532_v18 = vsub.f32 %v16454_v60, %v8920_v28  ;;  %v8921_v7 = vmul.f32 0.0078125, %v8898_v13 }
 0xedb   : > { %v8900_v1 = vpop.xlane.xlu0 %8899 }
 0xedc   : > { %v16535_v17 = vsub.f32 %v16459_v10, %v8921_v7  ;;  %v8922_v29 = vmul.f32 0.0078125, %v8900_v1  ;;  %v8952_v40 = vmul.f32 %v16532_v18, %v16532_v18 }
 0xedd   : > { %v8902_v62 = vpop.xlane.xlu1 %8901 }
 0xede   : > { %v16540_v51 = vsub.f32 %v16463_v31, %v8922_v29  ;;  %v8923_v8 = vmul.f32 0.0078125, %v8902_v62  ;;  %8976 = vadd.xlane.f32.xlu0 %v8952_v40  ;;  %v8953_v44 = vmul.f32 %v16535_v17, %v16535_v17 }
 0xee0   : > { %v16545_v60 = vsub.f32 %v16467_v35, %v8923_v8  ;;  %8978 = vadd.xlane.f32.xlu1 %v8953_v44  ;;  %v8954_v10 = vmul.f32 %v16540_v51, %v16540_v51 }
 0xee2   : > { %8980 = vadd.xlane.f32.xlu0 %v8954_v10  ;;  %v8955_v14 = vmul.f32 %v16545_v60, %v16545_v60 }
 0xee4   : > { %8982 = vadd.xlane.f32.xlu1 %v8955_v14 }
 0xf1b   : > { %v8904_v58 = vpop.xlane.xlu0 %8903 }
 0xf1c   : > { %v8924_v31 = vmul.f32 0.0078125, %v8904_v58 }
 0xf1d   : > { %v8906_v41 = vpop.xlane.xlu1 %8905 }
 0xf1e   : > { %v16552_v46 = vsub.f32 %v16474_v34, %v8924_v31  ;;  %v8925_v39 = vmul.f32 0.0078125, %v8906_v41 }
 0xf1f   : > { %v8908_v21 = vpop.xlane.xlu0 %8907 }
 0xf20   : > { %v16555_v35 = vsub.f32 %v16479_v33, %v8925_v39  ;;  %v8926_v24 = vmul.f32 0.0078125, %v8908_v21  ;;  %v8956_v12 = vmul.f32 %v16552_v46, %v16552_v46 }
 0xf21   : > { %v8910_v48 = vpop.xlane.xlu1 %8909 }
 0xf22   : > { %v16560_v20 = vsub.f32 %v16483_v54, %v8926_v24  ;;  %v8927_v47 = vmul.f32 0.0078125, %v8910_v48  ;;  %8984 = vadd.xlane.f32.xlu0 %v8956_v12  ;;  %v8957_v11 = vmul.f32 %v16555_v35, %v16555_v35 }
 0xf24   : > { %v16565_v34 = vsub.f32 %v16487_v9, %v8927_v47  ;;  %8986 = vadd.xlane.f32.xlu1 %v8957_v11  ;;  %v8958_v33 = vmul.f32 %v16560_v20, %v16560_v20 }
 0xf26   : > { %8988 = vadd.xlane.f32.xlu0 %v8958_v33  ;;  %v8959_v43 = vmul.f32 %v16565_v34, %v16565_v34 }
 0xf28   : > { %8990 = vadd.xlane.f32.xlu1 %v8959_v43 }
 0xf4a   : > { %v8961_v6 = vpop.xlane.xlu0 %8960 }
 0xf4b   : > { %v8992_v54 = vmul.f32 0.0078125, %v8961_v6 }
 0xf4c   : > { %v8963_v56 = vpop.xlane.xlu1 %8962 }
 0xf4d   : > { %v9008_v37 = vadd.f32 1e-05, %v8992_v54  ;;  %v8993_v32 = vmul.f32 0.0078125, %v8963_v56 }
 0xf4e   : > { %v8965_v25 = vpop.xlane.xlu0 %8964 }
 0xf4f   : > { %13092 = vrsqrt.f32 %v9008_v37  ;;  %v9009_v9 = vadd.f32 1e-05, %v8993_v32  ;;  %v8994_v49 = vmul.f32 0.0078125, %v8965_v25 }
 0xf51   : > { %13094 = vrsqrt.f32 %v9009_v9  ;;  %v9010_v27 = vadd.f32 1e-05, %v8994_v49 }
 0xf52   : > { %v8967_v55 = vpop.xlane.xlu1 %8966 }
 0xf53   : > { %13096 = vrsqrt.f32 %v9010_v27  ;;  %v8995_v36 = vmul.f32 0.0078125, %v8967_v55 }
 0xf55   : > { %v9011_v23 = vadd.f32 1e-05, %v8995_v36 }
 0xf57   : > { %13098 = vrsqrt.f32 %v9011_v23 }
 0xf59   : > { %v13093_v52 = vpop.eup %13092 }
 0xf5a   : > { %v9040_v38 = vmul.f32 %v13093_v52, %v16492_v3  ;;  %v16593_v3 = vld [vmem:[%s17815_s26] ss:$0 sm:$0xff]  ;;  %s13390_s26 = scalar_lea.vmem %s13389_s27, 4096 }
 0xf5b   : > { %v13095_v53 = vpop.eup %13094  ;;  %v8969_v16 = vpop.xlane.xlu0 %8968  ;;  %p13392_p2 = scmp.lt.s32.totalorder %s13390_s26, %s13384_s3 }
 0xf5c   : > { %v8996_v63 = vmul.f32 0.0078125, %v8969_v16  ;;  %v9062_v50 = vmul.f32 %v16576_v0, %v9040_v38  ;;  %v9041_v15 = vmul.f32 %v13095_v53, %v16495_v2 }
 0xf5d   : > { %v13097_v26 = vpop.eup %13096  ;;  %v8971_v19 = vpop.xlane.xlu1 %8970  ;;  %p13393_p0 = por %p13392_p2, %p13391_p11 }
 0xf5e   : > { %v9012_v45 = vadd.f32 1e-05, %v8996_v63  ;;  %v8997_v28 = vmul.f32 0.0078125, %v8971_v19  ;;  %v9084_v13 = vadd.f32 %v16584_v42, %v9062_v50  ;;  %v9063_v7 = vmul.f32 %v16576_v0, %v9041_v15 }
 0xf5f   : > { %v8973_v1 = vpop.xlane.xlu0 %8972  ;;  %v9042_v29 = vmul.f32 %v13097_v26, %v16500_v22 }
 0xf60   : > { %13100 = vrsqrt.f32 %v9012_v45  ;;  %v9013_v40 = vadd.f32 1e-05, %v8997_v28  ;;  %v8998_v2 = vmul.f32 0.0078125, %v8973_v1  ;;  %v16599_v62 = vadd.f32 %v16593_v3, %v9084_v13 }
 0xf61   : > { %v13099_v8 = vpop.eup %13098  ;;  %v8975_v44 = vpop.xlane.xlu1 %8974  ;;  %v9085_v10 = vadd.f32 %v16584_v42, %v9063_v7  ;;  %v9064_v14 = vmul.f32 %v16576_v0, %v9042_v29 }
 0xf62   : > { %13102 = vrsqrt.f32 %v9013_v40  ;;  %v9014_v58 = vadd.f32 1e-05, %v8998_v2  ;;  %v8999_v31 = vmul.f32 0.0078125, %v8975_v44  ;;  %9125 = vadd.xlane.f32.xlu0 %v16599_v62  ;;  %v9043_v41 = vmul.f32 %v13099_v8, %v16507_v59 }
 0xf63   : > { %v16606_v22 = vadd.f32 %v16593_v3, %v9085_v10  ;;  %v9086_v39 = vadd.f32 %v16584_v42, %v9064_v14 }
 0xf64   : > { %13104 = vrsqrt.f32 %v9014_v58  ;;  %v9015_v21 = vadd.f32 1e-05, %v8999_v31  ;;  %v9065_v24 = vmul.f32 %v16576_v0, %v9043_v41 }
 0xf65   : > { %9127 = vadd.xlane.f32.xlu1 %v16606_v22  ;;  %v16612_v12 = vadd.f32 %v16593_v3, %v9086_v39 }
 0xf66   : > { %13106 = vrsqrt.f32 %v9015_v21  ;;  %v9087_v48 = vadd.f32 %v16584_v42, %v9065_v24 }
 0xf67   : > { %9129 = vadd.xlane.f32.xlu0 %v16612_v12 }
 0xf68   : > { %v16617_v59 = vadd.f32 %v16593_v3, %v9087_v48 }
 0xf6a   : > { %v13101_v47 = vpop.eup %13100  ;;  %9131 = vadd.xlane.f32.xlu1 %v16617_v59 }
 0xf6b   : > { %v8977_v11 = vpop.xlane.xlu0 %8976  ;;  %v9044_v33 = vmul.f32 %v13101_v47, %v16512_v61 }
 0xf6c   : > { %v13103_v43 = vpop.eup %13102  ;;  %v9000_v6 = vmul.f32 0.0078125, %v8977_v11 }
 0xf6d   : > { %v8979_v54 = vpop.xlane.xlu1 %8978  ;;  %v9066_v56 = vmul.f32 %v16576_v0, %v9044_v33  ;;  %v9045_v37 = vmul.f32 %v13103_v43, %v16515_v5 }
 0xf6e   : > { %v13105_v32 = vpop.eup %13104  ;;  %v9016_v25 = vadd.f32 1e-05, %v9000_v6  ;;  %v9001_v9 = vmul.f32 0.0078125, %v8979_v54 }
 0xf6f   : > { %v8981_v49 = vpop.xlane.xlu0 %8980  ;;  %v9088_v27 = vadd.f32 %v16584_v42, %v9066_v56  ;;  %v9067_v55 = vmul.f32 %v16576_v0, %v9045_v37  ;;  %v9046_v36 = vmul.f32 %v13105_v32, %v16520_v57 }
 0xf70   : > { %v13107_v23 = vpop.eup %13106  ;;  %13108 = vrsqrt.f32 %v9016_v25  ;;  %v9017_v61 = vadd.f32 1e-05, %v9001_v9  ;;  %v9002_v52 = vmul.f32 0.0078125, %v8981_v49 }
 0xf71   : > { %v8983_v38 = vpop.xlane.xlu1 %8982  ;;  %v16627_v53 = vadd.f32 %v16593_v3, %v9088_v27  ;;  %v9089_v5 = vadd.f32 %v16584_v42, %v9067_v55  ;;  %v9068_v16 = vmul.f32 %v16576_v0, %v9046_v36  ;;  %v9047_v63 = vmul.f32 %v13107_v23, %v16525_v4 }
 0xf72   : > { %13110 = vrsqrt.f32 %v9017_v61  ;;  %v9018_v50 = vadd.f32 1e-05, %v9002_v52  ;;  %v9003_v15 = vmul.f32 0.0078125, %v8983_v38 }
 0xf73   : > { %9133 = vadd.xlane.f32.xlu0 %v16627_v53  ;;  %v16634_v57 = vadd.f32 %v16593_v3, %v9089_v5  ;;  %v9090_v26 = vadd.f32 %v16584_v42, %v9068_v16  ;;  %v9069_v19 = vmul.f32 %v16576_v0, %v9047_v63 }
 0xf74   : > { %13112 = vrsqrt.f32 %v9018_v50  ;;  %v9019_v45 = vadd.f32 1e-05, %v9003_v15 }
 0xf75   : > { %9135 = vadd.xlane.f32.xlu1 %v16634_v57  ;;  %v16640_v28 = vadd.f32 %v16593_v3, %v9090_v26  ;;  %v9091_v4 = vadd.f32 %v16584_v42, %v9069_v19 }
 0xf76   : > { %13114 = vrsqrt.f32 %v9019_v45 }
 0xf77   : > { %9137 = vadd.xlane.f32.xlu0 %v16640_v28  ;;  %v16645_v13 = vadd.f32 %v16593_v3, %v9091_v4 }
 0xf79   : > { %9139 = vadd.xlane.f32.xlu1 %v16645_v13 }
 0xf7a   : > { %v13109_v7 = vpop.eup %13108 }
 0xf7b   : > { %v9048_v1 = vmul.f32 %v13109_v7, %v16532_v18  ;;  %v12756_v7 = vld [vmem:[%s14034_s2] ss:$16 sps:$4 sm:$0xff]  }
 0xf7c   : > { %v13111_v29 = vpop.eup %13110 }
 0xf7d   : > { %v9070_v40 = vmul.f32 %v16576_v0, %v9048_v1  ;;  %v9049_v2 = vmul.f32 %v13111_v29, %v16535_v17  ;;  %v12758_v1 = vld [vmem:[%s14034_s2 + $0x4] ss:$16 sps:$4 sm:$0xff]   ;;  %v12759_v29 = vld [vmem:[%s14034_s2 + $0x8] ss:$16 sps:$4 sm:$0xff]  }
 0xf7e   : > { %v13113_v8 = vpop.eup %13112  ;;  %9567 = vmatprep.subr.bf16.mxu1 %v12758_v1 }
 0xf7f   : > { %v9092_v44 = vadd.f32 %v16584_v42, %v9070_v40  ;;  %v9071_v10 = vmul.f32 %v16576_v0, %v9049_v2  ;;  %v9050_v14 = vmul.f32 %v13113_v8, %v16540_v51  ;;  %v12764_v40 = vld [vmem:[%s14034_s2 + $0x24] ss:$16 sps:$4 sm:$0xff]   ;;  %v12767_v2 = vld [vmem:[%s14034_s2 + $0x2c] ss:$16 sps:$4 sm:$0xff]   ;;  %9568 = vmatpush1.bf16.msra.mxu1 %v12756_v7  ;;  %v12762_v8 = vld [vmem:[%s14034_s2 + $0x20] ss:$16 sps:$4 sm:$0xff]  }
 0xf80   : > { %v13115_v58 = vpop.eup %13114  ;;  %9569 = vmatprep.subr.bf16.mxu1 %v12764_v40  ;;  %v12791_v7 = vld [vmem:[%s14034_s2 + $0xac] ss:$16 sps:$4 sm:$0xff]  }
 0xf81   : > { %v16655_v31 = vadd.f32 %v16593_v3, %v9092_v44  ;;  %v9093_v41 = vadd.f32 %v16584_v42, %v9071_v10  ;;  %v9072_v18 = vmul.f32 %v16576_v0, %v9050_v14  ;;  %v9051_v39 = vmul.f32 %v13115_v58, %v16545_v60 }
 0xf83   : > { %9141 = vadd.xlane.f32.xlu0 %v16655_v31  ;;  %v16662_v17 = vadd.f32 %v16593_v3, %v9093_v41  ;;  %v9094_v21 = vadd.f32 %v16584_v42, %v9072_v18  ;;  %v9073_v24 = vmul.f32 %v16576_v0, %v9051_v39  ;;  %9570 = vmatpush1.bf16.msra.mxu1 %v12762_v8 }
 0xf85   : > { %9143 = vadd.xlane.f32.xlu1 %v16662_v17  ;;  %v16668_v51 = vadd.f32 %v16593_v3, %v9094_v21  ;;  %v9095_v48 = vadd.f32 %v16584_v42, %v9073_v24 }
 0xf87   : > { %9145 = vadd.xlane.f32.xlu0 %v16668_v51  ;;  %v16673_v60 = vadd.f32 %v16593_v3, %v9095_v48 }
 0xf89   : > { %9147 = vadd.xlane.f32.xlu1 %v16673_v60 }
 0xfaf   : > { %v8985_v47 = vpop.xlane.xlu0 %8984 }
 0xfb0   : > { %v9004_v11 = vmul.f32 0.0078125, %v8985_v47 }
 0xfb1   : > { %v8987_v33 = vpop.xlane.xlu1 %8986 }
 0xfb2   : > { %v9020_v43 = vadd.f32 1e-05, %v9004_v11  ;;  %v9005_v6 = vmul.f32 0.0078125, %v8987_v33 }
 0xfb3   : > { %v8989_v54 = vpop.xlane.xlu0 %8988 }
 0xfb4   : > { %13116 = vrsqrt.f32 %v9020_v43  ;;  %v9021_v56 = vadd.f32 1e-05, %v9005_v6  ;;  %v9006_v37 = vmul.f32 0.0078125, %v8989_v54 }
 0xfb5   : > { %v8991_v32 = vpop.xlane.xlu1 %8990 }
 0xfb6   : > { %13118 = vrsqrt.f32 %v9021_v56  ;;  %v9022_v25 = vadd.f32 1e-05, %v9006_v37  ;;  %v9007_v9 = vmul.f32 0.0078125, %v8991_v32 }
 0xfb8   : > { %13120 = vrsqrt.f32 %v9022_v25  ;;  %v9023_v49 = vadd.f32 1e-05, %v9007_v9  ;;  %v12770_v9 = vld [vmem:[%s14034_s2 + $0x44] ss:$16 sps:$4 sm:$0xff]  }
 0xfb9   : > { %9571 = vmatprep.subr.bf16.mxu1 %v12770_v9 }
 0xfba   : > { %13122 = vrsqrt.f32 %v9023_v49  ;;  %v12773_v49 = vld [vmem:[%s14034_s2 + $0x4c] ss:$16 sps:$4 sm:$0xff]  }
 0xfbe   : > { %v13117_v27 = vpop.eup %13116 }
 0xfbf   : > { %v9052_v55 = vmul.f32 %v13117_v27, %v16552_v46 }
 0xfc0   : > { %v13119_v36 = vpop.eup %13118 }
 0xfc1   : > { %v9074_v23 = vmul.f32 %v16576_v0, %v9052_v55  ;;  %v9053_v61 = vmul.f32 %v13119_v36, %v16555_v35  ;;  %v12768_v55 = vld [vmem:[%s14034_s2 + $0x40] ss:$16 sps:$4 sm:$0xff]   ;;  %v12771_v36 = vld [vmem:[%s14034_s2 + $0x48] ss:$16 sps:$4 sm:$0xff]  }
 0xfc2   : > { %v13121_v52 = vpop.eup %13120  ;;  %9572 = vmatpush1.bf16.msra.mxu1 %v12768_v55 }
 0xfc3   : > { %v9096_v38 = vadd.f32 %v16584_v42, %v9074_v23  ;;  %v9075_v5 = vmul.f32 %v16576_v0, %v9053_v61  ;;  %v9054_v16 = vmul.f32 %v13121_v52, %v16560_v20 }
 0xfc4   : > { %v13123_v63 = vpop.eup %13122 }
 0xfc5   : > { %v16683_v50 = vadd.f32 %v16593_v3, %v9096_v38  ;;  %v9097_v46 = vadd.f32 %v16584_v42, %v9075_v5  ;;  %v9076_v15 = vmul.f32 %v16576_v0, %v9054_v16  ;;  %v9055_v35 = vmul.f32 %v13123_v63, %v16565_v34  ;;  %v12779_v38 = vld [vmem:[%s14034_s2 + $0x6c] ss:$16 sps:$4 sm:$0xff]   ;;  %v12774_v5 = vld [vmem:[%s14034_s2 + $0x60] ss:$16 sps:$4 sm:$0xff]   ;;  %v12777_v16 = vld [vmem:[%s14034_s2 + $0x68] ss:$16 sps:$4 sm:$0xff]  }
 0xfc7   : > { %9149 = vadd.xlane.f32.xlu0 %v16683_v50  ;;  %v16690_v20 = vadd.f32 %v16593_v3, %v9097_v46  ;;  %v9098_v26 = vadd.f32 %v16584_v42, %v9076_v15  ;;  %v9077_v19 = vmul.f32 %v16576_v0, %v9055_v35  ;;  %v12761_v0 = vld [vmem:[%s14034_s2 + $0xc] ss:$16 sps:$4 sm:$0xff]   ;;  %v12780_v15 = vld [vmem:[%s14034_s2 + $0x80] ss:$16 sps:$4 sm:$0xff]   ;;  %v12783_v35 = vld [vmem:[%s14034_s2 + $0x88] ss:$16 sps:$4 sm:$0xff]  }
 0xfc8   : > { %9680 = vmatprep.subr.bf16.mxu0 %v12761_v0  ;;  %v12785_v46 = vld [vmem:[%s14034_s2 + $0x8c] ss:$16 sps:$4 sm:$0xff]   ;;  %v12789_v0 = vld [vmem:[%s14034_s2 + $0xa8] ss:$16 sps:$4 sm:$0xff]  }
 0xfc9   : > { %9151 = vadd.xlane.f32.xlu1 %v16690_v20  ;;  %v16696_v45 = vadd.f32 %v16593_v3, %v9098_v26  ;;  %v9099_v4 = vadd.f32 %v16584_v42, %v9077_v19  ;;  %9681 = vmatpush1.bf16.msra.mxu0 %v12759_v29  ;;  %v12765_v42 = vld [vmem:[%s14034_s2 + $0x28] ss:$16 sps:$4 sm:$0xff]   ;;  %v12786_v29 = vld [vmem:[%s14034_s2 + $0xa0] ss:$16 sps:$4 sm:$0xff]  }
 0xfca   : > { %9682 = vmatprep.subr.bf16.mxu0 %v12767_v2 }
 0xfcb   : > { %9153 = vadd.xlane.f32.xlu0 %v16696_v45  ;;  %v16701_v34 = vadd.f32 %v16593_v3, %v9099_v4  ;;  %v12788_v4 = vld [vmem:[%s14034_s2 + $0xa4] ss:$16 sps:$4 sm:$0xff]  }
 0xfcd   : > { %9155 = vadd.xlane.f32.xlu1 %v16701_v34  ;;  %9683 = vmatpush1.bf16.msra.mxu0 %v12765_v42 }
 0xfce   : > { %9684 = vmatprep.subr.bf16.mxu0 %v12773_v49 }
 0xfd1   : > { %9685 = vmatpush1.bf16.msra.mxu0 %v12771_v36 }
 0xfd2   : > { %9686 = vmatprep.subr.bf16.mxu0 %v12779_v38 }
 0xfd5   : > { %9687 = vmatpush1.bf16.msra.mxu0 %v12777_v16 }
 0xfd6   : > { %9688 = vmatprep.subr.bf16.mxu0 %v12785_v46  ;;  %v12804_v46 = vld [vmem:[%s14037_s16 + $0x40] sm:$0xff]  }
 0xfd9   : > { %9689 = vmatpush1.bf16.msra.mxu0 %v12783_v35 }
 0xfda   : > { %9690 = vmatprep.subr.bf16.mxu0 %v12791_v7 }
 0xfdd   : > { %9691 = vmatpush1.bf16.msra.mxu0 %v12789_v0 }
 0xfef   : > { %v9126_v3 = vpop.xlane.xlu0 %9125 }
 0xff0   : > { %v9157_v44 = vmul.f32 0.0078125, %v9126_v3 }
 0xff2   : > { %v16713_v10 = vsub.f32 %v16599_v62, %v9157_v44  ;;  %v9128_v14 = vpop.xlane.xlu1 %9127 }
 0xff3   : > { %v9158_v58 = vmul.f32 0.0078125, %v9128_v14  ;;  %v12794_v14 = vld [vmem:[%s14034_s2 + $0xc4] ss:$16 sps:$4 sm:$0xff]  }
 0xff4   : > { %v9130_v41 = vpop.xlane.xlu0 %9129  ;;  %v9189_v18 = vmul.f32 %v16713_v10, %v16713_v10 }
 0xff5   : > { %v16718_v39 = vsub.f32 %v16606_v22, %v9158_v58  ;;  %v9159_v21 = vmul.f32 0.0078125, %v9130_v41  ;;  %v12797_v58 = vld [vmem:[%s14034_s2 + $0xcc] ss:$16 sps:$4 sm:$0xff]  }
 0xff6   : > { %9205 = vadd.xlane.f32.xlu0 %v9189_v18  ;;  %v12795_v18 = vld [vmem:[%s14034_s2 + $0xc8] ss:$16 sps:$4 sm:$0xff]   ;;  %9692 = vmatprep.subr.bf16.mxu0 %v12797_v58 }
 0xff7   : > { %v16721_v24 = vsub.f32 %v16612_v12, %v9159_v21  ;;  %v9132_v48 = vpop.xlane.xlu1 %9131  ;;  %v9190_v47 = vmul.f32 %v16718_v39, %v16718_v39  ;;  %9693 = vmatpush1.bf16.msra.mxu0 %v12795_v18 }
 0xff8   : > { %v9160_v62 = vmul.f32 0.0078125, %v9132_v48 }
 0xff9   : > { %9207 = vadd.xlane.f32.xlu1 %v9190_v47  ;;  %v9191_v11 = vmul.f32 %v16721_v24, %v16721_v24 }
 0xffa   : > { %v16728_v33 = vsub.f32 %v16617_v59, %v9160_v62 }
 0xffb   : > { %9209 = vadd.xlane.f32.xlu0 %v9191_v11  ;;  %v12800_v11 = vld [vmem:[%s14034_s2 + $0xe4] ss:$16 sps:$4 sm:$0xff]  }
 0xffc   : > { %v9192_v22 = vmul.f32 %v16728_v33, %v16728_v33 }
 0xffe   : > { %9211 = vadd.xlane.f32.xlu1 %v9192_v22  ;;  %v12803_v22 = vld [vmem:[%s14034_s2 + $0xec] ss:$16 sps:$4 sm:$0xff]  }
 0xfff   : > { %9694 = vmatprep.subr.bf16.mxu0 %v12803_v22 }
0x1000   : > { %v9134_v12 = vpop.xlane.xlu0 %9133 }
0x1001   : > { %v9161_v43 = vmul.f32 0.0078125, %v9134_v12  ;;  %v12801_v12 = vld [vmem:[%s14034_s2 + $0xe8] ss:$16 sps:$4 sm:$0xff]  }
0x1002   : > { %v9136_v6 = vpop.xlane.xlu1 %9135  ;;  %9695 = vmatpush1.bf16.msra.mxu0 %v12801_v12 }
0x1003   : > { %v16733_v54 = vsub.f32 %v16627_v53, %v9161_v43  ;;  %v9162_v56 = vmul.f32 0.0078125, %v9136_v6 }
0x1004   : > { %v9138_v37 = vpop.xlane.xlu0 %9137 }
0x1005   : > { %v16736_v32 = vsub.f32 %v16634_v57, %v9162_v56  ;;  %v9163_v59 = vmul.f32 0.0078125, %v9138_v37  ;;  %v9193_v25 = vmul.f32 %v16733_v54, %v16733_v54 }
0x1006   : > { %v9140_v27 = vpop.xlane.xlu1 %9139 }
0x1007   : > { %v16745_v53 = vsub.f32 %v16640_v28, %v9163_v59  ;;  %v9164_v23 = vmul.f32 0.0078125, %v9140_v27  ;;  %9213 = vadd.xlane.f32.xlu0 %v9193_v25  ;;  %v9194_v57 = vmul.f32 %v16736_v32, %v16736_v32  ;;  %v12776_v28 = vld [vmem:[%s14034_s2 + $0x64] ss:$16 sps:$4 sm:$0xff]  }
0x1008   : > { %9573 = vmatprep.subr.bf16.mxu1 %v12776_v28 }
0x1009   : > { %v16750_v61 = vsub.f32 %v16645_v13, %v9164_v23  ;;  %9215 = vadd.xlane.f32.xlu1 %v9194_v57  ;;  %v9195_v52 = vmul.f32 %v16745_v53, %v16745_v53  ;;  %9574 = vmatpush1.bf16.msra.mxu1 %v12774_v5  ;;  %v12782_v13 = vld [vmem:[%s14034_s2 + $0x84] ss:$16 sps:$4 sm:$0xff]  }
0x100a   : > { %9575 = vmatprep.subr.bf16.mxu1 %v12782_v13 }
0x100b   : > { %9217 = vadd.xlane.f32.xlu0 %v9195_v52  ;;  %v9196_v63 = vmul.f32 %v16750_v61, %v16750_v61 }
0x100d   : > { %9219 = vadd.xlane.f32.xlu1 %v9196_v63  ;;  %9576 = vmatpush1.bf16.msra.mxu1 %v12780_v15  ;;  %v16818_v15 = vld [vmem:[%s14037_s16 + $0xc0] sm:$0xff]  }
0x100e   : > { %9577 = vmatprep.subr.bf16.mxu1 %v12788_v4  ;;  %11537 = vmatprep.subr.bf16.mxu0 %v16818_v15 }
0x1010   : > { %v9142_v26 = vpop.xlane.xlu0 %9141 }
0x1011   : > { %v9165_v19 = vmul.f32 0.0078125, %v9142_v26  ;;  %9578 = vmatpush1.bf16.msra.mxu1 %v12786_v29 }
0x1012   : > { %v9144_v1 = vpop.xlane.xlu1 %9143  ;;  %9579 = vmatprep.subr.bf16.mxu1 %v12794_v14 }
0x1013   : > { %v16769_v40 = vsub.f32 %v16655_v31, %v9165_v19  ;;  %v9166_v2 = vmul.f32 0.0078125, %v9144_v1  ;;  %v12792_v31 = vld [vmem:[%s14034_s2 + $0xc0] ss:$16 sps:$4 sm:$0xff]   ;;  %v16826_v1 = vld [vmem:[%s17817_s28] ss:$0 sm:$0xff] }
0x1014   : > { %v9146_v8 = vpop.xlane.xlu0 %9145 }
0x1015   : > { %v16772_v42 = vsub.f32 %v16662_v17, %v9166_v2  ;;  %v9167_v3 = vmul.f32 0.0078125, %v9146_v8  ;;  %v9197_v44 = vmul.f32 %v16769_v40, %v16769_v40  ;;  %9580 = vmatpush1.bf16.msra.mxu1 %v12792_v31 }
0x1016   : > { %v9148_v41 = vpop.xlane.xlu1 %9147  ;;  %9581 = vmatprep.subr.bf16.mxu1 %v12800_v11 }
0x1017   : > { %v16781_v21 = vsub.f32 %v16668_v51, %v9167_v3  ;;  %v9168_v48 = vmul.f32 0.0078125, %v9148_v41  ;;  %9221 = vadd.xlane.f32.xlu0 %v9197_v44  ;;  %v9198_v17 = vmul.f32 %v16772_v42, %v16772_v42  ;;  %v12798_v51 = vld [vmem:[%s14034_s2 + $0xe0] ss:$16 sps:$4 sm:$0xff]   ;;  %v16836_v41 = vld [vmem:[%s873_s22] ss:$0 sm:$0xff] }
0x1019   : > { %v16786_v47 = vsub.f32 %v16673_v60, %v9168_v48  ;;  %9223 = vadd.xlane.f32.xlu1 %v9198_v17  ;;  %v9199_v62 = vmul.f32 %v16781_v21, %v16781_v21  ;;  %9582 = vmatpush1.bf16.msra.mxu1 %v12798_v51 }
0x101a   : > { %11473 = vmatprep.subr.bf16.mxu1 %v12804_v46 }
0x101b   : > { %9225 = vadd.xlane.f32.xlu0 %v9199_v62  ;;  %v9200_v43 = vmul.f32 %v16786_v47, %v16786_v47 }
0x101d   : > { %9227 = vadd.xlane.f32.xlu1 %v9200_v43 }
0x1054   : > { %v9150_v60 = vpop.xlane.xlu0 %9149 }
0x1055   : > { %v9169_v6 = vmul.f32 0.0078125, %v9150_v60 }
0x1056   : > { %v9152_v56 = vpop.xlane.xlu1 %9151 }
0x1057   : > { %v16797_v37 = vsub.f32 %v16683_v50, %v9169_v6  ;;  %v9170_v59 = vmul.f32 0.0078125, %v9152_v56 }
0x1058   : > { %v9154_v25 = vpop.xlane.xlu0 %9153 }
0x1059   : > { %v16800_v9 = vsub.f32 %v16690_v20, %v9170_v59  ;;  %v9171_v49 = vmul.f32 0.0078125, %v9154_v25  ;;  %v9201_v27 = vmul.f32 %v16797_v37, %v16797_v37  ;;  %v12806_v59 = vld [vmem:[%s14037_s16] sm:$0xff]  }
0x105a   : > { %v9156_v55 = vpop.xlane.xlu1 %9155  ;;  %v16851_v25 = vld [vmem:[%s14037_s16 + $0x80] sm:$0xff]  }
0x105b   : > { %v16805_v36 = vsub.f32 %v16696_v45, %v9171_v49  ;;  %v9172_v23 = vmul.f32 0.0078125, %v9156_v55  ;;  %9229 = vadd.xlane.f32.xlu0 %v9201_v27  ;;  %v9202_v57 = vmul.f32 %v16800_v9, %v16800_v9  ;;  %v16856_v55 = vld [vmem:[%s14037_s16 + $0xc8] sm:$0xff]  }
0x105d   : > { %v16810_v50 = vsub.f32 %v16701_v34, %v9172_v23  ;;  %9231 = vadd.xlane.f32.xlu1 %v9202_v57  ;;  %v9203_v20 = vmul.f32 %v16805_v36, %v16805_v36  ;;  %v12810_v57 = vld [vmem:[%s14037_s16 + $0x8] sm:$0xff]  }
0x105f   : > { %9233 = vadd.xlane.f32.xlu0 %v9203_v20  ;;  %v9204_v52 = vmul.f32 %v16810_v50, %v16810_v50  ;;  %v16867_v20 = vld [vmem:[%s14037_s16 + $0x88] sm:$0xff]  }
0x1061   : > { %9235 = vadd.xlane.f32.xlu1 %v9204_v52  ;;  %v12812_v52 = vld [vmem:[%s14037_s16 + $0x50] sm:$0xff]  }
0x1083   : > { %v9206_v45 = vpop.xlane.xlu0 %9205 }
0x1084   : > { %v9237_v28 = vmul.f32 0.0078125, %v9206_v45  ;;  %v16872_v45 = vld [vmem:[%s14037_s16 + $0xd0] sm:$0xff]  }
0x1086   : > { %v9253_v38 = vadd.f32 1e-05, %v9237_v28  ;;  %v9208_v5 = vpop.xlane.xlu1 %9207 }
0x1087   : > { %v9238_v16 = vmul.f32 0.0078125, %v9208_v5 }
0x1088   : > { %13124 = vrsqrt.f32 %v9253_v38  ;;  %v9210_v63 = vpop.xlane.xlu0 %9209 }
0x1089   : > { %v9254_v34 = vadd.f32 1e-05, %v9238_v16  ;;  %v9239_v13 = vmul.f32 0.0078125, %v9210_v63 }
0x108b   : > { %13126 = vrsqrt.f32 %v9254_v34  ;;  %v9255_v35 = vadd.f32 1e-05, %v9239_v13  ;;  %v9212_v26 = vpop.xlane.xlu1 %9211  ;;  %v12814_v34 = vld [vmem:[%s14037_s16 + $0x10] sm:$0xff]  }
0x108c   : > { %v9240_v19 = vmul.f32 0.0078125, %v9212_v26  ;;  %v16883_v13 = vld [vmem:[%s14037_s16 + $0x90] sm:$0xff]   ;;  %v12816_v26 = vld [vmem:[%s14037_s16 + $0x58] sm:$0xff]  }
0x108d   : > { %13128 = vrsqrt.f32 %v9255_v35 }
0x108e   : > { %v9256_v4 = vadd.f32 1e-05, %v9240_v19  ;;  %v16888_v19 = vld [vmem:[%s14037_s16 + $0xd8] sm:$0xff]  }
0x1090   : > { %13130 = vrsqrt.f32 %v9256_v4 }
0x1092   : > { %v13125_v7 = vpop.eup %13124 }
0x1093   : > { %v9285_v29 = vmul.f32 %v13125_v7, %v16713_v10 }
0x1094   : > { %v9214_v0 = vpop.xlane.xlu0 %9213 }
0x1095   : > { %v13127_v2 = vpop.eup %13126  ;;  %v9241_v8 = vmul.f32 0.0078125, %v9214_v0  ;;  %v9307_v3 = vmul.f32 %v16826_v1, %v9285_v29 }
0x1096   : > { %v9286_v44 = vmul.f32 %v13127_v2, %v16718_v39  ;;  %v9216_v14 = vpop.xlane.xlu1 %9215 }
0x1097   : > { %v13129_v58 = vpop.eup %13128  ;;  %v9257_v31 = vadd.f32 1e-05, %v9241_v8  ;;  %v9242_v18 = vmul.f32 0.0078125, %v9216_v14  ;;  %v16840_v11 = vadd.f32 %v16836_v41, %v9307_v3 }
0x1098   : > { %v9308_v10 = vmul.f32 %v16826_v1, %v9286_v44  ;;  %v9218_v48 = vpop.xlane.xlu0 %9217  ;;  %v9287_v51 = vmul.f32 %v13129_v58, %v16721_v24  ;;  %v12808_v24 = vld [vmem:[%s14037_s16 + $0x48] sm:$0xff]   ;;  %v12818_v44 = vld [vmem:[%s14037_s16 + $0x18] sm:$0xff]  }
0x1099   : > { %13132 = vrsqrt.f32 %v9257_v31  ;;  %v9258_v17 = vadd.f32 1e-05, %v9242_v18  ;;  %v9243_v62 = vmul.f32 0.0078125, %v9218_v48  ;;  %v12820_v18 = vld [vmem:[%s14037_s16 + $0x60] sm:$0xff]  }
0x109a   : > { %v13131_v39 = vpop.eup %13130  ;;  %v16843_v22 = vadd.f32 %v16836_v41, %v9308_v10  ;;  %v9220_v12 = vpop.xlane.xlu1 %9219  ;;  %v16903_v10 = vld [vmem:[%s14037_s16 + $0xe0] sm:$0xff]  }
0x109b   : > { %v9288_v43 = vmul.f32 %v13131_v39, %v16728_v33  ;;  %13134 = vrsqrt.f32 %v9258_v17  ;;  %v9259_v60 = vadd.f32 1e-05, %v9243_v62  ;;  %v9244_v6 = vmul.f32 0.0078125, %v9220_v12 }
0x109c   : > { %v9345_v56 = vpack.c.bf16 %v16843_v22, %v16840_v11  ;;  %v9309_v33 = vmul.f32 %v16826_v1, %v9287_v51 }
0x109d   : > { %v9310_v49 = vmul.f32 %v16826_v1, %v9288_v43  ;;  %13136 = vrsqrt.f32 %v9259_v60  ;;  %v9260_v27 = vadd.f32 1e-05, %v9244_v6 }
0x109e   : > { %9600 = vmatmul.mubr.bf16.vlgmr.msra.gmra.mrb[24].mxu1 %v9345_v56  ;;  %9713 = vmatmul.mubr.bf16.vlgmr.msra.gmra.mrb[40].mxu0 %v9345_v56  ;;  %v16875_v28 = vadd.f32 %v16836_v41, %v9309_v33  ;;  %v12822_v56 = vld [vmem:[%s14037_s16 + $0x20] sm:$0xff]  }
0x109f   : > { %13138 = vrsqrt.f32 %v9260_v27  ;;  %9609 = vmatprep.mubr.bf16.mxu1 %v17774_v30  ;;  %9722 = vmatprep.mubr.bf16.mxu0 %v17774_v30  ;;  %v16862_v23 = vadd.f32 %v16836_v41, %v9310_v49  ;;  %v16924_v49 = vld [vmem:[%s14037_s16 + $0xe8] sm:$0xff]  }
0x10a0   : > { %11474 = vmatpush3.bf16.msra.mxu1 %v12806_v59  ;;  %11538 = vmatpush3.bf16.msra.mxu0 %v16851_v25  ;;  %v16919_v59 = vld [vmem:[%s14037_s16 + $0xa0] sm:$0xff]  }
0x10a1   : > { %11475 = vmatprep.subr.bf16.mxu1 %v12808_v24  ;;  %11539 = vmatprep.subr.bf16.mxu0 %v16856_v55  ;;  %v9346_v5 = vpack.c.bf16 %v16862_v23, %v16875_v28 }
0x10a3   : > { %v13133_v38 = vpop.eup %13132 }
0x10a4   : > { %v9289_v16 = vmul.f32 %v13133_v38, %v16733_v54  ;;  %v9222_v63 = vpop.xlane.xlu0 %9221  ;;  %11476 = vmatpush3.bf16.msra.mxu1 %v12810_v57  ;;  %11540 = vmatpush3.bf16.msra.mxu0 %v16867_v20 }
0x10a5   : > { %v13135_v46 = vpop.eup %13134  ;;  %v9245_v35 = vmul.f32 0.0078125, %v9222_v63  ;;  %11477 = vmatprep.subr.bf16.mxu1 %v12812_v52  ;;  %11541 = vmatprep.subr.bf16.mxu0 %v16872_v45 }
0x10a6   : > { %v9311_v4 = vmul.f32 %v16826_v1, %v9289_v16  ;;  %v9290_v54 = vmul.f32 %v13135_v46, %v16736_v32  ;;  %v9224_v7 = vpop.xlane.xlu1 %9223  ;;  %9610 = vmatmul.mubr.bf16.gmra.mrb[28].mxu1 %v9346_v5  ;;  %9723 = vmatmul.mubr.bf16.gmra.mrb[44].mxu0 %v9346_v5  ;;  %v16898_v32 = vld [vmem:[%s14037_s16 + $0x98] sm:$0xff]  }
0x10a7   : > { %v13137_v29 = vpop.eup %13136  ;;  %v9261_v0 = vadd.f32 1e-05, %v9245_v35  ;;  %v9246_v2 = vmul.f32 0.0078125, %v9224_v7  ;;  %9619 = vmatprep.mubr.bf16.mxu1 %v17774_v30  ;;  %9732 = vmatprep.mubr.bf16.mxu0 %v17774_v30 }
0x10a8   : > { %v9312_v8 = vmul.f32 %v16826_v1, %v9290_v54  ;;  %v9226_v3 = vpop.xlane.xlu0 %9225  ;;  %11478 = vmatpush3.bf16.msra.mxu1 %v12814_v34  ;;  %11542 = vmatpush3.bf16.msra.mxu0 %v16883_v13  ;;  %v16906_v48 = vadd.f32 %v16836_v41, %v9311_v4  ;;  %v9291_v62 = vmul.f32 %v13137_v29, %v16745_v53 }
0x10a9   : > { %v13139_v14 = vpop.eup %13138  ;;  %13140 = vrsqrt.f32 %v9261_v0  ;;  %v9262_v58 = vadd.f32 1e-05, %v9246_v2  ;;  %v9247_v31 = vmul.f32 0.0078125, %v9226_v3  ;;  %11479 = vmatprep.subr.bf16.mxu1 %v12816_v26  ;;  %11543 = vmatprep.subr.bf16.mxu0 %v16888_v19 }
0x10aa   : > { %v16909_v17 = vadd.f32 %v16836_v41, %v9312_v8  ;;  %v9292_v39 = vmul.f32 %v13139_v14, %v16750_v61  ;;  %v9228_v51 = vpop.xlane.xlu1 %9227  ;;  %v12824_v61 = vld [vmem:[%s14037_s16 + $0x68] sm:$0xff]   ;;  %v9313_v27 = vmul.f32 %v16826_v1, %v9291_v62 }
0x10ab   : > { %13142 = vrsqrt.f32 %v9262_v58  ;;  %v9263_v12 = vadd.f32 1e-05, %v9247_v31  ;;  %v9248_v43 = vmul.f32 0.0078125, %v9228_v51 }
0x10ac   : > { %v9347_v60 = vpack.c.bf16 %v16909_v17, %v16906_v48  ;;  %v9314_v6 = vmul.f32 %v16826_v1, %v9292_v39  ;;  %11480 = vmatpush3.bf16.msra.mxu1 %v12818_v44  ;;  %11544 = vmatpush3.bf16.msra.mxu0 %v16898_v32  ;;  %v16935_v33 = vadd.f32 %v16836_v41, %v9313_v27 }
0x10ad   : > { %13144 = vrsqrt.f32 %v9263_v12  ;;  %v9264_v53 = vadd.f32 1e-05, %v9248_v43  ;;  %11481 = vmatprep.subr.bf16.mxu1 %v12820_v18  ;;  %11545 = vmatprep.subr.bf16.mxu0 %v16903_v10  ;;  %v12826_v12 = vld [vmem:[%s14037_s16 + $0x28] sm:$0xff]  }
0x10ae   : > { %9620 = vmatmul.mubr.bf16.gmra.mrb[32].mxu1 %v9347_v60  ;;  %9733 = vmatmul.mubr.bf16.gmra.mrb[48].mxu0 %v9347_v60  ;;  %v16930_v24 = vadd.f32 %v16836_v41, %v9314_v6  ;;  %v16971_v43 = vld [vmem:[%s14037_s16 + $0xa8] sm:$0xff]   ;;  %v12828_v6 = vld [vmem:[%s14037_s16 + $0x70] sm:$0xff]  }
0x10af   : > { %13146 = vrsqrt.f32 %v9264_v53  ;;  %9629 = vmatprep.mubr.bf16.mxu1 %v17774_v30  ;;  %9742 = vmatprep.mubr.bf16.mxu0 %v17774_v30  ;;  %v12830_v53 = vld [vmem:[%s14037_s16 + $0x30] sm:$0xff]  }
0x10b0   : > { %11482 = vmatpush3.bf16.msra.mxu1 %v12822_v56  ;;  %11546 = vmatpush3.bf16.msra.mxu0 %v16919_v59  ;;  %v9348_v52 = vpack.c.bf16 %v16930_v24, %v16935_v33  ;;  %v16976_v56 = vld [vmem:[%s14037_s16 + $0xf0] sm:$0xff]  }
0x10b1   : > { %11483 = vmatprep.subr.bf16.mxu1 %v12824_v61  ;;  %11547 = vmatprep.subr.bf16.mxu0 %v16924_v49  ;;  %v16980_v61 = vld [vmem:[%s14037_s16 + $0xb0] sm:$0xff]  }
0x10b3   : > { %v13141_v57 = vpop.eup %13140 }
0x10b4   : > { %v9293_v38 = vmul.f32 %v13141_v57, %v16769_v40  ;;  %11484 = vmatpush3.bf16.msra.mxu1 %v12826_v12  ;;  %11548 = vmatpush3.bf16.msra.mxu0 %v16971_v43  ;;  %v12832_v57 = vld [vmem:[%s14037_s16 + $0x78] sm:$0xff]  }
0x10b5   : > { %v13143_v5 = vpop.eup %13142  ;;  %11485 = vmatprep.subr.bf16.mxu1 %v12828_v6  ;;  %11549 = vmatprep.subr.bf16.mxu0 %v16976_v56 }
0x10b6   : > { %v9315_v16 = vmul.f32 %v16826_v1, %v9293_v38  ;;  %v9294_v63 = vmul.f32 %v13143_v5, %v16772_v42  ;;  %9630 = vmatmul.mubr.bf16.gmra.mrb[36].mxu1 %v9348_v52  ;;  %9743 = vmatmul.mubr.bf16.gmra.mrb[52].mxu0 %v9348_v52  ;;  %v16986_v52 = vld [vmem:[%s14037_s16 + $0xf8] sm:$0xff]  }
0x10b7   : > { %v13145_v34 = vpop.eup %13144  ;;  %9639 = vmatprep.mubr.bf16.mxu1 %v17774_v30  ;;  %9752 = vmatprep.mubr.bf16.mxu0 %v17774_v30  ;;  %v12834_v5 = vld [vmem:[%s14037_s16 + $0x38] sm:$0xff]  }
0x10b8   : > { %v9316_v46 = vmul.f32 %v16826_v1, %v9294_v63  ;;  %v16946_v26 = vadd.f32 %v16836_v41, %v9315_v16  ;;  %v9295_v4 = vmul.f32 %v13145_v34, %v16781_v21  ;;  %11486 = vmatpush3.bf16.msra.mxu1 %v12830_v53  ;;  %11550 = vmatpush3.bf16.msra.mxu0 %v16980_v61  ;;  %v16991_v16 = vld [vmem:[%s14037_s16 + $0xb8] sm:$0xff]  }
0x10b9   : > { %v13147_v35 = vpop.eup %13146  ;;  %11487 = vmatprep.subr.bf16.mxu1 %v12832_v57  ;;  %11551 = vmatprep.subr.bf16.mxu0 %v16986_v52 }
0x10ba   : > { %v16949_v40 = vadd.f32 %v16836_v41, %v9316_v46  ;;  %v9296_v42 = vmul.f32 %v13147_v35, %v16786_v47  ;;  %v9317_v29 = vmul.f32 %v16826_v1, %v9295_v4 }
0x10bc   : > { %v9349_v54 = vpack.c.bf16 %v16949_v40, %v16946_v26  ;;  %v9318_v7 = vmul.f32 %v16826_v1, %v9296_v42  ;;  %v16963_v21 = vadd.f32 %v16836_v41, %v9317_v29  ;;  %11488 = vmatpush3.bf16.msra.mxu1 %v12834_v5  ;;  %11552 = vmatpush3.bf16.msra.mxu0 %v16991_v16 }
0x10bd   : > { %12433 = vmatprep.subr.bf16.mxu1 %v16818_v15 }
0x10be   : > { %9640 = vmatmul.mubr.bf16.gmra.mrb[40].mxu1 %v9349_v54  ;;  %9753 = vmatmul.mubr.bf16.gmra.mrb[56].mxu0 %v9349_v54  ;;  %v16960_v0 = vadd.f32 %v16836_v41, %v9318_v7 }
0x10bf   : > { %9649 = vmatprep.mubr.bf16.mxu1 %v17774_v30  ;;  %9762 = vmatprep.mubr.bf16.mxu0 %v17774_v30 }
0x10c0   : > { %v9350_v47 = vpack.c.bf16 %v16960_v0, %v16963_v21 }
0x10c6   : > { %9650 = vmatmul.mubr.bf16.gmra.mrb[44].mxu1 %v9350_v47  ;;  %9763 = vmatmul.mubr.bf16.gmra.mrb[60].mxu0 %v9350_v47 }
0x10c7   : > { %9659 = vmatprep.mubr.bf16.mxu1 %v17774_v30  ;;  %9772 = vmatprep.mubr.bf16.mxu0 %v17774_v30 }
0x10e8   : > { %v9230_v2 = vpop.xlane.xlu0 %9229 }
0x10e9   : > { %v9249_v8 = vmul.f32 0.0078125, %v9230_v2 }
0x10ea   : > { %v9232_v3 = vpop.xlane.xlu1 %9231 }
0x10eb   : > { %v9265_v44 = vadd.f32 1e-05, %v9249_v8  ;;  %v9250_v14 = vmul.f32 0.0078125, %v9232_v3  ;;  %v9385_v8 = vld [vmem:[%s14085_s13] sm:$0xf] }
0x10ec   : > { %v9234_v58 = vpop.xlane.xlu0 %9233  ;;  %v17819_v3 = vld [vmem:[#allocation39_spill] sm:$0xff] }
0x10ed   : > { %13148 = vrsqrt.f32 %v9265_v44  ;;  %v9266_v31 = vadd.f32 1e-05, %v9250_v14  ;;  %v9251_v18 = vmul.f32 0.0078125, %v9234_v58  ;;  %v17820_v44 = vsub.s32 0, %v17819_v3 }
0x10ee   : > { %v9236_v62 = vpop.xlane.xlu1 %9235 }
0x10ef   : > { %13150 = vrsqrt.f32 %v9266_v31  ;;  %v9267_v39 = vadd.f32 1e-05, %v9251_v18  ;;  %v9252_v51 = vmul.f32 0.0078125, %v9236_v62  ;;  %v17025_v14 = vrot.slane %v9385_v8, %v17820_v44 }
0x10f0   : > { %v17822_v31 = vsub.s32 1, %v17819_v3 }
0x10f1   : > { %13152 = vrsqrt.f32 %v9267_v39  ;;  %v9268_v60 = vadd.f32 1e-05, %v9252_v51 }
0x10f3   : > { %13154 = vrsqrt.f32 %v9268_v60 }
0x10f7   : > { %v13149_v27 = vpop.eup %13148 }
0x10f8   : > { %v9297_v38 = vmul.f32 %v13149_v27, %v16797_v37 }
0x10f9   : > { %v13151_v63 = vpop.eup %13150 }
0x10fa   : > { %v9319_v34 = vmul.f32 %v16826_v1, %v9297_v38  ;;  %v9298_v46 = vmul.f32 %v13151_v63, %v16800_v9 }
0x10fb   : > { %v13153_v35 = vpop.eup %13152 }
0x10fc   : > { %v9320_v4 = vmul.f32 %v16826_v1, %v9298_v46  ;;  %v17000_v42 = vadd.f32 %v16836_v41, %v9319_v34  ;;  %v9299_v7 = vmul.f32 %v13153_v35, %v16805_v36 }
0x10fd   : > { %v13155_v37 = vpop.eup %13154 }
0x10fe   : > { %v17003_v54 = vadd.f32 %v16836_v41, %v9320_v4  ;;  %v9300_v9 = vmul.f32 %v13155_v37, %v16810_v50  ;;  %v9321_v15 = vmul.f32 %v16826_v1, %v9299_v7 }
0x1100   : > { %v9351_v29 = vpack.c.bf16 %v17003_v54, %v17000_v42  ;;  %v9322_v47 = vmul.f32 %v16826_v1, %v9300_v9  ;;  %v17017_v36 = vadd.f32 %v16836_v41, %v9321_v15  ;;  %v9401_v1 = vsub.s32 3, %v17819_v3 }
0x1102   : > { %9660 = vmatmul.mubr.bf16.gmra.mrb[48].mxu1 %v9351_v29  ;;  %9773 = vmatmul.mubr.bf16.gmra.mrb[64].mxu0 %v9351_v29  ;;  %v17014_v2 = vadd.f32 %v16836_v41, %v9322_v47  ;;  %v17033_v41 = vrot.slane %v9385_v8, %v17822_v31  ;;  %v17035_v18 = vrot.slane %v9385_v8, %v9401_v1 }
0x1103   : > { %9669 = vmatprep.mubr.bf16.mxu1 %v17774_v30  ;;  %9782 = vmatprep.mubr.bf16.mxu0 %v17774_v30  ;;  %v17821_v30 = vsub.s32 2, %v17819_v3 }
0x1104   : > { %v9352_v50 = vpack.c.bf16 %v17014_v2, %v17017_v36 }
0x1105   : > { %v17029_v58 = vrot.slane %v9385_v8, %v17821_v30 }
0x110a   : > { %9670 = vmatmul.mubr.bf16.gmra.mrb[52].mxu1 %v9352_v50  ;;  %9783 = vmatmul.mubr.bf16.gmra.mrb[68].mxu0 %v9352_v50 }
0x1171   : > { %v9601_v62 = vpop.f32.mrb[24].mxu1  ;;  %v9714_v39 = vpop.f32.mrb[40].mxu0 }
0x1172   : > { %v9602_v51 = vadd.f32 %v9601_v62, %v17025_v14  ;;  %v9715_v12 = vadd.f32 %v9714_v39, %v17029_v58  ;;  %v9603_v60 = vpop.f32.mrb[25].mxu1  ;;  %v9716_v6 = vpop.f32.mrb[41].mxu0 }
0x1173   : > { %v9604_v53 = vadd.f32 %v9603_v60, %v17033_v41  ;;  %v9717_v27 = vadd.f32 %v9716_v6, %v17035_v18  ;;  %v9605_v57 = vpop.f32.mrb[26].mxu1  ;;  %v9718_v38 = vpop.f32.mrb[42].mxu0 }
0x1174   : > { %v9606_v5 = vadd.f32 %v9605_v57, %v17025_v14  ;;  %v9719_v63 = vadd.f32 %v9718_v38, %v17029_v58  ;;  %v9607_v34 = vpop.f32.mrb[27].mxu1  ;;  %v9720_v46 = vpop.f32.mrb[43].mxu0  ;;  %v9793_v37 = vmax.f32 %v9602_v51, 0.0  ;;  %v9795_v7 = vmax.f32 %v9715_v12, 0.0 }
0x1175   : > { %v9608_v35 = vadd.f32 %v9607_v34, %v17033_v41  ;;  %v9721_v4 = vadd.f32 %v9720_v46, %v17035_v18  ;;  %v9794_v47 = vmax.f32 %v9604_v53, 0.0  ;;  %v9796_v15 = vmax.f32 %v9717_v27, 0.0 }
0x1176   : > { %v9797_v9 = vmax.f32 %v9606_v5, 0.0  ;;  %v9799_v29 = vmax.f32 %v9719_v63, 0.0 }
0x1177   : > { %v9798_v50 = vmax.f32 %v9608_v35, 0.0  ;;  %v9800_v8 = vmax.f32 %v9721_v4, 0.0 }
0x1178   : > { %v9857_v3 = vpack.c.bf16 %v9797_v9, %v9793_v37  ;;  %v9859_v1 = vpack.c.bf16 %v9799_v29, %v9795_v7 }
0x1179   : > { %v9858_v44 = vpack.c.bf16 %v9798_v50, %v9794_v47  ;;  %v9860_v30 = vpack.c.bf16 %v9800_v8, %v9796_v15  ;;  %v9611_v31 = vpop.f32.mrb[28].mxu1  ;;  %v9724_v62 = vpop.f32.mrb[44].mxu0 }
0x117a   : > { %v9612_v39 = vadd.f32 %v9611_v31, %v17025_v14  ;;  %v9725_v60 = vadd.f32 %v9724_v62, %v17029_v58  ;;  %v9613_v6 = vpop.f32.mrb[29].mxu1  ;;  %v9726_v57 = vpop.f32.mrb[45].mxu0 }
0x117b   : > { %v9614_v51 = vadd.f32 %v9613_v6, %v17033_v41  ;;  %v9727_v12 = vadd.f32 %v9726_v57, %v17035_v18  ;;  %v9615_v53 = vpop.f32.mrb[30].mxu1  ;;  %v9728_v27 = vpop.f32.mrb[46].mxu0  ;;  %10177 = vmatprep.mubr.bf16.mxu1 %v9858_v44  ;;  %10274 = vmatprep.mubr.bf16.mxu0 %v9860_v30 }
0x117c   : > { %v9616_v38 = vadd.f32 %v9615_v53, %v17025_v14  ;;  %v9729_v5 = vadd.f32 %v9728_v27, %v17029_v58  ;;  %v9617_v63 = vpop.f32.mrb[31].mxu1  ;;  %v9730_v34 = vpop.f32.mrb[47].mxu0  ;;  %10178 = vmatmul.mubr.bf16.vlgmr.msra.gmra.mrb[56].mxu1 %v9857_v3  ;;  %10275 = vmatmul.mubr.bf16.vlgmr.msra.gmra.mrb[72].mxu0 %v9859_v1  ;;  %v9801_v4 = vmax.f32 %v9612_v39, 0.0  ;;  %v9803_v37 = vmax.f32 %v9725_v60, 0.0 }
0x117d   : > { %v9618_v46 = vadd.f32 %v9617_v63, %v17033_v41  ;;  %v9731_v35 = vadd.f32 %v9730_v34, %v17035_v18  ;;  %12441 = vmatpush3.bf16.msra.mxu1 %v16851_v25  ;;  %v9802_v29 = vmax.f32 %v9614_v51, 0.0  ;;  %v9804_v47 = vmax.f32 %v9727_v12, 0.0 }
0x117e   : > { %v9805_v7 = vmax.f32 %v9616_v38, 0.0  ;;  %v9807_v9 = vmax.f32 %v9729_v5, 0.0  ;;  %12434 = vmatprep.subr.bf16.mxu1 %v16856_v55 }
0x117f   : > { %v9806_v15 = vmax.f32 %v9618_v46, 0.0  ;;  %v9808_v50 = vmax.f32 %v9731_v35, 0.0 }
0x1180   : > { %v9861_v8 = vpack.c.bf16 %v9805_v7, %v9801_v4  ;;  %v9863_v44 = vpack.c.bf16 %v9807_v9, %v9803_v37 }
0x1181   : > { %v9862_v3 = vpack.c.bf16 %v9806_v15, %v9802_v29  ;;  %v9864_v1 = vpack.c.bf16 %v9808_v50, %v9804_v47  ;;  %v9621_v30 = vpop.f32.mrb[32].mxu1  ;;  %v9734_v31 = vpop.f32.mrb[48].mxu0  ;;  %12442 = vmatpush3.bf16.msra.mxu1 %v16867_v20 }
0x1182   : > { %v9622_v25 = vadd.f32 %v9621_v30, %v17025_v14  ;;  %v9735_v62 = vadd.f32 %v9734_v31, %v17029_v58  ;;  %v9623_v39 = vpop.f32.mrb[33].mxu1  ;;  %v9736_v60 = vpop.f32.mrb[49].mxu0  ;;  %12435 = vmatprep.subr.bf16.mxu1 %v16872_v45 }
0x1183   : > { %v9624_v55 = vadd.f32 %v9623_v39, %v17033_v41  ;;  %v9737_v6 = vadd.f32 %v9736_v60, %v17035_v18  ;;  %v9625_v57 = vpop.f32.mrb[34].mxu1  ;;  %v9738_v51 = vpop.f32.mrb[50].mxu0  ;;  %10185 = vmatprep.mubr.bf16.mxu1 %v9862_v3  ;;  %10282 = vmatprep.mubr.bf16.mxu0 %v9864_v1 }
0x1184   : > { %v9626_v12 = vadd.f32 %v9625_v57, %v17025_v14  ;;  %v9739_v20 = vadd.f32 %v9738_v51, %v17029_v58  ;;  %v9627_v53 = vpop.f32.mrb[35].mxu1  ;;  %v9740_v27 = vpop.f32.mrb[51].mxu0  ;;  %10186 = vmatmul.mubr.bf16.gmra.mrb[60].mxu1 %v9861_v8  ;;  %10283 = vmatmul.mubr.bf16.gmra.mrb[76].mxu0 %v9863_v44  ;;  %v9809_v5 = vmax.f32 %v9622_v25, 0.0  ;;  %v9811_v63 = vmax.f32 %v9735_v62, 0.0 }
0x1185   : > { %v9628_v38 = vadd.f32 %v9627_v53, %v17033_v41  ;;  %v9741_v45 = vadd.f32 %v9740_v27, %v17035_v18  ;;  %12443 = vmatpush3.bf16.msra.mxu1 %v16883_v13  ;;  %v9810_v35 = vmax.f32 %v9624_v55, 0.0  ;;  %v9812_v4 = vmax.f32 %v9737_v6, 0.0 }
0x1186   : > { %v9813_v34 = vmax.f32 %v9626_v12, 0.0  ;;  %v9815_v46 = vmax.f32 %v9739_v20, 0.0  ;;  %12436 = vmatprep.subr.bf16.mxu1 %v16888_v19 }
0x1187   : > { %v9814_v37 = vmax.f32 %v9628_v38, 0.0  ;;  %v9816_v7 = vmax.f32 %v9741_v45, 0.0 }
0x1188   : > { %v9865_v9 = vpack.c.bf16 %v9813_v34, %v9809_v5  ;;  %v9867_v29 = vpack.c.bf16 %v9815_v46, %v9811_v63 }
0x1189   : > { %v9866_v47 = vpack.c.bf16 %v9814_v37, %v9810_v35  ;;  %v9868_v15 = vpack.c.bf16 %v9816_v7, %v9812_v4  ;;  %v9631_v50 = vpop.f32.mrb[36].mxu1  ;;  %v9744_v8 = vpop.f32.mrb[52].mxu0  ;;  %12444 = vmatpush3.bf16.msra.mxu1 %v16898_v32 }
0x118a   : > { %v9632_v13 = vadd.f32 %v9631_v50, %v17025_v14  ;;  %v9745_v44 = vadd.f32 %v9744_v8, %v17029_v58  ;;  %v9633_v3 = vpop.f32.mrb[37].mxu1  ;;  %v9746_v1 = vpop.f32.mrb[53].mxu0  ;;  %12437 = vmatprep.subr.bf16.mxu1 %v16903_v10 }
0x118b   : > { %v9634_v19 = vadd.f32 %v9633_v3, %v17033_v41  ;;  %v9747_v30 = vadd.f32 %v9746_v1, %v17035_v18  ;;  %v9635_v31 = vpop.f32.mrb[38].mxu1  ;;  %v9748_v25 = vpop.f32.mrb[54].mxu0  ;;  %10193 = vmatprep.mubr.bf16.mxu1 %v9866_v47  ;;  %10290 = vmatprep.mubr.bf16.mxu0 %v9868_v15 }
0x118c   : > { %v9636_v62 = vadd.f32 %v9635_v31, %v17025_v14  ;;  %v9749_v32 = vadd.f32 %v9748_v25, %v17029_v58  ;;  %v9637_v39 = vpop.f32.mrb[39].mxu1  ;;  %v9750_v60 = vpop.f32.mrb[55].mxu0  ;;  %10194 = vmatmul.mubr.bf16.gmra.mrb[64].mxu1 %v9865_v9  ;;  %10291 = vmatmul.mubr.bf16.gmra.mrb[80].mxu0 %v9867_v29  ;;  %v9817_v6 = vmax.f32 %v9632_v13, 0.0  ;;  %v9819_v57 = vmax.f32 %v9745_v44, 0.0 }
0x118d   : > { %v9638_v55 = vadd.f32 %v9637_v39, %v17033_v41  ;;  %v9751_v10 = vadd.f32 %v9750_v60, %v17035_v18  ;;  %12445 = vmatpush3.bf16.msra.mxu1 %v16919_v59  ;;  %v9818_v20 = vmax.f32 %v9634_v19, 0.0  ;;  %v9820_v53 = vmax.f32 %v9747_v30, 0.0 }
0x118e   : > { %v9821_v51 = vmax.f32 %v9636_v62, 0.0  ;;  %v9823_v12 = vmax.f32 %v9749_v32, 0.0  ;;  %12438 = vmatprep.subr.bf16.mxu1 %v16924_v49 }
0x118f   : > { %v9822_v27 = vmax.f32 %v9638_v55, 0.0  ;;  %v9824_v38 = vmax.f32 %v9751_v10, 0.0 }
0x1190   : > { %v9869_v45 = vpack.c.bf16 %v9821_v51, %v9817_v6  ;;  %v9871_v5 = vpack.c.bf16 %v9823_v12, %v9819_v57 }
0x1191   : > { %v9870_v63 = vpack.c.bf16 %v9822_v27, %v9818_v20  ;;  %v9872_v34 = vpack.c.bf16 %v9824_v38, %v9820_v53  ;;  %v9641_v46 = vpop.f32.mrb[40].mxu1  ;;  %v9754_v35 = vpop.f32.mrb[56].mxu0  ;;  %12446 = vmatpush3.bf16.msra.mxu1 %v16971_v43 }
0x1192   : > { %v9642_v59 = vadd.f32 %v9641_v46, %v17025_v14  ;;  %v9755_v4 = vadd.f32 %v9754_v35, %v17029_v58  ;;  %v9643_v37 = vpop.f32.mrb[41].mxu1  ;;  %v9756_v7 = vpop.f32.mrb[57].mxu0  ;;  %12439 = vmatprep.subr.bf16.mxu1 %v16976_v56 }
0x1193   : > { %v9644_v49 = vadd.f32 %v9643_v37, %v17033_v41  ;;  %v9757_v9 = vadd.f32 %v9756_v7, %v17035_v18  ;;  %v9645_v29 = vpop.f32.mrb[42].mxu1  ;;  %v9758_v47 = vpop.f32.mrb[58].mxu0  ;;  %10201 = vmatprep.mubr.bf16.mxu1 %v9870_v63  ;;  %10298 = vmatprep.mubr.bf16.mxu0 %v9872_v34 }
0x1194   : > { %v9646_v15 = vadd.f32 %v9645_v29, %v17025_v14  ;;  %v9759_v43 = vadd.f32 %v9758_v47, %v17029_v58  ;;  %v9647_v50 = vpop.f32.mrb[43].mxu1  ;;  %v9760_v8 = vpop.f32.mrb[59].mxu0  ;;  %10202 = vmatmul.mubr.bf16.gmra.mrb[68].mxu1 %v9869_v45  ;;  %10299 = vmatmul.mubr.bf16.gmra.mrb[84].mxu0 %v9871_v5  ;;  %v9825_v44 = vmax.f32 %v9642_v59, 0.0  ;;  %v9827_v3 = vmax.f32 %v9755_v4, 0.0 }
0x1195   : > { %v9648_v13 = vadd.f32 %v9647_v50, %v17033_v41  ;;  %v9761_v56 = vadd.f32 %v9760_v8, %v17035_v18  ;;  %12447 = vmatpush3.bf16.msra.mxu1 %v16980_v61  ;;  %v9826_v30 = vmax.f32 %v9644_v49, 0.0  ;;  %v9828_v31 = vmax.f32 %v9757_v9, 0.0 }
0x1196   : > { %v9829_v1 = vmax.f32 %v9646_v15, 0.0  ;;  %v9831_v19 = vmax.f32 %v9759_v43, 0.0  ;;  %12440 = vmatprep.subr.bf16.mxu1 %v16986_v52 }
0x1197   : > { %v9830_v25 = vmax.f32 %v9648_v13, 0.0  ;;  %v9832_v62 = vmax.f32 %v9761_v56, 0.0 }
0x1198   : > { %v9873_v32 = vpack.c.bf16 %v9829_v1, %v9825_v44  ;;  %v9875_v39 = vpack.c.bf16 %v9831_v19, %v9827_v3 }
0x1199   : > { %v9874_v60 = vpack.c.bf16 %v9830_v25, %v9826_v30  ;;  %v9876_v55 = vpack.c.bf16 %v9832_v62, %v9828_v31  ;;  %v9651_v10 = vpop.f32.mrb[44].mxu1  ;;  %v9764_v6 = vpop.f32.mrb[60].mxu0  ;;  %12448 = vmatpush3.bf16.msra.mxu1 %v16991_v16 }
0x119a   : > { %v9652_v61 = vadd.f32 %v9651_v10, %v17025_v14  ;;  %v9765_v57 = vadd.f32 %v9764_v6, %v17029_v58  ;;  %v9653_v51 = vpop.f32.mrb[45].mxu1  ;;  %v9766_v12 = vpop.f32.mrb[61].mxu0 }
0x119b   : > { %v9654_v52 = vadd.f32 %v9653_v51, %v17033_v41  ;;  %v9767_v20 = vadd.f32 %v9766_v12, %v17035_v18  ;;  %v9655_v53 = vpop.f32.mrb[46].mxu1  ;;  %v9768_v27 = vpop.f32.mrb[62].mxu0  ;;  %10209 = vmatprep.mubr.bf16.mxu1 %v9874_v60  ;;  %10306 = vmatprep.mubr.bf16.mxu0 %v9876_v55 }
0x119c   : > { %v9656_v38 = vadd.f32 %v9655_v53, %v17025_v14  ;;  %v9769_v45 = vadd.f32 %v9768_v27, %v17029_v58  ;;  %v9657_v5 = vpop.f32.mrb[47].mxu1  ;;  %v9770_v16 = vpop.f32.mrb[63].mxu0  ;;  %10210 = vmatmul.mubr.bf16.gmra.mrb[72].mxu1 %v9873_v32  ;;  %10307 = vmatmul.mubr.bf16.gmra.mrb[88].mxu0 %v9875_v39  ;;  %v9833_v46 = vmax.f32 %v9652_v61, 0.0  ;;  %v9835_v35 = vmax.f32 %v9765_v57, 0.0 }
0x119d   : > { %v9658_v63 = vadd.f32 %v9657_v5, %v17033_v41  ;;  %v9771_v34 = vadd.f32 %v9770_v16, %v17035_v18  ;;  %v9834_v37 = vmax.f32 %v9654_v52, 0.0  ;;  %v9836_v7 = vmax.f32 %v9767_v20, 0.0 }
0x119e   : > { %v9837_v59 = vmax.f32 %v9656_v38, 0.0  ;;  %v9839_v4 = vmax.f32 %v9769_v45, 0.0 }
0x119f   : > { %v9838_v49 = vmax.f32 %v9658_v63, 0.0  ;;  %v9840_v9 = vmax.f32 %v9771_v34, 0.0 }
0x11a0   : > { %v9877_v29 = vpack.c.bf16 %v9837_v59, %v9833_v46  ;;  %v9879_v47 = vpack.c.bf16 %v9839_v4, %v9835_v35 }
0x11a1   : > { %v9878_v15 = vpack.c.bf16 %v9838_v49, %v9834_v37  ;;  %v9880_v43 = vpack.c.bf16 %v9840_v9, %v9836_v7 }
0x11a3   : > { %10217 = vmatprep.mubr.bf16.mxu1 %v9878_v15  ;;  %10314 = vmatprep.mubr.bf16.mxu0 %v9880_v43 }
0x11a4   : > { %10218 = vmatmul.mubr.bf16.gmra.mrb[76].mxu1 %v9877_v29  ;;  %10315 = vmatmul.mubr.bf16.gmra.mrb[92].mxu0 %v9879_v47 }
0x11d5   : > { %v9661_v50 = vpop.f32.mrb[48].mxu1  ;;  %v9774_v8 = vpop.f32.mrb[64].mxu0 }
0x11d6   : > { %v9662_v13 = vadd.f32 %v9661_v50, %v17025_v14  ;;  %v9775_v56 = vadd.f32 %v9774_v8, %v17029_v58  ;;  %v9663_v44 = vpop.f32.mrb[49].mxu1  ;;  %v9776_v3 = vpop.f32.mrb[65].mxu0 }
0x11d7   : > { %v9664_v1 = vadd.f32 %v9663_v44, %v17033_v41  ;;  %v9777_v19 = vadd.f32 %v9776_v3, %v17035_v18  ;;  %v9665_v30 = vpop.f32.mrb[50].mxu1  ;;  %v9778_v31 = vpop.f32.mrb[66].mxu0 }
0x11d8   : > { %v9666_v25 = vadd.f32 %v9665_v30, %v17025_v14  ;;  %v9779_v62 = vadd.f32 %v9778_v31, %v17029_v58  ;;  %v9667_v32 = vpop.f32.mrb[51].mxu1  ;;  %v9780_v39 = vpop.f32.mrb[67].mxu0  ;;  %v9841_v10 = vmax.f32 %v9662_v13, 0.0  ;;  %v9843_v6 = vmax.f32 %v9775_v56, 0.0 }
0x11d9   : > { %v9668_v60 = vadd.f32 %v9667_v32, %v17033_v41  ;;  %v9781_v55 = vadd.f32 %v9780_v39, %v17035_v18  ;;  %v9842_v51 = vmax.f32 %v9664_v1, 0.0  ;;  %v9844_v12 = vmax.f32 %v9777_v19, 0.0 }
0x11da   : > { %v9845_v61 = vmax.f32 %v9666_v25, 0.0  ;;  %v9847_v57 = vmax.f32 %v9779_v62, 0.0 }
0x11db   : > { %v9846_v52 = vmax.f32 %v9668_v60, 0.0  ;;  %v9848_v20 = vmax.f32 %v9781_v55, 0.0 }
0x11dc   : > { %v9881_v53 = vpack.c.bf16 %v9845_v61, %v9841_v10  ;;  %v9883_v27 = vpack.c.bf16 %v9847_v57, %v9843_v6 }
0x11dd   : > { %v9882_v38 = vpack.c.bf16 %v9846_v52, %v9842_v51  ;;  %v9884_v45 = vpack.c.bf16 %v9848_v20, %v9844_v12  ;;  %v9671_v5 = vpop.f32.mrb[52].mxu1  ;;  %v9784_v16 = vpop.f32.mrb[68].mxu0  ;;  %v17121_v12 = vld [vmem:[%s886_s24] ss:$0 sm:$0xff] }
0x11de   : > { %v9672_v63 = vadd.f32 %v9671_v5, %v17025_v14  ;;  %v9785_v34 = vadd.f32 %v9784_v16, %v17029_v58  ;;  %v9673_v46 = vpop.f32.mrb[53].mxu1  ;;  %v9786_v35 = vpop.f32.mrb[69].mxu0 }
0x11df   : > { %v9674_v59 = vadd.f32 %v9673_v46, %v17033_v41  ;;  %v9787_v4 = vadd.f32 %v9786_v35, %v17035_v18  ;;  %v9675_v37 = vpop.f32.mrb[54].mxu1  ;;  %v9788_v7 = vpop.f32.mrb[70].mxu0  ;;  %10225 = vmatprep.mubr.bf16.mxu1 %v9882_v38 }
0x11e0   : > { %v9676_v49 = vadd.f32 %v9675_v37, %v17025_v14  ;;  %v9789_v9 = vadd.f32 %v9788_v7, %v17029_v58  ;;  %v9677_v29 = vpop.f32.mrb[55].mxu1  ;;  %v9790_v47 = vpop.f32.mrb[71].mxu0  ;;  %10226 = vmatmul.mubr.bf16.gmra.mrb[80].mxu1 %v9881_v53  ;;  %v9849_v50 = vmax.f32 %v9672_v63, 0.0  ;;  %v9851_v8 = vmax.f32 %v9785_v34, 0.0 }
0x11e1   : > { %v9678_v15 = vadd.f32 %v9677_v29, %v17033_v41  ;;  %v9791_v43 = vadd.f32 %v9790_v47, %v17035_v18  ;;  %v9850_v44 = vmax.f32 %v9674_v59, 0.0  ;;  %v9852_v3 = vmax.f32 %v9787_v4, 0.0 }
0x11e2   : > { %v9853_v13 = vmax.f32 %v9676_v49, 0.0  ;;  %v9855_v56 = vmax.f32 %v9789_v9, 0.0 }
0x11e3   : > { %v9854_v1 = vmax.f32 %v9678_v15, 0.0  ;;  %v9856_v19 = vmax.f32 %v9791_v43, 0.0 }
0x11e4   : > { %v9885_v30 = vpack.c.bf16 %v9853_v13, %v9849_v50  ;;  %v9887_v31 = vpack.c.bf16 %v9855_v56, %v9851_v8 }
0x11e5   : > { %v9886_v14 = vpack.c.bf16 %v9854_v1, %v9850_v44  ;;  %v9888_v25 = vpack.c.bf16 %v9856_v19, %v9852_v3 }
0x11e7   : > { %10233 = vmatprep.mubr.bf16.mxu1 %v9886_v14 }
0x11e8   : > { %10234 = vmatmul.mubr.bf16.gmra.mrb[84].mxu1 %v9885_v30 }
0x11e9   : > { %10322 = vmatprep.mubr.bf16.mxu1 %v9884_v45 }
0x11f0   : > { %10323 = vmatmul.mubr.bf16.vlgmr.msra.gmra.mrb[88].mxu1 %v9883_v27 }
0x11f1   : > { %10330 = vmatprep.mubr.bf16.mxu1 %v9888_v25 }
0x11f8   : > { %10331 = vmatmul.mubr.bf16.gmra.mrb[92].mxu1 %v9887_v31 }
0x124f   : > { %v11489_v58 = vpop.f32.mrb[56].mxu1  ;;  %v11553_v41 = vpop.f32.mrb[72].mxu0 }
0x1250   : > { %v11490_v18 = vpop.f32.mrb[57].mxu1  ;;  %v11554_v62 = vpop.f32.mrb[73].mxu0 }
0x1251   : > { %v11491_v32 = vadd.f32 %v11490_v18, %v11489_v58  ;;  %v11555_v39 = vadd.f32 %v11554_v62, %v11553_v41  ;;  %v11492_v60 = vpop.f32.mrb[58].mxu1  ;;  %v11556_v55 = vpop.f32.mrb[74].mxu0 }
0x1252   : > { %v11493_v10 = vpop.f32.mrb[59].mxu1  ;;  %v11557_v6 = vpop.f32.mrb[75].mxu0 }
0x1253   : > { %v10277_v61 = vadd.f32 %v11555_v39, %v11491_v32  ;;  %v11494_v57 = vadd.f32 %v11493_v10, %v11492_v60  ;;  %v11558_v51 = vadd.f32 %v11557_v6, %v11556_v55 }
0x1255   : > { %v10339_v52 = vadd.f32 %v10277_v61, %v16840_v11  ;;  %v10280_v20 = vadd.f32 %v11558_v51, %v11494_v57 }
0x1257   : > { %v10340_v53 = vadd.f32 %v10280_v20, %v16843_v22  ;;  %v11495_v27 = vpop.f32.mrb[60].mxu1  ;;  %v11559_v38 = vpop.f32.mrb[76].mxu0  ;;  %v17126_v45 = vadd.f32 %v17121_v12, %v10339_v52 }
0x1258   : > { %v11496_v5 = vpop.f32.mrb[61].mxu1  ;;  %v11560_v16 = vpop.f32.mrb[77].mxu0 }
0x1259   : > { %v11497_v63 = vadd.f32 %v11496_v5, %v11495_v27  ;;  %v11561_v34 = vadd.f32 %v11560_v16, %v11559_v38  ;;  %v11498_v46 = vpop.f32.mrb[62].mxu1  ;;  %v11562_v35 = vpop.f32.mrb[78].mxu0  ;;  %10380 = vadd.xlane.f32.xlu0 %v17126_v45  ;;  %v17130_v59 = vadd.f32 %v17121_v12, %v10340_v53 }
0x125a   : > { %v11499_v11 = vpop.f32.mrb[63].mxu1  ;;  %v11563_v4 = vpop.f32.mrb[79].mxu0 }
0x125b   : > { %v10285_v37 = vadd.f32 %v11561_v34, %v11497_v63  ;;  %v11500_v22 = vadd.f32 %v11499_v11, %v11498_v46  ;;  %v11564_v7 = vadd.f32 %v11563_v4, %v11562_v35  ;;  %10382 = vadd.xlane.f32.xlu1 %v17130_v59 }
0x125d   : > { %v10341_v49 = vadd.f32 %v10285_v37, %v16875_v28  ;;  %v10288_v9 = vadd.f32 %v11564_v7, %v11500_v22 }
0x125f   : > { %v10342_v29 = vadd.f32 %v10288_v9, %v16862_v23  ;;  %v11501_v47 = vpop.f32.mrb[64].mxu1  ;;  %v11565_v15 = vpop.f32.mrb[80].mxu0  ;;  %v17136_v43 = vadd.f32 %v17121_v12, %v10341_v49 }
0x1260   : > { %v11502_v50 = vpop.f32.mrb[65].mxu1  ;;  %v11566_v8 = vpop.f32.mrb[81].mxu0 }
0x1261   : > { %v11503_v13 = vadd.f32 %v11502_v50, %v11501_v47  ;;  %v11567_v56 = vadd.f32 %v11566_v8, %v11565_v15  ;;  %v11504_v44 = vpop.f32.mrb[66].mxu1  ;;  %v11568_v3 = vpop.f32.mrb[82].mxu0  ;;  %10384 = vadd.xlane.f32.xlu0 %v17136_v43  ;;  %v17140_v1 = vadd.f32 %v17121_v12, %v10342_v29 }
0x1262   : > { %v11505_v28 = vpop.f32.mrb[67].mxu1  ;;  %v11569_v19 = vpop.f32.mrb[83].mxu0 }
0x1263   : > { %v10293_v30 = vadd.f32 %v11567_v56, %v11503_v13  ;;  %v11506_v23 = vadd.f32 %v11505_v28, %v11504_v44  ;;  %v11570_v31 = vadd.f32 %v11569_v19, %v11568_v3  ;;  %10386 = vadd.xlane.f32.xlu1 %v17140_v1 }
0x1265   : > { %v10343_v14 = vadd.f32 %v10293_v30, %v16906_v48  ;;  %v10296_v25 = vadd.f32 %v11570_v31, %v11506_v23 }
0x1267   : > { %v10344_v58 = vadd.f32 %v10296_v25, %v16909_v17  ;;  %v11507_v41 = vpop.f32.mrb[68].mxu1  ;;  %v11571_v18 = vpop.f32.mrb[84].mxu0  ;;  %v17146_v62 = vadd.f32 %v17121_v12, %v10343_v14 }
0x1268   : > { %v11508_v32 = vpop.f32.mrb[69].mxu1  ;;  %v11572_v39 = vpop.f32.mrb[85].mxu0 }
0x1269   : > { %v11509_v60 = vadd.f32 %v11508_v32, %v11507_v41  ;;  %v11573_v55 = vadd.f32 %v11572_v39, %v11571_v18  ;;  %v11510_v10 = vpop.f32.mrb[70].mxu1  ;;  %v11574_v6 = vpop.f32.mrb[86].mxu0  ;;  %10388 = vadd.xlane.f32.xlu0 %v17146_v62  ;;  %v17150_v61 = vadd.f32 %v17121_v12, %v10344_v58 }
0x126a   : > { %v11511_v48 = vpop.f32.mrb[71].mxu1  ;;  %v11575_v57 = vpop.f32.mrb[87].mxu0 }
0x126b   : > { %v10301_v51 = vadd.f32 %v11573_v55, %v11509_v60  ;;  %v11512_v17 = vadd.f32 %v11511_v48, %v11510_v10  ;;  %v11576_v52 = vadd.f32 %v11575_v57, %v11574_v6  ;;  %10390 = vadd.xlane.f32.xlu1 %v17150_v61 }
0x126d   : > { %v10345_v20 = vadd.f32 %v10301_v51, %v16935_v33  ;;  %v10304_v53 = vadd.f32 %v11576_v52, %v11512_v17 }
0x126f   : > { %v10346_v27 = vadd.f32 %v10304_v53, %v16930_v24  ;;  %v11513_v38 = vpop.f32.mrb[72].mxu1  ;;  %v11577_v5 = vpop.f32.mrb[88].mxu0  ;;  %v17156_v16 = vadd.f32 %v17121_v12, %v10345_v20 }
0x1270   : > { %v11514_v63 = vpop.f32.mrb[73].mxu1  ;;  %v11578_v34 = vpop.f32.mrb[89].mxu0 }
0x1271   : > { %v11515_v46 = vadd.f32 %v11514_v63, %v11513_v38  ;;  %v11579_v35 = vadd.f32 %v11578_v34, %v11577_v5  ;;  %v11516_v11 = vpop.f32.mrb[74].mxu1  ;;  %v11580_v4 = vpop.f32.mrb[90].mxu0  ;;  %10392 = vadd.xlane.f32.xlu0 %v17156_v16  ;;  %v17160_v37 = vadd.f32 %v17121_v12, %v10346_v27 }
0x1272   : > { %v11517_v33 = vpop.f32.mrb[75].mxu1  ;;  %v11581_v22 = vpop.f32.mrb[91].mxu0 }
0x1273   : > { %v10309_v7 = vadd.f32 %v11579_v35, %v11515_v46  ;;  %v11518_v24 = vadd.f32 %v11517_v33, %v11516_v11  ;;  %v11582_v49 = vadd.f32 %v11581_v22, %v11580_v4  ;;  %10394 = vadd.xlane.f32.xlu1 %v17160_v37 }
0x1275   : > { %v10347_v9 = vadd.f32 %v10309_v7, %v16946_v26  ;;  %v10312_v29 = vadd.f32 %v11582_v49, %v11518_v24 }
0x1277   : > { %v10348_v47 = vadd.f32 %v10312_v29, %v16949_v40  ;;  %v11519_v15 = vpop.f32.mrb[76].mxu1  ;;  %v11583_v50 = vpop.f32.mrb[92].mxu0  ;;  %v17166_v8 = vadd.f32 %v17121_v12, %v10347_v9 }
0x1278   : > { %v11520_v13 = vpop.f32.mrb[77].mxu1  ;;  %v11584_v56 = vpop.f32.mrb[93].mxu0 }
0x1279   : > { %v11521_v44 = vadd.f32 %v11520_v13, %v11519_v15  ;;  %v11585_v3 = vadd.f32 %v11584_v56, %v11583_v50  ;;  %v11522_v28 = vpop.f32.mrb[78].mxu1  ;;  %v11586_v19 = vpop.f32.mrb[94].mxu0  ;;  %10396 = vadd.xlane.f32.xlu0 %v17166_v8  ;;  %v17170_v30 = vadd.f32 %v17121_v12, %v10348_v47 }
0x127a   : > { %v11523_v26 = vpop.f32.mrb[79].mxu1  ;;  %v11587_v23 = vpop.f32.mrb[95].mxu0 }
0x127b   : > { %v10317_v31 = vadd.f32 %v11585_v3, %v11521_v44  ;;  %v11524_v40 = vadd.f32 %v11523_v26, %v11522_v28  ;;  %v11588_v14 = vadd.f32 %v11587_v23, %v11586_v19  ;;  %10398 = vadd.xlane.f32.xlu1 %v17170_v30 }
0x127d   : > { %v10349_v25 = vadd.f32 %v10317_v31, %v16963_v21  ;;  %v10320_v58 = vadd.f32 %v11588_v14, %v11524_v40 }
0x127f   : > { %v10350_v41 = vadd.f32 %v10320_v58, %v16960_v0  ;;  %v17176_v18 = vadd.f32 %v17121_v12, %v10349_v25 }
0x1281   : > { %10400 = vadd.xlane.f32.xlu0 %v17176_v18  ;;  %v17180_v32 = vadd.f32 %v17121_v12, %v10350_v41 }
0x1283   : > { %10402 = vadd.xlane.f32.xlu1 %v17180_v32 }
0x12b3   : > { %v11525_v39 = vpop.f32.mrb[80].mxu1 }
0x12b4   : > { %v11526_v60 = vpop.f32.mrb[81].mxu1 }
0x12b5   : > { %v11527_v55 = vadd.f32 %v11526_v60, %v11525_v39  ;;  %v11528_v10 = vpop.f32.mrb[82].mxu1 }
0x12b6   : > { %v11529_v6 = vpop.f32.mrb[83].mxu1 }
0x12b7   : > { %v11530_v48 = vadd.f32 %v11529_v6, %v11528_v10 }
0x12bb   : > { %v11531_v21 = vpop.f32.mrb[84].mxu1 }
0x12bc   : > { %v11532_v57 = vpop.f32.mrb[85].mxu1 }
0x12bd   : > { %v11533_v51 = vadd.f32 %v11532_v57, %v11531_v21  ;;  %v11534_v0 = vpop.f32.mrb[86].mxu1 }
0x12be   : > { %v11535_v17 = vpop.f32.mrb[87].mxu1 }
0x12bf   : > { %v11536_v52 = vadd.f32 %v11535_v17, %v11534_v0 }
0x12c3   : > { %v11589_v20 = vpop.f32.mrb[88].mxu1 }
0x12c4   : > { %v11590_v53 = vpop.f32.mrb[89].mxu1 }
0x12c5   : > { %v11591_v27 = vadd.f32 %v11590_v53, %v11589_v20  ;;  %v11592_v38 = vpop.f32.mrb[90].mxu1 }
0x12c6   : > { %v11593_v5 = vpop.f32.mrb[91].mxu1 }
0x12c7   : > { %v10325_v63 = vadd.f32 %v11591_v27, %v11527_v55  ;;  %v11594_v34 = vadd.f32 %v11593_v5, %v11592_v38 }
0x12c9   : > { %v10351_v46 = vadd.f32 %v10325_v63, %v17000_v42  ;;  %v10328_v35 = vadd.f32 %v11594_v34, %v11530_v48 }
0x12cb   : > { %v10352_v11 = vadd.f32 %v10328_v35, %v17003_v54  ;;  %v11595_v4 = vpop.f32.mrb[92].mxu1  ;;  %v17186_v33 = vadd.f32 %v17121_v12, %v10351_v46 }
0x12cc   : > { %v11596_v22 = vpop.f32.mrb[93].mxu1 }
0x12cd   : > { %v11597_v7 = vadd.f32 %v11596_v22, %v11595_v4  ;;  %v11598_v24 = vpop.f32.mrb[94].mxu1  ;;  %10404 = vadd.xlane.f32.xlu0 %v17186_v33  ;;  %v17190_v49 = vadd.f32 %v17121_v12, %v10352_v11 }
0x12ce   : > { %v11599_v9 = vpop.f32.mrb[95].mxu1 }
0x12cf   : > { %v10333_v29 = vadd.f32 %v11597_v7, %v11533_v51  ;;  %v11600_v47 = vadd.f32 %v11599_v9, %v11598_v24  ;;  %10406 = vadd.xlane.f32.xlu1 %v17190_v49 }
0x12d1   : > { %v10353_v42 = vadd.f32 %v10333_v29, %v17017_v36  ;;  %v10336_v54 = vadd.f32 %v11600_v47, %v11536_v52 }
0x12d3   : > { %v10354_v15 = vadd.f32 %v10336_v54, %v17014_v2  ;;  %v17196_v50 = vadd.f32 %v17121_v12, %v10353_v42 }
0x12d5   : > { %10408 = vadd.xlane.f32.xlu0 %v17196_v50  ;;  %v17200_v13 = vadd.f32 %v17121_v12, %v10354_v15 }
0x12d7   : > { %10410 = vadd.xlane.f32.xlu1 %v17200_v13 }
0x12e6   : > { %v10381_v56 = vpop.xlane.xlu0 %10380 }
0x12e7   : > { %v10412_v44 = vmul.f32 0.0078125, %v10381_v56 }
0x12e8   : > { %v10383_v3 = vpop.xlane.xlu1 %10382 }
0x12e9   : > { %v17204_v28 = vsub.f32 %v17126_v45, %v10412_v44  ;;  %v10413_v36 = vmul.f32 0.0078125, %v10383_v3 }
0x12eb   : > { %v17207_v19 = vsub.f32 %v17130_v59, %v10413_v36  ;;  %v10444_v2 = vmul.f32 %v17204_v28, %v17204_v28 }
0x12ed   : > { %10460 = vadd.xlane.f32.xlu0 %v10444_v2  ;;  %v10445_v12 = vmul.f32 %v17207_v19, %v17207_v19 }
0x12ee   : > { %v10385_v26 = vpop.xlane.xlu0 %10384 }
0x12ef   : > { %v10414_v23 = vmul.f32 0.0078125, %v10385_v26  ;;  %10462 = vadd.xlane.f32.xlu1 %v10445_v12 }
0x12f0   : > { %v10387_v31 = vpop.xlane.xlu1 %10386 }
0x12f1   : > { %v17214_v40 = vsub.f32 %v17136_v43, %v10414_v23  ;;  %v10415_v45 = vmul.f32 0.0078125, %v10387_v31 }
0x12f3   : > { %v17217_v14 = vsub.f32 %v17140_v1, %v10415_v45  ;;  %v10446_v59 = vmul.f32 %v17214_v40, %v17214_v40 }
0x12f5   : > { %10464 = vadd.xlane.f32.xlu0 %v10446_v59  ;;  %v10447_v25 = vmul.f32 %v17217_v14, %v17217_v14 }
0x12f6   : > { %v10389_v58 = vpop.xlane.xlu0 %10388 }
0x12f7   : > { %v10416_v41 = vmul.f32 0.0078125, %v10389_v58  ;;  %10466 = vadd.xlane.f32.xlu1 %v10447_v25 }
0x12f8   : > { %v10391_v39 = vpop.xlane.xlu1 %10390 }
0x12f9   : > { %v17224_v60 = vsub.f32 %v17146_v62, %v10416_v41  ;;  %v10417_v43 = vmul.f32 0.0078125, %v10391_v39  ;;  %v17288_v41 = vld [vmem:[%s876_s6] ss:$0 sm:$0xff]  ;;  %s17827_s6 = sld [smem:[#allocation35_spill]] }
0x12fb   : > { %v17227_v55 = vsub.f32 %v17150_v61, %v10417_v43  ;;  %v10448_v1 = vmul.f32 %v17224_v60, %v17224_v60 }
0x12fd   : > { %10468 = vadd.xlane.f32.xlu0 %v10448_v1  ;;  %v10449_v10 = vmul.f32 %v17227_v55, %v17227_v55 }
0x12fe   : > { %v10393_v6 = vpop.xlane.xlu0 %10392 }
0x12ff   : > { %v10418_v48 = vmul.f32 0.0078125, %v10393_v6  ;;  %10470 = vadd.xlane.f32.xlu1 %v10449_v10  ;;  %v17296_v10 = vld [vmem:[%s879_s17] ss:$0 sm:$0xff]  ;;  %s11184_s17 = sshll.u32 %s17826_s30, 11  ;;  %p17829_p8 = scmp.ne.s32.totalorder %s17827_s6, 0 }
0x1300   : > { %v10395_v21 = vpop.xlane.xlu1 %10394  ;;  %s17363_s20 = scalar_lea.hbm %s17828_s7, %s11184_s17 }
0x1301   : > { %v17234_v57 = vsub.f32 %v17156_v16, %v10418_v48  ;;  %v10419_v62 = vmul.f32 0.0078125, %v10395_v21  ;;  %p13386_p9 = pnand %p13385_p3, %p17829_p8 }
0x1303   : > { %v17237_v51 = vsub.f32 %v17160_v37, %v10419_v62  ;;  %v10450_v61 = vmul.f32 %v17234_v57, %v17234_v57  ;;  %p13387_p13 = pneg %p13386_p9 }
0x1305   : > { %10472 = vadd.xlane.f32.xlu0 %v10450_v61  ;;  %v10451_v0 = vmul.f32 %v17237_v51, %v17237_v51  ;;  %p13394_p5 = pnand %p13393_p0, %p13387_p13 }
0x1306   : > { %v10397_v17 = vpop.xlane.xlu0 %10396 }
0x1307   : > { %v10420_v52 = vmul.f32 0.0078125, %v10397_v17  ;;  %10474 = vadd.xlane.f32.xlu1 %v10451_v0 }
0x1308   : > { %v10399_v20 = vpop.xlane.xlu1 %10398 }
0x1309   : > { %v17244_v53 = vsub.f32 %v17166_v8, %v10420_v52  ;;  %v10421_v16 = vmul.f32 0.0078125, %v10399_v20 }
0x130b   : > { %v17247_v27 = vsub.f32 %v17170_v30, %v10421_v16  ;;  %v10452_v37 = vmul.f32 %v17244_v53, %v17244_v53 }
0x130d   : > { %10476 = vadd.xlane.f32.xlu0 %v10452_v37  ;;  %v10453_v38 = vmul.f32 %v17247_v27, %v17247_v27 }
0x130e   : > { %v10401_v5 = vpop.xlane.xlu0 %10400 }
0x130f   : > { %v10422_v63 = vmul.f32 0.0078125, %v10401_v5  ;;  %10478 = vadd.xlane.f32.xlu1 %v10453_v38 }
0x1310   : > { %v10403_v34 = vpop.xlane.xlu1 %10402 }
0x1311   : > { %v17254_v46 = vsub.f32 %v17176_v18, %v10422_v63  ;;  %v10423_v8 = vmul.f32 0.0078125, %v10403_v34 }
0x1313   : > { %v17257_v35 = vsub.f32 %v17180_v32, %v10423_v8  ;;  %v10454_v30 = vmul.f32 %v17254_v46, %v17254_v46 }
0x1315   : > { %10480 = vadd.xlane.f32.xlu0 %v10454_v30  ;;  %v10455_v11 = vmul.f32 %v17257_v35, %v17257_v35 }
0x1317   : > { %10482 = vadd.xlane.f32.xlu1 %v10455_v11 }
0x135a   : > { %v10405_v4 = vpop.xlane.xlu0 %10404 }
0x135b   : > { %v10424_v22 = vmul.f32 0.0078125, %v10405_v4 }
0x135c   : > { %v10407_v7 = vpop.xlane.xlu1 %10406 }
0x135d   : > { %v17264_v24 = vsub.f32 %v17186_v33, %v10424_v22  ;;  %v10425_v18 = vmul.f32 0.0078125, %v10407_v7 }
0x135f   : > { %v17267_v9 = vsub.f32 %v17190_v49, %v10425_v18  ;;  %v10456_v32 = vmul.f32 %v17264_v24, %v17264_v24 }
0x1361   : > { %10484 = vadd.xlane.f32.xlu0 %v10456_v32  ;;  %v10457_v29 = vmul.f32 %v17267_v9, %v17267_v9 }
0x1362   : > { %v10409_v47 = vpop.xlane.xlu0 %10408 }
0x1363   : > { %v10426_v42 = vmul.f32 0.0078125, %v10409_v47  ;;  %10486 = vadd.xlane.f32.xlu1 %v10457_v29 }
0x1364   : > { %v10411_v54 = vpop.xlane.xlu1 %10410 }
0x1365   : > { %v17274_v15 = vsub.f32 %v17196_v50, %v10426_v42  ;;  %v10427_v33 = vmul.f32 0.0078125, %v10411_v54 }
0x1367   : > { %v17277_v56 = vsub.f32 %v17200_v13, %v10427_v33  ;;  %v10458_v49 = vmul.f32 %v17274_v15, %v17274_v15 }
0x1369   : > { %10488 = vadd.xlane.f32.xlu0 %v10458_v49  ;;  %v10459_v44 = vmul.f32 %v17277_v56, %v17277_v56 }
0x136b   : > { %10490 = vadd.xlane.f32.xlu1 %v10459_v44 }
0x137a   : > { %v10461_v3 = vpop.xlane.xlu0 %10460 }
0x137b   : > { %v10492_v36 = vmul.f32 0.0078125, %v10461_v3 }
0x137c   : > { %v10463_v2 = vpop.xlane.xlu1 %10462 }
0x137d   : > { %v10508_v12 = vadd.f32 1e-05, %v10492_v36  ;;  %v10493_v26 = vmul.f32 0.0078125, %v10463_v2 }
0x137f   : > { %13156 = vrsqrt.f32 %v10508_v12  ;;  %v10509_v50 = vadd.f32 1e-05, %v10493_v26 }
0x1381   : > { %13158 = vrsqrt.f32 %v10509_v50 }
0x1382   : > { %v10465_v13 = vpop.xlane.xlu0 %10464 }
0x1383   : > { %v10494_v23 = vmul.f32 0.0078125, %v10465_v13 }
0x1384   : > { %v10467_v31 = vpop.xlane.xlu1 %10466 }
0x1385   : > { %v10510_v45 = vadd.f32 1e-05, %v10494_v23  ;;  %v10495_v59 = vmul.f32 0.0078125, %v10467_v31 }
0x1387   : > { %13160 = vrsqrt.f32 %v10510_v45  ;;  %v10511_v25 = vadd.f32 1e-05, %v10495_v59 }
0x1389   : > { %v13157_v58 = vpop.eup %13156  ;;  %13162 = vrsqrt.f32 %v10511_v25 }
0x138a   : > { %v10540_v39 = vmul.f32 %v13157_v58, %v17204_v28  ;;  %v10469_v43 = vpop.xlane.xlu0 %10468 }
0x138b   : > { %v13159_v1 = vpop.eup %13158  ;;  %v10496_v6 = vmul.f32 0.0078125, %v10469_v43 }
0x138c   : > { %v10562_v48 = vmul.f32 %v17288_v41, %v10540_v39  ;;  %v10541_v21 = vmul.f32 %v13159_v1, %v17207_v19  ;;  %v10471_v62 = vpop.xlane.xlu1 %10470 }
0x138d   : > { %v10512_v61 = vadd.f32 1e-05, %v10496_v6  ;;  %v10497_v0 = vmul.f32 0.0078125, %v10471_v62 }
0x138e   : > { %v10584_v17 = vadd.f32 %v17296_v10, %v10562_v48  ;;  %v10563_v28 = vmul.f32 %v17288_v41, %v10541_v21 }
0x138f   : > { %13164 = vrsqrt.f32 %v10512_v61  ;;  %v10513_v52 = vadd.f32 1e-05, %v10497_v0 }
0x1390   : > { %10600 = vst [vmem:[%s14093_s10] sm:$0xff] %v10584_v17  ;;  %v10585_v20 = vadd.f32 %v17296_v10, %v10563_v28 }
0x1391   : > { %v13161_v16 = vpop.eup %13160  ;;  %13166 = vrsqrt.f32 %v10513_v52 }
0x1392   : > { %10601 = vst [vmem:[%s14093_s10 + $0x8] sm:$0xff] %v10585_v20  ;;  %v10542_v37 = vmul.f32 %v13161_v16, %v17214_v40  ;;  %v10473_v38 = vpop.xlane.xlu0 %10472 }
0x1393   : > { %v13163_v19 = vpop.eup %13162  ;;  %v10498_v5 = vmul.f32 0.0078125, %v10473_v38 }
0x1394   : > { %v10564_v63 = vmul.f32 %v17288_v41, %v10542_v37  ;;  %v10543_v34 = vmul.f32 %v13163_v19, %v17217_v14  ;;  %v10475_v8 = vpop.xlane.xlu1 %10474 }
0x1395   : > { %v10514_v30 = vadd.f32 1e-05, %v10498_v5  ;;  %v10499_v11 = vmul.f32 0.0078125, %v10475_v8 }
0x1396   : > { %v10586_v4 = vadd.f32 %v17296_v10, %v10564_v63  ;;  %v10565_v22 = vmul.f32 %v17288_v41, %v10543_v34 }
0x1397   : > { %13168 = vrsqrt.f32 %v10514_v30  ;;  %v10515_v7 = vadd.f32 1e-05, %v10499_v11 }
0x1398   : > { %10602 = vst [vmem:[%s14093_s10 + $0x10] sm:$0xff] %v10586_v4  ;;  %v10587_v40 = vadd.f32 %v17296_v10, %v10565_v22 }
0x1399   : > { %v13165_v18 = vpop.eup %13164  ;;  %13170 = vrsqrt.f32 %v10515_v7 }
0x139a   : > { %10603 = vst [vmem:[%s14093_s10 + $0x18] sm:$0xff] %v10587_v40  ;;  %v10544_v32 = vmul.f32 %v13165_v18, %v17224_v60  ;;  %v10477_v29 = vpop.xlane.xlu0 %10476 }
0x139b   : > { %v13167_v14 = vpop.eup %13166  ;;  %v10500_v47 = vmul.f32 0.0078125, %v10477_v29 }
0x139c   : > { %v10566_v42 = vmul.f32 %v17288_v41, %v10544_v32  ;;  %v10545_v54 = vmul.f32 %v13167_v14, %v17227_v55  ;;  %v10479_v33 = vpop.xlane.xlu1 %10478 }
0x139d   : > { %v10516_v49 = vadd.f32 1e-05, %v10500_v47  ;;  %v10501_v44 = vmul.f32 0.0078125, %v10479_v33 }
0x139e   : > { %v10588_v3 = vadd.f32 %v17296_v10, %v10566_v42  ;;  %v10567_v36 = vmul.f32 %v17288_v41, %v10545_v54 }
0x139f   : > { %13172 = vrsqrt.f32 %v10516_v49  ;;  %v10517_v2 = vadd.f32 1e-05, %v10501_v44 }
0x13a0   : > { %10604 = vst [vmem:[%s14093_s10 + $0x20] sm:$0xff] %v10588_v3  ;;  %v10589_v60 = vadd.f32 %v17296_v10, %v10567_v36 }
0x13a1   : > { %v13169_v12 = vpop.eup %13168  ;;  %13174 = vrsqrt.f32 %v10517_v2 }
0x13a2   : > { %10605 = vst [vmem:[%s14093_s10 + $0x28] sm:$0xff] %v10589_v60  ;;  %v10546_v26 = vmul.f32 %v13169_v12, %v17234_v57  ;;  %v10481_v50 = vpop.xlane.xlu0 %10480 }
0x13a3   : > { %v13171_v55 = vpop.eup %13170  ;;  %v10502_v13 = vmul.f32 0.0078125, %v10481_v50 }
0x13a4   : > { %v10568_v23 = vmul.f32 %v17288_v41, %v10546_v26  ;;  %v10547_v31 = vmul.f32 %v13171_v55, %v17237_v51  ;;  %v10483_v45 = vpop.xlane.xlu1 %10482 }
0x13a5   : > { %v10518_v59 = vadd.f32 1e-05, %v10502_v13  ;;  %v10503_v25 = vmul.f32 0.0078125, %v10483_v45 }
0x13a6   : > { %v10590_v58 = vadd.f32 %v17296_v10, %v10568_v23  ;;  %v10569_v39 = vmul.f32 %v17288_v41, %v10547_v31 }
0x13a7   : > { %13176 = vrsqrt.f32 %v10518_v59  ;;  %v10519_v43 = vadd.f32 1e-05, %v10503_v25 }
0x13a8   : > { %10606 = vst [vmem:[%s14093_s10 + $0x30] sm:$0xff] %v10590_v58  ;;  %v10591_v57 = vadd.f32 %v17296_v10, %v10569_v39 }
0x13a9   : > { %v13173_v1 = vpop.eup %13172  ;;  %13178 = vrsqrt.f32 %v10519_v43 }
0x13aa   : > { %10607 = vst [vmem:[%s14093_s10 + $0x38] sm:$0xff] %v10591_v57  ;;  %v10548_v6 = vmul.f32 %v13173_v1, %v17244_v53 }
0x13ab   : > { %v13175_v51 = vpop.eup %13174 }
0x13ac   : > { %v10570_v48 = vmul.f32 %v17288_v41, %v10548_v6  ;;  %v10549_v21 = vmul.f32 %v13175_v51, %v17247_v27 }
0x13ae   : > { %v10592_v62 = vadd.f32 %v17296_v10, %v10570_v48  ;;  %v10571_v61 = vmul.f32 %v17288_v41, %v10549_v21 }
0x13b0   : > { %10608 = vst [vmem:[%s14093_s10 + $0x40] sm:$0xff] %v10592_v62  ;;  %v10593_v0 = vadd.f32 %v17296_v10, %v10571_v61 }
0x13b1   : > { %v13177_v17 = vpop.eup %13176 }
0x13b2   : > { %10609 = vst [vmem:[%s14093_s10 + $0x48] sm:$0xff] %v10593_v0  ;;  %v10550_v28 = vmul.f32 %v13177_v17, %v17254_v46 }
0x13b3   : > { %v13179_v52 = vpop.eup %13178 }
0x13b4   : > { %v10572_v53 = vmul.f32 %v17288_v41, %v10550_v28  ;;  %v10551_v20 = vmul.f32 %v13179_v52, %v17257_v35 }
0x13b6   : > { %v10594_v16 = vadd.f32 %v17296_v10, %v10572_v53  ;;  %v10573_v27 = vmul.f32 %v17288_v41, %v10551_v20 }
0x13b8   : > { %10610 = vst [vmem:[%s14093_s10 + $0x50] sm:$0xff] %v10594_v16  ;;  %v10595_v37 = vadd.f32 %v17296_v10, %v10573_v27 }
0x13ba   : > { %10611 = vst [vmem:[%s14093_s10 + $0x58] sm:$0xff] %v10595_v37 }
0x13ee   : > { %v10485_v38 = vpop.xlane.xlu0 %10484 }
0x13ef   : > { %v10504_v19 = vmul.f32 0.0078125, %v10485_v38 }
0x13f0   : > { %v10487_v5 = vpop.xlane.xlu1 %10486 }
0x13f1   : > { %v10520_v63 = vadd.f32 1e-05, %v10504_v19  ;;  %v10505_v34 = vmul.f32 0.0078125, %v10487_v5 }
0x13f3   : > { %13180 = vrsqrt.f32 %v10520_v63  ;;  %v10521_v46 = vadd.f32 1e-05, %v10505_v34 }
0x13f5   : > { %13182 = vrsqrt.f32 %v10521_v46 }
0x13f6   : > { %v10489_v8 = vpop.xlane.xlu0 %10488 }
0x13f7   : > { %v10506_v30 = vmul.f32 0.0078125, %v10489_v8 }
0x13f8   : > { %v10491_v35 = vpop.xlane.xlu1 %10490 }
0x13f9   : > { %v10522_v11 = vadd.f32 1e-05, %v10506_v30  ;;  %v10507_v4 = vmul.f32 0.0078125, %v10491_v35 }
0x13fb   : > { %13184 = vrsqrt.f32 %v10522_v11  ;;  %v10523_v22 = vadd.f32 1e-05, %v10507_v4 }
0x13fd   : > { %v13181_v7 = vpop.eup %13180  ;;  %13186 = vrsqrt.f32 %v10523_v22 }
0x13fe   : > { %v10552_v40 = vmul.f32 %v13181_v7, %v17264_v24 }
0x13ff   : > { %v13183_v18 = vpop.eup %13182 }
0x1400   : > { %v10574_v32 = vmul.f32 %v17288_v41, %v10552_v40  ;;  %v10553_v29 = vmul.f32 %v13183_v18, %v17267_v9 }
0x1402   : > { %v10596_v14 = vadd.f32 %v17296_v10, %v10574_v32  ;;  %v10575_v47 = vmul.f32 %v17288_v41, %v10553_v29 }
0x1404   : > { %10612 = vst [vmem:[%s14093_s10 + $0x60] sm:$0xff] %v10596_v14  ;;  %v10597_v42 = vadd.f32 %v17296_v10, %v10575_v47 }
0x1405   : > { %v13185_v54 = vpop.eup %13184 }
0x1406   : > { %10613 = vst [vmem:[%s14093_s10 + $0x68] sm:$0xff] %v10597_v42  ;;  %v10554_v33 = vmul.f32 %v13185_v54, %v17274_v15 }
0x1407   : > { %v13187_v24 = vpop.eup %13186 }
0x1408   : > { %v10576_v49 = vmul.f32 %v17288_v41, %v10554_v33  ;;  %v10555_v9 = vmul.f32 %v13187_v24, %v17277_v56 }
0x140a   : > { %v10598_v44 = vadd.f32 %v17296_v10, %v10576_v49  ;;  %v10577_v3 = vmul.f32 %v17288_v41, %v10555_v9 }
0x140c   : > { %10614 = vst [vmem:[%s14093_s10 + $0x70] sm:$0xff] %v10598_v44  ;;  %v10599_v15 = vadd.f32 %v17296_v10, %v10577_v3 }
0x140e   : > { %10615 = vst [vmem:[%s14093_s10 + $0x78] sm:$0xff] %v10599_v15 }
0x140f   : > { %13397 = shalt.err (!%p13394_p5)
}
0x1410   : > { %s13398_s10 = scalar_lea.hbm %s17363_s20, 2048  ;;  %s13402_s23 = scalar_lea.hbm %s17828_s7, 4096 }
0x1411   : > { %p13399_p10 = scmp.ne.s32.totalorder %s17363_s20, %s13398_s10  ;;  %p13403_p1 = scmp.lt.u32.totalorder %s17363_s20, %s17828_s7 }
0x1412   : > { %p13404_p4 = scmp.lt.u32.totalorder %s13402_s23, %s13398_s10  ;;  %p13406_p3 = scmp.lt.u32.totalorder %s13398_s10, %s17363_s20 }
0x1413   : > { %p13400_p7 = pnand %p13399_p10, %p17829_p8 }
0x1414   : > { %p13405_p12 = por %p13404_p4, %p13403_p1 }
0x1415   : > { %p13401_p6 = pneg %p13400_p7 }
0x1416   : > { %p13407_p9 = por %p13406_p3, %p13405_p12 }
0x1418   : > { %p13408_p13 = pnand %p13407_p9, %p13401_p6 }
0x141a   : > { %13411 = shalt.err (!%p13408_p13)
}
0x141b   : > { %s13541_s0 = smov 128   ;;  %s13542_s14 = smov 8  }
0x141c   : > { %12465 = dma.vmem_to_hbm [thread:$0]  (%p17829_p8), %s17365_s11, 2048, %s17363_s20, %s10617_s1, %s13541_s0, %s13541_s0, %s13542_s14  }
0x141d PF: > { %s17830_s16 = sld [smem:[#allocation28_spill]]  ;;  %s17831_s22 = sld [smem:[#allocation21_spill]] }
0x141e   : > { %s17832_s13 = sld [smem:[#allocation38_spill]] }
0x1423   : > { %p12491_p11 = scmp.ge.s32.totalorder %s17830_s16, 2  ;;  %s10645_s24 = sand.u32 1, %s17831_s22  }
0x1424   : > { %p17833_p2 = scmp.ne.s32.totalorder %s17832_s13, 0  ;;  %s10646_s25 = scalar_lea.sflag [#allocation4], %s10645_s24 }
0x1426   : > { %p12487_p0 = pnand %p12491_p11, %p17833_p2 }
0x1428   : > { %13473 = dma.done.wait (!%p12487_p0), %s10646_s25, 2048  }
0x1429   : > { %13475 = vsyncadd (!%p12487_p0), %s10646_s25, 4294965248  ;;  %s41_s0 = sadd.s32 1, %s17830_s16   ;;  %s17834_s21 = sld [smem:[#allocation19_spill]] }
0x142a   : > { %p38_p5 = scmp.ge.s32.totalorder %s41_s0, 6   ;;  %s17835_s22 = sld [smem:[#allocation20_spill]] }
0x142b   : > { %s17836_s23 = sld [smem:[#allocation36_spill]]  ;;  %s17837_s24 = sld [smem:[#allocation22_spill]] }
0x142c   : > { %s17838_s25 = sld [smem:[#allocation23_spill]]  ;;  %s17839_s26 = sld [smem:[#allocation37_spill]] }
0x142d   : > { %s17840_s27 = sld [smem:[#allocation26_spill]]  ;;  %s17841_s28 = sld [smem:[#allocation27_spill]] }
0x142e   : > { %s17842_s29 = sld [smem:[#allocation31_spill]]  ;;  %s17843_s30 = sld [smem:[#allocation32_spill]] }
0x142f   :  { %40 = sbr.rel (!%p38_p5) target bundleno = 33 (0x21), region = 224 }
0x1436   :  { %10651 = vsyncpa [#allocation3], 1 }
0x1437   :  { %10653 = vsyncpa [#allocation3 + $0x1], 1 }
0x1438   :  { %10654 = vsyncpa [#allocation6], 1 }
0x1439   :  { %10656 = vsyncpa [#allocation6 + $0x1], 1 }
0x143a   :  { %10657 = vsyncpa [#allocation9], 1 }
0x143b   :  { %10659 = vsyncpa [#allocation9 + $0x1], 1 }
0x143c   :  { %10660 = vsyncpa [#allocation12], 1 }
0x143d   :  { %10662 = vsyncpa [#allocation12 + $0x1], 1 }
0x143e   :  { %10663 = vsyncpa [#allocation4], 1 }
0x143f   :  { %10665 = vsyncpa [#allocation4 + $0x1], 1 }

</bundles_post_ra>
